<compile_context>
chip_gen: v7x
topology: tpu7x:2x2x1
jax: 0.10.0
libtpu: 0.0.40
codegen_flags: <defaults>
</compile_context>

<pallas_src>
import numpy as np
import jax
import jax.numpy as jnp
from jax.experimental import pallas as pl
from jax.experimental.pallas import tpu as pltpu


# --------------------------------------------------------------------------
# Trace-time hardware query and tile selection
# --------------------------------------------------------------------------
def _tpu_vmem_limit_bytes():
    """Per-generation scoped-VMEM budget: ~48 MiB on v7x (64 MiB physical),
    ~80 MiB on v5e/v6e (128 MiB physical), with a conservative fallback."""
    cap = 128 * 1024 * 1024
    try:
        cap = int(getattr(pltpu.get_tpu_info(), "vmem_capacity_bytes", cap))
    except Exception:
        pass
    return min(cap * 3 // 4, 80 * 1024 * 1024)


def _divisors(n):
    return [d for d in range(1, n + 1) if n % d == 0]


def _select_kernel_a_tiles(M, H, C, G, vmem_limit):
    """Pick (m_block, h_block) for the fused LN + pool + projection kernel.

    m_block (MXU M rows) is as large as possible -- folded-weight HBM
    re-streaming scales as 1/m_block.  h_block (K tile, in rows of the (H, C)
    slab) is the largest multiple of 8 (second-minor tiling rule) whose
    double-buffered working set fits the per-generation VMEM budget, so it
    naturally lands smaller on v7x's 64 MiB than on v5e/v6e's 128 MiB.
    """
    m_cap = 512 if vmem_limit >= 64 * 1024 * 1024 else 256
    m_cands = [d for d in _divisors(M) if d <= m_cap and (d % 8 == 0 or d == M)]
    m_block = max(m_cands) if m_cands else M

    h_cands = sorted({d for d in _divisors(H) if d % 8 == 0 or d == H},
                     reverse=True)

    def footprint(mb, hb):
        w = hb * C * G * 2 * 2          # bf16 folded-weight K tile, double-buffered
        xb = mb * hb * C * 4 * 2        # f32 input tile, double-buffered
        acc = mb * G * 4                # f32 accumulator scratch
        ob = mb * G * 2 * 2             # bf16 output tile, double-buffered
        return w + xb + acc + ob

    budget = int(vmem_limit * 0.6)
    h_block = h_cands[-1]               # smallest legal K tile as fallback
    for hb in h_cands:
        if footprint(m_block, hb) <= budget:
            h_block = hb
            break
    while (footprint(m_block, h_block) > budget and m_block % 2 == 0
           and (m_block // 2) % 8 == 0):
        m_block //= 2
    return m_block, h_block


def _select_b_block(B):
    """Batch rows per Kernel-B grid step.  Prefer a multiple of 8 (keeps the
    (8,128) tiling rule on the per-timestep (b_block, 4h) slice) that still
    leaves >= 2 grid steps so v7x's two TensorCores both get work; otherwise
    take the whole batch in one step (best on single-TC v5e/v6e)."""
    cands = [d for d in _divisors(B) if d % 8 == 0 and d < B and d <= 16]
    return max(cands) if cands else B


# --------------------------------------------------------------------------
# Kernel A: LayerNorm(C) + AdaptiveAvgPool(H->L) + LSTM layer-0 input
# projection, fused.  The pool matrix is pre-folded into the projection
# weight, so the kernel is LN + a K-tiled (m_blk, H*C) @ (H*C, 4h) matmul
# accumulated in a VMEM scratch; B and T are collapsed into the M axis.
# --------------------------------------------------------------------------
def _ln_pool_proj_kernel(x_ref, g_ref, b_ref, w_ref, b0_ref, o_ref, acc_ref):
    # x_ref : (m_blk, h_blk, C)      m_blk rows of the collapsed (b, t) axis
    # w_ref : (h_blk*C, G) bf16      K tile of the pool-folded projection weight
    # o_ref : (m_blk, G)   bf16      written only at the last K step
    k = pl.program_id(1)

    @pl.when(k == 0)
    def _init():
        acc_ref[...] = jnp.zeros_like(acc_ref)

    m_blk, h_blk, C = x_ref.shape

    # LayerNorm(C) vectorized over the whole block (one mean/var/rsqrt pass).
    x = x_ref[...].astype(jnp.float32)
    mu = jnp.mean(x, axis=-1, keepdims=True)
    var = jnp.mean(jnp.square(x - mu), axis=-1, keepdims=True)
    xn = ((x - mu) * jax.lax.rsqrt(var + 1e-5) * g_ref[...] + b_ref[...]
          ).astype(jnp.bfloat16)

    # K reduction: per-h (m_blk, C) @ (C, G) MXU matmuls, bf16 operands,
    # f32 accumulation in the VMEM scratch.
    part = jnp.zeros(acc_ref.shape, jnp.float32)
    for h in range(h_blk):
        part += jnp.dot(xn[:, h, :], w_ref[h * C:(h + 1) * C, :],
                        preferred_element_type=jnp.float32)
    acc_ref[...] += part

    @pl.when(k == pl.num_programs(1) - 1)
    def _finalize():
        o_ref[...] = (acc_ref[...] + b0_ref[...]).astype(o_ref.dtype)


def ln_pool_proj(xf, ln1g, ln1b, w0_fold, b0, *, m_block, h_block, vmem_limit):
    """Fused LN + adaptive pool + layer-0 input projection.

    xf: (M, H, C) with M = B*T collapsed.  Returns bf16 gate pre-activations
    (M, 4*hid) = LN(x)_pooled @ W_ih0 + (b_ih0 + b_hh0).
    """
    M, H, C = xf.shape
    G = w0_fold.shape[1]
    assert M % m_block == 0 and H % h_block == 0
    return pl.pallas_call(
        _ln_pool_proj_kernel,
        out_shape=jax.ShapeDtypeStruct((M, G), jnp.bfloat16),
        grid=(M // m_block, H // h_block),        # reduction (K) axis last
        in_specs=[
            pl.BlockSpec((m_block, h_block, C), lambda mi, k: (mi, k, 0)),
            pl.BlockSpec((1, C), lambda mi, k: (0, 0)),
            pl.BlockSpec((1, C), lambda mi, k: (0, 0)),
            pl.BlockSpec((h_block * C, G), lambda mi, k: (k, 0)),   # weight K tile
            pl.BlockSpec((1, G), lambda mi, k: (0, 0)),
        ],
        out_specs=pl.BlockSpec((m_block, G), lambda mi, k: (mi, 0)),
        scratch_shapes=[pltpu.VMEM((m_block, G), jnp.float32)],
        compiler_params=pltpu.CompilerParams(
            dimension_semantics=("parallel", "arbitrary"),
            vmem_limit_bytes=vmem_limit),
    )(xf, ln1g, ln1b, w0_fold, b0)


# --------------------------------------------------------------------------
# Kernel B: 2-layer LSTM recurrence (layer-0 input projection already done)
# + batched Linear(hid, C) + LayerNorm(C).  Batch-blocked; gates are
# time-major so every timestep slice is a contiguous (b_block, 4h) tile.
# --------------------------------------------------------------------------
def _lstm_fc_kernel(gin_ref, whh0_ref, w1cat_ref, b1_ref, wfc_ref, bfc_ref,
                    lng_ref, lnb_ref, o_ref, h2s_ref):
    # gin_ref : (T, b_blk, G) bf16   time-major layer-0 gate pre-activations
    # o_ref   : (b_blk, T, C)        lane-dense output slab for this batch block
    T, b_blk, G = gin_ref.shape
    hid = whh0_ref.shape[0]

    # Hoist all weight/bias loads out of the serial recurrence.  Constant
    # index maps -> fetched once; bf16 halves their resident VMEM.
    whh0 = whh0_ref[...]               # (hid, G)    bf16
    w1cat = w1cat_ref[...]             # (2*hid, G)  bf16  == [W_ih1; W_hh1]
    b1 = b1_ref[...]                   # (1, G)      f32

    def cell(gates, c):
        # PyTorch gate order: i, f, g, o
        i = jax.nn.sigmoid(gates[:, 0 * hid:1 * hid])
        f = jax.nn.sigmoid(gates[:, 1 * hid:2 * hid])
        g = jnp.tanh(gates[:, 2 * hid:3 * hid])
        o = jax.nn.sigmoid(gates[:, 3 * hid:4 * hid])
        c_new = f * c + i * g
        return o * jnp.tanh(c_new), c_new

    def step(t, carry):
        h1, c1, h2, c2 = carry
        gin_t = gin_ref[pl.ds(t, 1), :, :].reshape(b_blk, G).astype(jnp.float32)
        g0 = gin_t + jnp.dot(h1.astype(jnp.bfloat16), whh0,
                             preferred_element_type=jnp.float32)
        h1, c1 = cell(g0, c1)
        # Layer 1: both per-step matmuls fused into a single MXU call.
        h12 = jnp.concatenate([h1, h2], axis=-1).astype(jnp.bfloat16)
        g1 = jnp.dot(h12, w1cat, preferred_element_type=jnp.float32) + b1
        h2, c2 = cell(g1, c2)
        h2s_ref[pl.ds(t, 1), :, :] = h2[None]       # stage for the batched fc
        return (h1, c1, h2, c2)

    z = jnp.zeros((b_blk, hid), jnp.float32)
    unroll = next(u for u in (8, 4, 2, 1) if T % u == 0)   # partial unroll
    jax.lax.fori_loop(0, T, step, (z, z, z, z), unroll=unroll)

    # fc (Linear + LayerNorm) batched over all T timesteps, off the serial
    # path; one lane-dense (T, C) store per batch row -> (B, T, C) output.
    wfc = wfc_ref[...]
    bfc = bfc_ref[...]
    lng = lng_ref[...]
    lnb = lnb_ref[...]
    h2_all = h2s_ref[...]                                   # (T, b_blk, hid) f32
    for bb in range(b_blk):
        y = jnp.dot(h2_all[:, bb, :].astype(jnp.bfloat16), wfc,
                    preferred_element_type=jnp.float32) + bfc          # (T, C)
        mu = jnp.mean(y, axis=-1, keepdims=True)
        var = jnp.mean(jnp.square(y - mu), axis=-1, keepdims=True)
        yn = (y - mu) * jax.lax.rsqrt(var + 1e-5) * lng + lnb
        o_ref[pl.ds(bb, 1), :, :] = yn[None].astype(o_ref.dtype)


def lstm_fc(gates_tm, params, *, b_block, vmem_limit):
    """2-layer LSTM recurrence + fc + LayerNorm over time-major (T, B, 4h) gates."""
    T, B, G = gates_tm.shape
    hid = params["whh0_bf16"].shape[0]
    C = params["bfc"].shape[1]
    assert B % b_block == 0
    # TODO(synk): for very long T, additionally chunk the time axis (carry h/c in
    # a VMEM scratch across an "arbitrary" grid axis) so the gin block stays in VMEM.
    return pl.pallas_call(
        _lstm_fc_kernel,
        out_shape=jax.ShapeDtypeStruct((B, T, C), jnp.float32),
        grid=(B // b_block,),
        in_specs=[
            pl.BlockSpec((T, b_block, G), lambda bi: (0, bi, 0)),
            pl.BlockSpec((hid, G), lambda bi: (0, 0)),
            pl.BlockSpec((2 * hid, G), lambda bi: (0, 0)),
            pl.BlockSpec((1, G), lambda bi: (0, 0)),
            pl.BlockSpec((hid, C), lambda bi: (0, 0)),
            pl.BlockSpec((1, C), lambda bi: (0, 0)),
            pl.BlockSpec((1, C), lambda bi: (0, 0)),
            pl.BlockSpec((1, C), lambda bi: (0, 0)),
        ],
        out_specs=pl.BlockSpec((b_block, T, C), lambda bi: (bi, 0, 0)),
        scratch_shapes=[pltpu.VMEM((T, b_block, hid), jnp.float32)],
        compiler_params=pltpu.CompilerParams(
            dimension_semantics=("parallel",),     # v7x: batch blocks over 2 TCs
            vmem_limit_bytes=vmem_limit),
    )(gates_tm, params["whh0_bf16"], params["w1cat_bf16"], params["b1"],
      params["wfc_bf16"], params["bfc"], params["ln2g"], params["ln2b"])


# --------------------------------------------------------------------------
# Parameter preparation (one-time, exact algebraic transforms) and glue.
# --------------------------------------------------------------------------
def adaptive_avg_pool_matrix(in_size, out_size):
    """[L, H] matrix reproducing PyTorch AdaptiveAvgPool1d binning."""
    i = np.arange(out_size)
    starts = (i * in_size) // out_size
    ends = -((-(i + 1) * in_size) // out_size)   # ceil((i+1)*in/out)
    idx = np.arange(in_size)
    mask = (idx[None, :] >= starts[:, None]) & (idx[None, :] < ends[:, None])
    counts = (ends - starts).astype(np.float32)
    return jnp.asarray(mask.astype(np.float32) / counts[:, None])


def prepare_params(p, *, H, C):
    """Fold the pooling matrix into the layer-0 input-projection weight and
    pre-concatenate / pre-cast the recurrent weights.

    gates = flatten(pool @ LN(x)) @ Wih0  ==  flatten(LN(x)) @ W_fold
    with  W_fold[h*C + c, g] = sum_l pool[l, h] * Wih0[l*C + c, g].   (exact)
    """
    L = p["pool_mat"].shape[0]
    G = p["wih0T"].shape[1]
    w0_3d = p["wih0T"].reshape(L, C, G)
    w_fold = jnp.einsum("lh,lcg->hcg", p["pool_mat"], w0_3d)        # (H, C, G)
    return dict(
        w0_fold=w_fold.reshape(H * C, G).astype(jnp.bfloat16),      # K-tiled stream
        b0=p["b0"],
        ln1g=p["ln1g"], ln1b=p["ln1b"],
        whh0_bf16=p["whh0T"].astype(jnp.bfloat16),
        w1cat_bf16=jnp.concatenate([p["wih1T"], p["whh1T"]],
                                   axis=0).astype(jnp.bfloat16),    # (2*hid, G)
        b1=p["b1"],
        wfc_bf16=p["wfcT"].astype(jnp.bfloat16),
        bfc=p["bfc"], ln2g=p["ln2g"], ln2b=p["ln2b"],
    )


def lstm_adapter_head_forward(x, kparams):
    B, T, H, C = x.shape
    G = kparams["b0"].shape[1]
    vmem_limit = _tpu_vmem_limit_bytes()

    # Kernel A: LN + pool + layer-0 input projection with B and T collapsed
    # into one M axis (the M tile spans batch rows even when T is short).
    m_block, h_block = _select_kernel_a_tiles(B * T, H, C, G, vmem_limit)
    gates = ln_pool_proj(x.reshape(B * T, H, C),
                         kparams["ln1g"], kparams["ln1b"],
                         kparams["w0_fold"], kparams["b0"],
                         m_block=m_block, h_block=h_block, vmem_limit=vmem_limit)

    # Time-major bf16 gate layout so each LSTM timestep slice in Kernel B is a
    # contiguous (b_block, 4h) tile; one cheap transpose of the small gate
    # tensor, off the serial recurrence (lane dim 4h stays dense).
    gates_tm = jnp.transpose(gates.reshape(B, T, G), (1, 0, 2))

    # Kernel B: batch-blocked recurrence + fc -> (B, T, C) directly.
    b_block = _select_b_block(B)
    return lstm_fc(gates_tm, kparams, b_block=b_block, vmem_limit=vmem_limit)


# --------------------------------------------------------------------------
# Pure-JAX reference (module semantics, f32, no Pallas) for a sanity check.
# --------------------------------------------------------------------------
def reference_forward(x, params):
    B, T, H, C = x.shape
    mu = x.mean(-1, keepdims=True)
    var = ((x - mu) ** 2).mean(-1, keepdims=True)
    xn = (x - mu) / jnp.sqrt(var + 1e-5) * params["ln1g"][0] + params["ln1b"][0]
    pooled = jnp.einsum("lh,bthc->btlc", params["pool_mat"], xn)
    feat = pooled.reshape(B, T, -1)
    xs = jnp.transpose(feat, (1, 0, 2))
    hid = params["whh0T"].shape[0]

    def layer(seq, wihT, whhT, b):
        def step(carry, xt):
            h, c = carry
            g = xt @ wihT + h @ whhT + b
            i = jax.nn.sigmoid(g[:, :hid])
            f = jax.nn.sigmoid(g[:, hid:2 * hid])
            gg = jnp.tanh(g[:, 2 * hid:3 * hid])
            o = jax.nn.sigmoid(g[:, 3 * hid:])
            c = f * c + i * gg
            h = o * jnp.tanh(c)
            return (h, c), h
        z = jnp.zeros((seq.shape[1], hid), jnp.float32)
        _, ys = jax.lax.scan(step, (z, z), seq)
        return ys

    h1 = layer(xs, params["wih0T"], params["whh0T"], params["b0"])
    h2 = layer(h1, params["wih1T"], params["whh1T"], params["b1"])
    y = h2 @ params["wfcT"] + params["bfc"]
    mu = y.mean(-1, keepdims=True)
    var = ((y - mu) ** 2).mean(-1, keepdims=True)
    yn = (y - mu) / jnp.sqrt(var + 1e-5) * params["ln2g"] + params["ln2b"]
    return jnp.transpose(yn, (1, 0, 2))


# --------------------------------------------------------------------------
if __name__ == "__main__":
    # Small shapes consistent with the module's forward: x is [B, T, H, C].
    # L == C keeps the LSTM input_size == C*C invariant (the module's hardcoded
    # target_length=768 is only shape-consistent when C == 768).
    # NOTE: profile/tune at production widths (C=768, G=3072); at these demo
    # lane widths all stores are masked and tile conclusions do not transfer.
    B, T, H, C = 2, 16, 32, 16
    hidden_size_factor = 1.0
    hid = int(C * hidden_size_factor)
    L = C                       # target_length
    Din = L * C                 # LSTM input_size == C*C
    G = 4 * hid

    key = jax.random.PRNGKey(0)
    ks = jax.random.split(key, 13)
    s = 1.0 / np.sqrt(hid)
    u = lambda k, shape: jax.random.uniform(k, shape, jnp.float32, -s, s)

    torch_params = dict(
        pool_mat=adaptive_avg_pool_matrix(H, L),
        ln1g=1.0 + 0.1 * jax.random.normal(ks[0], (1, C), jnp.float32),
        ln1b=0.1 * jax.random.normal(ks[1], (1, C), jnp.float32),
        wih0T=u(ks[2], (Din, G)),
        whh0T=u(ks[3], (hid, G)),
        b0=u(ks[4], (1, G)),            # = b_ih_l0 + b_hh_l0 folded
        wih1T=u(ks[5], (hid, G)),
        whh1T=u(ks[6], (hid, G)),
        b1=u(ks[7], (1, G)),            # = b_ih_l1 + b_hh_l1 folded
        wfcT=u(ks[8], (hid, C)),
        bfc=u(ks[9], (1, C)),
        ln2g=1.0 + 0.1 * jax.random.normal(ks[10], (1, C), jnp.float32),
        ln2b=0.1 * jax.random.normal(ks[11], (1, C), jnp.float32),
    )
    x = jax.random.normal(ks[12], (B, T, H, C), jnp.float32)

    kparams = prepare_params(torch_params, H=H, C=C)

    out = lstm_adapter_head_forward(x, kparams)
    out = jax.block_until_ready(out)
    assert out.shape == (B, T, C), out.shape

    ref = jax.block_until_ready(reference_forward(x, torch_params))
    np.testing.assert_allclose(np.asarray(out), np.asarray(ref),
                               rtol=5e-2, atol=5e-2)
    print("KERNEL_OK")
</pallas_src>

<mosaic_0001>
module attributes {stable_mosaic.version = 11 : i64} {
  func.func @_ln_pool_proj_kernel(%arg0: i32, %arg1: i32, %arg2: memref<32x32x16xf32, #tpu.memory_space<vmem>>, %arg3: memref<1x16xf32, #tpu.memory_space<vmem>>, %arg4: memref<1x16xf32, #tpu.memory_space<vmem>>, %arg5: memref<512x64xbf16, #tpu.memory_space<vmem>>, %arg6: memref<1x64xf32, #tpu.memory_space<vmem>>, %arg7: memref<32x64xbf16, #tpu.memory_space<vmem>>, %arg8: memref<32x64xf32, #tpu.memory_space<vmem>>) attributes {dimension_semantics = [#tpu.dimension_semantics<parallel>, #tpu.dimension_semantics<arbitrary>], iteration_bounds = array<i64: 1, 1>, scalar_prefetch = 0 : i64, scratch_operands = 1 : i64, tpu.core_type = #tpu.core_type<tc>, window_params = [{transform_indices = @transform_0, window_bounds = array<i64: 32, 32, 16>}, {pipeline_mode = #tpu.pipeline_mode<synchronous>, transform_indices = @transform_1, window_bounds = array<i64: 1, 16>}, {pipeline_mode = #tpu.pipeline_mode<synchronous>, transform_indices = @transform_2, window_bounds = array<i64: 1, 16>}, {transform_indices = @transform_3, window_bounds = array<i64: 512, 64>}, {pipeline_mode = #tpu.pipeline_mode<synchronous>, transform_indices = @transform_4, window_bounds = array<i64: 1, 64>}, {transform_indices = @transform_5, window_bounds = array<i64: 32, 64>}]} {
    %c0_i32 = arith.constant 0 : i32
    %0 = arith.cmpi eq, %arg1, %c0_i32 : i32
    %1 = arith.extui %0 : i1 to i32
    %c0_i32_0 = arith.constant 0 : i32
    %2 = arith.cmpi ne, %1, %c0_i32_0 : i32
    scf.if %2 {
      %cst_83 = arith.constant 0.000000e+00 : f32
      %198 = vector.broadcast %cst_83 : f32 to vector<32x64xf32>
      %c0_84 = arith.constant 0 : index
      %c0_85 = arith.constant 0 : index
      %199 = vector.load %arg8[%c0_84, %c0_85] : memref<32x64xf32, #tpu.memory_space<vmem>>, vector<32x64xf32>
      tpu.vector_store %arg8[%c0_84, %c0_85], %198 {strides = array<i32>} : memref<32x64xf32, #tpu.memory_space<vmem>>, vector<32x64xf32>,
    } else {
    }
    %c0 = arith.constant 0 : index
    %c0_1 = arith.constant 0 : index
    %c0_2 = arith.constant 0 : index
    %3 = vector.load %arg2[%c0, %c0_1, %c0_2] : memref<32x32x16xf32, #tpu.memory_space<vmem>>, vector<32x32x16xf32>
    %cst = arith.constant dense<0.000000e+00> : vector<32x32xf32>
    %4 = vector.multi_reduction <add>, %3, %cst [2] : vector<32x32x16xf32> to vector<32x32xf32>
    %5 = vector.shape_cast %4 : vector<32x32xf32> to vector<32x32x1xf32>
    %cst_3 = arith.constant 1.600000e+01 : f32
    %6 = vector.broadcast %cst_3 : f32 to vector<32x32x1xf32>
    %7 = arith.divf %5, %6 : vector<32x32x1xf32>
    %8 = vector.broadcast %7 : vector<32x32x1xf32> to vector<32x32x16xf32>
    %9 = arith.subf %3, %8 : vector<32x32x16xf32>
    %10 = arith.mulf %9, %9 : vector<32x32x16xf32>
    %cst_4 = arith.constant dense<0.000000e+00> : vector<32x32xf32>
    %11 = vector.multi_reduction <add>, %10, %cst_4 [2] : vector<32x32x16xf32> to vector<32x32xf32>
    %12 = vector.shape_cast %11 : vector<32x32xf32> to vector<32x32x1xf32>
    %cst_5 = arith.constant 1.600000e+01 : f32
    %13 = vector.broadcast %cst_5 : f32 to vector<32x32x1xf32>
    %14 = arith.divf %12, %13 : vector<32x32x1xf32>
    %15 = vector.broadcast %7 : vector<32x32x1xf32> to vector<32x32x16xf32>
    %16 = arith.subf %3, %15 : vector<32x32x16xf32>
    %cst_6 = arith.constant 9.99999974E-6 : f32
    %17 = vector.broadcast %cst_6 : f32 to vector<32x32x1xf32>
    %18 = arith.addf %14, %17 : vector<32x32x1xf32>
    %19 = math.rsqrt %18 : vector<32x32x1xf32>
    %20 = vector.broadcast %19 : vector<32x32x1xf32> to vector<32x32x16xf32>
    %21 = arith.mulf %16, %20 : vector<32x32x16xf32>
    %c0_7 = arith.constant 0 : index
    %c0_8 = arith.constant 0 : index
    %22 = vector.load %arg3[%c0_7, %c0_8] : memref<1x16xf32, #tpu.memory_space<vmem>>, vector<1x16xf32>
    %23 = vector.shape_cast %22 : vector<1x16xf32> to vector<1x1x16xf32>
    %24 = vector.broadcast %23 : vector<1x1x16xf32> to vector<32x32x16xf32>
    %25 = arith.mulf %21, %24 : vector<32x32x16xf32>
    %c0_9 = arith.constant 0 : index
    %c0_10 = arith.constant 0 : index
    %26 = vector.load %arg4[%c0_9, %c0_10] : memref<1x16xf32, #tpu.memory_space<vmem>>, vector<1x16xf32>
    %27 = vector.shape_cast %26 : vector<1x16xf32> to vector<1x1x16xf32>
    %28 = vector.broadcast %27 : vector<1x1x16xf32> to vector<32x32x16xf32>
    %29 = arith.addf %25, %28 : vector<32x32x16xf32>
    %30 = arith.truncf %29 : vector<32x32x16xf32> to vector<32x32x16xbf16>
    %cst_11 = arith.constant 0.000000e+00 : f32
    %31 = vector.broadcast %cst_11 : f32 to vector<32x64xf32>
    %32 = vector.extract_strided_slice %30 {offsets = [0, 0, 0], sizes = [32, 1, 16], strides = [1, 1, 1]} : vector<32x32x16xbf16> to vector<32x1x16xbf16>
    %33 = vector.shape_cast %32 : vector<32x1x16xbf16> to vector<32x16xbf16>
    %c0_12 = arith.constant 0 : index
    %c0_13 = arith.constant 0 : index
    %34 = vector.load %arg5[%c0_12, %c0_13] : memref<512x64xbf16, #tpu.memory_space<vmem>>, vector<16x64xbf16>
    %cst_14 = arith.constant dense<0.000000e+00> : vector<32x64xf32>
    %35 = tpu.matmul %33, %34, %cst_14 {dimension_numbers = #tpu.dot_dimension_numbers<[1], [0], [0], [1], [0, 0, 1, 1], [], []>} : vector<32x16xbf16>, vector<16x64xbf16>, vector<32x64xf32> -> vector<32x64xf32>
    %36 = arith.addf %31, %35 : vector<32x64xf32>
    %37 = vector.extract_strided_slice %30 {offsets = [0, 1, 0], sizes = [32, 1, 16], strides = [1, 1, 1]} : vector<32x32x16xbf16> to vector<32x1x16xbf16>
    %38 = vector.shape_cast %37 : vector<32x1x16xbf16> to vector<32x16xbf16>
    %c16 = arith.constant 16 : index
    %c0_15 = arith.constant 0 : index
    %39 = vector.load %arg5[%c16, %c0_15] : memref<512x64xbf16, #tpu.memory_space<vmem>>, vector<16x64xbf16>
    %cst_16 = arith.constant dense<0.000000e+00> : vector<32x64xf32>
    %40 = tpu.matmul %38, %39, %cst_16 {dimension_numbers = #tpu.dot_dimension_numbers<[1], [0], [0], [1], [0, 0, 1, 1], [], []>} : vector<32x16xbf16>, vector<16x64xbf16>, vector<32x64xf32> -> vector<32x64xf32>
    %41 = arith.addf %36, %40 : vector<32x64xf32>
    %42 = vector.extract_strided_slice %30 {offsets = [0, 2, 0], sizes = [32, 1, 16], strides = [1, 1, 1]} : vector<32x32x16xbf16> to vector<32x1x16xbf16>
    %43 = vector.shape_cast %42 : vector<32x1x16xbf16> to vector<32x16xbf16>
    %c32 = arith.constant 32 : index
    %c0_17 = arith.constant 0 : index
    %44 = vector.load %arg5[%c32, %c0_17] : memref<512x64xbf16, #tpu.memory_space<vmem>>, vector<16x64xbf16>
    %cst_18 = arith.constant dense<0.000000e+00> : vector<32x64xf32>
    %45 = tpu.matmul %43, %44, %cst_18 {dimension_numbers = #tpu.dot_dimension_numbers<[1], [0], [0], [1], [0, 0, 1, 1], [], []>} : vector<32x16xbf16>, vector<16x64xbf16>, vector<32x64xf32> -> vector<32x64xf32>
    %46 = arith.addf %41, %45 : vector<32x64xf32>
    %47 = vector.extract_strided_slice %30 {offsets = [0, 3, 0], sizes = [32, 1, 16], strides = [1, 1, 1]} : vector<32x32x16xbf16> to vector<32x1x16xbf16>
    %48 = vector.shape_cast %47 : vector<32x1x16xbf16> to vector<32x16xbf16>
    %c48 = arith.constant 48 : index
    %c0_19 = arith.constant 0 : index
    %49 = vector.load %arg5[%c48, %c0_19] : memref<512x64xbf16, #tpu.memory_space<vmem>>, vector<16x64xbf16>
    %cst_20 = arith.constant dense<0.000000e+00> : vector<32x64xf32>
    %50 = tpu.matmul %48, %49, %cst_20 {dimension_numbers = #tpu.dot_dimension_numbers<[1], [0], [0], [1], [0, 0, 1, 1], [], []>} : vector<32x16xbf16>, vector<16x64xbf16>, vector<32x64xf32> -> vector<32x64xf32>
    %51 = arith.addf %46, %50 : vector<32x64xf32>
    %52 = vector.extract_strided_slice %30 {offsets = [0, 4, 0], sizes = [32, 1, 16], strides = [1, 1, 1]} : vector<32x32x16xbf16> to vector<32x1x16xbf16>
    %53 = vector.shape_cast %52 : vector<32x1x16xbf16> to vector<32x16xbf16>
    %c64 = arith.constant 64 : index
    %c0_21 = arith.constant 0 : index
    %54 = vector.load %arg5[%c64, %c0_21] : memref<512x64xbf16, #tpu.memory_space<vmem>>, vector<16x64xbf16>
    %cst_22 = arith.constant dense<0.000000e+00> : vector<32x64xf32>
    %55 = tpu.matmul %53, %54, %cst_22 {dimension_numbers = #tpu.dot_dimension_numbers<[1], [0], [0], [1], [0, 0, 1, 1], [], []>} : vector<32x16xbf16>, vector<16x64xbf16>, vector<32x64xf32> -> vector<32x64xf32>
    %56 = arith.addf %51, %55 : vector<32x64xf32>
    %57 = vector.extract_strided_slice %30 {offsets = [0, 5, 0], sizes = [32, 1, 16], strides = [1, 1, 1]} : vector<32x32x16xbf16> to vector<32x1x16xbf16>
    %58 = vector.shape_cast %57 : vector<32x1x16xbf16> to vector<32x16xbf16>
    %c80 = arith.constant 80 : index
    %c0_23 = arith.constant 0 : index
    %59 = vector.load %arg5[%c80, %c0_23] : memref<512x64xbf16, #tpu.memory_space<vmem>>, vector<16x64xbf16>
    %cst_24 = arith.constant dense<0.000000e+00> : vector<32x64xf32>
    %60 = tpu.matmul %58, %59, %cst_24 {dimension_numbers = #tpu.dot_dimension_numbers<[1], [0], [0], [1], [0, 0, 1, 1], [], []>} : vector<32x16xbf16>, vector<16x64xbf16>, vector<32x64xf32> -> vector<32x64xf32>
    %61 = arith.addf %56, %60 : vector<32x64xf32>
    %62 = vector.extract_strided_slice %30 {offsets = [0, 6, 0], sizes = [32, 1, 16], strides = [1, 1, 1]} : vector<32x32x16xbf16> to vector<32x1x16xbf16>
    %63 = vector.shape_cast %62 : vector<32x1x16xbf16> to vector<32x16xbf16>
    %c96 = arith.constant 96 : index
    %c0_25 = arith.constant 0 : index
    %64 = vector.load %arg5[%c96, %c0_25] : memref<512x64xbf16, #tpu.memory_space<vmem>>, vector<16x64xbf16>
    %cst_26 = arith.constant dense<0.000000e+00> : vector<32x64xf32>
    %65 = tpu.matmul %63, %64, %cst_26 {dimension_numbers = #tpu.dot_dimension_numbers<[1], [0], [0], [1], [0, 0, 1, 1], [], []>} : vector<32x16xbf16>, vector<16x64xbf16>, vector<32x64xf32> -> vector<32x64xf32>
    %66 = arith.addf %61, %65 : vector<32x64xf32>
    %67 = vector.extract_strided_slice %30 {offsets = [0, 7, 0], sizes = [32, 1, 16], strides = [1, 1, 1]} : vector<32x32x16xbf16> to vector<32x1x16xbf16>
    %68 = vector.shape_cast %67 : vector<32x1x16xbf16> to vector<32x16xbf16>
    %c112 = arith.constant 112 : index
    %c0_27 = arith.constant 0 : index
    %69 = vector.load %arg5[%c112, %c0_27] : memref<512x64xbf16, #tpu.memory_space<vmem>>, vector<16x64xbf16>
    %cst_28 = arith.constant dense<0.000000e+00> : vector<32x64xf32>
    %70 = tpu.matmul %68, %69, %cst_28 {dimension_numbers = #tpu.dot_dimension_numbers<[1], [0], [0], [1], [0, 0, 1, 1], [], []>} : vector<32x16xbf16>, vector<16x64xbf16>, vector<32x64xf32> -> vector<32x64xf32>
    %71 = arith.addf %66, %70 : vector<32x64xf32>
    %72 = vector.extract_strided_slice %30 {offsets = [0, 8, 0], sizes = [32, 1, 16], strides = [1, 1, 1]} : vector<32x32x16xbf16> to vector<32x1x16xbf16>
    %73 = vector.shape_cast %72 : vector<32x1x16xbf16> to vector<32x16xbf16>
    %c128 = arith.constant 128 : index
    %c0_29 = arith.constant 0 : index
    %74 = vector.load %arg5[%c128, %c0_29] : memref<512x64xbf16, #tpu.memory_space<vmem>>, vector<16x64xbf16>
    %cst_30 = arith.constant dense<0.000000e+00> : vector<32x64xf32>
    %75 = tpu.matmul %73, %74, %cst_30 {dimension_numbers = #tpu.dot_dimension_numbers<[1], [0], [0], [1], [0, 0, 1, 1], [], []>} : vector<32x16xbf16>, vector<16x64xbf16>, vector<32x64xf32> -> vector<32x64xf32>
    %76 = arith.addf %71, %75 : vector<32x64xf32>
    %77 = vector.extract_strided_slice %30 {offsets = [0, 9, 0], sizes = [32, 1, 16], strides = [1, 1, 1]} : vector<32x32x16xbf16> to vector<32x1x16xbf16>
    %78 = vector.shape_cast %77 : vector<32x1x16xbf16> to vector<32x16xbf16>
    %c144 = arith.constant 144 : index
    %c0_31 = arith.constant 0 : index
    %79 = vector.load %arg5[%c144, %c0_31] : memref<512x64xbf16, #tpu.memory_space<vmem>>, vector<16x64xbf16>
    %cst_32 = arith.constant dense<0.000000e+00> : vector<32x64xf32>
    %80 = tpu.matmul %78, %79, %cst_32 {dimension_numbers = #tpu.dot_dimension_numbers<[1], [0], [0], [1], [0, 0, 1, 1], [], []>} : vector<32x16xbf16>, vector<16x64xbf16>, vector<32x64xf32> -> vector<32x64xf32>
    %81 = arith.addf %76, %80 : vector<32x64xf32>
    %82 = vector.extract_strided_slice %30 {offsets = [0, 10, 0], sizes = [32, 1, 16], strides = [1, 1, 1]} : vector<32x32x16xbf16> to vector<32x1x16xbf16>
    %83 = vector.shape_cast %82 : vector<32x1x16xbf16> to vector<32x16xbf16>
    %c160 = arith.constant 160 : index
    %c0_33 = arith.constant 0 : index
    %84 = vector.load %arg5[%c160, %c0_33] : memref<512x64xbf16, #tpu.memory_space<vmem>>, vector<16x64xbf16>
    %cst_34 = arith.constant dense<0.000000e+00> : vector<32x64xf32>
    %85 = tpu.matmul %83, %84, %cst_34 {dimension_numbers = #tpu.dot_dimension_numbers<[1], [0], [0], [1], [0, 0, 1, 1], [], []>} : vector<32x16xbf16>, vector<16x64xbf16>, vector<32x64xf32> -> vector<32x64xf32>
    %86 = arith.addf %81, %85 : vector<32x64xf32>
    %87 = vector.extract_strided_slice %30 {offsets = [0, 11, 0], sizes = [32, 1, 16], strides = [1, 1, 1]} : vector<32x32x16xbf16> to vector<32x1x16xbf16>
    %88 = vector.shape_cast %87 : vector<32x1x16xbf16> to vector<32x16xbf16>
    %c176 = arith.constant 176 : index
    %c0_35 = arith.constant 0 : index
    %89 = vector.load %arg5[%c176, %c0_35] : memref<512x64xbf16, #tpu.memory_space<vmem>>, vector<16x64xbf16>
    %cst_36 = arith.constant dense<0.000000e+00> : vector<32x64xf32>
    %90 = tpu.matmul %88, %89, %cst_36 {dimension_numbers = #tpu.dot_dimension_numbers<[1], [0], [0], [1], [0, 0, 1, 1], [], []>} : vector<32x16xbf16>, vector<16x64xbf16>, vector<32x64xf32> -> vector<32x64xf32>
    %91 = arith.addf %86, %90 : vector<32x64xf32>
    %92 = vector.extract_strided_slice %30 {offsets = [0, 12, 0], sizes = [32, 1, 16], strides = [1, 1, 1]} : vector<32x32x16xbf16> to vector<32x1x16xbf16>
    %93 = vector.shape_cast %92 : vector<32x1x16xbf16> to vector<32x16xbf16>
    %c192 = arith.constant 192 : index
    %c0_37 = arith.constant 0 : index
    %94 = vector.load %arg5[%c192, %c0_37] : memref<512x64xbf16, #tpu.memory_space<vmem>>, vector<16x64xbf16>
    %cst_38 = arith.constant dense<0.000000e+00> : vector<32x64xf32>
    %95 = tpu.matmul %93, %94, %cst_38 {dimension_numbers = #tpu.dot_dimension_numbers<[1], [0], [0], [1], [0, 0, 1, 1], [], []>} : vector<32x16xbf16>, vector<16x64xbf16>, vector<32x64xf32> -> vector<32x64xf32>
    %96 = arith.addf %91, %95 : vector<32x64xf32>
    %97 = vector.extract_strided_slice %30 {offsets = [0, 13, 0], sizes = [32, 1, 16], strides = [1, 1, 1]} : vector<32x32x16xbf16> to vector<32x1x16xbf16>
    %98 = vector.shape_cast %97 : vector<32x1x16xbf16> to vector<32x16xbf16>
    %c208 = arith.constant 208 : index
    %c0_39 = arith.constant 0 : index
    %99 = vector.load %arg5[%c208, %c0_39] : memref<512x64xbf16, #tpu.memory_space<vmem>>, vector<16x64xbf16>
    %cst_40 = arith.constant dense<0.000000e+00> : vector<32x64xf32>
    %100 = tpu.matmul %98, %99, %cst_40 {dimension_numbers = #tpu.dot_dimension_numbers<[1], [0], [0], [1], [0, 0, 1, 1], [], []>} : vector<32x16xbf16>, vector<16x64xbf16>, vector<32x64xf32> -> vector<32x64xf32>
    %101 = arith.addf %96, %100 : vector<32x64xf32>
    %102 = vector.extract_strided_slice %30 {offsets = [0, 14, 0], sizes = [32, 1, 16], strides = [1, 1, 1]} : vector<32x32x16xbf16> to vector<32x1x16xbf16>
    %103 = vector.shape_cast %102 : vector<32x1x16xbf16> to vector<32x16xbf16>
    %c224 = arith.constant 224 : index
    %c0_41 = arith.constant 0 : index
    %104 = vector.load %arg5[%c224, %c0_41] : memref<512x64xbf16, #tpu.memory_space<vmem>>, vector<16x64xbf16>
    %cst_42 = arith.constant dense<0.000000e+00> : vector<32x64xf32>
    %105 = tpu.matmul %103, %104, %cst_42 {dimension_numbers = #tpu.dot_dimension_numbers<[1], [0], [0], [1], [0, 0, 1, 1], [], []>} : vector<32x16xbf16>, vector<16x64xbf16>, vector<32x64xf32> -> vector<32x64xf32>
    %106 = arith.addf %101, %105 : vector<32x64xf32>
    %107 = vector.extract_strided_slice %30 {offsets = [0, 15, 0], sizes = [32, 1, 16], strides = [1, 1, 1]} : vector<32x32x16xbf16> to vector<32x1x16xbf16>
    %108 = vector.shape_cast %107 : vector<32x1x16xbf16> to vector<32x16xbf16>
    %c240 = arith.constant 240 : index
    %c0_43 = arith.constant 0 : index
    %109 = vector.load %arg5[%c240, %c0_43] : memref<512x64xbf16, #tpu.memory_space<vmem>>, vector<16x64xbf16>
    %cst_44 = arith.constant dense<0.000000e+00> : vector<32x64xf32>
    %110 = tpu.matmul %108, %109, %cst_44 {dimension_numbers = #tpu.dot_dimension_numbers<[1], [0], [0], [1], [0, 0, 1, 1], [], []>} : vector<32x16xbf16>, vector<16x64xbf16>, vector<32x64xf32> -> vector<32x64xf32>
    %111 = arith.addf %106, %110 : vector<32x64xf32>
    %112 = vector.extract_strided_slice %30 {offsets = [0, 16, 0], sizes = [32, 1, 16], strides = [1, 1, 1]} : vector<32x32x16xbf16> to vector<32x1x16xbf16>
    %113 = vector.shape_cast %112 : vector<32x1x16xbf16> to vector<32x16xbf16>
    %c256 = arith.constant 256 : index
    %c0_45 = arith.constant 0 : index
    %114 = vector.load %arg5[%c256, %c0_45] : memref<512x64xbf16, #tpu.memory_space<vmem>>, vector<16x64xbf16>
    %cst_46 = arith.constant dense<0.000000e+00> : vector<32x64xf32>
    %115 = tpu.matmul %113, %114, %cst_46 {dimension_numbers = #tpu.dot_dimension_numbers<[1], [0], [0], [1], [0, 0, 1, 1], [], []>} : vector<32x16xbf16>, vector<16x64xbf16>, vector<32x64xf32> -> vector<32x64xf32>
    %116 = arith.addf %111, %115 : vector<32x64xf32>
    %117 = vector.extract_strided_slice %30 {offsets = [0, 17, 0], sizes = [32, 1, 16], strides = [1, 1, 1]} : vector<32x32x16xbf16> to vector<32x1x16xbf16>
    %118 = vector.shape_cast %117 : vector<32x1x16xbf16> to vector<32x16xbf16>
    %c272 = arith.constant 272 : index
    %c0_47 = arith.constant 0 : index
    %119 = vector.load %arg5[%c272, %c0_47] : memref<512x64xbf16, #tpu.memory_space<vmem>>, vector<16x64xbf16>
    %cst_48 = arith.constant dense<0.000000e+00> : vector<32x64xf32>
    %120 = tpu.matmul %118, %119, %cst_48 {dimension_numbers = #tpu.dot_dimension_numbers<[1], [0], [0], [1], [0, 0, 1, 1], [], []>} : vector<32x16xbf16>, vector<16x64xbf16>, vector<32x64xf32> -> vector<32x64xf32>
    %121 = arith.addf %116, %120 : vector<32x64xf32>
    %122 = vector.extract_strided_slice %30 {offsets = [0, 18, 0], sizes = [32, 1, 16], strides = [1, 1, 1]} : vector<32x32x16xbf16> to vector<32x1x16xbf16>
    %123 = vector.shape_cast %122 : vector<32x1x16xbf16> to vector<32x16xbf16>
    %c288 = arith.constant 288 : index
    %c0_49 = arith.constant 0 : index
    %124 = vector.load %arg5[%c288, %c0_49] : memref<512x64xbf16, #tpu.memory_space<vmem>>, vector<16x64xbf16>
    %cst_50 = arith.constant dense<0.000000e+00> : vector<32x64xf32>
    %125 = tpu.matmul %123, %124, %cst_50 {dimension_numbers = #tpu.dot_dimension_numbers<[1], [0], [0], [1], [0, 0, 1, 1], [], []>} : vector<32x16xbf16>, vector<16x64xbf16>, vector<32x64xf32> -> vector<32x64xf32>
    %126 = arith.addf %121, %125 : vector<32x64xf32>
    %127 = vector.extract_strided_slice %30 {offsets = [0, 19, 0], sizes = [32, 1, 16], strides = [1, 1, 1]} : vector<32x32x16xbf16> to vector<32x1x16xbf16>
    %128 = vector.shape_cast %127 : vector<32x1x16xbf16> to vector<32x16xbf16>
    %c304 = arith.constant 304 : index
    %c0_51 = arith.constant 0 : index
    %129 = vector.load %arg5[%c304, %c0_51] : memref<512x64xbf16, #tpu.memory_space<vmem>>, vector<16x64xbf16>
    %cst_52 = arith.constant dense<0.000000e+00> : vector<32x64xf32>
    %130 = tpu.matmul %128, %129, %cst_52 {dimension_numbers = #tpu.dot_dimension_numbers<[1], [0], [0], [1], [0, 0, 1, 1], [], []>} : vector<32x16xbf16>, vector<16x64xbf16>, vector<32x64xf32> -> vector<32x64xf32>
    %131 = arith.addf %126, %130 : vector<32x64xf32>
    %132 = vector.extract_strided_slice %30 {offsets = [0, 20, 0], sizes = [32, 1, 16], strides = [1, 1, 1]} : vector<32x32x16xbf16> to vector<32x1x16xbf16>
    %133 = vector.shape_cast %132 : vector<32x1x16xbf16> to vector<32x16xbf16>
    %c320 = arith.constant 320 : index
    %c0_53 = arith.constant 0 : index
    %134 = vector.load %arg5[%c320, %c0_53] : memref<512x64xbf16, #tpu.memory_space<vmem>>, vector<16x64xbf16>
    %cst_54 = arith.constant dense<0.000000e+00> : vector<32x64xf32>
    %135 = tpu.matmul %133, %134, %cst_54 {dimension_numbers = #tpu.dot_dimension_numbers<[1], [0], [0], [1], [0, 0, 1, 1], [], []>} : vector<32x16xbf16>, vector<16x64xbf16>, vector<32x64xf32> -> vector<32x64xf32>
    %136 = arith.addf %131, %135 : vector<32x64xf32>
    %137 = vector.extract_strided_slice %30 {offsets = [0, 21, 0], sizes = [32, 1, 16], strides = [1, 1, 1]} : vector<32x32x16xbf16> to vector<32x1x16xbf16>
    %138 = vector.shape_cast %137 : vector<32x1x16xbf16> to vector<32x16xbf16>
    %c336 = arith.constant 336 : index
    %c0_55 = arith.constant 0 : index
    %139 = vector.load %arg5[%c336, %c0_55] : memref<512x64xbf16, #tpu.memory_space<vmem>>, vector<16x64xbf16>
    %cst_56 = arith.constant dense<0.000000e+00> : vector<32x64xf32>
    %140 = tpu.matmul %138, %139, %cst_56 {dimension_numbers = #tpu.dot_dimension_numbers<[1], [0], [0], [1], [0, 0, 1, 1], [], []>} : vector<32x16xbf16>, vector<16x64xbf16>, vector<32x64xf32> -> vector<32x64xf32>
    %141 = arith.addf %136, %140 : vector<32x64xf32>
    %142 = vector.extract_strided_slice %30 {offsets = [0, 22, 0], sizes = [32, 1, 16], strides = [1, 1, 1]} : vector<32x32x16xbf16> to vector<32x1x16xbf16>
    %143 = vector.shape_cast %142 : vector<32x1x16xbf16> to vector<32x16xbf16>
    %c352 = arith.constant 352 : index
    %c0_57 = arith.constant 0 : index
    %144 = vector.load %arg5[%c352, %c0_57] : memref<512x64xbf16, #tpu.memory_space<vmem>>, vector<16x64xbf16>
    %cst_58 = arith.constant dense<0.000000e+00> : vector<32x64xf32>
    %145 = tpu.matmul %143, %144, %cst_58 {dimension_numbers = #tpu.dot_dimension_numbers<[1], [0], [0], [1], [0, 0, 1, 1], [], []>} : vector<32x16xbf16>, vector<16x64xbf16>, vector<32x64xf32> -> vector<32x64xf32>
    %146 = arith.addf %141, %145 : vector<32x64xf32>
    %147 = vector.extract_strided_slice %30 {offsets = [0, 23, 0], sizes = [32, 1, 16], strides = [1, 1, 1]} : vector<32x32x16xbf16> to vector<32x1x16xbf16>
    %148 = vector.shape_cast %147 : vector<32x1x16xbf16> to vector<32x16xbf16>
    %c368 = arith.constant 368 : index
    %c0_59 = arith.constant 0 : index
    %149 = vector.load %arg5[%c368, %c0_59] : memref<512x64xbf16, #tpu.memory_space<vmem>>, vector<16x64xbf16>
    %cst_60 = arith.constant dense<0.000000e+00> : vector<32x64xf32>
    %150 = tpu.matmul %148, %149, %cst_60 {dimension_numbers = #tpu.dot_dimension_numbers<[1], [0], [0], [1], [0, 0, 1, 1], [], []>} : vector<32x16xbf16>, vector<16x64xbf16>, vector<32x64xf32> -> vector<32x64xf32>
    %151 = arith.addf %146, %150 : vector<32x64xf32>
    %152 = vector.extract_strided_slice %30 {offsets = [0, 24, 0], sizes = [32, 1, 16], strides = [1, 1, 1]} : vector<32x32x16xbf16> to vector<32x1x16xbf16>
    %153 = vector.shape_cast %152 : vector<32x1x16xbf16> to vector<32x16xbf16>
    %c384 = arith.constant 384 : index
    %c0_61 = arith.constant 0 : index
    %154 = vector.load %arg5[%c384, %c0_61] : memref<512x64xbf16, #tpu.memory_space<vmem>>, vector<16x64xbf16>
    %cst_62 = arith.constant dense<0.000000e+00> : vector<32x64xf32>
    %155 = tpu.matmul %153, %154, %cst_62 {dimension_numbers = #tpu.dot_dimension_numbers<[1], [0], [0], [1], [0, 0, 1, 1], [], []>} : vector<32x16xbf16>, vector<16x64xbf16>, vector<32x64xf32> -> vector<32x64xf32>
    %156 = arith.addf %151, %155 : vector<32x64xf32>
    %157 = vector.extract_strided_slice %30 {offsets = [0, 25, 0], sizes = [32, 1, 16], strides = [1, 1, 1]} : vector<32x32x16xbf16> to vector<32x1x16xbf16>
    %158 = vector.shape_cast %157 : vector<32x1x16xbf16> to vector<32x16xbf16>
    %c400 = arith.constant 400 : index
    %c0_63 = arith.constant 0 : index
    %159 = vector.load %arg5[%c400, %c0_63] : memref<512x64xbf16, #tpu.memory_space<vmem>>, vector<16x64xbf16>
    %cst_64 = arith.constant dense<0.000000e+00> : vector<32x64xf32>
    %160 = tpu.matmul %158, %159, %cst_64 {dimension_numbers = #tpu.dot_dimension_numbers<[1], [0], [0], [1], [0, 0, 1, 1], [], []>} : vector<32x16xbf16>, vector<16x64xbf16>, vector<32x64xf32> -> vector<32x64xf32>
    %161 = arith.addf %156, %160 : vector<32x64xf32>
    %162 = vector.extract_strided_slice %30 {offsets = [0, 26, 0], sizes = [32, 1, 16], strides = [1, 1, 1]} : vector<32x32x16xbf16> to vector<32x1x16xbf16>
    %163 = vector.shape_cast %162 : vector<32x1x16xbf16> to vector<32x16xbf16>
    %c416 = arith.constant 416 : index
    %c0_65 = arith.constant 0 : index
    %164 = vector.load %arg5[%c416, %c0_65] : memref<512x64xbf16, #tpu.memory_space<vmem>>, vector<16x64xbf16>
    %cst_66 = arith.constant dense<0.000000e+00> : vector<32x64xf32>
    %165 = tpu.matmul %163, %164, %cst_66 {dimension_numbers = #tpu.dot_dimension_numbers<[1], [0], [0], [1], [0, 0, 1, 1], [], []>} : vector<32x16xbf16>, vector<16x64xbf16>, vector<32x64xf32> -> vector<32x64xf32>
    %166 = arith.addf %161, %165 : vector<32x64xf32>
    %167 = vector.extract_strided_slice %30 {offsets = [0, 27, 0], sizes = [32, 1, 16], strides = [1, 1, 1]} : vector<32x32x16xbf16> to vector<32x1x16xbf16>
    %168 = vector.shape_cast %167 : vector<32x1x16xbf16> to vector<32x16xbf16>
    %c432 = arith.constant 432 : index
    %c0_67 = arith.constant 0 : index
    %169 = vector.load %arg5[%c432, %c0_67] : memref<512x64xbf16, #tpu.memory_space<vmem>>, vector<16x64xbf16>
    %cst_68 = arith.constant dense<0.000000e+00> : vector<32x64xf32>
    %170 = tpu.matmul %168, %169, %cst_68 {dimension_numbers = #tpu.dot_dimension_numbers<[1], [0], [0], [1], [0, 0, 1, 1], [], []>} : vector<32x16xbf16>, vector<16x64xbf16>, vector<32x64xf32> -> vector<32x64xf32>
    %171 = arith.addf %166, %170 : vector<32x64xf32>
    %172 = vector.extract_strided_slice %30 {offsets = [0, 28, 0], sizes = [32, 1, 16], strides = [1, 1, 1]} : vector<32x32x16xbf16> to vector<32x1x16xbf16>
    %173 = vector.shape_cast %172 : vector<32x1x16xbf16> to vector<32x16xbf16>
    %c448 = arith.constant 448 : index
    %c0_69 = arith.constant 0 : index
    %174 = vector.load %arg5[%c448, %c0_69] : memref<512x64xbf16, #tpu.memory_space<vmem>>, vector<16x64xbf16>
    %cst_70 = arith.constant dense<0.000000e+00> : vector<32x64xf32>
    %175 = tpu.matmul %173, %174, %cst_70 {dimension_numbers = #tpu.dot_dimension_numbers<[1], [0], [0], [1], [0, 0, 1, 1], [], []>} : vector<32x16xbf16>, vector<16x64xbf16>, vector<32x64xf32> -> vector<32x64xf32>
    %176 = arith.addf %171, %175 : vector<32x64xf32>
    %177 = vector.extract_strided_slice %30 {offsets = [0, 29, 0], sizes = [32, 1, 16], strides = [1, 1, 1]} : vector<32x32x16xbf16> to vector<32x1x16xbf16>
    %178 = vector.shape_cast %177 : vector<32x1x16xbf16> to vector<32x16xbf16>
    %c464 = arith.constant 464 : index
    %c0_71 = arith.constant 0 : index
    %179 = vector.load %arg5[%c464, %c0_71] : memref<512x64xbf16, #tpu.memory_space<vmem>>, vector<16x64xbf16>
    %cst_72 = arith.constant dense<0.000000e+00> : vector<32x64xf32>
    %180 = tpu.matmul %178, %179, %cst_72 {dimension_numbers = #tpu.dot_dimension_numbers<[1], [0], [0], [1], [0, 0, 1, 1], [], []>} : vector<32x16xbf16>, vector<16x64xbf16>, vector<32x64xf32> -> vector<32x64xf32>
    %181 = arith.addf %176, %180 : vector<32x64xf32>
    %182 = vector.extract_strided_slice %30 {offsets = [0, 30, 0], sizes = [32, 1, 16], strides = [1, 1, 1]} : vector<32x32x16xbf16> to vector<32x1x16xbf16>
    %183 = vector.shape_cast %182 : vector<32x1x16xbf16> to vector<32x16xbf16>
    %c480 = arith.constant 480 : index
    %c0_73 = arith.constant 0 : index
    %184 = vector.load %arg5[%c480, %c0_73] : memref<512x64xbf16, #tpu.memory_space<vmem>>, vector<16x64xbf16>
    %cst_74 = arith.constant dense<0.000000e+00> : vector<32x64xf32>
    %185 = tpu.matmul %183, %184, %cst_74 {dimension_numbers = #tpu.dot_dimension_numbers<[1], [0], [0], [1], [0, 0, 1, 1], [], []>} : vector<32x16xbf16>, vector<16x64xbf16>, vector<32x64xf32> -> vector<32x64xf32>
    %186 = arith.addf %181, %185 : vector<32x64xf32>
    %187 = vector.extract_strided_slice %30 {offsets = [0, 31, 0], sizes = [32, 1, 16], strides = [1, 1, 1]} : vector<32x32x16xbf16> to vector<32x1x16xbf16>
    %188 = vector.shape_cast %187 : vector<32x1x16xbf16> to vector<32x16xbf16>
    %c496 = arith.constant 496 : index
    %c0_75 = arith.constant 0 : index
    %189 = vector.load %arg5[%c496, %c0_75] : memref<512x64xbf16, #tpu.memory_space<vmem>>, vector<16x64xbf16>
    %cst_76 = arith.constant dense<0.000000e+00> : vector<32x64xf32>
    %190 = tpu.matmul %188, %189, %cst_76 {dimension_numbers = #tpu.dot_dimension_numbers<[1], [0], [0], [1], [0, 0, 1, 1], [], []>} : vector<32x16xbf16>, vector<16x64xbf16>, vector<32x64xf32> -> vector<32x64xf32>
    %191 = arith.addf %186, %190 : vector<32x64xf32>
    %c0_77 = arith.constant 0 : index
    %c0_78 = arith.constant 0 : index
    %192 = vector.load %arg8[%c0_77, %c0_78] : memref<32x64xf32, #tpu.memory_space<vmem>>, vector<32x64xf32>
    %193 = arith.addf %192, %191 : vector<32x64xf32>
    %c0_79 = arith.constant 0 : index
    %c0_80 = arith.constant 0 : index
    %194 = vector.load %arg8[%c0_79, %c0_80] : memref<32x64xf32, #tpu.memory_space<vmem>>, vector<32x64xf32>
    tpu.vector_store %arg8[%c0_79, %c0_80], %193 {strides = array<i32>} : memref<32x64xf32, #tpu.memory_space<vmem>>, vector<32x64xf32>,
    %c0_i32_81 = arith.constant 0 : i32
    %195 = arith.cmpi eq, %arg1, %c0_i32_81 : i32
    %196 = arith.extui %195 : i1 to i32
    %c0_i32_82 = arith.constant 0 : i32
    %197 = arith.cmpi ne, %196, %c0_i32_82 : i32
    scf.if %197 {
      %c0_83 = arith.constant 0 : index
      %c0_84 = arith.constant 0 : index
      %198 = vector.load %arg8[%c0_83, %c0_84] : memref<32x64xf32, #tpu.memory_space<vmem>>, vector<32x64xf32>
      %c0_85 = arith.constant 0 : index
      %c0_86 = arith.constant 0 : index
      %199 = vector.load %arg6[%c0_85, %c0_86] : memref<1x64xf32, #tpu.memory_space<vmem>>, vector<1x64xf32>
      %200 = vector.broadcast %199 : vector<1x64xf32> to vector<32x64xf32>
      %201 = arith.addf %198, %200 : vector<32x64xf32>
      %202 = arith.truncf %201 : vector<32x64xf32> to vector<32x64xbf16>
      %c0_87 = arith.constant 0 : index
      %c0_88 = arith.constant 0 : index
      %203 = vector.load %arg7[%c0_87, %c0_88] : memref<32x64xbf16, #tpu.memory_space<vmem>>, vector<32x64xbf16>
      tpu.vector_store %arg7[%c0_87, %c0_88], %202 {strides = array<i32>} : memref<32x64xbf16, #tpu.memory_space<vmem>>, vector<32x64xbf16>,
    } else {
    }
    return
  }
  func.func @transform_0(%arg0: i32, %arg1: i32) -> (i32, i32, i32) {
    %c0_i32 = arith.constant 0 : i32
    %c0_i32_0 = arith.constant 0 : i32
    return %arg0, %arg1, %c0_i32 : i32, i32, i32
  }
  func.func @transform_1(%arg0: i32, %arg1: i32) -> (i32, i32) {
    %c0_i32 = arith.constant 0 : i32
    %c0_i32_0 = arith.constant 0 : i32
    %c0_i32_1 = arith.constant 0 : i32
    return %c0_i32, %c0_i32_0 : i32, i32
  }
  func.func @transform_2(%arg0: i32, %arg1: i32) -> (i32, i32) {
    %c0_i32 = arith.constant 0 : i32
    %c0_i32_0 = arith.constant 0 : i32
    %c0_i32_1 = arith.constant 0 : i32
    return %c0_i32, %c0_i32_0 : i32, i32
  }
  func.func @transform_3(%arg0: i32, %arg1: i32) -> (i32, i32) {
    %c0_i32 = arith.constant 0 : i32
    %c0_i32_0 = arith.constant 0 : i32
    return %arg1, %c0_i32 : i32, i32
  }
  func.func @transform_4(%arg0: i32, %arg1: i32) -> (i32, i32) {
    %c0_i32 = arith.constant 0 : i32
    %c0_i32_0 = arith.constant 0 : i32
    %c0_i32_1 = arith.constant 0 : i32
    return %c0_i32, %c0_i32_0 : i32, i32
  }
  func.func @transform_5(%arg0: i32, %arg1: i32) -> (i32, i32) {
    %c0_i32 = arith.constant 0 : i32
    %c0_i32_0 = arith.constant 0 : i32
    return %arg0, %c0_i32 : i32, i32
  }
}

</mosaic_0001>

<bundles_post_ra>
// kernel: tpu_custom_call.1
= control target key start
LH: loop header
LB: loop body
LE: loop exit
PB: predicated region body
PF: predicated region fallthrough
CT: control target
= control target key end

     0   :  { %10 = vsyncpa [#allocation4], 0  ;;  %s11963_s0 = inlined_call_operand.hbm [shape: f32[32,32,16], index: 0, kind: input, shape index: {}]   ;;  %s11964_s1 = inlined_call_operand.hbm [shape: f32[1,16], index: 1, kind: input, shape index: {}]   ;;  %s11965_s2 = inlined_call_operand.hbm [shape: f32[1,16], index: 2, kind: input, shape index: {}]   ;;  %s11966_s3 = inlined_call_operand.hbm [shape: bf16[512,64], index: 3, kind: input, shape index: {}]   ;;  %s11967_s4 = inlined_call_operand.hbm [shape: f32[1,64], index: 4, kind: input, shape index: {}]   ;;  %s11968_s5 = inlined_call_operand.hbm [shape: bf16[32,64], index: 5, kind: output, shape index: {}]  }
   0x1   :  { %11 = vsyncpa [#allocation7], 0 }
   0x2   :  { %12 = vsyncpa [#allocation10], 0 }
   0x3   :  { %13 = vsyncpa [#allocation5], 0  ;;  %s7571_s18 = smov [#allocation6]   ;;  %s7572_s20 = smov [#allocation9]  }
   0x4   :  { %s32_s19 = sshll.u32 %s7571_s18, 4  ;;  %s51_s21 = sshll.u32 %s7572_s20, 4  ;;  %s33_s19 = int_to_ptr.vmem [resolvable:$true] %s32_s19  ;;  %s7612_s21 = int_to_ptr.vmem [resolvable:$true] %s51_s21 }
   0x5   :  { %s7431_s24 = scalar_lea.hbm %s11964_s1, 16 }
   0x6   :  { %p7432_p0 = scmp.ne.s32.totalorder %s11964_s1, %s7431_s24  ;;  %p7435_p1 = scmp.lt.u32.totalorder %s7431_s24, %s11964_s1 }
   0x8   :  { %p7437_p2 = pnand %p7435_p1, %p7432_p0 }
   0xa   :  { %7440 = shalt.err (!%p7437_p2)
}
   0xb   :  { %s7441_s29 = scalar_lea.vmem %s33_s19, 16  ;;  %s7445_s30 = scalar_lea.vmem %s33_s19, 32 }
   0xc   :  { %p7442_p3 = scmp.ne.s32.totalorder %s33_s19, %s7441_s29  ;;  %p7446_p4 = scmp.lt.s32.totalorder %s33_s19, %s33_s19 }
   0xd   :  { %p7447_p5 = scmp.lt.s32.totalorder %s7445_s30, %s7441_s29 }
   0xf   :  { %p7448_p6 = por %p7447_p5, %p7446_p4 }
  0x11   :  { %p7449_p7 = pnand %p7448_p6, %p7442_p3 }
  0x13   :  { %7452 = shalt.err (!%p7449_p7)
}
  0x14   :  { %35 = dma.hbm_to_vmem [thread:$0]  %s11964_s1, 16, %s33_s19, [#allocation7]  }
  0x15   :  { %s7453_s10 = scalar_lea.hbm %s11966_s3, 4096 }
  0x16   :  { %p7454_p8 = scmp.ne.s32.totalorder %s11966_s3, %s7453_s10  ;;  %p7457_p9 = scmp.lt.u32.totalorder %s7453_s10, %s11966_s3 }
  0x18   :  { %p7459_p10 = pnand %p7457_p9, %p7454_p8 }
  0x1a   :  { %7462 = shalt.err (!%p7459_p10)
}
  0x1b   :  { %s7463_s15 = scalar_lea.vmem %s7612_s21, 4096  ;;  %p7468_p12 = scmp.lt.s32.totalorder %s7612_s21, %s7612_s21 }
  0x1c   :  { %p7464_p11 = scmp.ne.s32.totalorder %s7612_s21, %s7463_s15  ;;  %p7469_p13 = scmp.lt.s32.totalorder %s7463_s15, %s7463_s15 }
  0x1e   :  { %p7470_p0 = por %p7469_p13, %p7468_p12 }
  0x20   :  { %p7471_p1 = pnand %p7470_p0, %p7464_p11 }
  0x22   :  { %7474 = shalt.err (!%p7471_p1)
}
  0x23   :  { %s7573_s1 = smov 64   ;;  %s7574_s16 = smov 4  }
  0x24   :  { %57 = dma.hbm_to_vmem [thread:$0]  %s11966_s3, 4096, %s7612_s21, [#allocation10], %s7573_s1, %s7573_s1, %s7574_s16  }
  0x25   :  { %s7575_s19 = smov [#allocation3]   ;;  %s7475_s24 = scalar_lea.hbm %s11963_s0, 16384 }
  0x26   :  { %s19_s20 = sshll.u32 %s7575_s19, 4  ;;  %p7476_p2 = scmp.ne.s32.totalorder %s11963_s0, %s7475_s24  ;;  %s20_s20 = int_to_ptr.vmem [resolvable:$true] %s19_s20 }
  0x27   :  { %p7479_p3 = scmp.lt.u32.totalorder %s7475_s24, %s11963_s0 }
  0x29   :  { %p7481_p4 = pnand %p7479_p3, %p7476_p2 }
  0x2b   :  { %7484 = shalt.err (!%p7481_p4)
}
  0x2c   :  { %s7485_s29 = scalar_lea.vmem %s20_s20, 16384  ;;  %p7490_p6 = scmp.lt.s32.totalorder %s20_s20, %s20_s20 }
  0x2d   :  { %p7486_p5 = scmp.ne.s32.totalorder %s20_s20, %s7485_s29  ;;  %p7491_p7 = scmp.lt.s32.totalorder %s7485_s29, %s7485_s29 }
  0x2f   :  { %p7492_p8 = por %p7491_p7, %p7490_p6 }
  0x31   :  { %p7493_p9 = pnand %p7492_p8, %p7486_p5 }
  0x33   :  { %7496 = shalt.err (!%p7493_p9)
}
  0x34   :  { %s7576_s3 = smov 128   ;;  %s7577_s21 = smov 8  }
  0x35   :  { %25 = dma.hbm_to_vmem [thread:$0]  %s11963_s0, 16384, %s20_s20, [#allocation4], %s7576_s3, %s7576_s3, %s7577_s21  }
  0x36   :  { %s7578_s7 = smov [#allocation8]   ;;  %s7579_s9 = smov [#allocation11]  }
  0x37   :  { %s42_s8 = sshll.u32 %s7578_s7, 4  ;;  %s64_s10 = sshll.u32 %s7579_s9, 4  ;;  %s43_s8 = int_to_ptr.vmem [resolvable:$true] %s42_s8  ;;  %s65_s10 = int_to_ptr.vmem [resolvable:$true] %s64_s10 }
  0x38   :  { %s7497_s13 = scalar_lea.hbm %s11965_s2, 16 }
  0x39   :  { %p7498_p10 = scmp.ne.s32.totalorder %s11965_s2, %s7497_s13  ;;  %p7501_p11 = scmp.lt.u32.totalorder %s7497_s13, %s11965_s2 }
  0x3b   :  { %p7503_p12 = pnand %p7501_p11, %p7498_p10 }
  0x3d   :  { %7506 = shalt.err (!%p7503_p12)
}
  0x3e   :  { %s7507_s0 = scalar_lea.vmem %s43_s8, 16  ;;  %s7511_s19 = scalar_lea.vmem %s43_s8, 32 }
  0x3f   :  { %p7508_p13 = scmp.ne.s32.totalorder %s43_s8, %s7507_s0  ;;  %p7512_p0 = scmp.lt.s32.totalorder %s43_s8, %s43_s8 }
  0x40   :  { %p7513_p1 = scmp.lt.s32.totalorder %s7511_s19, %s7507_s0 }
  0x42   :  { %p7514_p2 = por %p7513_p1, %p7512_p0 }
  0x44   :  { %p7515_p3 = pnand %p7514_p2, %p7508_p13 }
  0x46   :  { %7518 = shalt.err (!%p7515_p3)
}
  0x47   :  { %45 = dma.hbm_to_vmem [thread:$0]  %s11965_s2, 16, %s43_s8, [#allocation7]  }
  0x48   :  { %s7519_s25 = scalar_lea.hbm %s11967_s4, 16 }
  0x49   :  { %p7520_p4 = scmp.ne.s32.totalorder %s11967_s4, %s7519_s25  ;;  %p7523_p5 = scmp.lt.u32.totalorder %s7519_s25, %s11967_s4 }
  0x4b   :  { %p7525_p6 = pnand %p7523_p5, %p7520_p4 }
  0x4d   :  { %7528 = shalt.err (!%p7525_p6)
}
  0x4e   :  { %s7529_s3 = scalar_lea.vmem %s65_s10, 16  ;;  %s7533_s21 = scalar_lea.vmem %s65_s10, 32 }
  0x4f   :  { %p7530_p7 = scmp.ne.s32.totalorder %s65_s10, %s7529_s3  ;;  %p7534_p8 = scmp.lt.s32.totalorder %s65_s10, %s65_s10 }
  0x50   :  { %p7535_p9 = scmp.lt.s32.totalorder %s7533_s21, %s7529_s3 }
  0x52   :  { %p7536_p10 = por %p7535_p9, %p7534_p8 }
  0x54   :  { %p7537_p11 = pnand %p7536_p10, %p7530_p7 }
  0x56   :  { %7540 = shalt.err (!%p7537_p11)
}
  0x57   :  { %67 = dma.hbm_to_vmem [thread:$0]  %s11967_s4, 16, %s65_s10, [#allocation10]  }
  0x58   :  { %7563 = dma.done.wait [#allocation4], 16384  }
  0x59   :  { %7564 = vsyncadd [#allocation4], 4294950912 }
  0x5a   :  { %7565 = dma.done.wait [#allocation7], 32  }
  0x5b   :  { %7566 = vsyncadd [#allocation7], 4294967264 }
  0x5c   :  { %7567 = dma.done.wait [#allocation10], 4112  }
  0x5d   :  { %7568 = vsyncadd [#allocation10], 4294963184  ;;  %vm221_vm0 = vcmask 130048   ;;  %v7682_v0 = vld [vmem:[#allocation3 + $0x30] sm:$0xff]  ;;  %v7684_v1 = vld [vmem:[#allocation3] sm:$0xff]  ;;  %vm2290_vm1 = vcmask 1041409  }
  0x5e   :  { %v7686_v2 = vld [vmem:[#allocation3 + $0x38] sm:$0xff]  ;;  %v240_v3 = vsel %vm221_vm0, %v7682_v0, 0.0  ;;  %v222_v4 = vsel %vm221_vm0, %v7684_v1, 0.0  ;;  %v7692_v5 = vld [vmem:[#allocation3 + $0x8] sm:$0xff]  ;;  %v125_v9 = vld [vmem:[#allocation3 + $0x100] sm:$0xff]  ;;  %vm2293_vm2 = vcmask 1042434  }
  0x5f   :  { %241 = vadd.xlane.f32.xlu1 %v240_v3  ;;  %223 = vadd.xlane.f32.xlu0 %v222_v4  ;;  %v243_v6 = vsel %vm221_vm0, %v7686_v2, 0.0  ;;  %v225_v7 = vsel %vm221_vm0, %v7692_v5, 0.0  ;;  %v126_v8 = vld [vmem:[#allocation3 + $0x108] sm:$0xff]  ;;  %v318_v11 = vsel %vm221_vm0, %v125_v9, 0.0  ;;  %v132_v12 = vld [vmem:[#allocation3 + $0x138] sm:$0xff]  ;;  %v131_v13 = vld [vmem:[#allocation3 + $0x130] sm:$0xff] }
  0x60   :  { %v321_v10 = vsel %vm221_vm0, %v126_v8, 0.0  ;;  %v339_v14 = vsel %vm221_vm0, %v132_v12, 0.0  ;;  %v336_v15 = vsel %vm221_vm0, %v131_v13, 0.0  ;;  %v102_v16 = vld [vmem:[#allocation3 + $0x48] sm:$0xff]  ;;  %v101_v17 = vld [vmem:[#allocation3 + $0x40] sm:$0xff]  ;;  %v104_v20 = vld [vmem:[#allocation3 + $0x58] sm:$0xff] }
  0x61   :  { %v249_v18 = vsel %vm221_vm0, %v102_v16, 0.0  ;;  %v246_v19 = vsel %vm221_vm0, %v101_v17, 0.0  ;;  %v103_v21 = vld [vmem:[#allocation3 + $0x50] sm:$0xff]  ;;  %v255_v22 = vsel %vm221_vm0, %v104_v20, 0.0  ;;  %v134_v24 = vld [vmem:[#allocation3 + $0x148] sm:$0xff]  ;;  %v133_v25 = vld [vmem:[#allocation3 + $0x140] sm:$0xff] }
  0x62   :  { %v252_v23 = vsel %vm221_vm0, %v103_v21, 0.0  ;;  %v345_v26 = vsel %vm221_vm0, %v134_v24, 0.0  ;;  %v342_v27 = vsel %vm221_vm0, %v133_v25, 0.0  ;;  %v136_v28 = vld [vmem:[#allocation3 + $0x158] sm:$0xff]  ;;  %v135_v29 = vld [vmem:[#allocation3 + $0x150] sm:$0xff]  ;;  %v158_v30 = vld [vmem:[#allocation3 + $0x208] sm:$0xff] }
  0x63   :  { %244 = vadd.xlane.f32.xlu1 %v243_v6  ;;  %226 = vadd.xlane.f32.xlu0 %v225_v7  ;;  %v351_v31 = vsel %vm221_vm0, %v136_v28, 0.0  ;;  %v348_v32 = vsel %vm221_vm0, %v135_v29, 0.0  ;;  %v157_v33 = vld [vmem:[#allocation3 + $0x200] sm:$0xff]  ;;  %v417_v34 = vsel %vm221_vm0, %v158_v30, 0.0  ;;  %v164_v35 = vld [vmem:[#allocation3 + $0x238] sm:$0xff]  ;;  %v163_v37 = vld [vmem:[#allocation3 + $0x230] sm:$0xff] }
  0x64   :  { %v414_v36 = vsel %vm221_vm0, %v157_v33, 0.0  ;;  %v435_v38 = vsel %vm221_vm0, %v164_v35, 0.0  ;;  %v190_v39 = vld [vmem:[#allocation3 + $0x308] sm:$0xff]  ;;  %v432_v40 = vsel %vm221_vm0, %v163_v37, 0.0  ;;  %v189_v41 = vld [vmem:[#allocation3 + $0x300] sm:$0xff]  ;;  %v196_v43 = vld [vmem:[#allocation3 + $0x338] sm:$0xff] }
  0x65   :  { %v513_v42 = vsel %vm221_vm0, %v190_v39, 0.0  ;;  %v510_v44 = vsel %vm221_vm0, %v189_v41, 0.0  ;;  %v195_v45 = vld [vmem:[#allocation3 + $0x330] sm:$0xff]  ;;  %v531_v46 = vsel %vm221_vm0, %v196_v43, 0.0  ;;  %v96_v47 = vld [vmem:[#allocation3 + $0x18] sm:$0xff]  ;;  %v98_v51 = vld [vmem:[#allocation3 + $0x28] sm:$0xff] }
  0x66   :  { %v528_v48 = vsel %vm221_vm0, %v195_v45, 0.0  ;;  %v95_v49 = vld [vmem:[#allocation3 + $0x10] sm:$0xff]  ;;  %v231_v50 = vsel %vm221_vm0, %v96_v47, 0.0  ;;  %v97_v53 = vld [vmem:[#allocation3 + $0x20] sm:$0xff]  ;;  %v237_v54 = vsel %vm221_vm0, %v98_v51, 0.0  ;;  %v106_v56 = vld [vmem:[#allocation3 + $0x68] sm:$0xff] }
  0x67   :  { %322 = vadd.xlane.f32.xlu1 %v321_v10  ;;  %319 = vadd.xlane.f32.xlu0 %v318_v11  ;;  %v228_v52 = vsel %vm221_vm0, %v95_v49, 0.0  ;;  %v234_v55 = vsel %vm221_vm0, %v97_v53, 0.0  ;;  %v105_v57 = vld [vmem:[#allocation3 + $0x60] sm:$0xff]  ;;  %v261_v58 = vsel %vm221_vm0, %v106_v56, 0.0  ;;  %v108_v60 = vld [vmem:[#allocation3 + $0x78] sm:$0xff]  ;;  %v107_v61 = vld [vmem:[#allocation3 + $0x70] sm:$0xff] }
  0x68   :  { %v258_v59 = vsel %vm221_vm0, %v105_v57, 0.0  ;;  %v267_v62 = vsel %vm221_vm0, %v108_v60, 0.0  ;;  %v264_v63 = vsel %vm221_vm0, %v107_v61, 0.0  ;;  %v128_v3 = vld [vmem:[#allocation3 + $0x118] sm:$0xff]  ;;  %v127_v4 = vld [vmem:[#allocation3 + $0x110] sm:$0xff]  ;;  %v130_v8 = vld [vmem:[#allocation3 + $0x128] sm:$0xff] }
  0x69   :  { %v327_v6 = vsel %vm221_vm0, %v128_v3, 0.0  ;;  %v324_v7 = vsel %vm221_vm0, %v127_v4, 0.0  ;;  %v129_v9 = vld [vmem:[#allocation3 + $0x120] sm:$0xff]  ;;  %v333_v10 = vsel %vm221_vm0, %v130_v8, 0.0  ;;  %v138_v12 = vld [vmem:[#allocation3 + $0x168] sm:$0xff]  ;;  %v140_v16 = vld [vmem:[#allocation3 + $0x178] sm:$0xff] }
  0x6a   :  { %v330_v11 = vsel %vm221_vm0, %v129_v9, 0.0  ;;  %v137_v13 = vld [vmem:[#allocation3 + $0x160] sm:$0xff]  ;;  %v139_v17 = vld [vmem:[#allocation3 + $0x170] sm:$0xff]  ;;  %v166_v20 = vld [vmem:[#allocation3 + $0x248] sm:$0xff]  ;;  %vm2296_vm3 = vcmask 1043459   ;;  %vm2299_vm4 = vcmask 1044484  }
  0x6b   :  { %340 = vadd.xlane.f32.xlu1 %v339_v14  ;;  %337 = vadd.xlane.f32.xlu0 %v336_v15  ;;  %v357_v14 = vsel %vm221_vm0, %v138_v12, 0.0  ;;  %v354_v15 = vsel %vm221_vm0, %v137_v13, 0.0  ;;  %v165_v21 = vld [vmem:[#allocation3 + $0x240] sm:$0xff]  ;;  %v168_v24 = vld [vmem:[#allocation3 + $0x258] sm:$0xff]  ;;  %v167_v25 = vld [vmem:[#allocation3 + $0x250] sm:$0xff]  ;;  %vm2302_vm5 = vcmask 1045509  }
  0x6c   :  { %v198_v28 = vld [vmem:[#allocation3 + $0x348] sm:$0xff]  ;;  %v197_v29 = vld [vmem:[#allocation3 + $0x340] sm:$0xff]  ;;  %v199_v33 = vld [vmem:[#allocation3 + $0x350] sm:$0xff]  ;;  %vm2305_vm6 = vcmask 1046534   ;;  %vm2308_vm7 = vcmask 1047559   ;;  %vm88_vm8 = vcmask 523264  }
  0x6d   :  { %v537_v30 = vsel %vm221_vm0, %v198_v28, 0.0  ;;  %v540_v35 = vsel %vm221_vm0, %v199_v33, 0.0  ;;  %v109_v37 = vld [vmem:[#allocation3 + $0x80] sm:$0xff]  ;;  %v111_v41 = vld [vmem:[#allocation3 + $0x90] sm:$0xff]  ;;  %v162_v56 = vld [vmem:[#allocation3 + $0x228] sm:$0xff]  ;;  %vm6459_vm9 = vcmask 519168  }
  0x6e   :  { %v270_v39 = vsel %vm221_vm0, %v109_v37, 0.0  ;;  %v276_v43 = vsel %vm221_vm0, %v111_v41, 0.0  ;;  %v141_v45 = vld [vmem:[#allocation3 + $0x180] sm:$0xff]  ;;  %v143_v49 = vld [vmem:[#allocation3 + $0x190] sm:$0xff]  ;;  %v170_v60 = vld [vmem:[#allocation3 + $0x268] sm:$0xff]  ;;  %s7581_s4 = smov [#allocation12]  }
  0x6f   :  { %250 = vadd.xlane.f32.xlu1 %v249_v18  ;;  %247 = vadd.xlane.f32.xlu0 %v246_v19  ;;  %v363_v18 = vsel %vm221_vm0, %v140_v16, 0.0  ;;  %v360_v19 = vsel %vm221_vm0, %v139_v17, 0.0  ;;  %v366_v47 = vsel %vm221_vm0, %v141_v45, 0.0  ;;  %v372_v51 = vsel %vm221_vm0, %v143_v49, 0.0  ;;  %v159_v53 = vld [vmem:[#allocation3 + $0x210] sm:$0xff]  ;;  %v161_v57 = vld [vmem:[#allocation3 + $0x220] sm:$0xff] }
  0x70   :  { %v169_v61 = vld [vmem:[#allocation3 + $0x260] sm:$0xff]  ;;  %v172_v3 = vld [vmem:[#allocation3 + $0x278] sm:$0xff]  ;;  %v171_v4 = vld [vmem:[#allocation3 + $0x270] sm:$0xff]  ;;  %s6469_s6 = sshll.u32 %s7581_s4, 4  ;;  %s6470_s6 = int_to_ptr.vmem [resolvable:$true] %s6469_s6 }
  0x71   :  { %v192_v8 = vld [vmem:[#allocation3 + $0x318] sm:$0xff]  ;;  %v191_v9 = vld [vmem:[#allocation3 + $0x310] sm:$0xff]  ;;  %v194_v12 = vld [vmem:[#allocation3 + $0x328] sm:$0xff]  ;;  %s7541_s7 = scalar_lea.vmem %s6470_s6, 256  ;;  %p7546_p13 = scmp.lt.s32.totalorder %s6470_s6, %s6470_s6 }
  0x72   :  { %v193_v13 = vld [vmem:[#allocation3 + $0x320] sm:$0xff]  ;;  %v202_v16 = vld [vmem:[#allocation3 + $0x368] sm:$0xff]  ;;  %p7542_p12 = scmp.ne.s32.totalorder %s6470_s6, %s7541_s7  ;;  %p7547_p0 = scmp.lt.s32.totalorder %s7541_s7, %s7541_s7 }
  0x73   :  { %256 = vadd.xlane.f32.xlu1 %v255_v22  ;;  %253 = vadd.xlane.f32.xlu0 %v252_v23  ;;  %v441_v22 = vsel %vm221_vm0, %v166_v20, 0.0  ;;  %v438_v23 = vsel %vm221_vm0, %v165_v21, 0.0  ;;  %v201_v17 = vld [vmem:[#allocation3 + $0x360] sm:$0xff]  ;;  %v204_v20 = vld [vmem:[#allocation3 + $0x378] sm:$0xff]  ;;  %v203_v21 = vld [vmem:[#allocation3 + $0x370] sm:$0xff] }
  0x74   :  { %v145_v37 = vld [vmem:[#allocation3 + $0x1a0] sm:$0xff]  ;;  %p7548_p1 = por %p7547_p0, %p7546_p13 }
  0x75   :  { %v378_v41 = vsel %vm221_vm0, %v145_v37, 0.0  ;;  %v173_v49 = vld [vmem:[#allocation3 + $0x280] sm:$0xff] }
  0x76   :  { %p7549_p2 = pnand %p7548_p1, %p7542_p12 }
  0x77   :  { %346 = vadd.xlane.f32.xlu1 %v345_v26  ;;  %343 = vadd.xlane.f32.xlu0 %v342_v27  ;;  %v447_v26 = vsel %vm221_vm0, %v168_v24, 0.0  ;;  %v444_v27 = vsel %vm221_vm0, %v167_v25, 0.0  ;;  %v114_v24 = vld [vmem:[#allocation3 + $0xa8] sm:$0xff]  ;;  %v113_v25 = vld [vmem:[#allocation3 + $0xa0] sm:$0xff] }
  0x78   :  { %v285_v28 = vsel %vm221_vm0, %v114_v24, 0.0  ;;  %v150_v24 = vld [vmem:[#allocation3 + $0x1c8] sm:$0xff] }
  0x7b   :  { %352 = vadd.xlane.f32.xlu1 %v351_v31  ;;  %349 = vadd.xlane.f32.xlu0 %v348_v32  ;;  %v534_v31 = vsel %vm221_vm0, %v197_v29, 0.0  ;;  %v200_v32 = vld [vmem:[#allocation3 + $0x358] sm:$0xff]  ;;  %v282_v29 = vsel %vm221_vm0, %v113_v25, 0.0  ;;  %v149_v25 = vld [vmem:[#allocation3 + $0x1c0] sm:$0xff] }
  0x7f   :  { %418 = vadd.xlane.f32.xlu1 %v417_v34  ;;  %415 = vadd.xlane.f32.xlu0 %v414_v36  ;;  %v543_v34 = vsel %vm221_vm0, %v200_v32, 0.0  ;;  %v110_v36 = vld [vmem:[#allocation3 + $0x88] sm:$0xff] }
  0x83   :  { %436 = vadd.xlane.f32.xlu1 %v435_v38  ;;  %433 = vadd.xlane.f32.xlu0 %v432_v40  ;;  %v273_v38 = vsel %vm221_vm0, %v110_v36, 0.0  ;;  %v112_v40 = vld [vmem:[#allocation3 + $0x98] sm:$0xff]  ;;  %v146_v36 = vld [vmem:[#allocation3 + $0x1a8] sm:$0xff] }
  0x87   :  { %514 = vadd.xlane.f32.xlu1 %v513_v42  ;;  %511 = vadd.xlane.f32.xlu0 %v510_v44  ;;  %v279_v42 = vsel %vm221_vm0, %v112_v40, 0.0  ;;  %v142_v44 = vld [vmem:[#allocation3 + $0x188] sm:$0xff]  ;;  %v381_v40 = vsel %vm221_vm0, %v146_v36, 0.0 }
  0x8b   :  { %532 = vadd.xlane.f32.xlu1 %v531_v46  ;;  %529 = vadd.xlane.f32.xlu0 %v528_v48  ;;  %v369_v46 = vsel %vm221_vm0, %v142_v44, 0.0  ;;  %v144_v48 = vld [vmem:[#allocation3 + $0x198] sm:$0xff] }
  0x8f   :  { %232 = vadd.xlane.f32.xlu1 %v231_v50  ;;  %229 = vadd.xlane.f32.xlu0 %v228_v52  ;;  %v375_v50 = vsel %vm221_vm0, %v144_v48, 0.0  ;;  %v160_v52 = vld [vmem:[#allocation3 + $0x218] sm:$0xff]  ;;  %v174_v48 = vld [vmem:[#allocation3 + $0x288] sm:$0xff] }
  0x93   :  { %238 = vadd.xlane.f32.xlu1 %v237_v54  ;;  %235 = vadd.xlane.f32.xlu0 %v234_v55  ;;  %v423_v54 = vsel %vm221_vm0, %v160_v52, 0.0  ;;  %v420_v55 = vsel %vm221_vm0, %v159_v53, 0.0  ;;  %v465_v52 = vsel %vm221_vm0, %v174_v48, 0.0  ;;  %v462_v53 = vsel %vm221_vm0, %v173_v49, 0.0 }
  0x97   :  { %262 = vadd.xlane.f32.xlu1 %v261_v58  ;;  %259 = vadd.xlane.f32.xlu0 %v258_v59  ;;  %v429_v58 = vsel %vm221_vm0, %v162_v56, 0.0  ;;  %v426_v59 = vsel %vm221_vm0, %v161_v57, 0.0 }
  0x9b   :  { %268 = vadd.xlane.f32.xlu1 %v267_v62  ;;  %265 = vadd.xlane.f32.xlu0 %v264_v63  ;;  %v453_v62 = vsel %vm221_vm0, %v170_v60, 0.0  ;;  %v450_v63 = vsel %vm221_vm0, %v169_v61, 0.0  ;;  %v206_v60 = vld [vmem:[#allocation3 + $0x388] sm:$0xff]  ;;  %v205_v61 = vld [vmem:[#allocation3 + $0x380] sm:$0xff] }
  0x9f   :  { %328 = vadd.xlane.f32.xlu1 %v327_v6  ;;  %325 = vadd.xlane.f32.xlu0 %v324_v7  ;;  %v459_v6 = vsel %vm221_vm0, %v172_v3, 0.0  ;;  %v456_v7 = vsel %vm221_vm0, %v171_v4, 0.0  ;;  %v561_v3 = vsel %vm221_vm0, %v206_v60, 0.0  ;;  %v558_v4 = vsel %vm221_vm0, %v205_v61, 0.0  ;;  %v210_v60 = vld [vmem:[#allocation3 + $0x3a8] sm:$0xff]  ;;  %v209_v61 = vld [vmem:[#allocation3 + $0x3a0] sm:$0xff] }
  0xa3   :  { %334 = vadd.xlane.f32.xlu1 %v333_v10  ;;  %331 = vadd.xlane.f32.xlu0 %v330_v11  ;;  %v519_v10 = vsel %vm221_vm0, %v192_v8, 0.0  ;;  %v516_v11 = vsel %vm221_vm0, %v191_v9, 0.0 }
  0xa7   :  { %358 = vadd.xlane.f32.xlu1 %v357_v14  ;;  %355 = vadd.xlane.f32.xlu0 %v354_v15  ;;  %v525_v14 = vsel %vm221_vm0, %v194_v12, 0.0  ;;  %v522_v15 = vsel %vm221_vm0, %v193_v13, 0.0  ;;  %v118_v12 = vld [vmem:[#allocation3 + $0xc8] sm:$0xff]  ;;  %v117_v13 = vld [vmem:[#allocation3 + $0xc0] sm:$0xff] }
  0xab   :  { %364 = vadd.xlane.f32.xlu1 %v363_v18  ;;  %361 = vadd.xlane.f32.xlu0 %v360_v19  ;;  %v549_v18 = vsel %vm221_vm0, %v202_v16, 0.0  ;;  %v546_v19 = vsel %vm221_vm0, %v201_v17, 0.0  ;;  %v297_v16 = vsel %vm221_vm0, %v118_v12, 0.0  ;;  %v294_v17 = vsel %vm221_vm0, %v117_v13, 0.0 }
  0xaf   :  { %442 = vadd.xlane.f32.xlu1 %v441_v22  ;;  %439 = vadd.xlane.f32.xlu0 %v438_v23  ;;  %v555_v22 = vsel %vm221_vm0, %v204_v20, 0.0  ;;  %v552_v23 = vsel %vm221_vm0, %v203_v21, 0.0 }
  0xb3   :  { %448 = vadd.xlane.f32.xlu1 %v447_v26  ;;  %445 = vadd.xlane.f32.xlu0 %v444_v27 }
  0xb7   :  { %538 = vadd.xlane.f32.xlu1 %v537_v30  ;;  %535 = vadd.xlane.f32.xlu0 %v534_v31  ;;  %v116_v30 = vld [vmem:[#allocation3 + $0xb8] sm:$0xff]  ;;  %v115_v31 = vld [vmem:[#allocation3 + $0xb0] sm:$0xff] }
  0xbb   :  { %544 = vadd.xlane.f32.xlu1 %v543_v34  ;;  %541 = vadd.xlane.f32.xlu0 %v540_v35  ;;  %v291_v34 = vsel %vm221_vm0, %v116_v30, 0.0  ;;  %v288_v35 = vsel %vm221_vm0, %v115_v31, 0.0  ;;  %v393_v30 = vsel %vm221_vm0, %v150_v24, 0.0  ;;  %v390_v31 = vsel %vm221_vm0, %v149_v25, 0.0 }
  0xbf   :  { %274 = vadd.xlane.f32.xlu1 %v273_v38  ;;  %271 = vadd.xlane.f32.xlu0 %v270_v39 }
  0xc3   :  { %280 = vadd.xlane.f32.xlu1 %v279_v42  ;;  %277 = vadd.xlane.f32.xlu0 %v276_v43  ;;  %v148_v42 = vld [vmem:[#allocation3 + $0x1b8] sm:$0xff]  ;;  %v147_v43 = vld [vmem:[#allocation3 + $0x1b0] sm:$0xff] }
  0xc7   :  { %370 = vadd.xlane.f32.xlu1 %v369_v46  ;;  %367 = vadd.xlane.f32.xlu0 %v366_v47  ;;  %v387_v46 = vsel %vm221_vm0, %v148_v42, 0.0  ;;  %v384_v47 = vsel %vm221_vm0, %v147_v43, 0.0  ;;  %v178_v42 = vld [vmem:[#allocation3 + $0x2a8] sm:$0xff]  ;;  %v177_v43 = vld [vmem:[#allocation3 + $0x2a0] sm:$0xff] }
  0xc8   :  { %v477_v48 = vsel %vm221_vm0, %v178_v42, 0.0  ;;  %v474_v49 = vsel %vm221_vm0, %v177_v43, 0.0  ;;  %v154_v42 = vld [vmem:[#allocation3 + $0x1e8] sm:$0xff]  ;;  %v153_v43 = vld [vmem:[#allocation3 + $0x1e0] sm:$0xff] }
  0xcb   :  { %376 = vadd.xlane.f32.xlu1 %v375_v50  ;;  %373 = vadd.xlane.f32.xlu0 %v372_v51 }
  0xcf   :  { %424 = vadd.xlane.f32.xlu1 %v423_v54  ;;  %421 = vadd.xlane.f32.xlu0 %v420_v55  ;;  %v176_v54 = vld [vmem:[#allocation3 + $0x298] sm:$0xff]  ;;  %v175_v55 = vld [vmem:[#allocation3 + $0x290] sm:$0xff] }
  0xd3   :  { %430 = vadd.xlane.f32.xlu1 %v429_v58  ;;  %427 = vadd.xlane.f32.xlu0 %v426_v59  ;;  %v471_v58 = vsel %vm221_vm0, %v176_v54, 0.0  ;;  %v468_v59 = vsel %vm221_vm0, %v175_v55, 0.0 }
  0xd7   :  { %454 = vadd.xlane.f32.xlu1 %v453_v62  ;;  %451 = vadd.xlane.f32.xlu0 %v450_v63 }
  0xdb   :  { %460 = vadd.xlane.f32.xlu1 %v459_v6  ;;  %457 = vadd.xlane.f32.xlu0 %v456_v7  ;;  %v208_v6 = vld [vmem:[#allocation3 + $0x398] sm:$0xff]  ;;  %v207_v7 = vld [vmem:[#allocation3 + $0x390] sm:$0xff] }
  0xdf   :  { %520 = vadd.xlane.f32.xlu1 %v519_v10  ;;  %517 = vadd.xlane.f32.xlu0 %v516_v11  ;;  %v567_v10 = vsel %vm221_vm0, %v208_v6, 0.0  ;;  %v564_v11 = vsel %vm221_vm0, %v207_v7, 0.0  ;;  %v573_v6 = vsel %vm221_vm0, %v210_v60, 0.0  ;;  %v570_v7 = vsel %vm221_vm0, %v209_v61, 0.0 }
  0xe3   :  { %526 = vadd.xlane.f32.xlu1 %v525_v14  ;;  %523 = vadd.xlane.f32.xlu0 %v522_v15 }
  0xe7   :  { %550 = vadd.xlane.f32.xlu1 %v549_v18  ;;  %547 = vadd.xlane.f32.xlu0 %v546_v19  ;;  %v120_v18 = vld [vmem:[#allocation3 + $0xd8] sm:$0xff]  ;;  %v119_v19 = vld [vmem:[#allocation3 + $0xd0] sm:$0xff] }
  0xeb   :  { %556 = vadd.xlane.f32.xlu1 %v555_v22  ;;  %553 = vadd.xlane.f32.xlu0 %v552_v23  ;;  %v303_v22 = vsel %vm221_vm0, %v120_v18, 0.0  ;;  %v300_v23 = vsel %vm221_vm0, %v119_v19, 0.0  ;;  %v122_v18 = vld [vmem:[#allocation3 + $0xe8] sm:$0xff]  ;;  %v121_v19 = vld [vmem:[#allocation3 + $0xe0] sm:$0xff] }
  0xec   :  { %v7766_v26 = vpop.xlane.xlu1 %241  ;;  %v7768_v27 = vpop.xlane.xlu0 %223  ;;  %v309_v24 = vsel %vm221_vm0, %v122_v18, 0.0  ;;  %v306_v25 = vsel %vm221_vm0, %v121_v19, 0.0 }
  0xef   :  { %286 = vadd.xlane.f32.xlu1 %v285_v28  ;;  %283 = vadd.xlane.f32.xlu0 %v282_v29 }
  0xf0   :  { %v7772_v32 = vpop.xlane.xlu1 %244  ;;  %v7774_v33 = vpop.xlane.xlu0 %226 }
  0xf3   :  { %292 = vadd.xlane.f32.xlu1 %v291_v34  ;;  %289 = vadd.xlane.f32.xlu0 %v288_v35  ;;  %v152_v34 = vld [vmem:[#allocation3 + $0x1d8] sm:$0xff]  ;;  %v151_v35 = vld [vmem:[#allocation3 + $0x1d0] sm:$0xff] }
  0xf4   :  { %v7778_v38 = vpop.xlane.xlu1 %322  ;;  %v7780_v39 = vpop.xlane.xlu0 %319 }
  0xf7   :  { %382 = vadd.xlane.f32.xlu1 %v381_v40  ;;  %379 = vadd.xlane.f32.xlu0 %v378_v41  ;;  %v399_v40 = vsel %vm221_vm0, %v152_v34, 0.0  ;;  %v396_v41 = vsel %vm221_vm0, %v151_v35, 0.0 }
  0xf8   :  { %v7784_v44 = vpop.xlane.xlu1 %340  ;;  %v7786_v45 = vpop.xlane.xlu0 %337 }
  0xfb   :  { %388 = vadd.xlane.f32.xlu1 %v387_v46  ;;  %385 = vadd.xlane.f32.xlu0 %v384_v47 }
  0xfc   :  { %v7790_v50 = vpop.xlane.xlu1 %250  ;;  %v7792_v51 = vpop.xlane.xlu0 %247 }
  0xff   :  { %466 = vadd.xlane.f32.xlu1 %v465_v52  ;;  %463 = vadd.xlane.f32.xlu0 %v462_v53  ;;  %v180_v52 = vld [vmem:[#allocation3 + $0x2b8] sm:$0xff]  ;;  %v179_v53 = vld [vmem:[#allocation3 + $0x2b0] sm:$0xff] }
 0x100   :  { %v7796_v56 = vpop.xlane.xlu1 %256  ;;  %v7798_v57 = vpop.xlane.xlu0 %253 }
 0x103   :  { %472 = vadd.xlane.f32.xlu1 %v471_v58  ;;  %469 = vadd.xlane.f32.xlu0 %v468_v59  ;;  %v483_v58 = vsel %vm221_vm0, %v180_v52, 0.0  ;;  %v480_v59 = vsel %vm221_vm0, %v179_v53, 0.0  ;;  %v405_v52 = vsel %vm221_vm0, %v154_v42, 0.0  ;;  %v402_v53 = vsel %vm221_vm0, %v153_v43, 0.0  ;;  %v214_v42 = vld [vmem:[#allocation3 + $0x3c8] sm:$0xff]  ;;  %v213_v43 = vld [vmem:[#allocation3 + $0x3c0] sm:$0xff] }
 0x104   :  { %v7802_v62 = vpop.xlane.xlu1 %346  ;;  %v7804_v63 = vpop.xlane.xlu0 %343 }
 0x107   :  { %562 = vadd.xlane.f32.xlu1 %v561_v3  ;;  %559 = vadd.xlane.f32.xlu0 %v558_v4 }
 0x108   :  { %v7808_v8 = vpop.xlane.xlu1 %352  ;;  %v7810_v9 = vpop.xlane.xlu0 %349 }
 0x10b   :  { %568 = vadd.xlane.f32.xlu1 %v567_v10  ;;  %565 = vadd.xlane.f32.xlu0 %v564_v11  ;;  %v212_v10 = vld [vmem:[#allocation3 + $0x3b8] sm:$0xff]  ;;  %v211_v11 = vld [vmem:[#allocation3 + $0x3b0] sm:$0xff] }
 0x10c   :  { %v7814_v14 = vpop.xlane.xlu1 %418  ;;  %v7816_v15 = vpop.xlane.xlu0 %415 }
 0x10f   :  { %298 = vadd.xlane.f32.xlu1 %v297_v16  ;;  %295 = vadd.xlane.f32.xlu0 %v294_v17  ;;  %v579_v16 = vsel %vm221_vm0, %v212_v10, 0.0  ;;  %v576_v17 = vsel %vm221_vm0, %v211_v11, 0.0  ;;  %v182_v10 = vld [vmem:[#allocation3 + $0x2c8] sm:$0xff]  ;;  %v181_v11 = vld [vmem:[#allocation3 + $0x2c0] sm:$0xff] }
 0x110   :  { %v7820_v20 = vpop.xlane.xlu1 %436  ;;  %v7822_v21 = vpop.xlane.xlu0 %433  ;;  %v489_v18 = vsel %vm221_vm0, %v182_v10, 0.0  ;;  %v486_v19 = vsel %vm221_vm0, %v181_v11, 0.0 }
 0x113   :  { %304 = vadd.xlane.f32.xlu1 %v303_v22  ;;  %301 = vadd.xlane.f32.xlu0 %v300_v23 }
 0x114   :  { %v7826_v28 = vpop.xlane.xlu1 %514  ;;  %v7828_v29 = vpop.xlane.xlu0 %511 }
 0x117   :  { %394 = vadd.xlane.f32.xlu1 %v393_v30  ;;  %391 = vadd.xlane.f32.xlu0 %v390_v31  ;;  %v124_v30 = vld [vmem:[#allocation3 + $0xf8] sm:$0xff]  ;;  %v123_v31 = vld [vmem:[#allocation3 + $0xf0] sm:$0xff] }
 0x118   :  { %v7832_v36 = vpop.xlane.xlu1 %532  ;;  %v7834_v37 = vpop.xlane.xlu0 %529 }
 0x11b   :  { %400 = vadd.xlane.f32.xlu1 %v399_v40  ;;  %397 = vadd.xlane.f32.xlu0 %v396_v41  ;;  %v315_v40 = vsel %vm221_vm0, %v124_v30, 0.0  ;;  %v312_v41 = vsel %vm221_vm0, %v123_v31, 0.0 }
 0x11c   :  { %v7838_v46 = vpop.xlane.xlu1 %232  ;;  %v7840_v47 = vpop.xlane.xlu0 %229 }
 0x11f   :  { %478 = vadd.xlane.f32.xlu1 %v477_v48  ;;  %475 = vadd.xlane.f32.xlu0 %v474_v49 }
 0x120   :  { %v7844_v54 = vpop.xlane.xlu1 %238  ;;  %v7846_v55 = vpop.xlane.xlu0 %235 }
 0x123   :  { %484 = vadd.xlane.f32.xlu1 %v483_v58  ;;  %481 = vadd.xlane.f32.xlu0 %v480_v59  ;;  %v156_v58 = vld [vmem:[#allocation3 + $0x1f8] sm:$0xff]  ;;  %v155_v59 = vld [vmem:[#allocation3 + $0x1f0] sm:$0xff] }
 0x124   :  { %v7850_v3 = vpop.xlane.xlu1 %262  ;;  %v7852_v4 = vpop.xlane.xlu0 %259 }
 0x127   :  { %574 = vadd.xlane.f32.xlu1 %v573_v6  ;;  %571 = vadd.xlane.f32.xlu0 %v570_v7  ;;  %v411_v6 = vsel %vm221_vm0, %v156_v58, 0.0  ;;  %v408_v7 = vsel %vm221_vm0, %v155_v59, 0.0  ;;  %v585_v58 = vsel %vm221_vm0, %v214_v42, 0.0  ;;  %v582_v59 = vsel %vm221_vm0, %v213_v43, 0.0 }
 0x128   :  { %v7856_v12 = vpop.xlane.xlu1 %268  ;;  %v7858_v13 = vpop.xlane.xlu0 %265 }
 0x12b   :  { %580 = vadd.xlane.f32.xlu1 %v579_v16  ;;  %577 = vadd.xlane.f32.xlu0 %v576_v17 }
 0x12c   :  { %v7862_v22 = vpop.xlane.xlu1 %328  ;;  %v7864_v23 = vpop.xlane.xlu0 %325 }
 0x12f   :  { %310 = vadd.xlane.f32.xlu1 %v309_v24  ;;  %307 = vadd.xlane.f32.xlu0 %v306_v25  ;;  %v184_v24 = vld [vmem:[#allocation3 + $0x2d8] sm:$0xff]  ;;  %v183_v25 = vld [vmem:[#allocation3 + $0x2d0] sm:$0xff] }
 0x130   :  { %v7868_v34 = vpop.xlane.xlu1 %334  ;;  %v7870_v35 = vpop.xlane.xlu0 %331 }
 0x133   :  { %316 = vadd.xlane.f32.xlu1 %v315_v40  ;;  %313 = vadd.xlane.f32.xlu0 %v312_v41  ;;  %v495_v40 = vsel %vm221_vm0, %v184_v24, 0.0  ;;  %v492_v41 = vsel %vm221_vm0, %v183_v25, 0.0  ;;  %v186_v24 = vld [vmem:[#allocation3 + $0x2e8] sm:$0xff]  ;;  %v185_v25 = vld [vmem:[#allocation3 + $0x2e0] sm:$0xff] }
 0x134   :  { %v7874_v48 = vpop.xlane.xlu1 %358  ;;  %v7876_v49 = vpop.xlane.xlu0 %355  ;;  %v501_v42 = vsel %vm221_vm0, %v186_v24, 0.0  ;;  %v498_v43 = vsel %vm221_vm0, %v185_v25, 0.0  ;;  %v608_v24 = vmul.f32 0.0625, %v7774_v33 }
 0x136   :  { %v7936_v33 = vsub.f32 %v7692_v5, %v608_v24 }
 0x137   :  { %406 = vadd.xlane.f32.xlu1 %v405_v52  ;;  %403 = vadd.xlane.f32.xlu0 %v402_v53 }
 0x138   :  { %v7880_v60 = vpop.xlane.xlu1 %364  ;;  %v7882_v61 = vpop.xlane.xlu0 %361  ;;  %12382 = vst [vmem:[#allocation24_spill] sm:$0xff] %v7936_v33 }
 0x13b   :  { %412 = vadd.xlane.f32.xlu1 %v411_v6  ;;  %409 = vadd.xlane.f32.xlu0 %v408_v7  ;;  %v216_v6 = vld [vmem:[#allocation3 + $0x3d8] sm:$0xff]  ;;  %v215_v7 = vld [vmem:[#allocation3 + $0x3d0] sm:$0xff] }
 0x13c   :  { %v7886_v16 = vpop.xlane.xlu1 %442  ;;  %v7888_v17 = vpop.xlane.xlu0 %439 }
 0x13f   :  { %490 = vadd.xlane.f32.xlu1 %v489_v18  ;;  %487 = vadd.xlane.f32.xlu0 %v486_v19  ;;  %v591_v18 = vsel %vm221_vm0, %v216_v6, 0.0  ;;  %v588_v19 = vsel %vm221_vm0, %v215_v7, 0.0 }
 0x140   :  { %v7892_v30 = vpop.xlane.xlu1 %448  ;;  %v7894_v31 = vpop.xlane.xlu0 %445 }
 0x143   :  { %496 = vadd.xlane.f32.xlu1 %v495_v40  ;;  %493 = vadd.xlane.f32.xlu0 %v492_v41 }
 0x144   :  { %v7898_v52 = vpop.xlane.xlu1 %538  ;;  %v7900_v53 = vpop.xlane.xlu0 %535 }
 0x147   :  { %586 = vadd.xlane.f32.xlu1 %v585_v58  ;;  %583 = vadd.xlane.f32.xlu0 %v582_v59  ;;  %v188_v58 = vld [vmem:[#allocation3 + $0x2f8] sm:$0xff]  ;;  %v187_v59 = vld [vmem:[#allocation3 + $0x2f0] sm:$0xff] }
 0x148   :  { %v7904_v10 = vpop.xlane.xlu1 %544  ;;  %v7906_v11 = vpop.xlane.xlu0 %541  ;;  %v507_v7 = vsel %vm221_vm0, %v188_v58, 0.0  ;;  %v613_v58 = vmul.f32 0.0625, %v7766_v26 }
 0x149   :  { %12375 = vst [vmem:[#allocation17_spill] sm:$0xff] %v7904_v10  ;;  %12376 = vst [vmem:[#allocation18_spill] sm:$0xff] %v7906_v11  ;;  %v219_v10 = vld [vmem:[#allocation3 + $0x3f0] sm:$0xff] }
 0x14a   :  { %v600_v26 = vsel %vm221_vm0, %v219_v10, 0.0 }
 0x14b   :  { %592 = vadd.xlane.f32.xlu1 %v591_v18  ;;  %589 = vadd.xlane.f32.xlu0 %v588_v19  ;;  %v504_v18 = vsel %vm221_vm0, %v187_v59, 0.0  ;;  %v607_v19 = vmul.f32 0.0625, %v7768_v27  ;;  %v614_v27 = vmul.f32 0.0625, %v7772_v32 }
 0x14c   :  { %v7910_v40 = vpop.xlane.xlu1 %274  ;;  %v7912_v41 = vpop.xlane.xlu0 %271 }
 0x14d   :  { %12377 = vst [vmem:[#allocation19_spill] sm:$0xff] %v7910_v40  ;;  %12378 = vst [vmem:[#allocation20_spill] sm:$0xff] %v7912_v41  ;;  %v218_v40 = vld [vmem:[#allocation3 + $0x3e8] sm:$0xff]  ;;  %v217_v41 = vld [vmem:[#allocation3 + $0x3e0] sm:$0xff]  ;;  %v7932_v59 = vsub.f32 %v7684_v1, %v607_v19  ;;  %v7945_v1 = vsub.f32 %v7682_v0, %v613_v58  ;;  %v7948_v32 = vsub.f32 %v7686_v2, %v614_v27  ;;  %v646_v0 = vmul.f32 0.0625, %v7784_v44 }
 0x14e   :  { %v864_v19 = vmul.f32 %v7936_v33, %v7936_v33  ;;  %v7302_v58 = vld [vmem:[#allocation3 + $0x100] sm:$0xff] }
 0x14f   :  { %502 = vadd.xlane.f32.xlu1 %v501_v42  ;;  %499 = vadd.xlane.f32.xlu0 %v498_v43  ;;  %v597_v43 = vsel %vm221_vm0, %v218_v40, 0.0  ;;  %12381 = vst [vmem:[#allocation23_spill] sm:$0xff] %v7932_v59  ;;  %12383 = vst [vmem:[#allocation25_spill] sm:$0xff] %v7945_v1  ;;  %v863_v5 = vmul.f32 %v7932_v59, %v7932_v59  ;;  %v870_v24 = vmul.f32 %v7948_v32, %v7948_v32 }
 0x150   :  { %v7916_v11 = vpop.xlane.xlu1 %280  ;;  %v7918_v6 = vpop.xlane.xlu0 %277  ;;  %12384 = vst [vmem:[#allocation26_spill] sm:$0xff] %v7948_v32  ;;  %v7303_v32 = vld [vmem:[#allocation3 + $0x138] sm:$0xff] }
 0x151   :  { %12379 = vst [vmem:[#allocation21_spill] sm:$0xff] %v7916_v11  ;;  %12380 = vst [vmem:[#allocation22_spill] sm:$0xff] %v7918_v6  ;;  %v594_v6 = vsel %vm221_vm0, %v217_v41, 0.0  ;;  %v220_v11 = vld [vmem:[#allocation3 + $0x3f8] sm:$0xff]  ;;  %v640_v41 = vmul.f32 0.0625, %v7778_v38  ;;  %v991_v2 = vsel %vm221_vm0, %v863_v5, 0.0  ;;  %v869_v38 = vmul.f32 %v7945_v1, %v7945_v1 }
 0x152   :  { %v603_v40 = vsel %vm221_vm0, %v220_v11, 0.0  ;;  %v7976_v59 = vsub.f32 %v7303_v32, %v646_v0  ;;  %v616_v1 = vmul.f32 0.0625, %v7790_v50  ;;  %v7305_v0 = vld [vmem:[#allocation3 + $0x48] sm:$0xff] }
 0x153   :  { %508 = vadd.xlane.f32.xlu1 %v507_v7  ;;  %505 = vadd.xlane.f32.xlu0 %v504_v18 }
 0x154   :  { %v7924_v25 = vpop.xlane.xlu1 %370  ;;  %v7926_v42 = vpop.xlane.xlu0 %367  ;;  %12387 = vst [vmem:[#allocation29_spill] sm:$0xff] %v7976_v59 }
 0x157   :  { %598 = vadd.xlane.f32.xlu1 %v597_v43  ;;  %595 = vadd.xlane.f32.xlu0 %v594_v6  ;;  %v639_v6 = vmul.f32 0.0625, %v7780_v39  ;;  %v7301_v39 = vld [vmem:[#allocation3 + $0x108] sm:$0xff] }
 0x158   :  { %v7938_v7 = vpop.xlane.xlu1 %376  ;;  %v7940_v18 = vpop.xlane.xlu0 %373  ;;  %v7966_v43 = vsub.f32 %v7301_v39, %v640_v41  ;;  %v1012_v41 = vsel %vm221_vm0, %v870_v24, 0.0  ;;  %v7304_v39 = vld [vmem:[#allocation3 + $0x130] sm:$0xff]  ;;  %v7992_v24 = vsub.f32 %v7305_v0, %v616_v1 }
 0x159   :  { %v7968_v27 = vsub.f32 %v7302_v58, %v639_v6  ;;  %v1009_v6 = vsel %vm221_vm0, %v869_v38, 0.0  ;;  %v618_v38 = vmul.f32 0.0625, %v7796_v56 }
 0x15a   :  { %12385 = vst [vmem:[#allocation27_spill] sm:$0xff] %v7966_v43  ;;  %12389 = vst [vmem:[#allocation31_spill] sm:$0xff] %v7992_v24 }
 0x15b   :  { %604 = vadd.xlane.f32.xlu1 %v603_v40  ;;  %601 = vadd.xlane.f32.xlu0 %v600_v26  ;;  %12386 = vst [vmem:[#allocation28_spill] sm:$0xff] %v7968_v27  ;;  %v645_v40 = vmul.f32 0.0625, %v7786_v45  ;;  %v994_v26 = vsel %vm221_vm0, %v864_v19, 0.0  ;;  %v615_v45 = vmul.f32 0.0625, %v7792_v51  ;;  %v896_v19 = vmul.f32 %v7966_v43, %v7966_v43 }
 0x15c   :  { %v7956_v11 = vpop.xlane.xlu1 %424  ;;  %v7958_v10 = vpop.xlane.xlu0 %421  ;;  %v902_v51 = vmul.f32 %v7976_v59, %v7976_v59  ;;  %v7308_v59 = vld [vmem:[#allocation3 + $0x50] sm:$0xff] }
 0x15d   :  { %v7981_v58 = vsub.f32 %v7304_v39, %v645_v40  ;;  %v617_v40 = vmul.f32 0.0625, %v7798_v57  ;;  %v7307_v57 = vld [vmem:[#allocation3 + $0x58] sm:$0xff] }
 0x15e   :  { %v8008_v0 = vsub.f32 %v7307_v57, %v618_v38 }
 0x15f   :  { %995 = vadd.xlane.f32.xlu1 %v994_v26  ;;  %992 = vadd.xlane.f32.xlu0 %v991_v2  ;;  %12388 = vst [vmem:[#allocation30_spill] sm:$0xff] %v7981_v58  ;;  %v895_v2 = vmul.f32 %v7968_v27, %v7968_v27  ;;  %v7306_v26 = vld [vmem:[#allocation3 + $0x40] sm:$0xff]  ;;  %v901_v27 = vmul.f32 %v7981_v58, %v7981_v58 }
 0x160   :  { %v7972_v44 = vpop.xlane.xlu1 %430  ;;  %v7974_v5 = vpop.xlane.xlu0 %427  ;;  %v7998_v39 = vsub.f32 %v7306_v26, %v615_v45  ;;  %12391 = vst [vmem:[#allocation33_spill] sm:$0xff] %v8008_v0  ;;  %v8010_v43 = vsub.f32 %v7308_v59, %v617_v40  ;;  %v1108_v45 = vsel %vm221_vm0, %v902_v51, 0.0  ;;  %v647_v26 = vmul.f32 0.0625, %v7804_v63 }
 0x161   :  { %v650_v40 = vmul.f32 0.0625, %v7808_v8 }
 0x162   :  { %12390 = vst [vmem:[#allocation32_spill] sm:$0xff] %v7998_v39  ;;  %12392 = vst [vmem:[#allocation34_spill] sm:$0xff] %v8010_v43  ;;  %v873_v63 = vmul.f32 %v8010_v43, %v8010_v43  ;;  %v672_v43 = vmul.f32 0.0625, %v7814_v14 }
 0x163   :  { %1013 = vadd.xlane.f32.xlu1 %v1012_v41  ;;  %1010 = vadd.xlane.f32.xlu0 %v1009_v6  ;;  %v1090_v41 = vsel %vm221_vm0, %v896_v19, 0.0  ;;  %v1087_v6 = vsel %vm221_vm0, %v895_v2, 0.0  ;;  %v872_v19 = vmul.f32 %v7992_v24, %v7992_v24  ;;  %v648_v2 = vmul.f32 0.0625, %v7802_v62 }
 0x164   :  { %v7988_v32 = vpop.xlane.xlu1 %454  ;;  %v7990_v50 = vpop.xlane.xlu0 %451  ;;  %v874_v62 = vmul.f32 %v8008_v0, %v8008_v0  ;;  %v7311_v0 = vld [vmem:[#allocation3 + $0x158] sm:$0xff] }
 0x165   :  { %v1018_v51 = vsel %vm221_vm0, %v872_v19, 0.0  ;;  %v8040_v58 = vsub.f32 %v7311_v0, %v650_v40  ;;  %v7313_v40 = vld [vmem:[#allocation3 + $0x208] sm:$0xff] }
 0x167   :  { %1091 = vadd.xlane.f32.xlu1 %v1090_v41  ;;  %1088 = vadd.xlane.f32.xlu0 %v1087_v6  ;;  %v1105_v41 = vsel %vm221_vm0, %v901_v27, 0.0  ;;  %v871_v6 = vmul.f32 %v7998_v39, %v7998_v39  ;;  %v7309_v27 = vld [vmem:[#allocation3 + $0x148] sm:$0xff]  ;;  %v7310_v39 = vld [vmem:[#allocation3 + $0x140] sm:$0xff]  ;;  %12395 = vst [vmem:[#allocation37_spill] sm:$0xff] %v8040_v58 }
 0x168   :  { %v8004_v1 = vpop.xlane.xlu1 %460  ;;  %v8006_v56 = vpop.xlane.xlu0 %457  ;;  %v8030_v57 = vsub.f32 %v7309_v27, %v648_v2  ;;  %v1024_v2 = vsel %vm221_vm0, %v874_v62, 0.0  ;;  %v678_v62 = vmul.f32 0.0625, %v7820_v20 }
 0x169   :  { %v1015_v24 = vsel %vm221_vm0, %v871_v6, 0.0 }
 0x16a   :  { %12393 = vst [vmem:[#allocation35_spill] sm:$0xff] %v8030_v57 }
 0x16b   :  { %1109 = vadd.xlane.f32.xlu1 %v1108_v45  ;;  %1106 = vadd.xlane.f32.xlu0 %v1105_v41  ;;  %v8032_v45 = vsub.f32 %v7310_v39, %v647_v26  ;;  %v649_v41 = vmul.f32 0.0625, %v7810_v9  ;;  %v1021_v39 = vsel %vm221_vm0, %v873_v63, 0.0  ;;  %v7312_v26 = vld [vmem:[#allocation3 + $0x150] sm:$0xff]  ;;  %v671_v9 = vmul.f32 0.0625, %v7816_v15 }
 0x16c   :  { %v8020_v38 = vpop.xlane.xlu1 %520  ;;  %v8022_v59 = vpop.xlane.xlu0 %517  ;;  %v677_v63 = vmul.f32 0.0625, %v7822_v21  ;;  %v906_v15 = vmul.f32 %v8040_v58, %v8040_v58  ;;  %v7315_v21 = vld [vmem:[#allocation3 + $0x238] sm:$0xff]  ;;  %v7316_v58 = vld [vmem:[#allocation3 + $0x230] sm:$0xff] }
 0x16d   :  { %12394 = vst [vmem:[#allocation36_spill] sm:$0xff] %v8032_v45  ;;  %v8045_v27 = vsub.f32 %v7312_v26, %v649_v41  ;;  %v903_v6 = vmul.f32 %v8032_v45, %v8032_v45  ;;  %v7314_v41 = vld [vmem:[#allocation3 + $0x200] sm:$0xff] }
 0x16e   :  { %v8062_v26 = vsub.f32 %v7314_v41, %v671_v9  ;;  %v1120_v9 = vsel %vm221_vm0, %v906_v15, 0.0  ;;  %v703_v41 = vmul.f32 0.0625, %v7828_v29 }
 0x16f   :  { %1019 = vadd.xlane.f32.xlu1 %v1018_v51  ;;  %1016 = vadd.xlane.f32.xlu0 %v1015_v24  ;;  %12396 = vst [vmem:[#allocation38_spill] sm:$0xff] %v8045_v27  ;;  %v904_v24 = vmul.f32 %v8030_v57, %v8030_v57  ;;  %v8056_v51 = vsub.f32 %v7313_v40, %v672_v43 }
 0x170   :  { %v8036_v8 = vpop.xlane.xlu1 %526  ;;  %v8038_v19 = vpop.xlane.xlu0 %523  ;;  %12398 = vst [vmem:[#allocation40_spill] sm:$0xff] %v8062_v26  ;;  %v905_v45 = vmul.f32 %v8045_v27, %v8045_v27  ;;  %v8072_v40 = vsub.f32 %v7315_v21, %v678_v62  ;;  %v8074_v57 = vsub.f32 %v7316_v58, %v677_v63  ;;  %v710_v63 = vmul.f32 0.0625, %v7832_v36 }
 0x171   :  { %12397 = vst [vmem:[#allocation39_spill] sm:$0xff] %v8056_v51 }
 0x172   :  { %12399 = vst [vmem:[#allocation41_spill] sm:$0xff] %v8072_v40  ;;  %12400 = vst [vmem:[#allocation42_spill] sm:$0xff] %v8074_v57  ;;  %v933_v29 = vmul.f32 %v8074_v57, %v8074_v57  ;;  %v610_v57 = vmul.f32 0.0625, %v7838_v46 }
 0x173   :  { %1025 = vadd.xlane.f32.xlu1 %v1024_v2  ;;  %1022 = vadd.xlane.f32.xlu0 %v1021_v39  ;;  %v1114_v2 = vsel %vm221_vm0, %v904_v24, 0.0  ;;  %v1111_v39 = vsel %vm221_vm0, %v903_v6, 0.0  ;;  %v928_v24 = vmul.f32 %v8056_v51, %v8056_v51  ;;  %v704_v6 = vmul.f32 0.0625, %v7826_v28 }
 0x174   :  { %v8052_v0 = vpop.xlane.xlu1 %550  ;;  %v8054_v14 = vpop.xlane.xlu0 %547  ;;  %v934_v28 = vmul.f32 %v8072_v40, %v8072_v40  ;;  %v7319_v40 = vld [vmem:[#allocation3 + $0x338] sm:$0xff] }
 0x175   :  { %v1186_v15 = vsel %vm221_vm0, %v928_v24, 0.0  ;;  %v8104_v27 = vsub.f32 %v7319_v40, %v710_v63  ;;  %v7321_v63 = vld [vmem:[#allocation3 + $0x18] sm:$0xff] }
 0x177   :  { %1115 = vadd.xlane.f32.xlu1 %v1114_v2  ;;  %1112 = vadd.xlane.f32.xlu0 %v1111_v39  ;;  %v1117_v2 = vsel %vm221_vm0, %v905_v45, 0.0  ;;  %v927_v39 = vmul.f32 %v8062_v26, %v8062_v26  ;;  %v7317_v45 = vld [vmem:[#allocation3 + $0x308] sm:$0xff]  ;;  %v7318_v26 = vld [vmem:[#allocation3 + $0x300] sm:$0xff]  ;;  %12403 = vst [vmem:[#allocation45_spill] sm:$0xff] %v8104_v27 }
 0x178   :  { %v8068_v43 = vpop.xlane.xlu1 %556  ;;  %v8070_v20 = vpop.xlane.xlu0 %553  ;;  %v8094_v21 = vsub.f32 %v7317_v45, %v704_v6  ;;  %v1204_v6 = vsel %vm221_vm0, %v934_v28, 0.0  ;;  %v612_v28 = vmul.f32 0.0625, %v7844_v54 }
 0x179   :  { %v1183_v51 = vsel %vm221_vm0, %v927_v39, 0.0 }
 0x17a   :  { %12401 = vst [vmem:[#allocation43_spill] sm:$0xff] %v8094_v21 }
 0x17b   :  { %1121 = vadd.xlane.f32.xlu1 %v1120_v9  ;;  %1118 = vadd.xlane.f32.xlu0 %v1117_v2  ;;  %v8096_v9 = vsub.f32 %v7318_v26, %v703_v41  ;;  %v709_v2 = vmul.f32 0.0625, %v7834_v37  ;;  %v1201_v26 = vsel %vm221_vm0, %v933_v29, 0.0  ;;  %v7320_v41 = vld [vmem:[#allocation3 + $0x330] sm:$0xff]  ;;  %v609_v37 = vmul.f32 0.0625, %v7840_v47 }
 0x17c   :  { %v8084_v62 = vpop.xlane.xlu1 %286  ;;  %v8086_v58 = vpop.xlane.xlu0 %283  ;;  %v611_v29 = vmul.f32 0.0625, %v7846_v55  ;;  %v966_v47 = vmul.f32 %v8104_v27, %v8104_v27  ;;  %v7323_v55 = vld [vmem:[#allocation3 + $0x28] sm:$0xff]  ;;  %v7324_v27 = vld [vmem:[#allocation3 + $0x20] sm:$0xff] }
 0x17d   :  { %12402 = vst [vmem:[#allocation44_spill] sm:$0xff] %v8096_v9  ;;  %v8109_v45 = vsub.f32 %v7320_v41, %v709_v2  ;;  %v959_v39 = vmul.f32 %v8096_v9, %v8096_v9  ;;  %v7322_v2 = vld [vmem:[#allocation3 + $0x10] sm:$0xff] }
 0x17e   :  { %v8126_v41 = vsub.f32 %v7322_v2, %v609_v37  ;;  %v1300_v37 = vsel %vm221_vm0, %v966_v47, 0.0  ;;  %v619_v2 = vmul.f32 0.0625, %v7852_v4 }
 0x17f   :  { %1187 = vadd.xlane.f32.xlu1 %v1186_v15  ;;  %1184 = vadd.xlane.f32.xlu0 %v1183_v51  ;;  %12404 = vst [vmem:[#allocation46_spill] sm:$0xff] %v8109_v45  ;;  %v960_v51 = vmul.f32 %v8094_v21, %v8094_v21  ;;  %v8120_v15 = vsub.f32 %v7321_v63, %v610_v57 }
 0x180   :  { %v8100_v36 = vpop.xlane.xlu1 %292  ;;  %v8102_v24 = vpop.xlane.xlu0 %289  ;;  %12406 = vst [vmem:[#allocation48_spill] sm:$0xff] %v8126_v41  ;;  %v965_v9 = vmul.f32 %v8109_v45, %v8109_v45  ;;  %v8136_v63 = vsub.f32 %v7323_v55, %v612_v28  ;;  %v8138_v21 = vsub.f32 %v7324_v27, %v611_v29  ;;  %v622_v29 = vmul.f32 0.0625, %v7856_v12 }
 0x181   :  { %12405 = vst [vmem:[#allocation47_spill] sm:$0xff] %v8120_v15 }
 0x182   :  { %12407 = vst [vmem:[#allocation49_spill] sm:$0xff] %v8136_v63  ;;  %12408 = vst [vmem:[#allocation50_spill] sm:$0xff] %v8138_v21  ;;  %v867_v4 = vmul.f32 %v8138_v21, %v8138_v21  ;;  %v642_v21 = vmul.f32 0.0625, %v7862_v22 }
 0x183   :  { %1205 = vadd.xlane.f32.xlu1 %v1204_v6  ;;  %1202 = vadd.xlane.f32.xlu0 %v1201_v26  ;;  %v1282_v6 = vsel %vm221_vm0, %v960_v51, 0.0  ;;  %v1279_v26 = vsel %vm221_vm0, %v959_v39, 0.0  ;;  %v866_v51 = vmul.f32 %v8120_v15, %v8120_v15  ;;  %v620_v39 = vmul.f32 0.0625, %v7850_v3 }
 0x184   :  { %v8116_v40 = vpop.xlane.xlu1 %382  ;;  %v8118_v46 = vpop.xlane.xlu0 %379  ;;  %v868_v3 = vmul.f32 %v8136_v63, %v8136_v63  ;;  %v7327_v63 = vld [vmem:[#allocation3 + $0x78] sm:$0xff] }
 0x185   :  { %v1000_v47 = vsel %vm221_vm0, %v866_v51, 0.0  ;;  %v8168_v45 = vsub.f32 %v7327_v63, %v622_v29  ;;  %v644_v63 = vmul.f32 0.0625, %v7868_v34 }
 0x187   :  { %1283 = vadd.xlane.f32.xlu1 %v1282_v6  ;;  %1280 = vadd.xlane.f32.xlu0 %v1279_v26  ;;  %v1297_v6 = vsel %vm221_vm0, %v965_v9, 0.0  ;;  %v865_v26 = vmul.f32 %v8126_v41, %v8126_v41  ;;  %v7325_v9 = vld [vmem:[#allocation3 + $0x68] sm:$0xff]  ;;  %v7326_v41 = vld [vmem:[#allocation3 + $0x60] sm:$0xff]  ;;  %12411 = vst [vmem:[#allocation53_spill] sm:$0xff] %v8168_v45 }
 0x188   :  { %v8132_v57 = vpop.xlane.xlu1 %388  ;;  %v8134_v54 = vpop.xlane.xlu0 %385  ;;  %v8158_v55 = vsub.f32 %v7325_v9, %v620_v39  ;;  %v1006_v39 = vsel %vm221_vm0, %v868_v3, 0.0 }
 0x189   :  { %v997_v15 = vsel %vm221_vm0, %v865_v26, 0.0 }
 0x18a   :  { %12409 = vst [vmem:[#allocation51_spill] sm:$0xff] %v8158_v55 }
 0x18b   :  { %1301 = vadd.xlane.f32.xlu1 %v1300_v37  ;;  %1298 = vadd.xlane.f32.xlu0 %v1297_v6  ;;  %v8160_v37 = vsub.f32 %v7326_v41, %v619_v2  ;;  %v621_v6 = vmul.f32 0.0625, %v7858_v13  ;;  %v1003_v41 = vsel %vm221_vm0, %v867_v4, 0.0  ;;  %v7328_v2 = vld [vmem:[#allocation3 + $0x70] sm:$0xff]  ;;  %v641_v13 = vmul.f32 0.0625, %v7864_v23 }
 0x18c   :  { %v8148_v28 = vpop.xlane.xlu1 %466  ;;  %v8150_v27 = vpop.xlane.xlu0 %463  ;;  %v643_v4 = vmul.f32 0.0625, %v7870_v35  ;;  %v878_v23 = vmul.f32 %v8168_v45, %v8168_v45  ;;  %v7332_v45 = vld [vmem:[#allocation3 + $0x120] sm:$0xff] }
 0x18d   :  { %12410 = vst [vmem:[#allocation52_spill] sm:$0xff] %v8160_v37  ;;  %v8173_v9 = vsub.f32 %v7328_v2, %v621_v6  ;;  %v875_v26 = vmul.f32 %v8160_v37, %v8160_v37  ;;  %v7330_v6 = vld [vmem:[#allocation3 + $0x110] sm:$0xff]  ;;  %v7331_v37 = vld [vmem:[#allocation3 + $0x128] sm:$0xff] }
 0x18e   :  { %v8190_v2 = vsub.f32 %v7330_v6, %v641_v13  ;;  %v1036_v13 = vsel %vm221_vm0, %v878_v23, 0.0  ;;  %v651_v6 = vmul.f32 0.0625, %v7876_v49  ;;  %v654_v23 = vmul.f32 0.0625, %v7880_v60 }
 0x18f   :  { %1001 = vadd.xlane.f32.xlu1 %v1000_v47  ;;  %998 = vadd.xlane.f32.xlu0 %v997_v15  ;;  %12412 = vst [vmem:[#allocation54_spill] sm:$0xff] %v8173_v9  ;;  %v876_v15 = vmul.f32 %v8158_v55, %v8158_v55  ;;  %v7329_v47 = vld [vmem:[#allocation3 + $0x118] sm:$0xff]  ;;  %v877_v34 = vmul.f32 %v8173_v9, %v8173_v9  ;;  %v682_v60 = vmul.f32 0.0625, %v7892_v30 }
 0x190   :  { %v8164_v12 = vpop.xlane.xlu1 %472  ;;  %v8166_v51 = vpop.xlane.xlu0 %469  ;;  %v8185_v3 = vsub.f32 %v7329_v47, %v642_v21  ;;  %12414 = vst [vmem:[#allocation56_spill] sm:$0xff] %v8190_v2  ;;  %v8196_v21 = vsub.f32 %v7331_v37, %v644_v63  ;;  %v8202_v55 = vsub.f32 %v7332_v45, %v643_v4  ;;  %v897_v37 = vmul.f32 %v8190_v2, %v8190_v2  ;;  %v12424_v30 = vld [vmem:[#allocation17_spill] sm:$0xff] }
 0x192   :  { %12413 = vst [vmem:[#allocation55_spill] sm:$0xff] %v8185_v3  ;;  %12415 = vst [vmem:[#allocation57_spill] sm:$0xff] %v8196_v21  ;;  %v900_v4 = vmul.f32 %v8196_v21, %v8196_v21  ;;  %v1093_v9 = vsel %vm221_vm0, %v897_v37, 0.0  ;;  %v679_v21 = vmul.f32 0.0625, %v7888_v17  ;;  %v7336_v17 = vld [vmem:[#allocation3 + $0x170] sm:$0xff] }
 0x193   :  { %1007 = vadd.xlane.f32.xlu1 %v1006_v39  ;;  %1004 = vadd.xlane.f32.xlu0 %v1003_v41  ;;  %v1030_v39 = vsel %vm221_vm0, %v876_v15, 0.0  ;;  %v1027_v41 = vsel %vm221_vm0, %v875_v26, 0.0  ;;  %12416 = vst [vmem:[#allocation58_spill] sm:$0xff] %v8202_v55  ;;  %v898_v15 = vmul.f32 %v8185_v3, %v8185_v3  ;;  %v652_v26 = vmul.f32 0.0625, %v7874_v48 }
 0x194   :  { %v8181_v22 = vpop.xlane.xlu1 %562  ;;  %v8183_v29 = vpop.xlane.xlu0 %559  ;;  %v653_v48 = vmul.f32 0.0625, %v7882_v61  ;;  %v680_v3 = vmul.f32 0.0625, %v7886_v16  ;;  %v681_v61 = vmul.f32 0.0625, %v7894_v31  ;;  %v1102_v16 = vsel %vm221_vm0, %v900_v4, 0.0 }
 0x195   :  { %v1096_v49 = vsel %vm221_vm0, %v898_v15, 0.0  ;;  %v712_v15 = vmul.f32 0.0625, %v7898_v52  ;;  %v714_v31 = vmul.f32 0.0625, %v12424_v30  ;;  %v7340_v30 = vld [vmem:[#allocation3 + $0x250] sm:$0xff] }
 0x197   :  { %1031 = vadd.xlane.f32.xlu1 %v1030_v39  ;;  %1028 = vadd.xlane.f32.xlu0 %v1027_v41  ;;  %v1033_v39 = vsel %vm221_vm0, %v877_v34, 0.0  ;;  %v899_v41 = vmul.f32 %v8202_v55, %v8202_v55  ;;  %v7333_v34 = vld [vmem:[#allocation3 + $0x168] sm:$0xff]  ;;  %v8241_v55 = vsub.f32 %v7336_v17, %v653_v48  ;;  %v7339_v48 = vld [vmem:[#allocation3 + $0x258] sm:$0xff] }
 0x198   :  { %v8198_v47 = vpop.xlane.xlu1 %568  ;;  %v8200_v35 = vpop.xlane.xlu0 %565  ;;  %v8223_v2 = vsub.f32 %v7333_v34, %v652_v26  ;;  %v711_v26 = vmul.f32 0.0625, %v7900_v53  ;;  %v12426_v53 = vld [vmem:[#allocation18_spill] sm:$0xff]  ;;  %v8254_v17 = vsub.f32 %v7339_v48, %v682_v60 }
 0x199   :  { %12423 = vst [vmem:[#allocation65_spill] sm:$0xff] %v8241_v55  ;;  %v713_v33 = vmul.f32 0.0625, %v12426_v53 }
 0x19a   :  { %12418 = vst [vmem:[#allocation60_spill] sm:$0xff] %v8223_v2  ;;  %12428 = vst [vmem:[#allocation66_spill] sm:$0xff] %v8254_v17 }
 0x19b   :  { %1037 = vadd.xlane.f32.xlu1 %v1036_v13  ;;  %1034 = vadd.xlane.f32.xlu0 %v1033_v39  ;;  %v7334_v13 = vld [vmem:[#allocation3 + $0x160] sm:$0xff] }
 0x19c   :  { %v8212_v63 = vpop.xlane.xlu1 %298  ;;  %v8214_v45 = vpop.xlane.xlu0 %295  ;;  %v8225_v39 = vsub.f32 %v7334_v13, %v651_v6  ;;  %v7335_v13 = vld [vmem:[#allocation3 + $0x178] sm:$0xff] }
 0x19d   :  { %12417 = vst [vmem:[#allocation59_spill] sm:$0xff] %v8214_v45  ;;  %v8239_v37 = vsub.f32 %v7335_v13, %v654_v23  ;;  %v7338_v23 = vld [vmem:[#allocation3 + $0x240] sm:$0xff] }
 0x19e   :  { %12419 = vst [vmem:[#allocation61_spill] sm:$0xff] %v8225_v39  ;;  %v907_v4 = vmul.f32 %v8225_v39, %v8225_v39  ;;  %v8252_v13 = vsub.f32 %v7338_v23, %v679_v21  ;;  %v7343_v23 = vld [vmem:[#allocation3 + $0x358] sm:$0xff] }
 0x19f   :  { %1097 = vadd.xlane.f32.xlu1 %v1096_v49  ;;  %1094 = vadd.xlane.f32.xlu0 %v1093_v9  ;;  %12422 = vst [vmem:[#allocation64_spill] sm:$0xff] %v8239_v37  ;;  %v1099_v9 = vsel %vm221_vm0, %v899_v41, 0.0  ;;  %v7337_v49 = vld [vmem:[#allocation3 + $0x248] sm:$0xff]  ;;  %v8267_v60 = vsub.f32 %v7343_v23, %v714_v31 }
 0x1a0   :  { %v8234_v34 = vpop.xlane.xlu1 %304  ;;  %v8236_v6 = vpop.xlane.xlu0 %301  ;;  %v8245_v52 = vsub.f32 %v7337_v49, %v680_v3  ;;  %12427 = vst [vmem:[#allocation18_spill] sm:$0xff] %v8252_v13  ;;  %v7341_v3 = vld [vmem:[#allocation3 + $0x348] sm:$0xff]  ;;  %v7342_v49 = vld [vmem:[#allocation3 + $0x340] sm:$0xff]  ;;  %v935_v31 = vmul.f32 %v8252_v13, %v8252_v13  ;;  %v12438_v13 = vld [vmem:[#allocation21_spill] sm:$0xff] }
 0x1a1   :  { %12420 = vst [vmem:[#allocation62_spill] sm:$0xff] %v8234_v34  ;;  %12421 = vst [vmem:[#allocation63_spill] sm:$0xff] %v8236_v6  ;;  %v908_v6 = vmul.f32 %v8223_v2, %v8223_v2  ;;  %v8256_v34 = vsub.f32 %v7340_v30, %v681_v61  ;;  %v8258_v41 = vsub.f32 %v7341_v3, %v712_v15  ;;  %v12432_v2 = vld [vmem:[#allocation19_spill] sm:$0xff]  ;;  %v7344_v15 = vld [vmem:[#allocation3 + $0x350] sm:$0xff] }
 0x1a2   :  { %12425 = vst [vmem:[#allocation17_spill] sm:$0xff] %v8245_v52  ;;  %v8260_v53 = vsub.f32 %v7342_v49, %v711_v26  ;;  %v624_v45 = vmul.f32 0.0625, %v12432_v2  ;;  %12433 = vst [vmem:[#allocation19_spill] sm:$0xff] %v8267_v60  ;;  %v910_v61 = vmul.f32 %v8239_v37, %v8239_v37  ;;  %v1123_v2 = vsel %vm221_vm0, %v907_v4, 0.0  ;;  %v12435_v30 = vld [vmem:[#allocation20_spill] sm:$0xff] }
 0x1a3   :  { %12429 = vst [vmem:[#allocation67_spill] sm:$0xff] %v8256_v34  ;;  %1103 = vadd.xlane.f32.xlu1 %v1102_v16  ;;  %1100 = vadd.xlane.f32.xlu0 %v1099_v9  ;;  %12430 = vst [vmem:[#allocation68_spill] sm:$0xff] %v8258_v41  ;;  %v909_v16 = vmul.f32 %v8241_v55, %v8241_v55  ;;  %v8273_v9 = vsub.f32 %v7344_v15, %v713_v33  ;;  %v1126_v26 = vsel %vm221_vm0, %v908_v6, 0.0  ;;  %v7345_v23 = vld [vmem:[#allocation3 + $0x88] sm:$0xff] }
 0x1a4   :  { %12431 = vst [vmem:[#allocation69_spill] sm:$0xff] %v8260_v53  ;;  %v8263_v39 = vpop.xlane.xlu1 %394  ;;  %v8265_v21 = vpop.xlane.xlu0 %391  ;;  %v936_v48 = vmul.f32 %v8245_v52, %v8245_v52  ;;  %v623_v3 = vmul.f32 0.0625, %v12435_v30  ;;  %v938_v49 = vmul.f32 %v8254_v17, %v8254_v17  ;;  %v937_v33 = vmul.f32 %v8256_v34, %v8256_v34 }
 0x1a5   :  { %12434 = vst [vmem:[#allocation70_spill] sm:$0xff] %v8273_v9  ;;  %v8286_v6 = vsub.f32 %v7345_v23, %v624_v45  ;;  %v1132_v30 = vsel %vm221_vm0, %v910_v61, 0.0  ;;  %v1129_v17 = vsel %vm221_vm0, %v909_v16, 0.0  ;;  %v970_v34 = vmul.f32 %v8267_v60, %v8267_v60  ;;  %v12439_v23 = vld [vmem:[#allocation22_spill] sm:$0xff] }
 0x1a6   :  { %v626_v45 = vmul.f32 0.0625, %v12438_v13  ;;  %v625_v52 = vmul.f32 0.0625, %v12439_v23  ;;  %v1210_v55 = vsel %vm221_vm0, %v936_v48, 0.0  ;;  %v969_v37 = vmul.f32 %v8273_v9, %v8273_v9 }
 0x1a7   :  { %1127 = vadd.xlane.f32.xlu1 %v1126_v26  ;;  %1124 = vadd.xlane.f32.xlu0 %v1123_v2  ;;  %12436 = vst [vmem:[#allocation20_spill] sm:$0xff] %v8286_v6  ;;  %v968_v26 = vmul.f32 %v8258_v41, %v8258_v41  ;;  %v967_v2 = vmul.f32 %v8260_v53, %v8260_v53  ;;  %v7346_v41 = vld [vmem:[#allocation3 + $0x80] sm:$0xff]  ;;  %v1207_v61 = vsel %vm221_vm0, %v935_v31, 0.0  ;;  %v1216_v16 = vsel %vm221_vm0, %v938_v49, 0.0 }
 0x1a8   :  { %v8288_v4 = vpop.xlane.xlu1 %400  ;;  %v8290_v15 = vpop.xlane.xlu0 %397  ;;  %v1213_v60 = vsel %vm221_vm0, %v937_v33, 0.0  ;;  %v656_v13 = vmul.f32 0.0625, %v7924_v25  ;;  %v658_v31 = vmul.f32 0.0625, %v7938_v7  ;;  %v657_v49 = vmul.f32 0.0625, %v7940_v18  ;;  %v7347_v33 = vld [vmem:[#allocation3 + $0x98] sm:$0xff] }
 0x1a9   :  { %12437 = vst [vmem:[#allocation71_spill] sm:$0xff] %v8290_v15  ;;  %v8305_v15 = vsub.f32 %v7346_v41, %v623_v3  ;;  %v8316_v48 = vsel %vm221_vm0, %v968_v26, 0.0  ;;  %v8319_v41 = vsel %vm221_vm0, %v967_v2, 0.0  ;;  %v655_v3 = vmul.f32 0.0625, %v7926_v42  ;;  %v7348_v26 = vld [vmem:[#allocation3 + $0x90] sm:$0xff] }
 0x1aa   :  { %v8327_v25 = vsel %vm221_vm0, %v970_v34, 0.0  ;;  %v8331_v9 = vsub.f32 %v7348_v26, %v625_v52  ;;  %v674_v2 = vmul.f32 0.0625, %v7956_v11  ;;  %v673_v42 = vmul.f32 0.0625, %v7958_v10 }
 0x1ab   :  { %12440 = vst [vmem:[#allocation21_spill] sm:$0xff] %v8305_v15  ;;  %1133 = vadd.xlane.f32.xlu1 %v1132_v30  ;;  %1130 = vadd.xlane.f32.xlu0 %v1129_v17  ;;  %v880_v17 = vmul.f32 %v8286_v6, %v8286_v6  ;;  %v8329_v30 = vsub.f32 %v7347_v33, %v626_v45  ;;  %v676_v7 = vmul.f32 0.0625, %v7972_v44  ;;  %v675_v18 = vmul.f32 0.0625, %v7974_v5  ;;  %v7349_v45 = vld [vmem:[#allocation3 + $0x188] sm:$0xff]  ;;  %v7350_v44 = vld [vmem:[#allocation3 + $0x180] sm:$0xff] }
 0x1ac   :  { %v8311_v53 = vpop.xlane.xlu1 %478  ;;  %v8313_v23 = vpop.xlane.xlu0 %475  ;;  %12443 = vst [vmem:[#allocation73_spill] sm:$0xff] %v8331_v9  ;;  %v879_v34 = vmul.f32 %v8305_v15, %v8305_v15  ;;  %v8342_v33 = vsub.f32 %v7349_v45, %v656_v13  ;;  %v684_v52 = vmul.f32 0.0625, %v7988_v32  ;;  %v683_v11 = vmul.f32 0.0625, %v7990_v50  ;;  %v7352_v15 = vld [vmem:[#allocation3 + $0x190] sm:$0xff]  ;;  %v7353_v45 = vld [vmem:[#allocation3 + $0x218] sm:$0xff] }
 0x1ad   :  { %12441 = vst [vmem:[#allocation22_spill] sm:$0xff] %v8313_v23  ;;  %12442 = vst [vmem:[#allocation72_spill] sm:$0xff] %v8329_v30  ;;  %v8335_v23 = vsel %vm221_vm0, %v969_v37, 0.0  ;;  %v8351_v10 = vsel %vm221_vm0, %v880_v17, 0.0  ;;  %v8353_v5 = vsub.f32 %v7350_v44, %v655_v3  ;;  %v8357_v13 = vsub.f32 %v7352_v15, %v657_v49  ;;  %v7354_v44 = vld [vmem:[#allocation3 + $0x210] sm:$0xff]  ;;  %v7356_v15 = vld [vmem:[#allocation3 + $0x220] sm:$0xff] }
 0x1ae   :  { %12444 = vst [vmem:[#allocation74_spill] sm:$0xff] %v8342_v33  ;;  %v686_v32 = vmul.f32 0.0625, %v8004_v1  ;;  %v8360_v50 = vsub.f32 %v7353_v45, %v674_v2  ;;  %v685_v6 = vmul.f32 0.0625, %v8006_v56  ;;  %v882_v17 = vmul.f32 %v8329_v30, %v8329_v30  ;;  %v7357_v56 = vld [vmem:[#allocation3 + $0x268] sm:$0xff]  ;;  %v7358_v45 = vld [vmem:[#allocation3 + $0x260] sm:$0xff] }
 0x1af   :  { %1211 = vadd.xlane.f32.xlu1 %v1210_v55  ;;  %1208 = vadd.xlane.f32.xlu0 %v1207_v61  ;;  %12446 = vst [vmem:[#allocation76_spill] sm:$0xff] %v8353_v5  ;;  %v7351_v55 = vld [vmem:[#allocation3 + $0x198] sm:$0xff]  ;;  %12448 = vst [vmem:[#allocation78_spill] sm:$0xff] %v8357_v13  ;;  %v881_v3 = vmul.f32 %v8331_v9, %v8331_v9  ;;  %v8371_v49 = vsub.f32 %v7356_v15, %v675_v18  ;;  %v8374_v1 = vsel %vm221_vm0, %v879_v34, 0.0 }
 0x1b0   :  { %v8346_v37 = vpop.xlane.xlu1 %484  ;;  %v8348_v26 = vpop.xlane.xlu0 %481  ;;  %v8355_v61 = vsub.f32 %v7351_v55, %v658_v31  ;;  %12449 = vst [vmem:[#allocation79_spill] sm:$0xff] %v8360_v50  ;;  %v7355_v31 = vld [vmem:[#allocation3 + $0x228] sm:$0xff]  ;;  %v8376_v2 = vsub.f32 %v7357_v56, %v684_v52  ;;  %v8378_v30 = vsub.f32 %v7358_v45, %v683_v11  ;;  %v912_v18 = vmul.f32 %v8342_v33, %v8342_v33 }
 0x1b1   :  { %12445 = vst [vmem:[#allocation75_spill] sm:$0xff] %v8348_v26  ;;  %v8367_v26 = vsub.f32 %v7354_v44, %v673_v42  ;;  %v8369_v55 = vsub.f32 %v7355_v31, %v676_v7  ;;  %12452 = vst [vmem:[#allocation82_spill] sm:$0xff] %v8371_v49  ;;  %v706_v42 = vmul.f32 0.0625, %v8020_v38  ;;  %v911_v34 = vmul.f32 %v8353_v5, %v8353_v5  ;;  %v7360_v38 = vld [vmem:[#allocation3 + $0x270] sm:$0xff] }
 0x1b2   :  { %12447 = vst [vmem:[#allocation77_spill] sm:$0xff] %v8355_v61  ;;  %12453 = vst [vmem:[#allocation83_spill] sm:$0xff] %v8376_v2  ;;  %v914_v52 = vmul.f32 %v8355_v61, %v8355_v61  ;;  %v913_v11 = vmul.f32 %v8357_v13, %v8357_v13  ;;  %v8395_v31 = vsub.f32 %v7360_v38, %v685_v6  ;;  %v8398_v15 = vsel %vm221_vm0, %v882_v17, 0.0 }
 0x1b3   :  { %12450 = vst [vmem:[#allocation80_spill] sm:$0xff] %v8367_v26  ;;  %12451 = vst [vmem:[#allocation81_spill] sm:$0xff] %v8369_v55  ;;  %1217 = vadd.xlane.f32.xlu1 %v1216_v16  ;;  %1214 = vadd.xlane.f32.xlu0 %v1213_v60  ;;  %v7359_v16 = vld [vmem:[#allocation3 + $0x278] sm:$0xff]  ;;  %v8401_v56 = vsel %vm221_vm0, %v881_v3, 0.0  ;;  %v705_v45 = vmul.f32 0.0625, %v8022_v59  ;;  %v932_v6 = vmul.f32 %v8369_v55, %v8369_v55  ;;  %v8421_v59 = vsel %vm221_vm0, %v912_v18, 0.0 }
 0x1b4   :  { %12454 = vst [vmem:[#allocation84_spill] sm:$0xff] %v8378_v30  ;;  %v8381_v44 = vpop.xlane.xlu1 %574  ;;  %v8383_v7 = vpop.xlane.xlu0 %571  ;;  %v8387_v60 = vsub.f32 %v7359_v16, %v686_v32  ;;  %12456 = vst [vmem:[#allocation86_spill] sm:$0xff] %v8395_v31  ;;  %v930_v32 = vmul.f32 %v8360_v50, %v8360_v50  ;;  %v929_v16 = vmul.f32 %v8367_v26, %v8367_v26  ;;  %v7361_v3 = vld [vmem:[#allocation3 + $0x318] sm:$0xff]  ;;  %v8428_v55 = vsel %vm221_vm0, %v911_v34, 0.0 }
 0x1b5   :  { %v931_v17 = vmul.f32 %v8371_v49, %v8371_v49  ;;  %v8414_v38 = vsub.f32 %v7361_v3, %v706_v42  ;;  %v8431_v49 = vsel %vm221_vm0, %v914_v52, 0.0  ;;  %v8434_v42 = vsel %vm221_vm0, %v913_v11, 0.0 }
 0x1b6   :  { %12455 = vst [vmem:[#allocation85_spill] sm:$0xff] %v8387_v60  ;;  %v942_v3 = vmul.f32 %v8387_v60, %v8387_v60  ;;  %v708_v18 = vmul.f32 0.0625, %v8036_v8  ;;  %v707_v26 = vmul.f32 0.0625, %v8038_v19  ;;  %v941_v34 = vmul.f32 %v8395_v31, %v8395_v31 }
 0x1b7   :  { %1307 = vadd.xlane.f32.xlu1 %v8316_v48  ;;  %1304 = vadd.xlane.f32.xlu0 %v8319_v41  ;;  %12457 = vst [vmem:[#allocation87_spill] sm:$0xff] %v8414_v38  ;;  %v940_v48 = vmul.f32 %v8376_v2, %v8376_v2  ;;  %v939_v41 = vmul.f32 %v8378_v30, %v8378_v30  ;;  %v8441_v2 = vsel %vm221_vm0, %v930_v32, 0.0  ;;  %v7362_v30 = vld [vmem:[#allocation3 + $0x310] sm:$0xff]  ;;  %v8450_v52 = vsel %vm221_vm0, %v929_v16, 0.0 }
 0x1b8   :  { %v8416_v13 = vpop.xlane.xlu1 %580  ;;  %v8418_v50 = vpop.xlane.xlu0 %577  ;;  %v8445_v61 = vsub.f32 %v7362_v30, %v705_v45  ;;  %v8453_v8 = vsel %vm221_vm0, %v932_v6, 0.0  ;;  %v8456_v19 = vsel %vm221_vm0, %v931_v17, 0.0  ;;  %v716_v11 = vmul.f32 0.0625, %v8052_v0  ;;  %v7363_v17 = vld [vmem:[#allocation3 + $0x328] sm:$0xff] }
 0x1b9   :  { %v8464_v30 = vsel %vm221_vm0, %v940_v48, 0.0  ;;  %v715_v45 = vmul.f32 0.0625, %v8054_v14  ;;  %v718_v16 = vmul.f32 0.0625, %v8068_v43  ;;  %v717_v6 = vmul.f32 0.0625, %v8070_v20  ;;  %v7364_v48 = vld [vmem:[#allocation3 + $0x320] sm:$0xff] }
 0x1ba   :  { %12458 = vst [vmem:[#allocation88_spill] sm:$0xff] %v8445_v61  ;;  %v8475_v0 = vsel %vm221_vm0, %v942_v3, 0.0  ;;  %v8477_v60 = vsub.f32 %v7363_v17, %v708_v18  ;;  %v8479_v5 = vsub.f32 %v7364_v48, %v707_v26  ;;  %v8483_v33 = vsel %vm221_vm0, %v941_v34, 0.0  ;;  %v7365_v26 = vld [vmem:[#allocation3 + $0x368] sm:$0xff] }
 0x1bb   :  { %1313 = vadd.xlane.f32.xlu1 %v8327_v25  ;;  %1310 = vadd.xlane.f32.xlu0 %v8335_v23  ;;  %v8467_v23 = vsel %vm221_vm0, %v939_v41, 0.0  ;;  %v962_v25 = vmul.f32 %v8414_v38, %v8414_v38  ;;  %v628_v41 = vmul.f32 0.0625, %v8084_v62  ;;  %v627_v14 = vmul.f32 0.0625, %v8086_v58 }
 0x1bc   :  { %v8459_v32 = vpop.xlane.xlu1 %310  ;;  %v8461_v31 = vpop.xlane.xlu0 %307  ;;  %12459 = vst [vmem:[#allocation89_spill] sm:$0xff] %v8477_v60  ;;  %12460 = vst [vmem:[#allocation90_spill] sm:$0xff] %v8479_v5  ;;  %v630_v43 = vmul.f32 0.0625, %v8100_v36  ;;  %v629_v20 = vmul.f32 0.0625, %v8102_v24  ;;  %v961_v3 = vmul.f32 %v8445_v61, %v8445_v61  ;;  %v8492_v18 = vsub.f32 %v7365_v26, %v716_v11  ;;  %v7366_v24 = vld [vmem:[#allocation3 + $0x360] sm:$0xff]  ;;  %v7368_v61 = vld [vmem:[#allocation3 + $0x370] sm:$0xff] }
 0x1bd   :  { %v660_v62 = vmul.f32 0.0625, %v8116_v40  ;;  %v659_v34 = vmul.f32 0.0625, %v8118_v46  ;;  %v8501_v36 = vsel %vm221_vm0, %v962_v25, 0.0  ;;  %v8507_v11 = vsub.f32 %v7368_v61, %v717_v6  ;;  %v7369_v26 = vld [vmem:[#allocation3 + $0xa8] sm:$0xff]  ;;  %v7372_v61 = vld [vmem:[#allocation3 + $0xb0] sm:$0xff] }
 0x1be   :  { %12461 = vst [vmem:[#allocation91_spill] sm:$0xff] %v8492_v18  ;;  %v662_v40 = vmul.f32 0.0625, %v8132_v57  ;;  %v8510_v46 = vsub.f32 %v7369_v26, %v628_v41  ;;  %v661_v38 = vmul.f32 0.0625, %v8134_v54  ;;  %v964_v25 = vmul.f32 %v8477_v60, %v8477_v60  ;;  %v7373_v54 = vld [vmem:[#allocation3 + $0x1a8] sm:$0xff]  ;;  %v7374_v26 = vld [vmem:[#allocation3 + $0x1a0] sm:$0xff] }
 0x1bf   :  { %1043 = vadd.xlane.f32.xlu1 %v8351_v10  ;;  %1040 = vadd.xlane.f32.xlu0 %v8374_v1  ;;  %v8503_v10 = vsub.f32 %v7366_v24, %v715_v45  ;;  %v7367_v1 = vld [vmem:[#allocation3 + $0x378] sm:$0xff]  ;;  %12464 = vst [vmem:[#allocation94_spill] sm:$0xff] %v8507_v11  ;;  %v963_v45 = vmul.f32 %v8479_v5, %v8479_v5  ;;  %v7370_v24 = vld [vmem:[#allocation3 + $0xa0] sm:$0xff]  ;;  %v8526_v57 = vsel %vm221_vm0, %v961_v3, 0.0 }
 0x1c0   :  { %v8496_v17 = vpop.xlane.xlu1 %316  ;;  %v8498_v58 = vpop.xlane.xlu0 %313  ;;  %v8505_v48 = vsub.f32 %v7367_v1, %v718_v16  ;;  %12465 = vst [vmem:[#allocation95_spill] sm:$0xff] %v8510_v46  ;;  %v8517_v9 = vsub.f32 %v7370_v24, %v627_v14  ;;  %v7371_v16 = vld [vmem:[#allocation3 + $0xb8] sm:$0xff]  ;;  %v8521_v6 = vsub.f32 %v7372_v61, %v629_v20  ;;  %v8528_v41 = vsub.f32 %v7373_v54, %v660_v62 }
 0x1c1   :  { %12462 = vst [vmem:[#allocation92_spill] sm:$0xff] %v8503_v10  ;;  %v8519_v1 = vsub.f32 %v7371_v16, %v630_v43  ;;  %v8530_v5 = vsub.f32 %v7374_v26, %v659_v34  ;;  %v688_v14 = vmul.f32 0.0625, %v8148_v28  ;;  %v7375_v20 = vld [vmem:[#allocation3 + $0x1b8] sm:$0xff]  ;;  %v971_v3 = vmul.f32 %v8503_v10, %v8503_v10  ;;  %v7376_v28 = vld [vmem:[#allocation3 + $0x1b0] sm:$0xff] }
 0x1c2   :  { %12463 = vst [vmem:[#allocation93_spill] sm:$0xff] %v8505_v48  ;;  %12466 = vst [vmem:[#allocation96_spill] sm:$0xff] %v8517_v9  ;;  %v974_v62 = vmul.f32 %v8505_v48, %v8505_v48  ;;  %v973_v34 = vmul.f32 %v8507_v11, %v8507_v11  ;;  %v8547_v16 = vsub.f32 %v7376_v28, %v661_v38  ;;  %v8550_v61 = vsel %vm221_vm0, %v964_v25, 0.0  ;;  %v12481_v60 = vld [vmem:[#allocation62_spill] sm:$0xff] }
 0x1c3   :  { %12467 = vst [vmem:[#allocation97_spill] sm:$0xff] %v8519_v1  ;;  %12468 = vst [vmem:[#allocation98_spill] sm:$0xff] %v8521_v6  ;;  %1049 = vadd.xlane.f32.xlu1 %v8398_v15  ;;  %1046 = vadd.xlane.f32.xlu0 %v8401_v56  ;;  %v972_v15 = vmul.f32 %v8492_v18, %v8492_v18  ;;  %v8539_v56 = vsub.f32 %v7375_v20, %v662_v40  ;;  %v8553_v54 = vsel %vm221_vm0, %v963_v45, 0.0  ;;  %v7377_v45 = vld [vmem:[#allocation3 + $0x288] sm:$0xff] }
 0x1c4   :  { %12469 = vst [vmem:[#allocation99_spill] sm:$0xff] %v8528_v41  ;;  %12470 = vst [vmem:[#allocation100_spill] sm:$0xff] %v8530_v5  ;;  %v8533_v43 = vpop.xlane.xlu1 %406  ;;  %v8535_v24 = vpop.xlane.xlu0 %403  ;;  %v884_v40 = vmul.f32 %v8510_v46, %v8510_v46  ;;  %v687_v26 = vmul.f32 0.0625, %v8150_v27  ;;  %v883_v20 = vmul.f32 %v8517_v9, %v8517_v9  ;;  %v886_v38 = vmul.f32 %v8519_v1, %v8519_v1 }
 0x1c5   :  { %12471 = vst [vmem:[#allocation101_spill] sm:$0xff] %v8539_v56  ;;  %12472 = vst [vmem:[#allocation102_spill] sm:$0xff] %v8547_v16  ;;  %v885_v25 = vmul.f32 %v8521_v6, %v8521_v6  ;;  %v8566_v28 = vsub.f32 %v7377_v45, %v688_v14  ;;  %v8573_v27 = vsel %vm221_vm0, %v972_v15, 0.0  ;;  %v8580_v1 = vsel %vm221_vm0, %v971_v3, 0.0 }
 0x1c6   :  { %v8583_v6 = vsel %vm221_vm0, %v974_v62, 0.0  ;;  %v8586_v14 = vsel %vm221_vm0, %v973_v34, 0.0  ;;  %v918_v45 = vmul.f32 %v8539_v56, %v8539_v56  ;;  %v690_v15 = vmul.f32 0.0625, %v8164_v12 }
 0x1c7   :  { %1139 = vadd.xlane.f32.xlu1 %v8421_v59  ;;  %1136 = vadd.xlane.f32.xlu0 %v8428_v55  ;;  %12473 = vst [vmem:[#allocation103_spill] sm:$0xff] %v8566_v28  ;;  %v916_v55 = vmul.f32 %v8528_v41, %v8528_v41  ;;  %v915_v59 = vmul.f32 %v8530_v5, %v8530_v5  ;;  %v689_v9 = vmul.f32 0.0625, %v8166_v51  ;;  %v8593_v41 = vsel %vm221_vm0, %v884_v40, 0.0  ;;  %v7378_v5 = vld [vmem:[#allocation3 + $0x280] sm:$0xff] }
 0x1c8   :  { %v8568_v11 = vpop.xlane.xlu1 %412  ;;  %v8570_v46 = vpop.xlane.xlu0 %409  ;;  %v917_v3 = vmul.f32 %v8547_v16, %v8547_v16  ;;  %v8597_v48 = vsub.f32 %v7378_v5, %v687_v26  ;;  %v8602_v62 = vsel %vm221_vm0, %v883_v20, 0.0  ;;  %v8605_v12 = vsel %vm221_vm0, %v886_v38, 0.0 }
 0x1c9   :  { %v8608_v51 = vsel %vm221_vm0, %v885_v25, 0.0  ;;  %v720_v34 = vmul.f32 0.0625, %v8181_v22  ;;  %v8616_v5 = vsel %vm221_vm0, %v916_v55, 0.0  ;;  %v719_v26 = vmul.f32 0.0625, %v8183_v29  ;;  %v7379_v25 = vld [vmem:[#allocation3 + $0x298] sm:$0xff]  ;;  %v7380_v55 = vld [vmem:[#allocation3 + $0x290] sm:$0xff] }
 0x1ca   :  { %12474 = vst [vmem:[#allocation104_spill] sm:$0xff] %v8597_v48  ;;  %v722_v20 = vmul.f32 0.0625, %v8198_v47  ;;  %v721_v38 = vmul.f32 0.0625, %v8200_v35  ;;  %v8627_v22 = vsel %vm221_vm0, %v918_v45, 0.0  ;;  %v8629_v56 = vsub.f32 %v7379_v25, %v690_v15 }
 0x1cb   :  { %1145 = vadd.xlane.f32.xlu1 %v8431_v49  ;;  %1142 = vadd.xlane.f32.xlu0 %v8434_v42  ;;  %v8619_v49 = vsel %vm221_vm0, %v915_v59, 0.0  ;;  %v944_v42 = vmul.f32 %v8566_v28, %v8566_v28  ;;  %12476 = vst [vmem:[#allocation106_spill] sm:$0xff] %v8627_v22  ;;  %v8631_v10 = vsub.f32 %v7380_v55, %v689_v9  ;;  %v632_v59 = vmul.f32 0.0625, %v8212_v63  ;;  %v12480_v28 = vld [vmem:[#allocation59_spill] sm:$0xff] }
 0x1cc   :  { %v8611_v40 = vpop.xlane.xlu1 %490  ;;  %v8613_v16 = vpop.xlane.xlu0 %487  ;;  %12475 = vst [vmem:[#allocation105_spill] sm:$0xff] %v8619_v49  ;;  %12477 = vst [vmem:[#allocation107_spill] sm:$0xff] %v8629_v56  ;;  %v8635_v18 = vsel %vm221_vm0, %v917_v3, 0.0  ;;  %v631_v29 = vmul.f32 0.0625, %v12480_v28  ;;  %v634_v47 = vmul.f32 0.0625, %v12481_v60  ;;  %v12482_v49 = vld [vmem:[#allocation63_spill] sm:$0xff]  ;;  %v943_v45 = vmul.f32 %v8597_v48, %v8597_v48 }
 0x1cd   :  { %12478 = vst [vmem:[#allocation108_spill] sm:$0xff] %v8631_v10  ;;  %12479 = vst [vmem:[#allocation109_spill] sm:$0xff] %v8635_v18  ;;  %v633_v35 = vmul.f32 0.0625, %v12482_v49  ;;  %v7381_v9 = vld [vmem:[#allocation3 + $0x388] sm:$0xff]  ;;  %v664_v63 = vmul.f32 0.0625, %v8263_v39  ;;  %v663_v3 = vmul.f32 0.0625, %v8265_v21 }
 0x1ce   :  { %v8644_v15 = vsub.f32 %v7381_v9, %v720_v34  ;;  %v8653_v60 = vsel %vm221_vm0, %v944_v42, 0.0  ;;  %v7384_v48 = vld [vmem:[#allocation3 + $0x390] sm:$0xff]  ;;  %v666_v39 = vmul.f32 0.0625, %v8288_v4  ;;  %v7385_v9 = vld [vmem:[#allocation3 + $0xc8] sm:$0xff]  ;;  %v946_v42 = vmul.f32 %v8629_v56, %v8629_v56 }
 0x1cf   :  { %1193 = vadd.xlane.f32.xlu1 %v8441_v2  ;;  %1190 = vadd.xlane.f32.xlu0 %v8450_v52  ;;  %12484 = vst [vmem:[#allocation62_spill] sm:$0xff] %v8653_v60  ;;  %v7382_v2 = vld [vmem:[#allocation3 + $0x380] sm:$0xff]  ;;  %v7383_v52 = vld [vmem:[#allocation3 + $0x398] sm:$0xff]  ;;  %v8659_v34 = vsub.f32 %v7384_v48, %v721_v38  ;;  %v8662_v21 = vsub.f32 %v7385_v9, %v632_v59  ;;  %v7388_v48 = vld [vmem:[#allocation3 + $0xd0] sm:$0xff]  ;;  %v8678_v4 = vsel %vm221_vm0, %v943_v45, 0.0 }
 0x1d0   :  { %12483 = vst [vmem:[#allocation59_spill] sm:$0xff] %v8644_v15  ;;  %v8648_v25 = vpop.xlane.xlu1 %496  ;;  %v8650_v28 = vpop.xlane.xlu0 %493  ;;  %v8655_v49 = vsub.f32 %v7382_v2, %v719_v26  ;;  %v8657_v55 = vsub.f32 %v7383_v52, %v722_v20  ;;  %v12489_v18 = vld [vmem:[#allocation71_spill] sm:$0xff]  ;;  %v945_v26 = vmul.f32 %v8631_v10, %v8631_v10  ;;  %v7387_v20 = vld [vmem:[#allocation3 + $0xd8] sm:$0xff]  ;;  %v8673_v38 = vsub.f32 %v7388_v48, %v633_v35 }
 0x1d1   :  { %12487 = vst [vmem:[#allocation111_spill] sm:$0xff] %v8659_v34  ;;  %12488 = vst [vmem:[#allocation112_spill] sm:$0xff] %v8662_v21  ;;  %v665_v22 = vmul.f32 0.0625, %v12489_v18  ;;  %v7386_v2 = vld [vmem:[#allocation3 + $0xc0] sm:$0xff]  ;;  %v8671_v52 = vsub.f32 %v7387_v20, %v634_v47  ;;  %v7389_v18 = vld [vmem:[#allocation3 + $0x1c8] sm:$0xff]  ;;  %v8702_v48 = vsel %vm221_vm0, %v946_v42, 0.0 }
 0x1d2   :  { %12485 = vst [vmem:[#allocation63_spill] sm:$0xff] %v8655_v49  ;;  %12486 = vst [vmem:[#allocation110_spill] sm:$0xff] %v8657_v55  ;;  %v8669_v60 = vsub.f32 %v7386_v2, %v631_v29  ;;  %v8680_v59 = vsub.f32 %v7389_v18, %v664_v63  ;;  %v7390_v9 = vld [vmem:[#allocation3 + $0x1c0] sm:$0xff]  ;;  %v692_v29 = vmul.f32 0.0625, %v8311_v53  ;;  %v7391_v35 = vld [vmem:[#allocation3 + $0x1d8] sm:$0xff]  ;;  %v975_v45 = vmul.f32 %v8655_v49, %v8655_v49 }
 0x1d3   :  { %12491 = vst [vmem:[#allocation113_spill] sm:$0xff] %v8671_v52  ;;  %12492 = vst [vmem:[#allocation114_spill] sm:$0xff] %v8673_v38  ;;  %1199 = vadd.xlane.f32.xlu1 %v8453_v8  ;;  %1196 = vadd.xlane.f32.xlu0 %v8456_v19  ;;  %v8682_v10 = vsub.f32 %v7390_v9, %v663_v3  ;;  %v976_v8 = vmul.f32 %v8644_v15, %v8644_v15  ;;  %v7392_v53 = vld [vmem:[#allocation3 + $0x1d0] sm:$0xff]  ;;  %v8705_v18 = vsel %vm221_vm0, %v945_v26, 0.0  ;;  %v12497_v9 = vld [vmem:[#allocation22_spill] sm:$0xff] }
 0x1d4   :  { %12490 = vst [vmem:[#allocation71_spill] sm:$0xff] %v8669_v60  ;;  %12493 = vst [vmem:[#allocation115_spill] sm:$0xff] %v8680_v59  ;;  %v8685_v47 = vpop.xlane.xlu1 %586  ;;  %v8687_v2 = vpop.xlane.xlu0 %583  ;;  %v8691_v19 = vsub.f32 %v7391_v35, %v666_v39  ;;  %v978_v63 = vmul.f32 %v8657_v55, %v8657_v55  ;;  %v977_v3 = vmul.f32 %v8659_v34, %v8659_v34  ;;  %v691_v35 = vmul.f32 0.0625, %v12497_v9  ;;  %v7393_v26 = vld [vmem:[#allocation3 + $0x2a8] sm:$0xff] }
 0x1d5   :  { %12494 = vst [vmem:[#allocation116_spill] sm:$0xff] %v8682_v10  ;;  %v8699_v20 = vsub.f32 %v7392_v53, %v665_v22  ;;  %v888_v39 = vmul.f32 %v8662_v21, %v8662_v21  ;;  %v887_v34 = vmul.f32 %v8669_v60, %v8669_v60  ;;  %v890_v22 = vmul.f32 %v8671_v52, %v8671_v52  ;;  %v12499_v60 = vld [vmem:[#allocation75_spill] sm:$0xff] }
 0x1d6   :  { %12495 = vst [vmem:[#allocation117_spill] sm:$0xff] %v8691_v19  ;;  %v889_v42 = vmul.f32 %v8673_v38, %v8673_v38  ;;  %v8718_v53 = vsub.f32 %v7393_v26, %v692_v29  ;;  %v919_v9 = vmul.f32 %v8682_v10, %v8682_v10  ;;  %v8732_v52 = vsel %vm221_vm0, %v975_v45, 0.0  ;;  %v7394_v10 = vld [vmem:[#allocation3 + $0x2a0] sm:$0xff] }
 0x1d7   :  { %12496 = vst [vmem:[#allocation118_spill] sm:$0xff] %v8699_v20  ;;  %1223 = vadd.xlane.f32.xlu1 %v8464_v30  ;;  %1220 = vadd.xlane.f32.xlu0 %v8467_v23  ;;  %v8725_v30 = vsel %vm221_vm0, %v976_v8, 0.0  ;;  %v920_v23 = vmul.f32 %v8680_v59, %v8680_v59  ;;  %v8735_v38 = vsel %vm221_vm0, %v978_v63, 0.0  ;;  %v8738_v29 = vsel %vm221_vm0, %v977_v3, 0.0 }
 0x1d8   :  { %12498 = vst [vmem:[#allocation22_spill] sm:$0xff] %v8718_v53  ;;  %v8720_v55 = vpop.xlane.xlu1 %592  ;;  %v8722_v21 = vpop.xlane.xlu0 %589  ;;  %v922_v26 = vmul.f32 %v8691_v19, %v8691_v19  ;;  %v694_v8 = vmul.f32 0.0625, %v8346_v37  ;;  %v693_v49 = vmul.f32 0.0625, %v12499_v60  ;;  %v8745_v59 = vsel %vm221_vm0, %v888_v39, 0.0 }
 0x1d9   :  { %v921_v45 = vmul.f32 %v8699_v20, %v8699_v20  ;;  %v8749_v15 = vsub.f32 %v7394_v10, %v691_v35  ;;  %v8754_v63 = vsel %vm221_vm0, %v887_v34, 0.0  ;;  %v8757_v37 = vsel %vm221_vm0, %v890_v22, 0.0 }
 0x1da   :  { %v8760_v60 = vsel %vm221_vm0, %v889_v42, 0.0  ;;  %v724_v3 = vmul.f32 0.0625, %v8381_v44  ;;  %v8768_v10 = vsel %vm221_vm0, %v920_v23, 0.0  ;;  %v723_v34 = vmul.f32 0.0625, %v8383_v7  ;;  %v7395_v42 = vld [vmem:[#allocation3 + $0x2b8] sm:$0xff]  ;;  %v7396_v23 = vld [vmem:[#allocation3 + $0x2b0] sm:$0xff] }
 0x1db   :  { %12500 = vst [vmem:[#allocation75_spill] sm:$0xff] %v8749_v15  ;;  %1229 = vadd.xlane.f32.xlu1 %v8475_v0  ;;  %1226 = vadd.xlane.f32.xlu0 %v8483_v33  ;;  %v8771_v33 = vsel %vm221_vm0, %v919_v9, 0.0  ;;  %v948_v0 = vmul.f32 %v8718_v53, %v8718_v53  ;;  %v726_v35 = vmul.f32 0.0625, %v8416_v13  ;;  %v725_v22 = vmul.f32 0.0625, %v8418_v50 }
 0x1dc   :  { %v8763_v39 = vpop.xlane.xlu1 %502  ;;  %v8765_v20 = vpop.xlane.xlu0 %499  ;;  %12501 = vst [vmem:[#allocation119_spill] sm:$0xff] %v8771_v33  ;;  %v8779_v44 = vsel %vm221_vm0, %v922_v26, 0.0  ;;  %v8781_v19 = vsub.f32 %v7395_v42, %v694_v8  ;;  %v8783_v56 = vsub.f32 %v7396_v23, %v693_v49  ;;  %v636_v9 = vmul.f32 0.0625, %v8459_v32  ;;  %v7397_v49 = vld [vmem:[#allocation3 + $0x3a8] sm:$0xff] }
 0x1dd   :  { %v8787_v33 = vsel %vm221_vm0, %v921_v45, 0.0  ;;  %v635_v7 = vmul.f32 0.0625, %v8461_v31  ;;  %v638_v13 = vmul.f32 0.0625, %v8496_v17  ;;  %v637_v50 = vmul.f32 0.0625, %v8498_v58  ;;  %v7398_v58 = vld [vmem:[#allocation3 + $0x3a0] sm:$0xff] }
 0x1de   :  { %12502 = vst [vmem:[#allocation120_spill] sm:$0xff] %v8781_v19  ;;  %12503 = vst [vmem:[#allocation121_spill] sm:$0xff] %v8783_v56  ;;  %v947_v26 = vmul.f32 %v8749_v15, %v8749_v15  ;;  %v8796_v8 = vsub.f32 %v7397_v49, %v724_v3  ;;  %v668_v32 = vmul.f32 0.0625, %v8533_v43  ;;  %v667_v45 = vmul.f32 0.0625, %v8535_v24  ;;  %v7400_v15 = vld [vmem:[#allocation3 + $0x3b0] sm:$0xff]  ;;  %v7401_v49 = vld [vmem:[#allocation3 + $0xe8] sm:$0xff] }
 0x1df   :  { %1289 = vadd.xlane.f32.xlu1 %v8501_v36  ;;  %1286 = vadd.xlane.f32.xlu0 %v8526_v57  ;;  %v8805_v17 = vsel %vm221_vm0, %v948_v0, 0.0  ;;  %v8807_v36 = vsub.f32 %v7398_v58, %v723_v34  ;;  %v7399_v57 = vld [vmem:[#allocation3 + $0x3b8] sm:$0xff]  ;;  %v8811_v3 = vsub.f32 %v7400_v15, %v725_v22  ;;  %v670_v43 = vmul.f32 0.0625, %v8568_v11  ;;  %v7402_v58 = vld [vmem:[#allocation3 + $0xe0] sm:$0xff]  ;;  %v7404_v15 = vld [vmem:[#allocation3 + $0xf0] sm:$0xff] }
 0x1e0   :  { %12504 = vst [vmem:[#allocation122_spill] sm:$0xff] %v8796_v8  ;;  %v8800_v42 = vpop.xlane.xlu1 %508  ;;  %v8802_v31 = vpop.xlane.xlu0 %505  ;;  %12505 = vst [vmem:[#allocation123_spill] sm:$0xff] %v8805_v17  ;;  %v8809_v23 = vsub.f32 %v7399_v57, %v726_v35  ;;  %v8814_v24 = vsub.f32 %v7401_v49, %v636_v9  ;;  %v669_v53 = vmul.f32 0.0625, %v8570_v46  ;;  %v950_v0 = vmul.f32 %v8781_v19, %v8781_v19  ;;  %v7403_v35 = vld [vmem:[#allocation3 + $0xf8] sm:$0xff]  ;;  %v7405_v46 = vld [vmem:[#allocation3 + $0x1e8] sm:$0xff] }
 0x1e1   :  { %12506 = vst [vmem:[#allocation124_spill] sm:$0xff] %v8807_v36  ;;  %12508 = vst [vmem:[#allocation126_spill] sm:$0xff] %v8811_v3  ;;  %v949_v34 = vmul.f32 %v8783_v56, %v8783_v56  ;;  %v8821_v17 = vsub.f32 %v7402_v58, %v635_v7  ;;  %v8823_v57 = vsub.f32 %v7403_v35, %v638_v13  ;;  %v8830_v11 = vsel %vm221_vm0, %v947_v26, 0.0  ;;  %v7406_v49 = vld [vmem:[#allocation3 + $0x1e0] sm:$0xff] }
 0x1e2   :  { %12507 = vst [vmem:[#allocation125_spill] sm:$0xff] %v8809_v23  ;;  %12509 = vst [vmem:[#allocation127_spill] sm:$0xff] %v8814_v24  ;;  %v8825_v22 = vsub.f32 %v7404_v15, %v637_v50  ;;  %v8832_v9 = vsub.f32 %v7405_v46, %v668_v32  ;;  %v8834_v56 = vsub.f32 %v7406_v49, %v667_v45  ;;  %v696_v7 = vmul.f32 0.0625, %v8611_v40  ;;  %v7407_v50 = vld [vmem:[#allocation3 + $0x1f8] sm:$0xff]  ;;  %v7408_v40 = vld [vmem:[#allocation3 + $0x1f0] sm:$0xff] }
 0x1e3   :  { %12510 = vst [vmem:[#allocation128_spill] sm:$0xff] %v8821_v17  ;;  %12511 = vst [vmem:[#allocation129_spill] sm:$0xff] %v8823_v57  ;;  %1295 = vadd.xlane.f32.xlu1 %v8550_v61  ;;  %1292 = vadd.xlane.f32.xlu0 %v8553_v54  ;;  %v980_v61 = vmul.f32 %v8796_v8, %v8796_v8  ;;  %v8843_v54 = vsub.f32 %v7407_v50, %v670_v43  ;;  %v695_v15 = vmul.f32 0.0625, %v8613_v16  ;;  %v7412_v8 = vld [vmem:[#allocation3 + $0x2d0] sm:$0xff] }
 0x1e4   :  { %12512 = vst [vmem:[#allocation130_spill] sm:$0xff] %v8825_v22  ;;  %12513 = vst [vmem:[#allocation131_spill] sm:$0xff] %v8832_v9  ;;  %v8837_v13 = vpop.xlane.xlu1 %598  ;;  %v8839_v58 = vpop.xlane.xlu0 %595  ;;  %v979_v26 = vmul.f32 %v8807_v36, %v8807_v36  ;;  %v982_v32 = vmul.f32 %v8809_v23, %v8809_v23  ;;  %v981_v45 = vmul.f32 %v8811_v3, %v8811_v3  ;;  %v8855_v46 = vsel %vm221_vm0, %v950_v0, 0.0  ;;  %v7409_v0 = vld [vmem:[#allocation3 + $0x2c8] sm:$0xff] }
 0x1e5   :  { %12514 = vst [vmem:[#allocation132_spill] sm:$0xff] %v8834_v56  ;;  %12515 = vst [vmem:[#allocation133_spill] sm:$0xff] %v8843_v54  ;;  %v8851_v35 = vsub.f32 %v7408_v40, %v669_v53  ;;  %v892_v43 = vmul.f32 %v8814_v24, %v8814_v24  ;;  %v8862_v49 = vsel %vm221_vm0, %v949_v34, 0.0  ;;  %v891_v50 = vmul.f32 %v8821_v17, %v8821_v17 }
 0x1e6   :  { %v894_v53 = vmul.f32 %v8823_v57, %v8823_v57  ;;  %v893_v16 = vmul.f32 %v8825_v22, %v8825_v22  ;;  %v8870_v40 = vsub.f32 %v7409_v0, %v696_v7  ;;  %v924_v34 = vmul.f32 %v8832_v9, %v8832_v9 }
 0x1e7   :  { %12516 = vst [vmem:[#allocation134_spill] sm:$0xff] %v8851_v35  ;;  %1319 = vadd.xlane.f32.xlu1 %v8573_v27  ;;  %1316 = vadd.xlane.f32.xlu0 %v8580_v1  ;;  %v8877_v1 = vsel %vm221_vm0, %v980_v61, 0.0  ;;  %v923_v17 = vmul.f32 %v8834_v56, %v8834_v56  ;;  %v8884_v57 = vsel %vm221_vm0, %v979_v26, 0.0  ;;  %v8887_v22 = vsel %vm221_vm0, %v982_v32, 0.0  ;;  %v7410_v61 = vld [vmem:[#allocation3 + $0x2c0] sm:$0xff]  ;;  %v7411_v56 = vld [vmem:[#allocation3 + $0x2d8] sm:$0xff] }
 0x1e8   :  { %12517 = vst [vmem:[#allocation135_spill] sm:$0xff] %v8870_v40  ;;  %v8872_v24 = vpop.xlane.xlu1 %604  ;;  %v8874_v27 = vpop.xlane.xlu0 %601  ;;  %v8890_v7 = vsel %vm221_vm0, %v981_v45, 0.0  ;;  %v926_v0 = vmul.f32 %v8843_v54, %v8843_v54  ;;  %v8894_v3 = vsub.f32 %v7410_v61, %v695_v15  ;;  %v698_v9 = vmul.f32 0.0625, %v8648_v25 }
 0x1e9   :  { %v8898_v23 = vsel %vm221_vm0, %v892_v43, 0.0  ;;  %v925_v26 = vmul.f32 %v8851_v35, %v8851_v35  ;;  %v697_v32 = vmul.f32 0.0625, %v8650_v28  ;;  %v8906_v45 = vsel %vm221_vm0, %v891_v50, 0.0 }
 0x1ea   :  { %12518 = vst [vmem:[#allocation136_spill] sm:$0xff] %v8894_v3  ;;  %v8909_v15 = vsel %vm221_vm0, %v894_v53, 0.0  ;;  %v8912_v25 = vsel %vm221_vm0, %v893_v16, 0.0  ;;  %v728_v43 = vmul.f32 0.0625, %v8685_v47  ;;  %v8916_v35 = vsel %vm221_vm0, %v924_v34, 0.0 }
 0x1eb   :  { %1325 = vadd.xlane.f32.xlu1 %v8583_v6  ;;  %1322 = vadd.xlane.f32.xlu0 %v8586_v14  ;;  %v8919_v6 = vsel %vm221_vm0, %v923_v17, 0.0  ;;  %v952_v14 = vmul.f32 %v8870_v40, %v8870_v40  ;;  %v727_v28 = vmul.f32 0.0625, %v8687_v2  ;;  %v8925_v16 = vsel %vm221_vm0, %v926_v0, 0.0 }
 0x1ec   :  { %v996_v61 = vpop.xlane.xlu1 %995  ;;  %v993_v54 = vpop.xlane.xlu0 %992  ;;  %v8927_v47 = vsub.f32 %v7411_v56, %v698_v9  ;;  %v730_v36 = vmul.f32 0.0625, %v8720_v55  ;;  %v8931_v34 = vsel %vm221_vm0, %v925_v26, 0.0  ;;  %v951_v17 = vmul.f32 %v8894_v3, %v8894_v3  ;;  %v7413_v56 = vld [vmem:[#allocation3 + $0x3c8] sm:$0xff] }
 0x1ed   :  { %v1376_v50 = vmul.f32 0.0625, %v996_v61  ;;  %v1375_v53 = vmul.f32 0.0625, %v993_v54  ;;  %v8935_v40 = vsub.f32 %v7412_v8, %v697_v32  ;;  %v729_v2 = vmul.f32 0.0625, %v8722_v21  ;;  %v7414_v32 = vld [vmem:[#allocation3 + $0x3c0] sm:$0xff] }
 0x1ee   :  { %12519 = vst [vmem:[#allocation137_spill] sm:$0xff] %v8927_v47  ;;  %v8940_v9 = vsub.f32 %v7413_v56, %v728_v43  ;;  %v700_v55 = vmul.f32 0.0625, %v8763_v39  ;;  %v699_v0 = vmul.f32 0.0625, %v8765_v20  ;;  %v8945_v8 = vsel %vm221_vm0, %v952_v14, 0.0  ;;  %v7416_v39 = vld [vmem:[#allocation3 + $0x3d0] sm:$0xff] }
 0x1ef   :  { %12520 = vst [vmem:[#allocation138_spill] sm:$0xff] %v8935_v40  ;;  %v1504_v54 = vadd.f32 1e-05, %v1376_v50  ;;  %v1503_v61 = vadd.f32 1e-05, %v1375_v53  ;;  %1055 = vadd.xlane.f32.xlu1 %v8593_v41  ;;  %1052 = vadd.xlane.f32.xlu0 %v8602_v62  ;;  %v8947_v21 = vsub.f32 %v7414_v32, %v727_v28  ;;  %v7415_v53 = vld [vmem:[#allocation3 + $0x3d8] sm:$0xff]  ;;  %v954_v20 = vmul.f32 %v8927_v47, %v8927_v47 }
 0x1f0   :  { %12521 = vst [vmem:[#allocation139_spill] sm:$0xff] %v8940_v9  ;;  %v1014_v26 = vpop.xlane.xlu1 %1013  ;;  %v1011_v3 = vpop.xlane.xlu0 %1010  ;;  %v8949_v62 = vsub.f32 %v7415_v53, %v730_v36  ;;  %v8952_v43 = vsel %vm221_vm0, %v951_v17, 0.0  ;;  %v8956_v56 = vsub.f32 %v7416_v39, %v729_v2  ;;  %v953_v36 = vmul.f32 %v8935_v40, %v8935_v40  ;;  %v7418_v17 = vld [vmem:[#allocation3 + $0x2e0] sm:$0xff]  ;;  %v12527_v39 = vld [vmem:[#allocation105_spill] sm:$0xff]  ;;  %v7421_v40 = vld [vmem:[#allocation3 + $0x3e8] sm:$0xff] }
 0x1f1   :  { %12522 = vst [vmem:[#allocation140_spill] sm:$0xff] %v8947_v21  ;;  %7045 = vrsqrt.f32 %v1504_v54  ;;  %v1382_v50 = vmul.f32 0.0625, %v1014_v26  ;;  %v1381_v41 = vmul.f32 0.0625, %v1011_v3  ;;  %v7417_v3 = vld [vmem:[#allocation3 + $0x2e8] sm:$0xff]  ;;  %v8964_v54 = vsub.f32 %v7418_v17, %v699_v0  ;;  %v7422_v47 = vld [vmem:[#allocation3 + $0x3e0] sm:$0xff] }
 0x1f2   :  { %12523 = vst [vmem:[#allocation141_spill] sm:$0xff] %v8949_v62  ;;  %7047 = vrsqrt.f32 %v1503_v61  ;;  %12524 = vst [vmem:[#allocation142_spill] sm:$0xff] %v8956_v56  ;;  %v8962_v28 = vsub.f32 %v7417_v3, %v700_v55  ;;  %v702_v61 = vmul.f32 0.0625, %v8800_v42  ;;  %v984_v32 = vmul.f32 %v8940_v9, %v8940_v9 }
 0x1f3   :  { %v1510_v14 = vadd.f32 1e-05, %v1382_v50  ;;  %v1509_v19 = vadd.f32 1e-05, %v1381_v41  ;;  %1061 = vadd.xlane.f32.xlu1 %v8605_v12  ;;  %1058 = vadd.xlane.f32.xlu0 %v8608_v51  ;;  %12526 = vst [vmem:[#allocation144_spill] sm:$0xff] %v8964_v54  ;;  %v983_v51 = vmul.f32 %v8947_v21, %v8947_v21  ;;  %v701_v41 = vmul.f32 0.0625, %v8802_v31 }
 0x1f4   :  { %12525 = vst [vmem:[#allocation143_spill] sm:$0xff] %v8962_v28  ;;  %v1092_v26 = vpop.xlane.xlu1 %1091  ;;  %v1089_v2 = vpop.xlane.xlu0 %1088  ;;  %v8973_v55 = vsel %vm221_vm0, %v954_v20, 0.0  ;;  %v986_v42 = vmul.f32 %v8949_v62, %v8949_v62  ;;  %v985_v3 = vmul.f32 %v8956_v56, %v8956_v56  ;;  %v7419_v31 = vld [vmem:[#allocation3 + $0x2f8] sm:$0xff]  ;;  %v8999_v56 = vld [vmem:[#allocation6] ss:$0 sm:$0xff] }
 0x1f5   :  { %7049 = vrsqrt.f32 %v1510_v14  ;;  %v1408_v12 = vmul.f32 0.0625, %v1092_v26  ;;  %v1407_v50 = vmul.f32 0.0625, %v1089_v2  ;;  %v8980_v14 = vsel %vm221_vm0, %v953_v36, 0.0 }
 0x1f6   :  { %7051 = vrsqrt.f32 %v1509_v19  ;;  %v8984_v19 = vsub.f32 %v7419_v31, %v702_v61  ;;  %v8987_v26 = vsel %vm221_vm0, %v984_v32, 0.0  ;;  %v956_v2 = vmul.f32 %v8962_v28, %v8962_v28 }
 0x1f7   :  { %v1536_v0 = vadd.f32 1e-05, %v1408_v12  ;;  %v1535_v53 = vadd.f32 1e-05, %v1407_v50  ;;  %1151 = vadd.xlane.f32.xlu1 %v8616_v5  ;;  %1148 = vadd.xlane.f32.xlu0 %v12527_v39  ;;  %v955_v5 = vmul.f32 %v8964_v54, %v8964_v54  ;;  %v8994_v50 = vsel %vm221_vm0, %v983_v51, 0.0  ;;  %v7420_v39 = vld [vmem:[#allocation3 + $0x2f0] sm:$0xff] }
 0x1f8   :  { %12528 = vst [vmem:[#allocation105_spill] sm:$0xff] %v8984_v19  ;;  %v1110_v20 = vpop.xlane.xlu1 %1109  ;;  %v1107_v17 = vpop.xlane.xlu0 %1106  ;;  %v8996_v61 = vsub.f32 %v7420_v39, %v701_v41  ;;  %v732_v31 = vmul.f32 0.0625, %v8837_v13  ;;  %v9002_v32 = vsel %vm221_vm0, %v986_v42, 0.0  ;;  %v731_v54 = vmul.f32 0.0625, %v8839_v58  ;;  %v12531_v51 = vld [vmem:[#allocation109_spill] sm:$0xff]  ;;  %v12532_v13 = vld [vmem:[#allocation24_spill] sm:$0xff] }
 0x1f9   :  { %7053 = vrsqrt.f32 %v1536_v0  ;;  %v1414_v36 = vmul.f32 0.0625, %v1110_v20  ;;  %v1413_v12 = vmul.f32 0.0625, %v1107_v17  ;;  %v12530_v17 = vld [vmem:[#allocation106_spill] sm:$0xff]  ;;  %v9008_v41 = vsel %vm221_vm0, %v985_v3, 0.0 }
 0x1fa   :  { %12529 = vst [vmem:[#allocation145_spill] sm:$0xff] %v8996_v61  ;;  %7055 = vrsqrt.f32 %v1535_v53  ;;  %v9012_v42 = vsel %vm221_vm0, %v956_v2, 0.0  ;;  %v9015_v9 = vsel %vm221_vm0, %v955_v5, 0.0  ;;  %v958_v58 = vmul.f32 %v8984_v19, %v8984_v19 }
 0x1fb   :  { %v7046_v28 = vpop.eup %7045  ;;  %v1542_v0 = vadd.f32 1e-05, %v1414_v36  ;;  %v1541_v20 = vadd.f32 1e-05, %v1413_v12  ;;  %1157 = vadd.xlane.f32.xlu1 %v12530_v17  ;;  %1154 = vadd.xlane.f32.xlu0 %v12531_v51  ;;  %12533 = vst [vmem:[#allocation106_spill] sm:$0xff] %v9012_v42  ;;  %12534 = vst [vmem:[#allocation109_spill] sm:$0xff] %v9015_v9  ;;  %v957_v2 = vmul.f32 %v8996_v61, %v8996_v61 }
 0x1fc   :  { %v7048_v39 = vpop.eup %7047  ;;  %v1760_v62 = vmul.f32 %v7046_v28, %v12532_v13  ;;  %v1020_v21 = vpop.xlane.xlu1 %1019  ;;  %v9019_v36 = vld [vmem:[#allocation8] ss:$0 sm:$0xff]  ;;  %v12535_v12 = vld [vmem:[#allocation23_spill] sm:$0xff]  ;;  %v9022_v28 = vsub.f32 %v7421_v40, %v732_v31  ;;  %v9027_v9 = vsub.f32 %v7422_v47, %v731_v54  ;;  %v9036_v47 = vsel %vm221_vm0, %v958_v58, 0.0 }
 0x1fd   :  { %v1017_v53 = vpop.xlane.xlu0 %1016  ;;  %v1759_v17 = vmul.f32 %v7048_v39, %v12535_v12  ;;  %7057 = vrsqrt.f32 %v1542_v0  ;;  %v1384_v3 = vmul.f32 0.0625, %v1020_v21  ;;  %v12537_v0 = vld [vmem:[#allocation62_spill] sm:$0xff]  ;;  %v734_v21 = vmul.f32 0.0625, %v8872_v24 }
 0x1fe   :  { %v1383_v51 = vmul.f32 0.0625, %v1017_v53  ;;  %12536 = vst [vmem:[#allocation24_spill] sm:$0xff] %v9022_v28  ;;  %v1895_v13 = vmul.f32 %v8999_v56, %v1760_v62  ;;  %7059 = vrsqrt.f32 %v1541_v20  ;;  %v12538_v31 = vld [vmem:[#allocation26_spill] sm:$0xff]  ;;  %v9042_v24 = vsel %vm221_vm0, %v957_v2, 0.0 }
 0x1ff   :  { %v7050_v5 = vpop.eup %7049  ;;  %v1894_v19 = vmul.f32 %v8999_v56, %v1759_v17  ;;  %v1512_v42 = vadd.f32 1e-05, %v1384_v3  ;;  %1235 = vadd.xlane.f32.xlu1 %v12537_v0  ;;  %1232 = vadd.xlane.f32.xlu0 %v8678_v4  ;;  %v12539_v17 = vld [vmem:[#allocation25_spill] sm:$0xff] }
 0x200   :  { %v1511_v39 = vadd.f32 1e-05, %v1383_v51  ;;  %v7052_v40 = vpop.eup %7051  ;;  %v2030_v62 = vadd.f32 %v9019_v36, %v1895_v13  ;;  %v1766_v20 = vmul.f32 %v7050_v5, %v12538_v31  ;;  %v1026_v53 = vpop.xlane.xlu1 %1025  ;;  %v733_v5 = vmul.f32 0.0625, %v8874_v27 }
 0x201   :  { %v1023_v12 = vpop.xlane.xlu0 %1022  ;;  %v2029_v54 = vadd.f32 %v9019_v36, %v1894_v19  ;;  %v1765_v3 = vmul.f32 %v7052_v40, %v12539_v17  ;;  %7061 = vrsqrt.f32 %v1512_v42  ;;  %v1386_v51 = vmul.f32 0.0625, %v1026_v53  ;;  %v12541_v17 = vld [vmem:[#allocation28_spill] sm:$0xff] }
 0x202   :  { %v1901_v4 = vmul.f32 %v8999_v56, %v1766_v20  ;;  %7063 = vrsqrt.f32 %v1511_v39  ;;  %v1385_v0 = vmul.f32 0.0625, %v1023_v12  ;;  %v12540_v39 = vld [vmem:[#allocation27_spill] sm:$0xff]  ;;  %v988_v27 = vmul.f32 %v9022_v28, %v9022_v28 }
 0x203   :  { %v7054_v13 = vpop.eup %7053  ;;  %v9045_v31 = vpack.c.bf16 %v2030_v62, %v2029_v54  ;;  %v1900_v58 = vmul.f32 %v8999_v56, %v1765_v3  ;;  %v1514_v61 = vadd.f32 1e-05, %v1386_v51  ;;  %1241 = vadd.xlane.f32.xlu1 %v8702_v48  ;;  %1238 = vadd.xlane.f32.xlu0 %v8705_v18  ;;  %v7423_v62 = vld [vmem:[#allocation3 + $0x3f8] sm:$0xff]  ;;  %v987_v18 = vmul.f32 %v9027_v9, %v9027_v9 }
 0x204   :  { %v7056_v19 = vpop.eup %7055  ;;  %v2036_v42 = vadd.f32 %v9019_v36, %v1901_v4  ;;  %v1792_v40 = vmul.f32 %v7054_v13, %v12540_v39  ;;  %v1513_v20 = vadd.f32 1e-05, %v1385_v0  ;;  %v1116_v2 = vpop.xlane.xlu1 %1115  ;;  %v9054_v12 = vsub.f32 %v7423_v62, %v734_v21  ;;  %v7424_v13 = vld [vmem:[#allocation3 + $0x3f0] sm:$0xff] }
 0x205   :  { %v1113_v53 = vpop.xlane.xlu0 %1112  ;;  %v2035_v54 = vadd.f32 %v9019_v36, %v1900_v58  ;;  %v1791_v48 = vmul.f32 %v7056_v19, %v12541_v17  ;;  %7065 = vrsqrt.f32 %v1514_v61  ;;  %v1416_v51 = vmul.f32 0.0625, %v1116_v2 }
 0x206   :  { %v1927_v3 = vmul.f32 %v8999_v56, %v1792_v40  ;;  %v1415_v4 = vmul.f32 0.0625, %v1113_v53  ;;  %v9061_v39 = vsub.f32 %v7424_v13, %v733_v5  ;;  %7067 = vrsqrt.f32 %v1513_v20  ;;  %v12542_v40 = vld [vmem:[#allocation29_spill] sm:$0xff] }
 0x207   :  { %v7058_v0 = vpop.eup %7057  ;;  %v9063_v28 = vpack.c.bf16 %v2036_v42, %v2035_v54  ;;  %v1926_v21 = vmul.f32 %v8999_v56, %v1791_v48  ;;  %1331 = vadd.xlane.f32.xlu1 %v8725_v30  ;;  %1328 = vadd.xlane.f32.xlu0 %v8732_v52  ;;  %v1544_v2 = vadd.f32 1e-05, %v1416_v51  ;;  %v12543_v42 = vld [vmem:[#allocation30_spill] sm:$0xff]  ;;  %v9073_v48 = vsel %vm221_vm0, %v988_v27, 0.0 }
 0x208   :  { %v7060_v58 = vpop.eup %7059  ;;  %v2062_v19 = vadd.f32 %v9019_v36, %v1927_v3  ;;  %v1798_v61 = vmul.f32 %v7058_v0, %v12542_v40  ;;  %v1543_v53 = vadd.f32 1e-05, %v1415_v4  ;;  %v1122_v62 = vpop.xlane.xlu1 %1121  ;;  %v990_v30 = vmul.f32 %v9054_v12, %v9054_v12 }
 0x209   :  { %v1119_v17 = vpop.xlane.xlu0 %1118  ;;  %v2061_v5 = vadd.f32 %v9019_v36, %v1926_v21  ;;  %v1797_v54 = vmul.f32 %v7060_v58, %v12543_v42  ;;  %7069 = vrsqrt.f32 %v1544_v2  ;;  %v1418_v20 = vmul.f32 0.0625, %v1122_v62  ;;  %v12544_v58 = vld [vmem:[#allocation31_spill] sm:$0xff] }
 0x20a   :  { %v1933_v52 = vmul.f32 %v8999_v56, %v1798_v61  ;;  %v1417_v3 = vmul.f32 0.0625, %v1119_v17  ;;  %7071 = vrsqrt.f32 %v1543_v53  ;;  %v989_v27 = vmul.f32 %v9061_v39, %v9061_v39 }
 0x20b   :  { %v7062_v0 = vpop.eup %7061  ;;  %v9078_v51 = vpack.c.bf16 %v2062_v19, %v2061_v5  ;;  %v1932_v4 = vmul.f32 %v8999_v56, %v1797_v54  ;;  %1337 = vadd.xlane.f32.xlu1 %v8735_v38  ;;  %1334 = vadd.xlane.f32.xlu0 %v8738_v29  ;;  %v1546_v61 = vadd.f32 1e-05, %v1418_v20  ;;  %v12545_v5 = vld [vmem:[#allocation32_spill] sm:$0xff]  ;;  %v9090_v38 = vsel %vm221_vm0, %v987_v18, 0.0 }
 0x20c   :  { %v7064_v13 = vpop.eup %7063  ;;  %v2068_v21 = vadd.f32 %v9019_v36, %v1933_v52  ;;  %v1768_v40 = vmul.f32 %v7062_v0, %v12544_v58  ;;  %v1545_v2 = vadd.f32 1e-05, %v1417_v3  ;;  %v1188_v62 = vpop.xlane.xlu1 %1187  ;;  %v9093_v29 = vsel %vm221_vm0, %v990_v30, 0.0 }
 0x20d   :  { %v1185_v19 = vpop.xlane.xlu0 %1184  ;;  %v2067_v17 = vadd.f32 %v9019_v36, %v1932_v4  ;;  %v1767_v53 = vmul.f32 %v7064_v13, %v12545_v5  ;;  %7073 = vrsqrt.f32 %v1546_v61  ;;  %v1440_v54 = vmul.f32 0.0625, %v1188_v62 }
 0x20e   :  { %v1903_v42 = vmul.f32 %v8999_v56, %v1768_v40  ;;  %v1439_v52 = vmul.f32 0.0625, %v1185_v19  ;;  %v9097_v20 = vunpack.c.l.b16 %v9045_v31  ;;  %7075 = vrsqrt.f32 %v1545_v2 }
 0x20f   :  { %v2176_v3 = vpack.c.bf16 %v2068_v21, %v2067_v17  ;;  %v1902_v0 = vmul.f32 %v8999_v56, %v1767_v53  ;;  %1067 = vadd.xlane.f32.xlu1 %v8745_v59  ;;  %1064 = vadd.xlane.f32.xlu0 %v8754_v63  ;;  %v7066_v18 = vpop.eup %7065  ;;  %v1568_v4 = vadd.f32 1e-05, %v1440_v54  ;;  %v9104_v61 = vsel %vm221_vm0, %v989_v27, 0.0  ;;  %v12549_v63 = vld [vmem:[#allocation33_spill] sm:$0xff]  ;;  %v12550_v17 = vld [vmem:[#allocation34_spill] sm:$0xff] }
 0x210   :  { %12546 = vst [vmem:[#allocation23_spill] sm:$0xff] %v9097_v20  ;;  %v2038_v30 = vadd.f32 %v9019_v36, %v1903_v42  ;;  %v1567_v13 = vadd.f32 1e-05, %v1439_v52  ;;  %v1206_v58 = vpop.xlane.xlu1 %1205  ;;  %v7068_v62 = vpop.eup %7067  ;;  %v9107_v21 = vunpack.c.h.b16 %v9045_v31  ;;  %v9110_v2 = vunpack.c.l.b16 %v9063_v28 }
 0x211   :  { %v1203_v40 = vpop.xlane.xlu0 %1202  ;;  %v2037_v59 = vadd.f32 %v9019_v36, %v1902_v0  ;;  %v1770_v19 = vmul.f32 %v7066_v18, %v12549_v63  ;;  %v1769_v5 = vmul.f32 %v7068_v62, %v12550_v17  ;;  %7077 = vrsqrt.f32 %v1568_v4  ;;  %v12554_v17 = vld [vmem:[#allocation36_spill] sm:$0xff] }
 0x212   :  { %12547 = vst [vmem:[#allocation62_spill] sm:$0xff] %v9107_v21  ;;  %12548 = vst [vmem:[#allocation26_spill] sm:$0xff] %v9110_v2  ;;  %v1446_v53 = vmul.f32 0.0625, %v1206_v58  ;;  %v1445_v42 = vmul.f32 0.0625, %v1203_v40  ;;  %7079 = vrsqrt.f32 %v1567_v13  ;;  %v9120_v0 = vunpack.c.l.b16 %v9078_v51  ;;  %v12553_v13 = vld [vmem:[#allocation35_spill] sm:$0xff] }
 0x213   :  { %v2161_v54 = vpack.c.bf16 %v2038_v30, %v2037_v59  ;;  %v1905_v27 = vmul.f32 %v8999_v56, %v1770_v19  ;;  %1073 = vadd.xlane.f32.xlu1 %v8757_v37  ;;  %1070 = vadd.xlane.f32.xlu0 %v8760_v60  ;;  %v7070_v52 = vpop.eup %7069  ;;  %v1904_v18 = vmul.f32 %v8999_v56, %v1769_v5  ;;  %v9124_v59 = vunpack.c.h.b16 %v9063_v28 }
 0x214   :  { %12551 = vst [vmem:[#allocation25_spill] sm:$0xff] %v9120_v0  ;;  %v1574_v62 = vadd.f32 1e-05, %v1446_v53  ;;  %v1573_v4 = vadd.f32 1e-05, %v1445_v42  ;;  %v1284_v58 = vpop.xlane.xlu1 %1283  ;;  %v7072_v30 = vpop.eup %7071  ;;  %v1800_v60 = vmul.f32 %v7070_v52, %v12553_v13  ;;  %v9132_v53 = vunpack.c.h.b16 %v9078_v51 }
 0x215   :  { %v1281_v40 = vpop.xlane.xlu0 %1280  ;;  %12552 = vst [vmem:[#allocation27_spill] sm:$0xff] %v9124_v59  ;;  %v2040_v37 = vadd.f32 %v9019_v36, %v1905_v27  ;;  %v2039_v19 = vadd.f32 %v9019_v36, %v1904_v18  ;;  %v1799_v31 = vmul.f32 %v7072_v30, %v12554_v17  ;;  %v1472_v5 = vmul.f32 0.0625, %v1284_v58  ;;  %v12556_v27 = vld [vmem:[#allocation119_spill] sm:$0xff]  ;;  %v12557_v17 = vld [vmem:[#allocation37_spill] sm:$0xff] }
 0x216   :  { %7081 = vrsqrt.f32 %v1574_v62  ;;  %12555 = vst [vmem:[#allocation28_spill] sm:$0xff] %v9132_v53  ;;  %v1935_v42 = vmul.f32 %v8999_v56, %v1800_v60  ;;  %v1471_v28 = vmul.f32 0.0625, %v1281_v40  ;;  %v9141_v53 = vunpack.c.l.b16 %v2176_v3 }
 0x217   :  { %7083 = vrsqrt.f32 %v1573_v4  ;;  %1163 = vadd.xlane.f32.xlu1 %v8768_v10  ;;  %1160 = vadd.xlane.f32.xlu0 %v12556_v27  ;;  %v7074_v52 = vpop.eup %7073  ;;  %v2162_v13 = vpack.c.bf16 %v2040_v37, %v2039_v19  ;;  %v1934_v63 = vmul.f32 %v8999_v56, %v1799_v31  ;;  %v1600_v18 = vadd.f32 1e-05, %v1472_v5  ;;  %v12560_v19 = vld [vmem:[#allocation38_spill] sm:$0xff] }
 0x218   :  { %v1302_v59 = vpop.xlane.xlu1 %1301  ;;  %v7076_v58 = vpop.eup %7075  ;;  %v2070_v51 = vadd.f32 %v9019_v36, %v1935_v42  ;;  %v1802_v60 = vmul.f32 %v7074_v52, %v12557_v17  ;;  %v1599_v4 = vadd.f32 1e-05, %v1471_v28  ;;  %12558 = vst [vmem:[#allocation29_spill] sm:$0xff] %v9141_v53  ;;  %v9143_v10 = vunpack.c.h.b16 %v2176_v3 }
 0x219   :  { %v1299_v30 = vpop.xlane.xlu0 %1298  ;;  %v1478_v40 = vmul.f32 0.0625, %v1302_v59  ;;  %v2069_v37 = vadd.f32 %v9019_v36, %v1934_v63  ;;  %v1801_v31 = vmul.f32 %v7076_v58, %v12560_v19  ;;  %7085 = vrsqrt.f32 %v1600_v18 }
 0x21a   :  { %12559 = vst [vmem:[#allocation30_spill] sm:$0xff] %v9143_v10  ;;  %v1937_v5 = vmul.f32 %v8999_v56, %v1802_v60  ;;  %v1477_v62 = vmul.f32 0.0625, %v1299_v30  ;;  %v9150_v28 = vunpack.c.l.b16 %v2161_v54  ;;  %7087 = vrsqrt.f32 %v1599_v4  ;;  %v12562_v60 = vld [vmem:[#allocation39_spill] sm:$0xff] }
 0x21b   :  { %v1606_v27 = vadd.f32 1e-05, %v1478_v40  ;;  %1169 = vadd.xlane.f32.xlu1 %v8779_v44  ;;  %1166 = vadd.xlane.f32.xlu0 %v8787_v33  ;;  %v7078_v42 = vpop.eup %7077  ;;  %v2177_v59 = vpack.c.bf16 %v2070_v51, %v2069_v37  ;;  %v1936_v3 = vmul.f32 %v8999_v56, %v1801_v31  ;;  %v9155_v40 = vunpack.c.h.b16 %v2161_v54  ;;  %v12564_v44 = vld [vmem:[#allocation40_spill] sm:$0xff]  ;;  %v12565_v10 = vld [vmem:[#allocation123_spill] sm:$0xff] }
 0x21c   :  { %12561 = vst [vmem:[#allocation31_spill] sm:$0xff] %v9150_v28  ;;  %v1002_v52 = vpop.xlane.xlu1 %1001  ;;  %v7080_v17 = vpop.eup %7079  ;;  %v2072_v58 = vadd.f32 %v9019_v36, %v1937_v5  ;;  %v1824_v18 = vmul.f32 %v7078_v42, %v12562_v60  ;;  %v1605_v30 = vadd.f32 1e-05, %v1477_v62 }
 0x21d   :  { %v999_v63 = vpop.xlane.xlu0 %998  ;;  %7089 = vrsqrt.f32 %v1606_v27  ;;  %12563 = vst [vmem:[#allocation32_spill] sm:$0xff] %v9155_v40  ;;  %v2071_v33 = vadd.f32 %v9019_v36, %v1936_v3  ;;  %v1823_v19 = vmul.f32 %v7080_v17, %v12564_v44  ;;  %v1378_v4 = vmul.f32 0.0625, %v1002_v52 }
 0x21e   :  { %v1959_v37 = vmul.f32 %v8999_v56, %v1824_v18  ;;  %7091 = vrsqrt.f32 %v1605_v30  ;;  %v1377_v31 = vmul.f32 0.0625, %v999_v63  ;;  %v9163_v27 = vunpack.c.l.b16 %v2162_v13  ;;  %v12567_v30 = vld [vmem:[#allocation41_spill] sm:$0xff] }
 0x21f   :  { %1247 = vadd.xlane.f32.xlu1 %v12565_v10  ;;  %1244 = vadd.xlane.f32.xlu0 %v8830_v11  ;;  %v2178_v54 = vpack.c.bf16 %v2072_v58, %v2071_v33  ;;  %v1958_v62 = vmul.f32 %v8999_v56, %v1823_v19  ;;  %v1506_v63 = vadd.f32 1e-05, %v1378_v4  ;;  %v9169_v10 = vunpack.c.h.b16 %v2162_v13  ;;  %v12570_v58 = vld [vmem:[#allocation42_spill] sm:$0xff] }
 0x220   :  { %v7082_v5 = vpop.eup %7081  ;;  %12566 = vst [vmem:[#allocation33_spill] sm:$0xff] %v9163_v27  ;;  %v1008_v42 = vpop.xlane.xlu1 %1007  ;;  %v2094_v18 = vadd.f32 %v9019_v36, %v1959_v37  ;;  %v1505_v44 = vadd.f32 1e-05, %v1377_v31  ;;  %v9171_v11 = vunpack.c.l.b16 %v2177_v59 }
 0x221   :  { %v1005_v3 = vpop.xlane.xlu0 %1004  ;;  %v7084_v60 = vpop.eup %7083  ;;  %v1830_v52 = vmul.f32 %v7082_v5, %v12567_v30  ;;  %12568 = vst [vmem:[#allocation34_spill] sm:$0xff] %v9169_v10  ;;  %v2093_v51 = vadd.f32 %v9019_v36, %v1958_v62  ;;  %7093 = vrsqrt.f32 %v1506_v63  ;;  %v1380_v21 = vmul.f32 0.0625, %v1008_v42 }
 0x222   :  { %12569 = vst [vmem:[#allocation35_spill] sm:$0xff] %v9171_v11  ;;  %v1829_v33 = vmul.f32 %v7084_v60, %v12570_v58  ;;  %v1379_v17 = vmul.f32 0.0625, %v1005_v3  ;;  %7095 = vrsqrt.f32 %v1505_v44  ;;  %v9181_v3 = vunpack.c.h.b16 %v2177_v59  ;;  %v12573_v58 = vld [vmem:[#allocation44_spill] sm:$0xff] }
 0x223   :  { %v1965_v19 = vmul.f32 %v8999_v56, %v1830_v52  ;;  %1253 = vadd.xlane.f32.xlu1 %v8855_v46  ;;  %1250 = vadd.xlane.f32.xlu0 %v8862_v49  ;;  %v2189_v37 = vpack.c.bf16 %v2094_v18, %v2093_v51  ;;  %v7086_v62 = vpop.eup %7085  ;;  %v1508_v30 = vadd.f32 1e-05, %v1380_v21  ;;  %v12572_v49 = vld [vmem:[#allocation43_spill] sm:$0xff] }
 0x224   :  { %v1964_v4 = vmul.f32 %v8999_v56, %v1829_v33  ;;  %v1032_v13 = vpop.xlane.xlu1 %1031  ;;  %v1507_v52 = vadd.f32 1e-05, %v1379_v17  ;;  %v7088_v42 = vpop.eup %7087  ;;  %12571 = vst [vmem:[#allocation36_spill] sm:$0xff] %v9181_v3  ;;  %v1856_v51 = vmul.f32 %v7086_v62, %v12572_v49  ;;  %v12574_v17 = vld [vmem:[#allocation45_spill] sm:$0xff] }
 0x225   :  { %v1029_v31 = vpop.xlane.xlu0 %1028  ;;  %v2100_v60 = vadd.f32 %v9019_v36, %v1965_v19  ;;  %v1388_v63 = vmul.f32 0.0625, %v1032_v13  ;;  %v1855_v33 = vmul.f32 %v7088_v42, %v12573_v58  ;;  %7097 = vrsqrt.f32 %v1508_v30 }
 0x226   :  { %v2099_v46 = vadd.f32 %v9019_v36, %v1964_v4  ;;  %v1387_v10 = vmul.f32 0.0625, %v1029_v31  ;;  %v1991_v59 = vmul.f32 %v8999_v56, %v1856_v51  ;;  %7099 = vrsqrt.f32 %v1507_v52 }
 0x227   :  { %v7090_v44 = vpop.eup %7089  ;;  %v1516_v5 = vadd.f32 1e-05, %v1388_v63  ;;  %1343 = vadd.xlane.f32.xlu1 %v8877_v1  ;;  %1340 = vadd.xlane.f32.xlu0 %v8884_v57  ;;  %v1990_v49 = vmul.f32 %v8999_v56, %v1855_v33  ;;  %v9192_v63 = vunpack.c.l.b16 %v2178_v54  ;;  %v9194_v31 = vunpack.c.h.b16 %v2178_v54 }
 0x228   :  { %v2192_v21 = vpack.c.bf16 %v2100_v60, %v2099_v46  ;;  %v1862_v19 = vmul.f32 %v7090_v44, %v12574_v17  ;;  %v1038_v4 = vpop.xlane.xlu1 %1037  ;;  %v7092_v62 = vpop.eup %7091  ;;  %v1515_v42 = vadd.f32 1e-05, %v1387_v10  ;;  %v2126_v57 = vadd.f32 %v9019_v36, %v1991_v59  ;;  %v12577_v46 = vld [vmem:[#allocation46_spill] sm:$0xff] }
 0x229   :  { %v1035_v13 = vpop.xlane.xlu0 %1034  ;;  %7101 = vrsqrt.f32 %v1516_v5  ;;  %v1390_v30 = vmul.f32 0.0625, %v1038_v4  ;;  %12575 = vst [vmem:[#allocation119_spill] sm:$0xff] %v9192_v63  ;;  %12576 = vst [vmem:[#allocation37_spill] sm:$0xff] %v9194_v31  ;;  %v2125_v60 = vadd.f32 %v9019_v36, %v1990_v49  ;;  %v1861_v52 = vmul.f32 %v7092_v62, %v12577_v46 }
 0x22a   :  { %v1997_v1 = vmul.f32 %v8999_v56, %v1862_v19  ;;  %7103 = vrsqrt.f32 %v1515_v42  ;;  %v9202_v10 = vunpack.c.l.b16 %v2189_v37  ;;  %v9204_v5 = vunpack.c.h.b16 %v2189_v37 }
 0x22b   :  { %v1518_v51 = vadd.f32 1e-05, %v1390_v30  ;;  %1349 = vadd.xlane.f32.xlu1 %v8887_v22  ;;  %1346 = vadd.xlane.f32.xlu0 %v8890_v7  ;;  %v1389_v44 = vmul.f32 0.0625, %v1035_v13  ;;  %v7094_v59 = vpop.eup %7093  ;;  %v2205_v17 = vpack.c.bf16 %v2126_v57, %v2125_v60  ;;  %v1996_v19 = vmul.f32 %v8999_v56, %v1861_v52  ;;  %v12580_v22 = vld [vmem:[#allocation47_spill] sm:$0xff]  ;;  %v12582_v13 = vld [vmem:[#allocation48_spill] sm:$0xff] }
 0x22c   :  { %12578 = vst [vmem:[#allocation38_spill] sm:$0xff] %v9204_v5  ;;  %v2132_v54 = vadd.f32 %v9019_v36, %v1997_v1  ;;  %v1098_v58 = vpop.xlane.xlu1 %1097  ;;  %v7096_v62 = vpop.eup %7095  ;;  %v9208_v49 = vunpack.c.l.b16 %v2192_v21  ;;  %v1762_v7 = vmul.f32 %v7094_v59, %v12580_v22  ;;  %v9211_v37 = vunpack.c.h.b16 %v2192_v21 }
 0x22d   :  { %v1095_v33 = vpop.xlane.xlu0 %1094  ;;  %7105 = vrsqrt.f32 %v1518_v51  ;;  %v1410_v4 = vmul.f32 0.0625, %v1098_v58  ;;  %v1517_v42 = vadd.f32 1e-05, %v1389_v44  ;;  %v2131_v1 = vadd.f32 %v9019_v36, %v1996_v19 }
 0x22e   :  { %12579 = vst [vmem:[#allocation39_spill] sm:$0xff] %v9208_v49  ;;  %v1409_v30 = vmul.f32 0.0625, %v1095_v33  ;;  %12581 = vst [vmem:[#allocation40_spill] sm:$0xff] %v9211_v37  ;;  %v1761_v46 = vmul.f32 %v7096_v62, %v12582_v13  ;;  %v1897_v60 = vmul.f32 %v8999_v56, %v1762_v7 }
 0x22f   :  { %1079 = vadd.xlane.f32.xlu1 %v8898_v23  ;;  %1076 = vadd.xlane.f32.xlu0 %v8906_v45  ;;  %7107 = vrsqrt.f32 %v1517_v42  ;;  %v1538_v52 = vadd.f32 1e-05, %v1410_v4  ;;  %v7098_v21 = vpop.eup %7097  ;;  %v2208_v33 = vpack.c.bf16 %v2132_v54, %v2131_v1  ;;  %v12583_v45 = vld [vmem:[#allocation49_spill] sm:$0xff]  ;;  %v9223_v4 = vunpack.c.l.b16 %v2205_v17  ;;  %v12586_v54 = vld [vmem:[#allocation50_spill] sm:$0xff] }
 0x230   :  { %v1537_v51 = vadd.f32 1e-05, %v1409_v30  ;;  %v1104_v58 = vpop.xlane.xlu1 %1103  ;;  %v1896_v59 = vmul.f32 %v8999_v56, %v1761_v46  ;;  %v7100_v22 = vpop.eup %7099  ;;  %v2032_v23 = vadd.f32 %v9019_v36, %v1897_v60  ;;  %v1764_v13 = vmul.f32 %v7098_v21, %v12583_v45  ;;  %v12587_v60 = vld [vmem:[#allocation51_spill] sm:$0xff] }
 0x231   :  { %v1101_v44 = vpop.xlane.xlu0 %1100  ;;  %v1412_v19 = vmul.f32 0.0625, %v1104_v58  ;;  %7109 = vrsqrt.f32 %v1538_v52  ;;  %12584 = vst [vmem:[#allocation123_spill] sm:$0xff] %v9223_v4  ;;  %v9225_v30 = vunpack.c.h.b16 %v2205_v17  ;;  %v1763_v1 = vmul.f32 %v7100_v22, %v12586_v54  ;;  %v12588_v54 = vld [vmem:[#allocation52_spill] sm:$0xff] }
 0x232   :  { %v1411_v62 = vmul.f32 0.0625, %v1101_v44  ;;  %v2031_v57 = vadd.f32 %v9019_v36, %v1896_v59  ;;  %v1899_v46 = vmul.f32 %v8999_v56, %v1764_v13  ;;  %7111 = vrsqrt.f32 %v1537_v51 }
 0x233   :  { %v7102_v42 = vpop.eup %7101  ;;  %12585 = vst [vmem:[#allocation41_spill] sm:$0xff] %v9225_v30  ;;  %1085 = vadd.xlane.f32.xlu1 %v8909_v15  ;;  %1082 = vadd.xlane.f32.xlu0 %v8912_v25  ;;  %v1540_v52 = vadd.f32 1e-05, %v1412_v19  ;;  %v1898_v17 = vmul.f32 %v8999_v56, %v1763_v1  ;;  %v9237_v37 = vunpack.c.l.b16 %v2208_v33  ;;  %v12618_v30 = vld [vmem:[#allocation106_spill] sm:$0xff] }
 0x234   :  { %v1772_v58 = vmul.f32 %v7102_v42, %v12587_v60  ;;  %v1128_v44 = vpop.xlane.xlu1 %1127  ;;  %v7104_v45 = vpop.eup %7103  ;;  %v2158_v7 = vpack.c.bf16 %v2032_v23, %v2031_v57  ;;  %v1539_v18 = vadd.f32 1e-05, %v1411_v62  ;;  %v2034_v22 = vadd.f32 %v9019_v36, %v1899_v46  ;;  %v12591_v23 = vld [vmem:[#allocation53_spill] sm:$0xff] }
 0x235   :  { %v1125_v21 = vpop.xlane.xlu0 %1124  ;;  %v1420_v59 = vmul.f32 0.0625, %v1128_v44  ;;  %v1771_v25 = vmul.f32 %v7104_v45, %v12588_v54  ;;  %7113 = vrsqrt.f32 %v1540_v52  ;;  %12589 = vst [vmem:[#allocation42_spill] sm:$0xff] %v9237_v37  ;;  %v2033_v19 = vadd.f32 %v9019_v36, %v1898_v17 }
 0x236   :  { %v1907_v15 = vmul.f32 %v8999_v56, %v1772_v58  ;;  %v9239_v51 = vunpack.c.l.b16 %v2158_v7  ;;  %7115 = vrsqrt.f32 %v1539_v18  ;;  %v1419_v52 = vmul.f32 0.0625, %v1125_v21 }
 0x237   :  { %v7106_v13 = vpop.eup %7105  ;;  %1175 = vadd.xlane.f32.xlu1 %v8916_v35  ;;  %1172 = vadd.xlane.f32.xlu0 %v8919_v6  ;;  %v1906_v62 = vmul.f32 %v8999_v56, %v1771_v25  ;;  %v1548_v1 = vadd.f32 1e-05, %v1420_v59  ;;  %v2159_v58 = vpack.c.bf16 %v2034_v22, %v2033_v19  ;;  %v9247_v17 = vunpack.c.h.b16 %v2208_v33 }
 0x238   :  { %12590 = vst [vmem:[#allocation43_spill] sm:$0xff] %v9239_v51  ;;  %v2042_v57 = vadd.f32 %v9019_v36, %v1907_v15  ;;  %v1774_v42 = vmul.f32 %v7106_v13, %v12591_v23  ;;  %v1134_v46 = vpop.xlane.xlu1 %1133  ;;  %v9251_v18 = vunpack.c.h.b16 %v2158_v7  ;;  %v12594_v15 = vld [vmem:[#allocation54_spill] sm:$0xff]  ;;  %v1547_v13 = vadd.f32 1e-05, %v1419_v52 }
 0x239   :  { %v1131_v60 = vpop.xlane.xlu0 %1130  ;;  %v1422_v44 = vmul.f32 0.0625, %v1134_v46  ;;  %v7108_v54 = vpop.eup %7107  ;;  %12592 = vst [vmem:[#allocation44_spill] sm:$0xff] %v9247_v17  ;;  %v2041_v35 = vadd.f32 %v9019_v36, %v1906_v62  ;;  %7117 = vrsqrt.f32 %v1548_v1  ;;  %v12595_v21 = vrot.slane %v9110_v2, 7  ;;  %v12596_v46 = vld [vmem:[#allocation55_spill] sm:$0xff] }
 0x23a   :  { %v1421_v45 = vmul.f32 0.0625, %v1131_v60  ;;  %v1909_v6 = vmul.f32 %v8999_v56, %v1774_v42  ;;  %12593 = vst [vmem:[#allocation45_spill] sm:$0xff] %v9251_v18  ;;  %v1773_v25 = vmul.f32 %v7108_v54, %v12594_v15  ;;  %7119 = vrsqrt.f32 %v1547_v13 }
 0x23b   :  { %1181 = vadd.xlane.f32.xlu1 %v8925_v16  ;;  %1178 = vadd.xlane.f32.xlu0 %v8931_v34  ;;  %v9260_v33 = vsel %vm2290_vm1, %v12595_v21, %v9239_v51  ;;  %v7110_v59 = vpop.eup %7109  ;;  %v2163_v22 = vpack.c.bf16 %v2042_v57, %v2041_v35  ;;  %v1550_v62 = vadd.f32 1e-05, %v1422_v44  ;;  %v9265_v52 = vunpack.c.l.b16 %v2159_v58 }
 0x23c   :  { %v2044_v19 = vadd.f32 %v9019_v36, %v1909_v6  ;;  %v1549_v7 = vadd.f32 1e-05, %v1421_v45  ;;  %v1212_v23 = vpop.xlane.xlu1 %1211  ;;  %v1908_v1 = vmul.f32 %v8999_v56, %v1773_v25  ;;  %v1794_v16 = vmul.f32 %v7110_v59, %v12596_v46  ;;  %v7112_v60 = vpop.eup %7111  ;;  %v12599_v45 = vld [vmem:[#allocation56_spill] sm:$0xff] }
 0x23d   :  { %v1209_v42 = vpop.xlane.xlu0 %1208  ;;  %v1448_v34 = vmul.f32 0.0625, %v1212_v23  ;;  %12597 = vst [vmem:[#allocation46_spill] sm:$0xff] %v9265_v52  ;;  %v9267_v54 = vunpack.c.l.b16 %v2163_v22  ;;  %7121 = vrsqrt.f32 %v1550_v62  ;;  %v1793_v35 = vmul.f32 %v7112_v60, %v12599_v45 }
 0x23e   :  { %v1447_v15 = vmul.f32 0.0625, %v1209_v42  ;;  %v2043_v57 = vadd.f32 %v9019_v36, %v1908_v1  ;;  %v1929_v44 = vmul.f32 %v8999_v56, %v1794_v16  ;;  %7123 = vrsqrt.f32 %v1549_v7  ;;  %v12602_v7 = vld [vmem:[#allocation57_spill] sm:$0xff] }
 0x23f   :  { %12598 = vst [vmem:[#allocation47_spill] sm:$0xff] %v9267_v54  ;;  %1259 = vadd.xlane.f32.xlu1 %v8945_v8  ;;  %1256 = vadd.xlane.f32.xlu0 %v8952_v43  ;;  %v7114_v6 = vpop.eup %7113  ;;  %v9274_v25 = vunpack.c.h.b16 %v2159_v58  ;;  %v9276_v13 = vunpack.c.h.b16 %v2163_v22  ;;  %v1576_v21 = vadd.f32 1e-05, %v1448_v34  ;;  %v1928_v16 = vmul.f32 %v8999_v56, %v1793_v35  ;;  %v12603_v8 = vld [vmem:[#allocation58_spill] sm:$0xff] }
 0x240   :  { %v1575_v59 = vadd.f32 1e-05, %v1447_v15  ;;  %v1218_v62 = vpop.xlane.xlu1 %1217  ;;  %v7116_v42 = vpop.eup %7115  ;;  %v2164_v1 = vpack.c.bf16 %v2044_v19, %v2043_v57  ;;  %v2064_v46 = vadd.f32 %v9019_v36, %v1929_v44  ;;  %v1796_v60 = vmul.f32 %v7114_v6, %v12602_v7 }
 0x241   :  { %12600 = vst [vmem:[#allocation48_spill] sm:$0xff] %v9274_v25  ;;  %12601 = vst [vmem:[#allocation49_spill] sm:$0xff] %v9276_v13  ;;  %v1215_v23 = vpop.xlane.xlu0 %1214  ;;  %v1795_v45 = vmul.f32 %v7116_v42, %v12603_v8  ;;  %7125 = vrsqrt.f32 %v1576_v21  ;;  %v1450_v43 = vmul.f32 0.0625, %v1218_v62  ;;  %v2063_v22 = vadd.f32 %v9019_v36, %v1928_v16  ;;  %v12605_v16 = vld [vmem:[#allocation60_spill] sm:$0xff] }
 0x242   :  { %v1449_v58 = vmul.f32 0.0625, %v1215_v23  ;;  %v1931_v34 = vmul.f32 %v8999_v56, %v1796_v60  ;;  %v12604_v19 = vrot.slane %v9097_v20, 1  ;;  %7127 = vrsqrt.f32 %v1575_v59  ;;  %v7013_v25 = vld [vmem:[#allocation9 + $0x8] sm:$0xff]  }
 0x243   :  { %1265 = vadd.xlane.f32.xlu1 %v8973_v55  ;;  %1262 = vadd.xlane.f32.xlu0 %v8980_v14  ;;  %v7118_v44 = vpop.eup %7117  ;;  %v1930_v35 = vmul.f32 %v8999_v56, %v1795_v45  ;;  %v1578_v6 = vadd.f32 1e-05, %v1450_v43  ;;  %v2174_v42 = vpack.c.bf16 %v2064_v46, %v2063_v22  ;;  %v9294_v60 = vunpack.c.l.b16 %v2164_v1  ;;  %v12609_v22 = vld [vmem:[#allocation61_spill] sm:$0xff] }
 0x244   :  { %v2291_v15 = vsel %vm2290_vm1, %v9265_v52, %v12604_v19  ;;  %v1577_v21 = vadd.f32 1e-05, %v1449_v58  ;;  %v1308_v62 = vpop.xlane.xlu1 %1307  ;;  %v2066_v55 = vadd.f32 %v9019_v36, %v1931_v34  ;;  %v1804_v14 = vmul.f32 %v7118_v44, %v12605_v16  ;;  %v7120_v57 = vpop.eup %7119  ;;  %6686 = vmatprep.subr.bf16.mxu1 %v7013_v25 }
 0x245   :  { %v1305_v23 = vpop.xlane.xlu0 %1304  ;;  %v1480_v7 = vmul.f32 0.0625, %v1308_v62  ;;  %12606 = vst [vmem:[#allocation50_spill] sm:$0xff] %v9294_v60  ;;  %v2065_v8 = vadd.f32 %v9019_v36, %v1930_v35  ;;  %7129 = vrsqrt.f32 %v1578_v6  ;;  %v9297_v17 = vunpack.c.h.b16 %v2164_v1  ;;  %6687 = vmatpush3.bf16.msra.mxu1 %v7013_v25 }
 0x246   :  { %v1479_v19 = vmul.f32 0.0625, %v1305_v23  ;;  %v1939_v59 = vmul.f32 %v8999_v56, %v1804_v14  ;;  %7131 = vrsqrt.f32 %v1577_v21  ;;  %v12608_v46 = vrot.slane %v9150_v28, 7  ;;  %v12611_v21 = vld [vmem:[#allocation64_spill] sm:$0xff] }
 0x247   :  { %12607 = vst [vmem:[#allocation51_spill] sm:$0xff] %v9297_v17  ;;  %1355 = vadd.xlane.f32.xlu1 %v8987_v26  ;;  %1352 = vadd.xlane.f32.xlu0 %v8994_v50  ;;  %v7122_v43 = vpop.eup %7121  ;;  %v2175_v58 = vpack.c.bf16 %v2066_v55, %v2065_v8  ;;  %v1803_v34 = vmul.f32 %v7120_v57, %v12609_v22  ;;  %v1608_v44 = vadd.f32 1e-05, %v1480_v7  ;;  %v9306_v23 = vunpack.c.l.b16 %v2174_v42  ;;  %v12613_v55 = vld [vmem:[#allocation65_spill] sm:$0xff]  ;;  %v12655_v17 = vld [vmem:[#allocation79_spill] sm:$0xff] }
 0x248   :  { %v2294_v45 = vsel %vm2293_vm2, %v12608_v46, %v2291_v15  ;;  %v1607_v35 = vadd.f32 1e-05, %v1479_v19  ;;  %v1314_v1 = vpop.xlane.xlu1 %1313  ;;  %v7124_v62 = vpop.eup %7123  ;;  %v1806_v26 = vmul.f32 %v7122_v43, %v12611_v21  ;;  %v9309_v14 = vunpack.c.h.b16 %v2174_v42 }
 0x249   :  { %v1311_v6 = vpop.xlane.xlu0 %1310  ;;  %12610 = vst [vmem:[#allocation52_spill] sm:$0xff] %v9306_v23  ;;  %v1482_v16 = vmul.f32 0.0625, %v1314_v1  ;;  %v2074_v15 = vadd.f32 %v9019_v36, %v1939_v59  ;;  %v1938_v46 = vmul.f32 %v8999_v56, %v1803_v34  ;;  %v1805_v8 = vmul.f32 %v7124_v62, %v12613_v55  ;;  %v12615_v62 = vld [vmem:[#allocation17_spill] sm:$0xff]  ;;  %v12617_v55 = vld [vmem:[#allocation18_spill] sm:$0xff] }
 0x24a   :  { %v1481_v50 = vmul.f32 0.0625, %v1311_v6  ;;  %12612 = vst [vmem:[#allocation53_spill] sm:$0xff] %v9309_v14  ;;  %v1941_v57 = vmul.f32 %v8999_v56, %v1806_v26  ;;  %7133 = vrsqrt.f32 %v1608_v44  ;;  %v9317_v22 = vunpack.c.l.b16 %v2175_v58 }
 0x24b   :  { %v1610_v7 = vadd.f32 1e-05, %v1482_v16  ;;  %1361 = vadd.xlane.f32.xlu1 %v9002_v32  ;;  %1358 = vadd.xlane.f32.xlu0 %v9008_v41  ;;  %v7126_v43 = vpop.eup %7125  ;;  %v2073_v42 = vadd.f32 %v9019_v36, %v1938_v46  ;;  %v1940_v59 = vmul.f32 %v8999_v56, %v1805_v8  ;;  %7135 = vrsqrt.f32 %v1607_v35 }
 0x24c   :  { %v1609_v19 = vadd.f32 1e-05, %v1481_v50  ;;  %12614 = vst [vmem:[#allocation54_spill] sm:$0xff] %v9317_v22  ;;  %v1044_v34 = vpop.xlane.xlu1 %1043  ;;  %v2076_v6 = vadd.f32 %v9019_v36, %v1941_v57  ;;  %v1832_v44 = vmul.f32 %v7126_v43, %v12615_v62  ;;  %v7128_v26 = vpop.eup %7127  ;;  %v9324_v50 = vunpack.c.h.b16 %v2175_v58  ;;  %v12619_v57 = vld [vmem:[#allocation109_spill] sm:$0xff] }
 0x24d   :  { %v1041_v1 = vpop.xlane.xlu0 %1040  ;;  %7137 = vrsqrt.f32 %v1610_v7  ;;  %v1392_v21 = vmul.f32 0.0625, %v1044_v34  ;;  %v2179_v32 = vpack.c.bf16 %v2074_v15, %v2073_v42  ;;  %v2075_v41 = vadd.f32 %v9019_v36, %v1940_v59 }
 0x24e   :  { %7139 = vrsqrt.f32 %v1609_v19  ;;  %v1391_v16 = vmul.f32 0.0625, %v1041_v1  ;;  %12616 = vst [vmem:[#allocation55_spill] sm:$0xff] %v9324_v50  ;;  %v1967_v46 = vmul.f32 %v8999_v56, %v1832_v44  ;;  %v1831_v35 = vmul.f32 %v7128_v26, %v12617_v55 }
 0x24f   :  { %v1520_v8 = vadd.f32 1e-05, %v1392_v21  ;;  %1271 = vadd.xlane.f32.xlu1 %v12618_v30  ;;  %1268 = vadd.xlane.f32.xlu0 %v12619_v57  ;;  %v7130_v43 = vpop.eup %7129  ;;  %v9330_v7 = vunpack.c.l.b16 %v2179_v32  ;;  %v2180_v34 = vpack.c.bf16 %v2076_v6, %v2075_v41  ;;  %v12621_v19 = vrot.slane %v9267_v54, 6  ;;  %v12622_v30 = vld [vmem:[#allocation66_spill] sm:$0xff]  ;;  %v12625_v6 = vld [vmem:[#allocation67_spill] sm:$0xff] }
 0x250   :  { %v1519_v15 = vadd.f32 1e-05, %v1391_v16  ;;  %v1050_v42 = vpop.xlane.xlu1 %1049  ;;  %v7132_v1 = vpop.eup %7131  ;;  %v2102_v62 = vadd.f32 %v9019_v36, %v1967_v46  ;;  %v1966_v44 = vmul.f32 %v8999_v56, %v1831_v35  ;;  %v1834_v21 = vmul.f32 %v7130_v43, %v12622_v30 }
 0x251   :  { %12620 = vst [vmem:[#allocation56_spill] sm:$0xff] %v9330_v7  ;;  %v1047_v59 = vpop.xlane.xlu0 %1046  ;;  %v9335_v58 = vsel %vm2296_vm3, %v12621_v19, %v2294_v45  ;;  %7141 = vrsqrt.f32 %v1520_v8  ;;  %v9340_v26 = vunpack.c.h.b16 %v2179_v32  ;;  %v9342_v55 = vunpack.c.l.b16 %v2180_v34 }
 0x252   :  { %v1833_v41 = vmul.f32 %v7132_v1, %v12625_v6  ;;  %7143 = vrsqrt.f32 %v1519_v15  ;;  %v2101_v16 = vadd.f32 %v9019_v36, %v1966_v44  ;;  %v1969_v45 = vmul.f32 %v8999_v56, %v1834_v21  ;;  %v12637_v1 = vld [vmem:[#allocation21_spill] sm:$0xff] }
 0x253   :  { %12623 = vst [vmem:[#allocation57_spill] sm:$0xff] %v9340_v26  ;;  %12624 = vst [vmem:[#allocation58_spill] sm:$0xff] %v9342_v55  ;;  %v1394_v57 = vmul.f32 0.0625, %v1050_v42  ;;  %v1393_v19 = vmul.f32 0.0625, %v1047_v59  ;;  %1277 = vadd.xlane.f32.xlu1 %v9036_v47  ;;  %1274 = vadd.xlane.f32.xlu0 %v9042_v24  ;;  %v9349_v46 = vunpack.c.h.b16 %v2180_v34  ;;  %v12627_v43 = vrot.slane %v9120_v0, 1  ;;  %v12656_v26 = vld [vmem:[#allocation80_spill] sm:$0xff] }
 0x254   :  { %v1968_v32 = vmul.f32 %v8999_v56, %v1833_v41  ;;  %v1140_v35 = vpop.xlane.xlu1 %1139  ;;  %v7134_v42 = vpop.eup %7133  ;;  %v2193_v59 = vpack.c.bf16 %v2102_v62, %v2101_v16  ;;  %v2104_v47 = vadd.f32 %v9019_v36, %v1969_v45  ;;  %v12628_v56 = vld [vmem:[#allocation68_spill] sm:$0xff]  ;;  %v12631_v62 = vrot.slane %v9163_v27, 6 }
 0x255   :  { %12626 = vst [vmem:[#allocation60_spill] sm:$0xff] %v9349_v46  ;;  %v1137_v8 = vpop.xlane.xlu0 %1136  ;;  %v9356_v15 = vsel %vm2290_vm1, %v9317_v22, %v12627_v43  ;;  %v1522_v44 = vadd.f32 1e-05, %v1394_v57  ;;  %v1521_v24 = vadd.f32 1e-05, %v1393_v19  ;;  %v7136_v34 = vpop.eup %7135  ;;  %v1864_v21 = vmul.f32 %v7134_v42, %v12628_v56  ;;  %v12630_v43 = vld [vmem:[#allocation69_spill] sm:$0xff] }
 0x256   :  { %v2103_v30 = vadd.f32 %v9019_v36, %v1968_v32  ;;  %v1424_v6 = vmul.f32 0.0625, %v1140_v35  ;;  %v1423_v41 = vmul.f32 0.0625, %v1137_v8  ;;  %v9362_v14 = vunpack.c.l.b16 %v2193_v59  ;;  %v9373_v57 = vld [vmem:[#allocation6] ss:$0 sm:$0xff]  ;;  %v12632_v32 = vld [vmem:[#allocation19_spill] sm:$0xff] }
 0x257   :  { %v7138_v5 = vpop.eup %7137  ;;  %v1863_v46 = vmul.f32 %v7136_v34, %v12630_v43  ;;  %7145 = vrsqrt.f32 %v1522_v44  ;;  %1367 = vadd.xlane.f32.xlu1 %v9073_v48  ;;  %1364 = vadd.xlane.f32.xlu0 %v9090_v38  ;;  %v9371_v16 = vsel %vm2293_vm2, %v12631_v62, %v9260_v33  ;;  %v1999_v19 = vmul.f32 %v9373_v57, %v1864_v21  ;;  %v12633_v38 = vld [vmem:[#allocation70_spill] sm:$0xff] }
 0x258   :  { %12629 = vst [vmem:[#allocation61_spill] sm:$0xff] %v9362_v14  ;;  %v7140_v36 = vpop.eup %7139  ;;  %v2194_v45 = vpack.c.bf16 %v2104_v47, %v2103_v30  ;;  %v1866_v35 = vmul.f32 %v7138_v5, %v12632_v32  ;;  %7147 = vrsqrt.f32 %v1521_v24  ;;  %v1146_v8 = vpop.xlane.xlu1 %1145  ;;  %v1552_v34 = vadd.f32 1e-05, %v1424_v6  ;;  %v9383_v47 = vld [vmem:[#allocation8] ss:$0 sm:$0xff] }
 0x259   :  { %v1143_v42 = vpop.xlane.xlu0 %1142  ;;  %v1998_v48 = vmul.f32 %v9373_v57, %v1863_v46  ;;  %v1865_v44 = vmul.f32 %v7140_v36, %v12633_v38  ;;  %v1551_v56 = vadd.f32 1e-05, %v1423_v41  ;;  %v9379_v43 = vunpack.c.h.b16 %v2193_v59  ;;  %v12636_v41 = vld [vmem:[#allocation20_spill] sm:$0xff] }
 0x25a   :  { %v9381_v33 = vunpack.c.l.b16 %v2194_v45  ;;  %v2134_v30 = vadd.f32 %v9383_v47, %v1999_v19  ;;  %v2001_v21 = vmul.f32 %v9373_v57, %v1866_v35  ;;  %7149 = vrsqrt.f32 %v1552_v34 }
 0x25b   :  { %12634 = vst [vmem:[#allocation64_spill] sm:$0xff] %v9379_v43  ;;  %v7142_v5 = vpop.eup %7141  ;;  %v2133_v24 = vadd.f32 %v9383_v47, %v1998_v48  ;;  %v2000_v62 = vmul.f32 %v9373_v57, %v1865_v44  ;;  %v1426_v46 = vmul.f32 0.0625, %v1146_v8  ;;  %1373 = vadd.xlane.f32.xlu1 %v9093_v29  ;;  %1370 = vadd.xlane.f32.xlu0 %v9104_v61  ;;  %7151 = vrsqrt.f32 %v1551_v56 }
 0x25c   :  { %12635 = vst [vmem:[#allocation65_spill] sm:$0xff] %v9381_v33  ;;  %v7144_v59 = vpop.eup %7143  ;;  %v2136_v6 = vadd.f32 %v9383_v47, %v2001_v21  ;;  %v1776_v36 = vmul.f32 %v7142_v5, %v12636_v41  ;;  %v1425_v19 = vmul.f32 0.0625, %v1143_v42  ;;  %v1194_v32 = vpop.xlane.xlu1 %1193  ;;  %v9396_v31 = vunpack.c.h.b16 %v2194_v45  ;;  %v12773_v33 = vld [vmem:[#allocation138_spill] sm:$0xff] }
 0x25d   :  { %v1191_v35 = vpop.xlane.xlu0 %1190  ;;  %v2209_v38 = vpack.c.bf16 %v2134_v30, %v2133_v24  ;;  %v2135_v48 = vadd.f32 %v9383_v47, %v2000_v62  ;;  %v1775_v44 = vmul.f32 %v7144_v59, %v12637_v1  ;;  %v1554_v34 = vadd.f32 1e-05, %v1426_v46 }
 0x25e   :  { %v1911_v8 = vmul.f32 %v9373_v57, %v1776_v36  ;;  %v1553_v29 = vadd.f32 1e-05, %v1425_v19  ;;  %v1442_v43 = vmul.f32 0.0625, %v1194_v32  ;;  %v1441_v61 = vmul.f32 0.0625, %v1191_v35  ;;  %12638 = vst [vmem:[#allocation17_spill] sm:$0xff] %v9396_v31 }
 0x25f   :  { %v9398_v21 = vunpack.c.l.b16 %v2209_v38  ;;  %v2210_v5 = vpack.c.bf16 %v2136_v6, %v2135_v48  ;;  %v1910_v42 = vmul.f32 %v9373_v57, %v1775_v44  ;;  %7153 = vrsqrt.f32 %v1554_v34  ;;  %v12642_v6 = vld [vmem:[#allocation72_spill] sm:$0xff]  ;;  %v12644_v44 = vld [vmem:[#allocation73_spill] sm:$0xff] }
 0x260   :  { %v2046_v56 = vadd.f32 %v9383_v47, %v1911_v8  ;;  %v1570_v30 = vadd.f32 1e-05, %v1442_v43  ;;  %v1569_v24 = vadd.f32 1e-05, %v1441_v61  ;;  %v1200_v62 = vpop.xlane.xlu1 %1199  ;;  %v9402_v59 = vunpack.c.h.b16 %v2209_v38 }
 0x261   :  { %12639 = vst [vmem:[#allocation18_spill] sm:$0xff] %v9398_v21  ;;  %v1197_v1 = vpop.xlane.xlu0 %1196  ;;  %v7146_v46 = vpop.eup %7145  ;;  %v9404_v41 = vunpack.c.l.b16 %v2210_v5  ;;  %v2045_v45 = vadd.f32 %v9383_v47, %v1910_v42  ;;  %7155 = vrsqrt.f32 %v1553_v29  ;;  %v1444_v32 = vmul.f32 0.0625, %v1200_v62 }
 0x262   :  { %12640 = vst [vmem:[#allocation106_spill] sm:$0xff] %v9402_v59  ;;  %v7148_v36 = vpop.eup %7147  ;;  %v1778_v19 = vmul.f32 %v7146_v46, %v12642_v6  ;;  %7157 = vrsqrt.f32 %v1570_v30  ;;  %v1443_v35 = vmul.f32 0.0625, %v1197_v1  ;;  %v9408_v48 = vunpack.c.h.b16 %v2210_v5 }
 0x263   :  { %12641 = vst [vmem:[#allocation109_spill] sm:$0xff] %v9404_v41  ;;  %v2165_v43 = vpack.c.bf16 %v2046_v56, %v2045_v45  ;;  %v1777_v34 = vmul.f32 %v7148_v36, %v12644_v44  ;;  %7159 = vrsqrt.f32 %v1569_v24  ;;  %v1572_v8 = vadd.f32 1e-05, %v1444_v32  ;;  %v12648_v36 = vld [vmem:[#allocation74_spill] sm:$0xff] }
 0x264   :  { %12643 = vst [vmem:[#allocation66_spill] sm:$0xff] %v9408_v48  ;;  %v1913_v38 = vmul.f32 %v9373_v57, %v1778_v19  ;;  %v1571_v61 = vadd.f32 1e-05, %v1443_v35  ;;  %v1224_v31 = vpop.xlane.xlu1 %1223  ;;  %v12645_v29 = vrot.slane %v9171_v11, 7  ;;  %v7150_v30 = vpop.eup %7149  ;;  %v12649_v35 = vld [vmem:[#allocation76_spill] sm:$0xff] }
 0x265   :  { %v1221_v42 = vpop.xlane.xlu0 %1220  ;;  %v9416_v62 = vunpack.c.l.b16 %v2165_v43  ;;  %v9418_v5 = vunpack.c.h.b16 %v2165_v43  ;;  %v1912_v56 = vmul.f32 %v9373_v57, %v1777_v34  ;;  %v1452_v1 = vmul.f32 0.0625, %v1224_v31  ;;  %v7152_v24 = vpop.eup %7151 }
 0x266   :  { %v2313_v46 = vsel %vm2293_vm2, %v12645_v29, %v9356_v15  ;;  %v2048_v45 = vadd.f32 %v9383_v47, %v1913_v38  ;;  %v1808_v6 = vmul.f32 %v7150_v30, %v12648_v36  ;;  %7161 = vrsqrt.f32 %v1572_v8 }
 0x267   :  { %12646 = vst [vmem:[#allocation67_spill] sm:$0xff] %v9416_v62  ;;  %12647 = vst [vmem:[#allocation68_spill] sm:$0xff] %v9418_v5  ;;  %v1451_v19 = vmul.f32 0.0625, %v1221_v42  ;;  %v2047_v32 = vadd.f32 %v9383_v47, %v1912_v56  ;;  %v1807_v44 = vmul.f32 %v7152_v24, %v12649_v35  ;;  %7163 = vrsqrt.f32 %v1571_v61 }
 0x268   :  { %v1580_v15 = vadd.f32 1e-05, %v1452_v1  ;;  %v1943_v29 = vmul.f32 %v9373_v57, %v1808_v6  ;;  %v1230_v48 = vpop.xlane.xlu1 %1229  ;;  %v2298_v31 = vrot.slane %v9416_v62, 5  ;;  %v12650_v34 = vrot.slane %v9330_v7, 6 }
 0x269   :  { %v1579_v43 = vadd.f32 1e-05, %v1451_v19  ;;  %v1227_v59 = vpop.xlane.xlu0 %1226  ;;  %v2166_v8 = vpack.c.bf16 %v2048_v45, %v2047_v32  ;;  %v1942_v42 = vmul.f32 %v9373_v57, %v1807_v44  ;;  %v1454_v30 = vmul.f32 0.0625, %v1230_v48  ;;  %v7154_v56 = vpop.eup %7153  ;;  %v12653_v45 = vld [vmem:[#allocation77_spill] sm:$0xff]  ;;  %v12654_v48 = vld [vmem:[#allocation78_spill] sm:$0xff] }
 0x26a   :  { %v9430_v38 = vsel %vm2296_vm3, %v12650_v34, %v2313_v46  ;;  %7165 = vrsqrt.f32 %v1580_v15  ;;  %v2078_v61 = vadd.f32 %v9383_v47, %v1943_v29  ;;  %v1453_v1 = vmul.f32 0.0625, %v1227_v59 }
 0x26b   :  { %7167 = vrsqrt.f32 %v1579_v43  ;;  %v9436_v24 = vsel %vm2299_vm4, %v2298_v31, %v9335_v58  ;;  %v7156_v36 = vpop.eup %7155  ;;  %v9438_v6 = vunpack.c.l.b16 %v2166_v8  ;;  %v9440_v19 = vunpack.c.h.b16 %v2166_v8 }
 0x26c   :  { %v2077_v46 = vadd.f32 %v9383_v47, %v1942_v42  ;;  %v1810_v32 = vmul.f32 %v7154_v56, %v12653_v45  ;;  %v7158_v35 = vpop.eup %7157  ;;  %v1809_v44 = vmul.f32 %v7156_v36, %v12654_v48  ;;  %v1582_v15 = vadd.f32 1e-05, %v1454_v30  ;;  %v1290_v43 = vpop.xlane.xlu1 %1289 }
 0x26d   :  { %12651 = vst [vmem:[#allocation69_spill] sm:$0xff] %v9438_v6  ;;  %12652 = vst [vmem:[#allocation19_spill] sm:$0xff] %v9440_v19  ;;  %v1581_v29 = vadd.f32 1e-05, %v1453_v1  ;;  %v1287_v59 = vpop.xlane.xlu0 %1286  ;;  %v4386_v34 = vrot.slane %v9294_v60, 5  ;;  %v7160_v58 = vpop.eup %7159  ;;  %v1826_v8 = vmul.f32 %v7158_v35, %v12655_v17  ;;  %v1474_v19 = vmul.f32 0.0625, %v1290_v43 }
 0x26e   :  { %v2181_v31 = vpack.c.bf16 %v2078_v61, %v2077_v46  ;;  %v1945_v18 = vmul.f32 %v9373_v57, %v1810_v32  ;;  %v1944_v42 = vmul.f32 %v9373_v57, %v1809_v44  ;;  %v1825_v56 = vmul.f32 %v7160_v58, %v12656_v26  ;;  %v12659_v43 = vld [vmem:[#allocation81_spill] sm:$0xff] }
 0x26f   :  { %7169 = vrsqrt.f32 %v1582_v15  ;;  %v1473_v45 = vmul.f32 0.0625, %v1287_v59  ;;  %v1961_v48 = vmul.f32 %v9373_v57, %v1826_v8  ;;  %v1602_v32 = vadd.f32 1e-05, %v1474_v19  ;;  %v12660_v8 = vld [vmem:[#allocation82_spill] sm:$0xff] }
 0x270   :  { %v9450_v36 = vunpack.c.l.b16 %v2181_v31  ;;  %v9452_v30 = vunpack.c.h.b16 %v2181_v31  ;;  %v2080_v1 = vadd.f32 %v9383_v47, %v1945_v18  ;;  %v7162_v61 = vpop.eup %7161  ;;  %v2079_v46 = vadd.f32 %v9383_v47, %v1944_v42  ;;  %v1296_v35 = vpop.xlane.xlu1 %1295 }
 0x271   :  { %v1960_v17 = vmul.f32 %v9373_v57, %v1825_v56  ;;  %7171 = vrsqrt.f32 %v1581_v29  ;;  %v1293_v44 = vpop.xlane.xlu0 %1292  ;;  %v7164_v26 = vpop.eup %7163  ;;  %v2096_v15 = vadd.f32 %v9383_v47, %v1961_v48  ;;  %v1828_v59 = vmul.f32 %v7162_v61, %v12659_v43 }
 0x272   :  { %12657 = vst [vmem:[#allocation70_spill] sm:$0xff] %v9450_v36  ;;  %12658 = vst [vmem:[#allocation20_spill] sm:$0xff] %v9452_v30  ;;  %v1601_v58 = vadd.f32 1e-05, %v1473_v45  ;;  %v1476_v31 = vmul.f32 0.0625, %v1296_v35  ;;  %v2182_v30 = vpack.c.bf16 %v2080_v1, %v2079_v46  ;;  %v1827_v3 = vmul.f32 %v7164_v26, %v12660_v8  ;;  %v12663_v35 = vld [vmem:[#allocation83_spill] sm:$0xff] }
 0x273   :  { %v2095_v18 = vadd.f32 %v9383_v47, %v1960_v17  ;;  %7173 = vrsqrt.f32 %v1602_v32  ;;  %v1963_v56 = vmul.f32 %v9373_v57, %v1828_v59  ;;  %v1475_v29 = vmul.f32 0.0625, %v1293_v44  ;;  %v12664_v26 = vld [vmem:[#allocation84_spill] sm:$0xff] }
 0x274   :  { %v7166_v42 = vpop.eup %7165  ;;  %7175 = vrsqrt.f32 %v1601_v58  ;;  %v1604_v19 = vadd.f32 1e-05, %v1476_v31  ;;  %v9463_v5 = vunpack.c.l.b16 %v2182_v30  ;;  %v9465_v48 = vunpack.c.h.b16 %v2182_v30  ;;  %v1320_v1 = vpop.xlane.xlu1 %1319 }
 0x275   :  { %v7168_v50 = vpop.eup %7167  ;;  %v2190_v61 = vpack.c.bf16 %v2096_v15, %v2095_v18  ;;  %v1962_v45 = vmul.f32 %v9373_v57, %v1827_v3  ;;  %v1317_v46 = vpop.xlane.xlu0 %1316  ;;  %v2098_v17 = vadd.f32 %v9383_v47, %v1963_v56  ;;  %v1836_v32 = vmul.f32 %v7166_v42, %v12663_v35 }
 0x276   :  { %12661 = vst [vmem:[#allocation21_spill] sm:$0xff] %v9463_v5  ;;  %12662 = vst [vmem:[#allocation72_spill] sm:$0xff] %v9465_v48  ;;  %v1835_v43 = vmul.f32 %v7168_v50, %v12664_v26  ;;  %7177 = vrsqrt.f32 %v1604_v19  ;;  %v1603_v30 = vadd.f32 1e-05, %v1475_v29  ;;  %v1484_v31 = vmul.f32 0.0625, %v1320_v1  ;;  %v12669_v48 = vld [vmem:[#allocation86_spill] sm:$0xff] }
 0x277   :  { %v9471_v59 = vunpack.c.l.b16 %v2190_v61  ;;  %v9473_v44 = vunpack.c.h.b16 %v2190_v61  ;;  %v2097_v58 = vadd.f32 %v9383_v47, %v1962_v45  ;;  %v1971_v15 = vmul.f32 %v9373_v57, %v1836_v32  ;;  %v12667_v45 = vld [vmem:[#allocation85_spill] sm:$0xff] }
 0x278   :  { %v1970_v3 = vmul.f32 %v9373_v57, %v1835_v43  ;;  %v1483_v18 = vmul.f32 0.0625, %v1317_v46  ;;  %7179 = vrsqrt.f32 %v1603_v30  ;;  %v1326_v42 = vpop.xlane.xlu1 %1325  ;;  %v2316_v50 = vrot.slane %v9450_v36, 5 }
 0x279   :  { %12665 = vst [vmem:[#allocation73_spill] sm:$0xff] %v9471_v59  ;;  %12666 = vst [vmem:[#allocation74_spill] sm:$0xff] %v9473_v44  ;;  %v7170_v8 = vpop.eup %7169  ;;  %v2191_v56 = vpack.c.bf16 %v2098_v17, %v2097_v58  ;;  %v1323_v35 = vpop.xlane.xlu0 %1322  ;;  %v9481_v19 = vsel %vm2296_vm3, %v4386_v34, %v9371_v16  ;;  %v2106_v61 = vadd.f32 %v9383_v47, %v1971_v15  ;;  %v1612_v26 = vadd.f32 1e-05, %v1484_v31 }
 0x27a   :  { %v2105_v29 = vadd.f32 %v9383_v47, %v1970_v3  ;;  %v1838_v32 = vmul.f32 %v7170_v8, %v12667_v45  ;;  %v1611_v43 = vadd.f32 1e-05, %v1483_v18  ;;  %v1486_v58 = vmul.f32 0.0625, %v1326_v42 }
 0x27b   :  { %v7172_v1 = vpop.eup %7171  ;;  %v9486_v46 = vunpack.c.l.b16 %v2191_v56  ;;  %v9488_v17 = vunpack.c.h.b16 %v2191_v56  ;;  %7181 = vrsqrt.f32 %v1612_v26  ;;  %v1485_v3 = vmul.f32 0.0625, %v1323_v35 }
 0x27c   :  { %v2195_v30 = vpack.c.bf16 %v2106_v61, %v2105_v29  ;;  %v1973_v44 = vmul.f32 %v9373_v57, %v1838_v32  ;;  %v1837_v16 = vmul.f32 %v7172_v1, %v12669_v48  ;;  %7183 = vrsqrt.f32 %v1611_v43  ;;  %v1056_v13 = vpop.xlane.xlu1 %1055  ;;  %v12672_v61 = vld [vmem:[#allocation87_spill] sm:$0xff]  ;;  %v12673_v32 = vld [vmem:[#allocation88_spill] sm:$0xff] }
 0x27d   :  { %12668 = vst [vmem:[#allocation76_spill] sm:$0xff] %v9488_v17  ;;  %v7174_v34 = vpop.eup %7173  ;;  %v1614_v15 = vadd.f32 1e-05, %v1486_v58  ;;  %v1053_v8 = vpop.xlane.xlu0 %1052  ;;  %v9494_v31 = vsel %vm2299_vm4, %v2316_v50, %v9430_v38  ;;  %v1613_v35 = vadd.f32 1e-05, %v1485_v3  ;;  %v1396_v38 = vmul.f32 0.0625, %v1056_v13 }
 0x27e   :  { %v7176_v56 = vpop.eup %7175  ;;  %v9496_v45 = vunpack.c.l.b16 %v2195_v30  ;;  %v9498_v18 = vunpack.c.h.b16 %v2195_v30  ;;  %v2108_v42 = vadd.f32 %v9383_v47, %v1973_v44  ;;  %v1972_v48 = vmul.f32 %v9373_v57, %v1837_v16  ;;  %v12674_v44 = vld [vmem:[#allocation89_spill] sm:$0xff] }
 0x27f   :  { %v1858_v29 = vmul.f32 %v7174_v34, %v12672_v61  ;;  %v1857_v26 = vmul.f32 %v7176_v56, %v12673_v32  ;;  %7185 = vrsqrt.f32 %v1614_v15  ;;  %v1395_v50 = vmul.f32 0.0625, %v1053_v8 }
 0x280   :  { %12670 = vst [vmem:[#allocation77_spill] sm:$0xff] %v9496_v45  ;;  %12671 = vst [vmem:[#allocation78_spill] sm:$0xff] %v9498_v18  ;;  %v7178_v1 = vpop.eup %7177  ;;  %v2107_v43 = vadd.f32 %v9383_v47, %v1972_v48  ;;  %v4388_v58 = vrot.slane %v9438_v6, 4  ;;  %7187 = vrsqrt.f32 %v1613_v35  ;;  %v1062_v16 = vpop.xlane.xlu1 %1061  ;;  %v1524_v56 = vadd.f32 1e-05, %v1396_v38  ;;  %v7014_v6 = vld [vmem:[#allocation9 + $0x80] sm:$0xff]  }
 0x281   :  { %v1993_v30 = vmul.f32 %v9373_v57, %v1858_v29  ;;  %v1992_v18 = vmul.f32 %v9373_v57, %v1857_v26  ;;  %v1860_v17 = vmul.f32 %v7178_v1, %v12674_v44  ;;  %v1059_v34 = vpop.xlane.xlu0 %1058  ;;  %v1523_v15 = vadd.f32 1e-05, %v1395_v50  ;;  %v12677_v1 = vld [vmem:[#allocation90_spill] sm:$0xff]  ;;  %6782 = vmatprep.subr.bf16.mxu0 %v7014_v6 }
 0x282   :  { %v2196_v61 = vpack.c.bf16 %v2108_v42, %v2107_v43  ;;  %v1398_v3 = vmul.f32 0.0625, %v1062_v16  ;;  %v7180_v32 = vpop.eup %7179  ;;  %v1397_v40 = vmul.f32 0.0625, %v1059_v34  ;;  %7189 = vrsqrt.f32 %v1524_v56  ;;  %v12680_v56 = vld [vmem:[#allocation91_spill] sm:$0xff]  ;;  %6783 = vmatpush3.bf16.msra.mxu0 %v7014_v6  ;;  %v12686_v6 = vld [vmem:[#allocation94_spill] sm:$0xff] }
 0x283   :  { %v2128_v48 = vadd.f32 %v9383_v47, %v1993_v30  ;;  %v2127_v13 = vadd.f32 %v9383_v47, %v1992_v18  ;;  %v1995_v8 = vmul.f32 %v9373_v57, %v1860_v17  ;;  %v1859_v35 = vmul.f32 %v7180_v32, %v12677_v1 }
 0x284   :  { %v9512_v29 = vunpack.c.l.b16 %v2196_v61  ;;  %v9514_v26 = vunpack.c.h.b16 %v2196_v61  ;;  %7191 = vrsqrt.f32 %v1523_v15  ;;  %v1526_v43 = vadd.f32 1e-05, %v1398_v3  ;;  %v1152_v38 = vpop.xlane.xlu1 %1151  ;;  %v12681_v3 = vld [vmem:[#allocation92_spill] sm:$0xff] }
 0x285   :  { %v2206_v44 = vpack.c.bf16 %v2128_v48, %v2127_v13  ;;  %v2130_v42 = vadd.f32 %v9383_v47, %v1995_v8  ;;  %v1149_v50 = vpop.xlane.xlu0 %1148  ;;  %v7182_v30 = vpop.eup %7181  ;;  %v1994_v18 = vmul.f32 %v9373_v57, %v1859_v35  ;;  %v1525_v16 = vadd.f32 1e-05, %v1397_v40 }
 0x286   :  { %12675 = vst [vmem:[#allocation79_spill] sm:$0xff] %v9512_v29  ;;  %12676 = vst [vmem:[#allocation80_spill] sm:$0xff] %v9514_v26  ;;  %v1428_v17 = vmul.f32 0.0625, %v1152_v38  ;;  %v1427_v34 = vmul.f32 0.0625, %v1149_v50  ;;  %v7184_v61 = vpop.eup %7183  ;;  %v1868_v48 = vmul.f32 %v7182_v30, %v12680_v56  ;;  %7193 = vrsqrt.f32 %v1526_v43 }
 0x287   :  { %v9519_v26 = vunpack.c.l.b16 %v2206_v44  ;;  %v9521_v32 = vunpack.c.h.b16 %v2206_v44  ;;  %v2129_v15 = vadd.f32 %v9383_v47, %v1994_v18  ;;  %v1867_v13 = vmul.f32 %v7184_v61, %v12681_v3 }
 0x288   :  { %7195 = vrsqrt.f32 %v1525_v16  ;;  %v1556_v8 = vadd.f32 1e-05, %v1428_v17  ;;  %v2003_v1 = vmul.f32 %v9373_v57, %v1868_v48  ;;  %v1555_v35 = vadd.f32 1e-05, %v1427_v34  ;;  %v1158_v38 = vpop.xlane.xlu1 %1157  ;;  %v12683_v17 = vld [vmem:[#allocation93_spill] sm:$0xff] }
 0x289   :  { %12678 = vst [vmem:[#allocation81_spill] sm:$0xff] %v9519_v26  ;;  %12679 = vst [vmem:[#allocation82_spill] sm:$0xff] %v9521_v32  ;;  %v7186_v40 = vpop.eup %7185  ;;  %v1155_v50 = vpop.xlane.xlu0 %1154  ;;  %v9529_v44 = vsel %vm2299_vm4, %v4388_v58, %v9481_v19  ;;  %v12682_v43 = vrot.slane %v9141_v53, 7  ;;  %v2207_v18 = vpack.c.bf16 %v2130_v42, %v2129_v15  ;;  %v2002_v16 = vmul.f32 %v9373_v57, %v1867_v13 }
 0x28a   :  { %v1870_v61 = vmul.f32 %v7186_v40, %v12683_v17  ;;  %7197 = vrsqrt.f32 %v1556_v8  ;;  %v7188_v34 = vpop.eup %7187  ;;  %v2138_v56 = vadd.f32 %v9383_v47, %v2003_v1  ;;  %v1430_v48 = vmul.f32 0.0625, %v1158_v38 }
 0x28b   :  { %v4397_v30 = vsel %vm2290_vm1, %v12682_v43, %v9306_v23  ;;  %7199 = vrsqrt.f32 %v1555_v35  ;;  %v1429_v19 = vmul.f32 0.0625, %v1155_v50  ;;  %v9538_v58 = vunpack.c.l.b16 %v2207_v18 }
 0x28c   :  { %v9540_v3 = vunpack.c.h.b16 %v2207_v18  ;;  %v2137_v43 = vadd.f32 %v9383_v47, %v2002_v16  ;;  %v2005_v25 = vmul.f32 %v9373_v57, %v1870_v61  ;;  %v1869_v42 = vmul.f32 %v7188_v34, %v12686_v6  ;;  %v1236_v40 = vpop.xlane.xlu1 %1235  ;;  %v7190_v35 = vpop.eup %7189  ;;  %v7015_v16 = vld [vmem:[#allocation9] sm:$0xff]  }
 0x28d   :  { %12684 = vst [vmem:[#allocation83_spill] sm:$0xff] %v9538_v58  ;;  %v1558_v15 = vadd.f32 1e-05, %v1430_v48  ;;  %v1557_v13 = vadd.f32 1e-05, %v1429_v19  ;;  %v1233_v8 = vpop.xlane.xlu0 %1232  ;;  %v12687_v17 = vrot.slane %v9192_v63, 6  ;;  %6692 = vmatprep.subr.bf16.mxu1 %v7015_v16 }
 0x28e   :  { %12685 = vst [vmem:[#allocation84_spill] sm:$0xff] %v9540_v3  ;;  %v2211_v38 = vpack.c.bf16 %v2138_v56, %v2137_v43  ;;  %v2140_v50 = vadd.f32 %v9383_v47, %v2005_v25  ;;  %v1456_v18 = vmul.f32 0.0625, %v1236_v40  ;;  %v1455_v32 = vmul.f32 0.0625, %v1233_v8  ;;  %v7016_v3 = vld [vmem:[#allocation9 + $0x88] sm:$0xff]   ;;  %v7192_v61 = vpop.eup %7191  ;;  %v12692_v63 = vld [vmem:[#allocation97_spill] sm:$0xff] }
 0x28f   :  { %v9548_v1 = vsel %vm2293_vm2, %v12687_v17, %v4397_v30  ;;  %v2004_v34 = vmul.f32 %v9373_v57, %v1869_v42  ;;  %v12688_v48 = vld [vmem:[#allocation95_spill] sm:$0xff]  ;;  %7201 = vrsqrt.f32 %v1558_v15  ;;  %v12691_v17 = vld [vmem:[#allocation96_spill] sm:$0xff]  ;;  %6788 = vmatprep.subr.bf16.mxu0 %v7016_v3  ;;  %v12693_v3 = vld [vmem:[#allocation98_spill] sm:$0xff] }
 0x290   :  { %v1780_v19 = vmul.f32 %v7190_v35, %v12688_v48  ;;  %v9554_v53 = vunpack.c.l.b16 %v2211_v38  ;;  %v9556_v30 = vunpack.c.h.b16 %v2211_v38  ;;  %v1779_v56 = vmul.f32 %v7192_v61, %v12691_v17  ;;  %v7194_v43 = vpop.eup %7193  ;;  %v1242_v35 = vpop.xlane.xlu1 %1241 }
 0x291   :  { %7203 = vrsqrt.f32 %v1557_v13  ;;  %v2139_v25 = vadd.f32 %v9383_v47, %v2004_v34  ;;  %v1584_v42 = vadd.f32 1e-05, %v1456_v18  ;;  %v1583_v8 = vadd.f32 1e-05, %v1455_v32  ;;  %v1239_v15 = vpop.xlane.xlu0 %1238 }
 0x292   :  { %12689 = vst [vmem:[#allocation85_spill] sm:$0xff] %v9554_v53  ;;  %12690 = vst [vmem:[#allocation86_spill] sm:$0xff] %v9556_v30  ;;  %v1915_v40 = vmul.f32 %v9373_v57, %v1780_v19  ;;  %v7196_v48 = vpop.eup %7195  ;;  %v1914_v6 = vmul.f32 %v9373_v57, %v1779_v56  ;;  %v1782_v38 = vmul.f32 %v7194_v43, %v12692_v63  ;;  %v1458_v30 = vmul.f32 0.0625, %v1242_v35 }
 0x293   :  { %v1457_v23 = vmul.f32 0.0625, %v1239_v15  ;;  %v2212_v61 = vpack.c.bf16 %v2140_v50, %v2139_v25  ;;  %v1781_v16 = vmul.f32 %v7196_v48, %v12693_v3  ;;  %7205 = vrsqrt.f32 %v1584_v42  ;;  %v12696_v50 = vld [vmem:[#allocation99_spill] sm:$0xff]  ;;  %v12697_v15 = vld [vmem:[#allocation100_spill] sm:$0xff] }
 0x294   :  { %v2050_v13 = vadd.f32 %v9383_v47, %v1915_v40  ;;  %v7198_v34 = vpop.eup %7197  ;;  %v2049_v19 = vadd.f32 %v9383_v47, %v1914_v6  ;;  %v1917_v32 = vmul.f32 %v9373_v57, %v1782_v38  ;;  %7207 = vrsqrt.f32 %v1583_v8  ;;  %v1332_v25 = vpop.xlane.xlu1 %1331 }
 0x295   :  { %v1586_v18 = vadd.f32 1e-05, %v1458_v30  ;;  %v7200_v17 = vpop.eup %7199  ;;  %v9567_v2 = vunpack.c.l.b16 %v2212_v61  ;;  %v9569_v56 = vunpack.c.h.b16 %v2212_v61  ;;  %v1916_v63 = vmul.f32 %v9373_v57, %v1781_v16  ;;  %v1329_v40 = vpop.xlane.xlu0 %1328 }
 0x296   :  { %v1812_v43 = vmul.f32 %v7198_v34, %v12696_v50  ;;  %v2167_v35 = vpack.c.bf16 %v2050_v13, %v2049_v19  ;;  %v2052_v42 = vadd.f32 %v9383_v47, %v1917_v32  ;;  %v1811_v6 = vmul.f32 %v7200_v17, %v12697_v15 }
 0x297   :  { %12694 = vst [vmem:[#allocation87_spill] sm:$0xff] %v9567_v2  ;;  %12695 = vst [vmem:[#allocation88_spill] sm:$0xff] %v9569_v56  ;;  %7209 = vrsqrt.f32 %v1586_v18  ;;  %v2051_v8 = vadd.f32 %v9383_v47, %v1916_v63  ;;  %v1585_v48 = vadd.f32 1e-05, %v1457_v23  ;;  %v1488_v38 = vmul.f32 0.0625, %v1332_v25 }
 0x298   :  { %v1947_v30 = vmul.f32 %v9373_v57, %v1812_v43  ;;  %v9577_v61 = vunpack.c.l.b16 %v2167_v35  ;;  %v9579_v3 = vunpack.c.h.b16 %v2167_v35  ;;  %v1946_v16 = vmul.f32 %v9373_v57, %v1811_v6  ;;  %v1338_v17 = vpop.xlane.xlu1 %1337  ;;  %v12700_v43 = vld [vmem:[#allocation101_spill] sm:$0xff] }
 0x299   :  { %v1487_v34 = vmul.f32 0.0625, %v1329_v40  ;;  %v7202_v13 = vpop.eup %7201  ;;  %v2168_v19 = vpack.c.bf16 %v2052_v42, %v2051_v8  ;;  %7211 = vrsqrt.f32 %v1585_v48  ;;  %v1616_v18 = vadd.f32 1e-05, %v1488_v38  ;;  %v1335_v63 = vpop.xlane.xlu0 %1334  ;;  %v12703_v40 = vld [vmem:[#allocation102_spill] sm:$0xff] }
 0x29a   :  { %12698 = vst [vmem:[#allocation89_spill] sm:$0xff] %v9577_v61  ;;  %12699 = vst [vmem:[#allocation90_spill] sm:$0xff] %v9579_v3  ;;  %v2082_v32 = vadd.f32 %v9383_v47, %v1947_v30  ;;  %v2081_v23 = vadd.f32 %v9383_v47, %v1946_v16  ;;  %v1814_v25 = vmul.f32 %v7202_v13, %v12700_v43  ;;  %v1490_v56 = vmul.f32 0.0625, %v1338_v17 }
 0x29b   :  { %v7204_v50 = vpop.eup %7203  ;;  %v1615_v15 = vadd.f32 1e-05, %v1487_v34  ;;  %v9585_v35 = vunpack.c.l.b16 %v2168_v19  ;;  %v9587_v3 = vunpack.c.h.b16 %v2168_v19  ;;  %7213 = vrsqrt.f32 %v1616_v18  ;;  %v12706_v18 = vld [vmem:[#allocation103_spill] sm:$0xff] }
 0x29c   :  { %v1813_v6 = vmul.f32 %v7204_v50, %v12703_v40  ;;  %v2183_v42 = vpack.c.bf16 %v2082_v32, %v2081_v23  ;;  %v1949_v8 = vmul.f32 %v9373_v57, %v1814_v25  ;;  %v1618_v30 = vadd.f32 1e-05, %v1490_v56  ;;  %v1068_v60 = vpop.xlane.xlu1 %1067  ;;  %v12707_v25 = vld [vmem:[#allocation104_spill] sm:$0xff] }
 0x29d   :  { %12701 = vst [vmem:[#allocation91_spill] sm:$0xff] %v9585_v35  ;;  %12702 = vst [vmem:[#allocation92_spill] sm:$0xff] %v9587_v3  ;;  %7215 = vrsqrt.f32 %v1615_v15  ;;  %v7206_v48 = vpop.eup %7205  ;;  %v1489_v16 = vmul.f32 0.0625, %v1335_v63  ;;  %v1065_v13 = vpop.xlane.xlu0 %1064  ;;  %v2301_v34 = vrot.slane %v9577_v61, 4  ;;  %v4390_v17 = vrot.slane %v9585_v35, 3 }
 0x29e   :  { %v1948_v38 = vmul.f32 %v9373_v57, %v1813_v6  ;;  %v7208_v19 = vpop.eup %7207  ;;  %v9594_v43 = vunpack.c.l.b16 %v2183_v42  ;;  %v9596_v50 = vunpack.c.h.b16 %v2183_v42  ;;  %v2084_v32 = vadd.f32 %v9383_v47, %v1949_v8 }
 0x29f   :  { %v1840_v23 = vmul.f32 %v7206_v48, %v12706_v18  ;;  %v1839_v15 = vmul.f32 %v7208_v19, %v12707_v25  ;;  %7217 = vrsqrt.f32 %v1618_v30  ;;  %v1617_v63 = vadd.f32 1e-05, %v1489_v16 }
 0x2a0   :  { %12704 = vst [vmem:[#allocation93_spill] sm:$0xff] %v9594_v43  ;;  %12705 = vst [vmem:[#allocation94_spill] sm:$0xff] %v9596_v50  ;;  %v2083_v56 = vadd.f32 %v9383_v47, %v1948_v38  ;;  %v1400_v3 = vmul.f32 0.0625, %v1068_v60  ;;  %v1399_v35 = vmul.f32 0.0625, %v1065_v13  ;;  %v9605_v27 = vsel %vm2302_vm5, %v2301_v34, %v9436_v24  ;;  %v12708_v50 = vld [vmem:[#allocation107_spill] sm:$0xff]  ;;  %v1074_v38 = vpop.xlane.xlu1 %1073 }
 0x2a1   :  { %v7210_v40 = vpop.eup %7209  ;;  %v1975_v6 = vmul.f32 %v9373_v57, %v1840_v23  ;;  %v1974_v8 = vmul.f32 %v9373_v57, %v1839_v15  ;;  %7219 = vrsqrt.f32 %v1617_v63  ;;  %v1071_v18 = vpop.xlane.xlu0 %1070  ;;  %v1402_v25 = vmul.f32 0.0625, %v1074_v38 }
 0x2a2   :  { %v2184_v42 = vpack.c.bf16 %v2084_v32, %v2083_v56  ;;  %v1842_v48 = vmul.f32 %v7210_v40, %v12708_v50  ;;  %v1528_v16 = vadd.f32 1e-05, %v1400_v3  ;;  %v1527_v19 = vadd.f32 1e-05, %v1399_v35  ;;  %v12711_v32 = vld [vmem:[#allocation108_spill] sm:$0xff] }
 0x2a3   :  { %v2110_v30 = vadd.f32 %v9383_v47, %v1975_v6  ;;  %v7212_v23 = vpop.eup %7211  ;;  %v2109_v24 = vadd.f32 %v9383_v47, %v1974_v8  ;;  %v1530_v50 = vadd.f32 1e-05, %v1402_v25  ;;  %v1401_v15 = vmul.f32 0.0625, %v1071_v18  ;;  %v12712_v8 = vld [vmem:[#allocation59_spill] sm:$0xff] }
 0x2a4   :  { %v9610_v60 = vunpack.c.l.b16 %v2184_v42  ;;  %v9612_v13 = vunpack.c.h.b16 %v2184_v42  ;;  %v1977_v34 = vmul.f32 %v9373_v57, %v1842_v48  ;;  %v1841_v56 = vmul.f32 %v7212_v23, %v12711_v32  ;;  %v1164_v35 = vpop.xlane.xlu1 %1163  ;;  %v12715_v18 = vld [vmem:[#allocation63_spill] sm:$0xff] }
 0x2a5   :  { %7221 = vrsqrt.f32 %v1528_v16  ;;  %v7214_v63 = vpop.eup %7213  ;;  %v2197_v40 = vpack.c.bf16 %v2110_v30, %v2109_v24  ;;  %v1161_v6 = vpop.xlane.xlu0 %1160  ;;  %v2318_v38 = vrot.slane %v9594_v43, 4  ;;  %v1529_v48 = vadd.f32 1e-05, %v1401_v15 }
 0x2a6   :  { %12709 = vst [vmem:[#allocation95_spill] sm:$0xff] %v9610_v60  ;;  %12710 = vst [vmem:[#allocation96_spill] sm:$0xff] %v9612_v13  ;;  %v2112_v3 = vadd.f32 %v9383_v47, %v1977_v34  ;;  %7223 = vrsqrt.f32 %v1527_v19  ;;  %v1976_v13 = vmul.f32 %v9373_v57, %v1841_v56  ;;  %v1872_v51 = vmul.f32 %v7214_v63, %v12712_v8 }
 0x2a7   :  { %v7216_v42 = vpop.eup %7215  ;;  %7225 = vrsqrt.f32 %v1530_v50  ;;  %v9621_v23 = vunpack.c.l.b16 %v2197_v40  ;;  %v9623_v16 = vunpack.c.h.b16 %v2197_v40  ;;  %v1432_v25 = vmul.f32 0.0625, %v1164_v35 }
 0x2a8   :  { %v1871_v30 = vmul.f32 %v7216_v42, %v12715_v18  ;;  %v2111_v19 = vadd.f32 %v9383_v47, %v1976_v13  ;;  %v2007_v24 = vmul.f32 %v9373_v57, %v1872_v51  ;;  %7227 = vrsqrt.f32 %v1529_v48  ;;  %v1170_v63 = vpop.xlane.xlu1 %1169  ;;  %v12716_v51 = vld [vmem:[#allocation110_spill] sm:$0xff] }
 0x2a9   :  { %12713 = vst [vmem:[#allocation97_spill] sm:$0xff] %v9621_v23  ;;  %12714 = vst [vmem:[#allocation98_spill] sm:$0xff] %v9623_v16  ;;  %v1431_v34 = vmul.f32 0.0625, %v1161_v6  ;;  %v7218_v32 = vpop.eup %7217  ;;  %v1560_v26 = vadd.f32 1e-05, %v1432_v25  ;;  %v1167_v50 = vpop.xlane.xlu0 %1166  ;;  %v9631_v15 = vsel %vm2302_vm5, %v2318_v38, %v9494_v31  ;;  %v9635_v40 = vsel %vm2302_vm5, %v4390_v17, %v9529_v44  ;;  %v12719_v44 = vld [vmem:[#allocation111_spill] sm:$0xff] }
 0x2aa   :  { %v2006_v56 = vmul.f32 %v9373_v57, %v1871_v30  ;;  %v2198_v35 = vpack.c.bf16 %v2112_v3, %v2111_v19  ;;  %v2142_v13 = vadd.f32 %v9383_v47, %v2007_v24  ;;  %v1874_v42 = vmul.f32 %v7218_v32, %v12716_v51 }
 0x2ab   :  { %v1559_v6 = vadd.f32 1e-05, %v1431_v34  ;;  %v7220_v8 = vpop.eup %7219  ;;  %7229 = vrsqrt.f32 %v1560_v26  ;;  %v1434_v18 = vmul.f32 0.0625, %v1170_v63  ;;  %v1433_v30 = vmul.f32 0.0625, %v1167_v50 }
 0x2ac   :  { %v2141_v48 = vadd.f32 %v9383_v47, %v2006_v56  ;;  %v9640_v25 = vunpack.c.l.b16 %v2198_v35  ;;  %v9642_v31 = vunpack.c.h.b16 %v2198_v35  ;;  %v2009_v38 = vmul.f32 %v9373_v57, %v1874_v42  ;;  %v1248_v32 = vpop.xlane.xlu1 %1247  ;;  %v12722_v42 = vld [vmem:[#allocation112_spill] sm:$0xff] }
 0x2ad   :  { %v1873_v17 = vmul.f32 %v7220_v8, %v12719_v44  ;;  %7231 = vrsqrt.f32 %v1559_v6  ;;  %v1562_v19 = vadd.f32 1e-05, %v1434_v18  ;;  %v1561_v24 = vadd.f32 1e-05, %v1433_v30  ;;  %v1245_v34 = vpop.xlane.xlu0 %1244  ;;  %v12724_v44 = vld [vmem:[#allocation113_spill] sm:$0xff] }
 0x2ae   :  { %12717 = vst [vmem:[#allocation99_spill] sm:$0xff] %v9640_v25  ;;  %12718 = vst [vmem:[#allocation100_spill] sm:$0xff] %v9642_v31  ;;  %v2213_v3 = vpack.c.bf16 %v2142_v13, %v2141_v48  ;;  %v2144_v56 = vadd.f32 %v9383_v47, %v2009_v38  ;;  %v1460_v63 = vmul.f32 0.0625, %v1248_v32  ;;  %v1459_v50 = vmul.f32 0.0625, %v1245_v34  ;;  %v12723_v48 = vld [vmem:[#allocation71_spill] sm:$0xff] }
 0x2af   :  { %v7222_v51 = vpop.eup %7221  ;;  %v2008_v26 = vmul.f32 %v9373_v57, %v1873_v17  ;;  %7233 = vrsqrt.f32 %v1562_v19 }
 0x2b0   :  { %v7224_v16 = vpop.eup %7223  ;;  %v9648_v35 = vunpack.c.l.b16 %v2213_v3  ;;  %v9650_v31 = vunpack.c.h.b16 %v2213_v3  ;;  %v1784_v8 = vmul.f32 %v7222_v51, %v12722_v42  ;;  %7235 = vrsqrt.f32 %v1561_v24  ;;  %v1254_v34 = vpop.xlane.xlu1 %1253 }
 0x2b1   :  { %v7226_v13 = vpop.eup %7225  ;;  %v2143_v6 = vadd.f32 %v9383_v47, %v2008_v26  ;;  %v1783_v18 = vmul.f32 %v7224_v16, %v12723_v48  ;;  %v1588_v30 = vadd.f32 1e-05, %v1460_v63  ;;  %v1587_v32 = vadd.f32 1e-05, %v1459_v50  ;;  %v1251_v2 = vpop.xlane.xlu0 %1250 }
 0x2b2   :  { %12720 = vst [vmem:[#allocation101_spill] sm:$0xff] %v9648_v35  ;;  %12721 = vst [vmem:[#allocation102_spill] sm:$0xff] %v9650_v31  ;;  %v1919_v38 = vmul.f32 %v9373_v57, %v1784_v8  ;;  %v1786_v17 = vmul.f32 %v7226_v13, %v12724_v44  ;;  %v12725_v3 = vrot.slane %v9342_v55, 5  ;;  %v7228_v19 = vpop.eup %7227  ;;  %v1462_v16 = vmul.f32 0.0625, %v1254_v34  ;;  %v12726_v8 = vld [vmem:[#allocation114_spill] sm:$0xff] }
 0x2b3   :  { %v2214_v42 = vpack.c.bf16 %v2144_v56, %v2143_v6  ;;  %v1918_v26 = vmul.f32 %v9373_v57, %v1783_v18  ;;  %7237 = vrsqrt.f32 %v1588_v30  ;;  %v1785_v13 = vmul.f32 %v7228_v19, %v12726_v8  ;;  %v12729_v19 = vld [vmem:[#allocation115_spill] sm:$0xff] }
 0x2b4   :  { %v4401_v51 = vsel %vm2296_vm3, %v12725_v3, %v9548_v1  ;;  %v2054_v24 = vadd.f32 %v9383_v47, %v1919_v38  ;;  %v1921_v63 = vmul.f32 %v9373_v57, %v1786_v17  ;;  %7239 = vrsqrt.f32 %v1587_v32  ;;  %v1344_v30 = vpop.xlane.xlu1 %1343 }
 0x2b5   :  { %v9665_v50 = vunpack.c.l.b16 %v2214_v42  ;;  %v9667_v48 = vunpack.c.h.b16 %v2214_v42  ;;  %v2053_v44 = vadd.f32 %v9383_v47, %v1918_v26  ;;  %v1590_v1 = vadd.f32 1e-05, %v1462_v16  ;;  %v7230_v3 = vpop.eup %7229  ;;  %v1341_v38 = vpop.xlane.xlu0 %1340 }
 0x2b6   :  { %v2056_v56 = vadd.f32 %v9383_v47, %v1921_v63  ;;  %v1920_v6 = vmul.f32 %v9373_v57, %v1785_v13  ;;  %v1461_v18 = vmul.f32 0.0625, %v1251_v2  ;;  %v4402_v17 = vrot.slane %v9463_v5, 4  ;;  %v12732_v5 = vld [vmem:[#allocation116_spill] sm:$0xff] }
 0x2b7   :  { %12727 = vst [vmem:[#allocation103_spill] sm:$0xff] %v9665_v50  ;;  %12728 = vst [vmem:[#allocation104_spill] sm:$0xff] %v9667_v48  ;;  %v2169_v34 = vpack.c.bf16 %v2054_v24, %v2053_v44  ;;  %v1816_v32 = vmul.f32 %v7230_v3, %v12729_v19  ;;  %7241 = vrsqrt.f32 %v1590_v1  ;;  %v1492_v8 = vmul.f32 0.0625, %v1344_v30  ;;  %v7232_v42 = vpop.eup %7231 }
 0x2b8   :  { %v2055_v48 = vadd.f32 %v9383_v47, %v1920_v6  ;;  %v1589_v26 = vadd.f32 1e-05, %v1461_v18  ;;  %v1491_v16 = vmul.f32 0.0625, %v1341_v38  ;;  %v9676_v31 = vsel %vm2299_vm4, %v4402_v17, %v4401_v51  ;;  %v1350_v19 = vpop.xlane.xlu1 %1349  ;;  %v12733_v17 = vld [vmem:[#allocation117_spill] sm:$0xff] }
 0x2b9   :  { %v9678_v63 = vunpack.c.l.b16 %v2169_v34  ;;  %v9680_v2 = vunpack.c.h.b16 %v2169_v34  ;;  %v1951_v13 = vmul.f32 %v9373_v57, %v1816_v32  ;;  %v1815_v24 = vmul.f32 %v7232_v42, %v12732_v5  ;;  %v7234_v44 = vpop.eup %7233  ;;  %v1347_v6 = vpop.xlane.xlu0 %1346  ;;  %v12736_v5 = vld [vmem:[#allocation118_spill] sm:$0xff] }
 0x2ba   :  { %v2170_v3 = vpack.c.bf16 %v2056_v56, %v2055_v48  ;;  %7243 = vrsqrt.f32 %v1589_v26  ;;  %v1620_v1 = vadd.f32 1e-05, %v1492_v8  ;;  %v1619_v30 = vadd.f32 1e-05, %v1491_v16  ;;  %v7236_v18 = vpop.eup %7235 }
 0x2bb   :  { %12730 = vst [vmem:[#allocation107_spill] sm:$0xff] %v9678_v63  ;;  %12731 = vst [vmem:[#allocation108_spill] sm:$0xff] %v9680_v2  ;;  %v2086_v38 = vadd.f32 %v9383_v47, %v1951_v13  ;;  %v1950_v51 = vmul.f32 %v9373_v57, %v1815_v24  ;;  %v1818_v55 = vmul.f32 %v7234_v44, %v12733_v17  ;;  %v1494_v34 = vmul.f32 0.0625, %v1350_v19  ;;  %v9694_v13 = vld [vmem:[#allocation6] ss:$0 sm:$0xff] }
 0x2bc   :  { %v9687_v2 = vunpack.c.l.b16 %v2170_v3  ;;  %v9689_v32 = vunpack.c.h.b16 %v2170_v3  ;;  %v1817_v42 = vmul.f32 %v7236_v18, %v12736_v5  ;;  %7245 = vrsqrt.f32 %v1620_v1  ;;  %v12737_v44 = vld [vmem:[#allocation22_spill] sm:$0xff]  ;;  %v1080_v17 = vpop.xlane.xlu1 %1079  ;;  %v12738_v5 = vld [vmem:[#allocation75_spill] sm:$0xff] }
 0x2bd   :  { %v7238_v48 = vpop.eup %7237  ;;  %v2085_v56 = vadd.f32 %v9383_v47, %v1950_v51  ;;  %v1953_v8 = vmul.f32 %v9373_v57, %v1818_v55  ;;  %7247 = vrsqrt.f32 %v1619_v30  ;;  %v1622_v26 = vadd.f32 1e-05, %v1494_v34  ;;  %v9701_v57 = vld [vmem:[#allocation8] ss:$0 sm:$0xff] }
 0x2be   :  { %12734 = vst [vmem:[#allocation59_spill] sm:$0xff] %v9687_v2  ;;  %12735 = vst [vmem:[#allocation63_spill] sm:$0xff] %v9689_v32  ;;  %v7240_v16 = vpop.eup %7239  ;;  %v1952_v24 = vmul.f32 %v9694_v13, %v1817_v42  ;;  %v1844_v19 = vmul.f32 %v7238_v48, %v12737_v44  ;;  %v1493_v3 = vmul.f32 0.0625, %v1347_v6  ;;  %v1077_v32 = vpop.xlane.xlu0 %1076  ;;  %v2304_v1 = vrot.slane %v9678_v63, 3 }
 0x2bf   :  { %v2185_v18 = vpack.c.bf16 %v2086_v38, %v2085_v56  ;;  %v2088_v51 = vadd.f32 %v9383_v47, %v1953_v8  ;;  %v1843_v55 = vmul.f32 %v7240_v16, %v12738_v5  ;;  %7249 = vrsqrt.f32 %v1622_v26  ;;  %v12741_v26 = vld [vmem:[#allocation120_spill] sm:$0xff] }
 0x2c0   :  { %v2087_v30 = vadd.f32 %v9701_v57, %v1952_v24  ;;  %v1979_v34 = vmul.f32 %v9694_v13, %v1844_v19  ;;  %v1621_v42 = vadd.f32 1e-05, %v1493_v3  ;;  %v1404_v50 = vmul.f32 0.0625, %v1080_v17  ;;  %v1086_v5 = vpop.xlane.xlu1 %1085 }
 0x2c1   :  { %v7242_v48 = vpop.eup %7241  ;;  %v9705_v6 = vunpack.c.l.b16 %v2185_v18  ;;  %v9707_v44 = vunpack.c.h.b16 %v2185_v18  ;;  %v1978_v38 = vmul.f32 %v9694_v13, %v1843_v55  ;;  %v1403_v56 = vmul.f32 0.0625, %v1077_v32 }
 0x2c2   :  { %v2186_v47 = vpack.c.bf16 %v2088_v51, %v2087_v30  ;;  %v2114_v8 = vadd.f32 %v9701_v57, %v1979_v34  ;;  %v1846_v16 = vmul.f32 %v7242_v48, %v12741_v26  ;;  %7251 = vrsqrt.f32 %v1621_v42  ;;  %v1083_v24 = vpop.xlane.xlu0 %1082  ;;  %v12743_v30 = vld [vmem:[#allocation121_spill] sm:$0xff] }
 0x2c3   :  { %12739 = vst [vmem:[#allocation110_spill] sm:$0xff] %v9705_v6  ;;  %12740 = vst [vmem:[#allocation111_spill] sm:$0xff] %v9707_v44  ;;  %v2113_v19 = vadd.f32 %v9701_v57, %v1978_v38  ;;  %v1532_v3 = vadd.f32 1e-05, %v1404_v50  ;;  %v1531_v17 = vadd.f32 1e-05, %v1403_v56 }
 0x2c4   :  { %v1406_v41 = vmul.f32 0.0625, %v1086_v5  ;;  %v7244_v37 = vpop.eup %7243  ;;  %v9713_v59 = vunpack.c.l.b16 %v2186_v47  ;;  %v9715_v18 = vunpack.c.h.b16 %v2186_v47  ;;  %v1981_v32 = vmul.f32 %v9694_v13, %v1846_v16  ;;  %v1176_v38 = vpop.xlane.xlu1 %1175 }
 0x2c5   :  { %v1405_v51 = vmul.f32 0.0625, %v1083_v24  ;;  %v2199_v55 = vpack.c.bf16 %v2114_v8, %v2113_v19  ;;  %v1845_v34 = vmul.f32 %v7244_v37, %v12743_v30  ;;  %7253 = vrsqrt.f32 %v1532_v3  ;;  %v12746_v8 = vld [vmem:[#allocation122_spill] sm:$0xff]  ;;  %v12747_v24 = vld [vmem:[#allocation124_spill] sm:$0xff]  ;;  %v12748_v30 = vld [vmem:[#allocation125_spill] sm:$0xff] }
 0x2c6   :  { %12742 = vst [vmem:[#allocation112_spill] sm:$0xff] %v9715_v18  ;;  %v1534_v42 = vadd.f32 1e-05, %v1406_v41  ;;  %v7246_v48 = vpop.eup %7245  ;;  %v2116_v26 = vadd.f32 %v9701_v57, %v1981_v32  ;;  %7255 = vrsqrt.f32 %v1531_v17  ;;  %v1173_v56 = vpop.xlane.xlu0 %1172  ;;  %v9722_v5 = vsel %vm2305_vm6, %v2304_v1, %v9605_v27 }
 0x2c7   :  { %v1533_v50 = vadd.f32 1e-05, %v1405_v51  ;;  %v7248_v47 = vpop.eup %7247  ;;  %v9724_v18 = vunpack.c.l.b16 %v2199_v55  ;;  %v9726_v16 = vunpack.c.h.b16 %v2199_v55  ;;  %v1980_v37 = vmul.f32 %v9694_v13, %v1845_v34 }
 0x2c8   :  { %v1876_v41 = vmul.f32 %v7246_v48, %v12746_v8  ;;  %v1875_v19 = vmul.f32 %v7248_v47, %v12747_v24  ;;  %7257 = vrsqrt.f32 %v1534_v42  ;;  %v1436_v3 = vmul.f32 0.0625, %v1176_v38  ;;  %v1182_v48 = vpop.xlane.xlu1 %1181 }
 0x2c9   :  { %12744 = vst [vmem:[#allocation71_spill] sm:$0xff] %v9724_v18  ;;  %12745 = vst [vmem:[#allocation113_spill] sm:$0xff] %v9726_v16  ;;  %v1435_v17 = vmul.f32 0.0625, %v1173_v56  ;;  %v7250_v32 = vpop.eup %7249  ;;  %v2115_v51 = vadd.f32 %v9701_v57, %v1980_v37  ;;  %7259 = vrsqrt.f32 %v1533_v50  ;;  %v2320_v1 = vrot.slane %v9705_v6, 3 }
 0x2ca   :  { %v2011_v27 = vmul.f32 %v9694_v13, %v1876_v41  ;;  %v2010_v55 = vmul.f32 %v9694_v13, %v1875_v19  ;;  %v1878_v16 = vmul.f32 %v7250_v32, %v12748_v30  ;;  %v1564_v34 = vadd.f32 1e-05, %v1436_v3  ;;  %v1179_v8 = vpop.xlane.xlu0 %1178 }
 0x2cb   :  { %v1563_v44 = vadd.f32 1e-05, %v1435_v17  ;;  %v2200_v47 = vpack.c.bf16 %v2116_v26, %v2115_v51  ;;  %v1438_v38 = vmul.f32 0.0625, %v1182_v48  ;;  %v1437_v56 = vmul.f32 0.0625, %v1179_v8  ;;  %v12751_v17 = vld [vmem:[#allocation126_spill] sm:$0xff] }
 0x2cc   :  { %v2146_v42 = vadd.f32 %v9701_v57, %v2011_v27  ;;  %v7252_v24 = vpop.eup %7251  ;;  %v2145_v37 = vadd.f32 %v9701_v57, %v2010_v55  ;;  %v2013_v50 = vmul.f32 %v9694_v13, %v1878_v16  ;;  %7261 = vrsqrt.f32 %v1564_v34  ;;  %v1260_v55 = vpop.xlane.xlu1 %1259 }
 0x2cd   :  { %v9741_v41 = vsel %vm2305_vm6, %v2320_v1, %v9631_v15  ;;  %v9743_v19 = vunpack.c.l.b16 %v2200_v47  ;;  %v9745_v3 = vunpack.c.h.b16 %v2200_v47  ;;  %v1877_v26 = vmul.f32 %v7252_v24, %v12751_v17 }
 0x2ce   :  { %7263 = vrsqrt.f32 %v1563_v44  ;;  %v2215_v32 = vpack.c.bf16 %v2146_v42, %v2145_v37  ;;  %v2148_v51 = vadd.f32 %v9701_v57, %v2013_v50  ;;  %v1566_v27 = vadd.f32 1e-05, %v1438_v38  ;;  %v1257_v48 = vpop.xlane.xlu0 %1256  ;;  %v12754_v44 = vld [vmem:[#allocation127_spill] sm:$0xff] }
 0x2cf   :  { %12749 = vst [vmem:[#allocation114_spill] sm:$0xff] %v9743_v19  ;;  %12750 = vst [vmem:[#allocation115_spill] sm:$0xff] %v9745_v3  ;;  %v1565_v30 = vadd.f32 1e-05, %v1437_v56  ;;  %v7254_v16 = vpop.eup %7253  ;;  %v2012_v34 = vmul.f32 %v9694_v13, %v1877_v26  ;;  %v1464_v8 = vmul.f32 0.0625, %v1260_v55  ;;  %v1463_v15 = vmul.f32 0.0625, %v1257_v48 }
 0x2d0   :  { %v4392_v1 = vrot.slane %v9687_v2, 2  ;;  %v7256_v19 = vpop.eup %7255  ;;  %v9751_v47 = vunpack.c.l.b16 %v2215_v32  ;;  %v9753_v3 = vunpack.c.h.b16 %v2215_v32  ;;  %v1788_v42 = vmul.f32 %v7254_v16, %v12754_v44  ;;  %v12755_v56 = vld [vmem:[#allocation128_spill] sm:$0xff]  ;;  %v1266_v55 = vpop.xlane.xlu1 %1265  ;;  %v12756_v44 = vld [vmem:[#allocation129_spill] sm:$0xff] }
 0x2d1   :  { %7265 = vrsqrt.f32 %v1566_v27  ;;  %v2147_v38 = vadd.f32 %v9701_v57, %v2012_v34  ;;  %v1787_v24 = vmul.f32 %v7256_v19, %v12755_v56  ;;  %v1592_v37 = vadd.f32 1e-05, %v1464_v8  ;;  %v12757_v8 = vld [vmem:[#allocation130_spill] sm:$0xff] }
 0x2d2   :  { %12752 = vst [vmem:[#allocation116_spill] sm:$0xff] %v9751_v47  ;;  %12753 = vst [vmem:[#allocation117_spill] sm:$0xff] %v9753_v3  ;;  %7267 = vrsqrt.f32 %v1565_v30  ;;  %v7258_v50 = vpop.eup %7257  ;;  %v1923_v17 = vmul.f32 %v9694_v13, %v1788_v42  ;;  %v1591_v26 = vadd.f32 1e-05, %v1463_v15  ;;  %v1263_v48 = vpop.xlane.xlu0 %1262  ;;  %v9761_v2 = vsel %vm2305_vm6, %v4392_v1, %v9635_v40 }
 0x2d3   :  { %v4404_v32 = vrot.slane %v9610_v60, 3  ;;  %v7260_v16 = vpop.eup %7259  ;;  %v2216_v27 = vpack.c.bf16 %v2148_v51, %v2147_v38  ;;  %v1922_v34 = vmul.f32 %v9694_v13, %v1787_v24  ;;  %v1790_v19 = vmul.f32 %v7258_v50, %v12756_v44 }
 0x2d4   :  { %7269 = vrsqrt.f32 %v1592_v37  ;;  %v2058_v30 = vadd.f32 %v9701_v57, %v1923_v17  ;;  %v1789_v42 = vmul.f32 %v7260_v16, %v12757_v8  ;;  %v1466_v15 = vmul.f32 0.0625, %v1266_v55  ;;  %v1356_v37 = vpop.xlane.xlu1 %1355 }
 0x2d5   :  { %7271 = vrsqrt.f32 %v1591_v26  ;;  %v9768_v56 = vunpack.c.l.b16 %v2216_v27  ;;  %v9770_v3 = vunpack.c.h.b16 %v2216_v27  ;;  %v2057_v40 = vadd.f32 %v9701_v57, %v1922_v34  ;;  %v12760_v27 = vld [vmem:[#allocation131_spill] sm:$0xff] }
 0x2d6   :  { %v1925_v1 = vmul.f32 %v9694_v13, %v1790_v19  ;;  %v7262_v51 = vpop.eup %7261  ;;  %v1924_v38 = vmul.f32 %v9694_v13, %v1789_v42  ;;  %v1594_v24 = vadd.f32 1e-05, %v1466_v15  ;;  %v1465_v50 = vmul.f32 0.0625, %v1263_v48  ;;  %v1353_v44 = vpop.xlane.xlu0 %1352 }
 0x2d7   :  { %12758 = vst [vmem:[#allocation118_spill] sm:$0xff] %v9768_v56  ;;  %12759 = vst [vmem:[#allocation22_spill] sm:$0xff] %v9770_v3  ;;  %v9777_v17 = vsel %vm2302_vm5, %v4404_v32, %v9676_v31  ;;  %v2171_v55 = vpack.c.bf16 %v2058_v30, %v2057_v40  ;;  %v1820_v8 = vmul.f32 %v7262_v51, %v12760_v27  ;;  %v1496_v34 = vmul.f32 0.0625, %v1356_v37  ;;  %v12761_v3 = vld [vmem:[#allocation132_spill] sm:$0xff] }
 0x2d8   :  { %v7264_v26 = vpop.eup %7263  ;;  %v2060_v16 = vadd.f32 %v9701_v57, %v1925_v1  ;;  %v2059_v19 = vadd.f32 %v9701_v57, %v1924_v38  ;;  %7273 = vrsqrt.f32 %v1594_v24  ;;  %v1593_v42 = vadd.f32 1e-05, %v1465_v50  ;;  %v1362_v37 = vpop.xlane.xlu1 %1361  ;;  %v12764_v24 = vld [vmem:[#allocation133_spill] sm:$0xff] }
 0x2d9   :  { %v1819_v60 = vmul.f32 %v7264_v26, %v12761_v3  ;;  %v9783_v48 = vunpack.c.l.b16 %v2171_v55  ;;  %v9785_v15 = vunpack.c.h.b16 %v2171_v55  ;;  %v1955_v31 = vmul.f32 %v9694_v13, %v1820_v8 }
 0x2da   :  { %v1624_v32 = vadd.f32 1e-05, %v1496_v34  ;;  %v2172_v40 = vpack.c.bf16 %v2060_v16, %v2059_v19  ;;  %7275 = vrsqrt.f32 %v1593_v42  ;;  %v1495_v51 = vmul.f32 0.0625, %v1353_v44  ;;  %v1359_v38 = vpop.xlane.xlu0 %1358  ;;  %v12766_v16 = vld [vmem:[#allocation134_spill] sm:$0xff] }
 0x2db   :  { %12762 = vst [vmem:[#allocation75_spill] sm:$0xff] %v9783_v48  ;;  %12763 = vst [vmem:[#allocation120_spill] sm:$0xff] %v9785_v15  ;;  %v7266_v30 = vpop.eup %7265  ;;  %v1954_v1 = vmul.f32 %v9694_v13, %v1819_v60  ;;  %v2090_v3 = vadd.f32 %v9701_v57, %v1955_v31  ;;  %v1498_v26 = vmul.f32 0.0625, %v1362_v37  ;;  %v1497_v56 = vmul.f32 0.0625, %v1359_v38 }
 0x2dc   :  { %v7268_v27 = vpop.eup %7267  ;;  %v1822_v50 = vmul.f32 %v7266_v30, %v12764_v24  ;;  %7277 = vrsqrt.f32 %v1624_v32  ;;  %v9791_v55 = vunpack.c.l.b16 %v2172_v40  ;;  %v9793_v8 = vunpack.c.h.b16 %v2172_v40  ;;  %v12767_v32 = vld [vmem:[#allocation135_spill] sm:$0xff]  ;;  %v1272_v24 = vpop.xlane.xlu1 %1271 }
 0x2dd   :  { %v2089_v34 = vadd.f32 %v9701_v57, %v1954_v1  ;;  %v1821_v19 = vmul.f32 %v7268_v27, %v12766_v16  ;;  %v1623_v42 = vadd.f32 1e-05, %v1495_v51  ;;  %v1626_v15 = vadd.f32 1e-05, %v1498_v26 }
 0x2de   :  { %12765 = vst [vmem:[#allocation121_spill] sm:$0xff] %v9793_v8  ;;  %v7270_v60 = vpop.eup %7269  ;;  %v1957_v44 = vmul.f32 %v9694_v13, %v1822_v50  ;;  %v1269_v29 = vpop.xlane.xlu0 %1268  ;;  %v2307_v40 = vrot.slane %v9783_v48, 2  ;;  %v12768_v8 = vld [vmem:[#allocation136_spill] sm:$0xff]  ;;  %v1625_v16 = vadd.f32 1e-05, %v1497_v56 }
 0x2df   :  { %v7272_v25 = vpop.eup %7271  ;;  %v2187_v31 = vpack.c.bf16 %v2090_v3, %v2089_v34  ;;  %v1956_v30 = vmul.f32 %v9694_v13, %v1821_v19  ;;  %v1848_v37 = vmul.f32 %v7270_v60, %v12767_v32  ;;  %7279 = vrsqrt.f32 %v1623_v42 }
 0x2e0   :  { %v2092_v1 = vadd.f32 %v9701_v57, %v1957_v44  ;;  %v1847_v27 = vmul.f32 %v7272_v25, %v12768_v8  ;;  %7281 = vrsqrt.f32 %v1626_v15  ;;  %v1468_v34 = vmul.f32 0.0625, %v1272_v24  ;;  %v1278_v25 = vpop.xlane.xlu1 %1277 }
 0x2e1   :  { %v9803_v50 = vunpack.c.l.b16 %v2187_v31  ;;  %v9805_v51 = vunpack.c.h.b16 %v2187_v31  ;;  %v2091_v38 = vadd.f32 %v9701_v57, %v1956_v30  ;;  %v1983_v3 = vmul.f32 %v9694_v13, %v1848_v37  ;;  %v12771_v31 = vld [vmem:[#allocation137_spill] sm:$0xff] }
 0x2e2   :  { %v1982_v26 = vmul.f32 %v9694_v13, %v1847_v27  ;;  %v1467_v19 = vmul.f32 0.0625, %v1269_v29  ;;  %v7274_v60 = vpop.eup %7273  ;;  %7283 = vrsqrt.f32 %v1625_v16  ;;  %v1275_v56 = vpop.xlane.xlu0 %1274  ;;  %v2309_v8 = vsel %vm2308_vm7, %v2307_v40, %v9722_v5  ;;  %v12774_v5 = vld [vmem:[#allocation139_spill] sm:$0xff] }
 0x2e3   :  { %12769 = vst [vmem:[#allocation122_spill] sm:$0xff] %v9803_v50  ;;  %12770 = vst [vmem:[#allocation124_spill] sm:$0xff] %v9805_v51  ;;  %v2188_v32 = vpack.c.bf16 %v2092_v1, %v2091_v38  ;;  %v2118_v44 = vadd.f32 %v9701_v57, %v1983_v3  ;;  %v1850_v30 = vmul.f32 %v7274_v60, %v12771_v31  ;;  %v1596_v37 = vadd.f32 1e-05, %v1468_v34 }
 0x2e4   :  { %v2117_v42 = vadd.f32 %v9701_v57, %v1982_v26  ;;  %v1595_v51 = vadd.f32 1e-05, %v1467_v19  ;;  %v7276_v27 = vpop.eup %7275  ;;  %v1470_v24 = vmul.f32 0.0625, %v1278_v25  ;;  %v1469_v1 = vmul.f32 0.0625, %v1275_v56  ;;  %v1368_v19 = vpop.xlane.xlu1 %1367 }
 0x2e5   :  { %v9815_v15 = vunpack.c.l.b16 %v2188_v32  ;;  %v9817_v29 = vunpack.c.h.b16 %v2188_v32  ;;  %v1985_v3 = vmul.f32 %v9694_v13, %v1850_v30  ;;  %v1849_v49 = vmul.f32 %v7276_v27, %v12773_v33 }
 0x2e6   :  { %v7278_v38 = vpop.eup %7277  ;;  %v2201_v16 = vpack.c.bf16 %v2118_v44, %v2117_v42  ;;  %7285 = vrsqrt.f32 %v1596_v37  ;;  %v1598_v26 = vadd.f32 1e-05, %v1470_v24  ;;  %v1597_v34 = vadd.f32 1e-05, %v1469_v1  ;;  %v1365_v60 = vpop.xlane.xlu0 %1364  ;;  %v12777_v1 = vld [vmem:[#allocation140_spill] sm:$0xff] }
 0x2e7   :  { %12772 = vst [vmem:[#allocation125_spill] sm:$0xff] %v9817_v29  ;;  %v1880_v40 = vmul.f32 %v7278_v38, %v12774_v5  ;;  %7287 = vrsqrt.f32 %v1595_v51  ;;  %v2120_v25 = vadd.f32 %v9701_v57, %v1985_v3  ;;  %v1984_v44 = vmul.f32 %v9694_v13, %v1849_v49 }
 0x2e8   :  { %v9822_v31 = vunpack.c.l.b16 %v2201_v16  ;;  %v9824_v32 = vunpack.c.h.b16 %v2201_v16  ;;  %7289 = vrsqrt.f32 %v1598_v26  ;;  %v2322_v33 = vrot.slane %v9803_v50, 2 }
 0x2e9   :  { %v2015_v56 = vmul.f32 %v9694_v13, %v1880_v40  ;;  %v1500_v42 = vmul.f32 0.0625, %v1368_v19  ;;  %v7280_v30 = vpop.eup %7279  ;;  %v2119_v51 = vadd.f32 %v9701_v57, %v1984_v44  ;;  %7291 = vrsqrt.f32 %v1597_v34 }
 0x2ea   :  { %12775 = vst [vmem:[#allocation126_spill] sm:$0xff] %v9822_v31  ;;  %12776 = vst [vmem:[#allocation127_spill] sm:$0xff] %v9824_v32  ;;  %v1499_v37 = vmul.f32 0.0625, %v1365_v60  ;;  %v4394_v27 = vrot.slane %v9791_v55, 1  ;;  %v1879_v38 = vmul.f32 %v7280_v30, %v12777_v1  ;;  %v2323_v49 = vsel %vm2308_vm7, %v2322_v33, %v9741_v41  ;;  %v7282_v3 = vpop.eup %7281  ;;  %v12778_v60 = vld [vmem:[#allocation141_spill] sm:$0xff]  ;;  %v1374_v30 = vpop.xlane.xlu1 %1373 }
 0x2eb   :  { %v2150_v24 = vadd.f32 %v9701_v57, %v2015_v56  ;;  %v1628_v16 = vadd.f32 1e-05, %v1500_v42  ;;  %v2202_v5 = vpack.c.bf16 %v2120_v25, %v2119_v51  ;;  %v2352_v40 = vpack.c.b16 %v2323_v49, %v2309_v8  ;;  %v1371_v1 = vpop.xlane.xlu0 %1370  ;;  %v12781_v25 = vld [vmem:[#allocation142_spill] sm:$0xff] }
 0x2ec   :  { %v1627_v26 = vadd.f32 1e-05, %v1499_v37  ;;  %v4395_v19 = vsel %vm2308_vm7, %v4394_v27, %v9761_v2  ;;  %v7284_v44 = vpop.eup %7283  ;;  %v2014_v34 = vmul.f32 %v9694_v13, %v1879_v38  ;;  %v1882_v32 = vmul.f32 %v7282_v3, %v12778_v60  ;;  %v12784_v60 = vld [vmem:[#allocation144_spill] sm:$0xff] }
 0x2ed   :  { %7293 = vrsqrt.f32 %v1628_v16  ;;  %v4406_v56 = vrot.slane %v9713_v59, 2  ;;  %v9841_v29 = vunpack.c.l.b16 %v2202_v5  ;;  %v9843_v41 = vunpack.c.h.b16 %v2202_v5  ;;  %6688 = vmatprep.mubr.msk.bf16.mxu1 %vm221_vm0, %v2352_v40 }
 0x2ee   :  { %v1881_v8 = vmul.f32 %v7284_v44, %v12781_v25  ;;  %7295 = vrsqrt.f32 %v1627_v26  ;;  %v2149_v2 = vadd.f32 %v9701_v57, %v2014_v34  ;;  %v2017_v33 = vmul.f32 %v9694_v13, %v1882_v32  ;;  %v12783_v32 = vld [vmem:[#allocation143_spill] sm:$0xff] }
 0x2ef   :  { %12779 = vst [vmem:[#allocation128_spill] sm:$0xff] %v9841_v29  ;;  %12780 = vst [vmem:[#allocation129_spill] sm:$0xff] %v9843_v41  ;;  %v4407_v42 = vsel %vm2305_vm6, %v4406_v56, %v9777_v17  ;;  %v4408_v51 = vrot.slane %v9815_v15, 1  ;;  %v1502_v38 = vmul.f32 0.0625, %v1374_v30  ;;  %v1501_v49 = vmul.f32 0.0625, %v1371_v1 }
 0x2f0   :  { %v7286_v37 = vpop.eup %7285  ;;  %v2016_v27 = vmul.f32 %v9694_v13, %v1881_v8  ;;  %v12782_v16 = vrot.slane %v9202_v10, 1  ;;  %v2217_v40 = vpack.c.bf16 %v2150_v24, %v2149_v2  ;;  %v2152_v26 = vadd.f32 %v9701_v57, %v2017_v33 }
 0x2f1   :  { %v7288_v5 = vpop.eup %7287  ;;  %v1852_v44 = vmul.f32 %v7286_v37, %v12783_v32  ;;  %v4409_v17 = vsel %vm2308_vm7, %v4408_v51, %v4407_v42  ;;  %v1630_v30 = vadd.f32 1e-05, %v1502_v38  ;;  %v1629_v24 = vadd.f32 1e-05, %v1501_v49  ;;  %v12787_v32 = vld [vmem:[#allocation105_spill] sm:$0xff] }
 0x2f2   :  { %v2325_v3 = vsel %vm2290_vm1, %v9486_v46, %v12782_v16  ;;  %v2151_v34 = vadd.f32 %v9701_v57, %v2016_v27  ;;  %v1851_v56 = vmul.f32 %v7288_v5, %v12784_v60  ;;  %v4438_v25 = vpack.c.b16 %v4409_v17, %v4395_v19  ;;  %v7290_v1 = vpop.eup %7289  ;;  %v12788_v51 = vld [vmem:[#allocation145_spill] sm:$0xff] }
 0x2f3   :  { %v9862_v8 = vunpack.c.l.b16 %v2217_v40  ;;  %v9864_v41 = vunpack.c.h.b16 %v2217_v40  ;;  %v1987_v16 = vmul.f32 %v9694_v13, %v1852_v44  ;;  %v7292_v2 = vpop.eup %7291  ;;  %v1854_v42 = vmul.f32 %v7290_v1, %v12787_v32 }
 0x2f4   :  { %v2218_v33 = vpack.c.bf16 %v2152_v26, %v2151_v34  ;;  %v1986_v37 = vmul.f32 %v9694_v13, %v1851_v56  ;;  %6784 = vmatprep.mubr.msk.bf16.mxu0 %vm221_vm0, %v4438_v25  ;;  %7297 = vrsqrt.f32 %v1630_v30  ;;  %v1853_v27 = vmul.f32 %v7292_v2, %v12788_v51 }
 0x2f5   :  { %12785 = vst [vmem:[#allocation130_spill] sm:$0xff] %v9862_v8  ;;  %12786 = vst [vmem:[#allocation131_spill] sm:$0xff] %v9864_v41  ;;  %v2122_v19 = vadd.f32 %v9701_v57, %v1987_v16  ;;  %7299 = vrsqrt.f32 %v1629_v24  ;;  %v2326_v38 = vrot.slane %v9362_v14, 7  ;;  %v1989_v26 = vmul.f32 %v9694_v13, %v1854_v42  ;;  %v12791_v16 = vld [vmem:[#allocation24_spill] sm:$0xff] }
 0x2f6   :  { %v9873_v5 = vunpack.c.l.b16 %v2218_v33  ;;  %v9875_v40 = vunpack.c.h.b16 %v2218_v33  ;;  %v2121_v49 = vadd.f32 %v9701_v57, %v1986_v37  ;;  %v1988_v17 = vmul.f32 %v9694_v13, %v1853_v27 }
 0x2f7   :  { %v7294_v44 = vpop.eup %7293  ;;  %v2327_v34 = vsel %vm2293_vm2, %v2326_v38, %v2325_v3  ;;  %v2328_v60 = vrot.slane %v9496_v45, 6  ;;  %v2330_v56 = vrot.slane %v9621_v23, 5  ;;  %v2124_v1 = vadd.f32 %v9701_v57, %v1989_v26 }
 0x2f8   :  { %12789 = vst [vmem:[#allocation132_spill] sm:$0xff] %v9873_v5  ;;  %12790 = vst [vmem:[#allocation133_spill] sm:$0xff] %v9875_v40  ;;  %v7296_v25 = vpop.eup %7295  ;;  %v2203_v30 = vpack.c.bf16 %v2122_v19, %v2121_v49  ;;  %v1884_v24 = vmul.f32 %v7294_v44, %v12791_v16  ;;  %v2332_v2 = vrot.slane %v9724_v18, 4  ;;  %v2123_v33 = vadd.f32 %v9701_v57, %v1988_v17  ;;  %v12806_v40 = vld [vmem:[#allocation73_spill] sm:$0xff] }
 0x2f9   :  { %v1883_v37 = vmul.f32 %v7296_v25, %v9027_v9  ;;  %v2329_v32 = vsel %vm2296_vm3, %v2328_v60, %v2327_v34  ;;  %v2334_v3 = vrot.slane %v9822_v31, 3  ;;  %v2338_v44 = vrot.slane %v9223_v4, 1 }
 0x2fa   :  { %v9890_v42 = vunpack.c.l.b16 %v2203_v30  ;;  %v9892_v51 = vunpack.c.h.b16 %v2203_v30  ;;  %v2019_v19 = vmul.f32 %v9694_v13, %v1884_v24  ;;  %v2331_v27 = vsel %vm2299_vm4, %v2330_v56, %v2329_v32 }
 0x2fb   :  { %v2204_v38 = vpack.c.bf16 %v2124_v1, %v2123_v33  ;;  %v2018_v49 = vmul.f32 %v9694_v13, %v1883_v37  ;;  %v2333_v26 = vsel %vm2302_vm5, %v2332_v2, %v2331_v27  ;;  %v2340_v60 = vrot.slane %v9398_v21, 7 }
 0x2fc   :  { %12792 = vst [vmem:[#allocation134_spill] sm:$0xff] %v9890_v42  ;;  %12793 = vst [vmem:[#allocation135_spill] sm:$0xff] %v9892_v51  ;;  %v2154_v9 = vadd.f32 %v9701_v57, %v2019_v19  ;;  %v2335_v17 = vsel %vm2305_vm6, %v2334_v3, %v2333_v26  ;;  %v2336_v34 = vrot.slane %v9890_v42, 2  ;;  %v2339_v1 = vsel %vm2290_vm1, %v9538_v58, %v2338_v44  ;;  %v12808_v51 = vld [vmem:[#allocation109_spill] sm:$0xff] }
 0x2fd   :  { %v9903_v25 = vunpack.c.l.b16 %v2204_v38  ;;  %v9905_v30 = vunpack.c.h.b16 %v2204_v38  ;;  %v2153_v56 = vadd.f32 %v9701_v57, %v2018_v49  ;;  %v2341_v2 = vsel %vm2293_vm2, %v2340_v60, %v2339_v1 }
 0x2fe   :  { %v7298_v16 = vpop.eup %7297  ;;  %v2337_v24 = vsel %vm2308_vm7, %v2336_v34, %v2335_v17  ;;  %v2342_v33 = vrot.slane %v9554_v53, 6  ;;  %v2344_v37 = vrot.slane %v9648_v35, 5  ;;  %v2346_v27 = vrot.slane %v9751_v47, 4 }
 0x2ff   :  { %12794 = vst [vmem:[#allocation136_spill] sm:$0xff] %v9903_v25  ;;  %12795 = vst [vmem:[#allocation137_spill] sm:$0xff] %v9905_v30  ;;  %v7300_v32 = vpop.eup %7299  ;;  %v2219_v3 = vpack.c.bf16 %v2154_v9, %v2153_v56  ;;  %v1886_v19 = vmul.f32 %v7298_v16, %v9054_v12  ;;  %v2348_v38 = vrot.slane %v9862_v8, 3  ;;  %v2415_v44 = vrot.slane %v9265_v52, 7 }
 0x300   :  { %v1885_v49 = vmul.f32 %v7300_v32, %v9061_v39  ;;  %v2343_v26 = vsel %vm2296_vm3, %v2342_v33, %v2341_v2  ;;  %v2417_v17 = vrot.slane %v9150_v28, 6  ;;  %v2419_v16 = vrot.slane %v9267_v54, 5 }
 0x301   :  { %v9921_v34 = vunpack.c.l.b16 %v2219_v3  ;;  %v9923_v60 = vunpack.c.h.b16 %v2219_v3  ;;  %v2021_v9 = vmul.f32 %v9694_v13, %v1886_v19  ;;  %v2345_v12 = vsel %vm2299_vm4, %v2344_v37, %v2343_v26 }
 0x302   :  { %v2020_v56 = vmul.f32 %v9694_v13, %v1885_v49  ;;  %v2347_v1 = vsel %vm2302_vm5, %v2346_v27, %v2345_v12  ;;  %v2416_v39 = vsel %vm2290_vm1, %v2415_v44, %v9097_v20  ;;  %v2421_v13 = vrot.slane %v9416_v62, 4 }
 0x303   :  { %12796 = vst [vmem:[#allocation138_spill] sm:$0xff] %v9921_v34  ;;  %12797 = vst [vmem:[#allocation139_spill] sm:$0xff] %v9923_v60  ;;  %v2156_v2 = vadd.f32 %v9701_v57, %v2021_v9  ;;  %v2349_v33 = vsel %vm2305_vm6, %v2348_v38, %v2347_v1  ;;  %v2350_v32 = vrot.slane %v9921_v34, 2  ;;  %v2418_v3 = vsel %vm2293_vm2, %v2417_v17, %v2416_v39 }
 0x304   :  { %v2155_v19 = vadd.f32 %v9701_v57, %v2020_v56  ;;  %v2420_v37 = vsel %vm2296_vm3, %v2419_v16, %v2418_v3  ;;  %v2423_v27 = vrot.slane %v9577_v61, 3  ;;  %v2425_v26 = vrot.slane %v9678_v63, 2  ;;  %v9946_v56 = vld [vmem:[#allocation9 + $0x10] sm:$0xff]  }
 0x305   :  { %v2351_v49 = vsel %vm2308_vm7, %v2350_v32, %v2349_v33  ;;  %v2427_v44 = vrot.slane %v9783_v48, 1  ;;  %v2429_v38 = vrot.slane %v9317_v22, 7  ;;  %v2422_v17 = vsel %vm2299_vm4, %v2421_v13, %v2420_v37  ;;  %12798 = vst [vmem:[#allocation140_spill] sm:$0xff] %v9946_v56 }
 0x306   :  { %v2220_v9 = vpack.c.bf16 %v2156_v2, %v2155_v19  ;;  %v2353_v12 = vpack.c.b16 %v2351_v49, %v2337_v24  ;;  %v2431_v57 = vrot.slane %v9171_v11, 6  ;;  %v2424_v1 = vsel %vm2302_vm5, %v2423_v27, %v2422_v17  ;;  %v7429_v49 = vld [vmem:[#allocation9] sm:$0xff]  }
 0x307   :  { %v2430_v39 = vsel %vm2290_vm1, %v2429_v38, %v9120_v0  ;;  %v2433_v16 = vrot.slane %v9330_v7, 5  ;;  %v2435_v33 = vrot.slane %v9450_v36, 4  ;;  %v2426_v24 = vsel %vm2305_vm6, %v2425_v26, %v2424_v1  ;;  %v12801_v17 = vld [vmem:[#allocation39_spill] sm:$0xff] }
 0x308   :  { %v9953_v32 = vunpack.c.l.b16 %v2220_v9  ;;  %v9955_v3 = vunpack.c.h.b16 %v2220_v9  ;;  %6689 = vmatmul.mubr.msk.bf16.vlgmr.msra.gmra.mrb[0].mxu1 %vm221_vm0, %v2353_v12  ;;  %v2432_v2 = vsel %vm2293_vm2, %v2431_v57, %v2430_v39  ;;  %v2428_v19 = vsel %vm2308_vm7, %v2427_v44, %v2426_v24  ;;  %v12803_v57 = vld [vmem:[#allocation79_spill] sm:$0xff]  ;;  %v12805_v24 = vld [vmem:[#allocation114_spill] sm:$0xff] }
 0x309   :  { %v2434_v37 = vsel %vm2296_vm3, %v2433_v16, %v2432_v2  ;;  %v2437_v13 = vrot.slane %v9594_v43, 3  ;;  %v2439_v27 = vrot.slane %v9705_v6, 2  ;;  %6693 = vmatpush3.bf16.msra.mxu1 %v7429_v49  ;;  %v2441_v9 = vrot.slane %v9803_v50, 1  ;;  %v12804_v39 = vld [vmem:[#allocation99_spill] sm:$0xff] }
 0x30a   :  { %12799 = vst [vmem:[#allocation141_spill] sm:$0xff] %v9953_v32  ;;  %12800 = vst [vmem:[#allocation142_spill] sm:$0xff] %v9955_v3  ;;  %v2436_v38 = vsel %vm2299_vm4, %v2435_v33, %v2434_v37  ;;  %v4410_v12 = vrot.slane %v12801_v17, 7  ;;  %v12802_v3 = vld [vmem:[#allocation65_spill] sm:$0xff]  ;;  %6698 = vmatprep.subr.bf16.mxu1 %v9946_v56  ;;  %v4414_v1 = vrot.slane %v12803_v57, 5  ;;  %v4416_v16 = vrot.slane %v12804_v39, 4 }
 0x30b   :  { %v4412_v26 = vrot.slane %v12802_v3, 6  ;;  %v2438_v44 = vsel %vm2302_vm5, %v2437_v13, %v2436_v38  ;;  %v4418_v2 = vrot.slane %v12805_v24, 3  ;;  %v4420_v37 = vrot.slane %v9841_v29, 2  ;;  %v12807_v13 = vld [vmem:[#allocation42_spill] sm:$0xff]  ;;  %v12809_v57 = vld [vmem:[#allocation87_spill] sm:$0xff]  ;;  %v12811_v29 = vld [vmem:[#allocation81_spill] sm:$0xff] }
 0x30c   :  { %v2440_v49 = vsel %vm2305_vm6, %v2439_v27, %v2438_v44  ;;  %v4411_v33 = vsel %vm2290_vm1, %v4410_v12, %v12806_v40  ;;  %v4422_v30 = vrot.slane %v9903_v25, 1  ;;  %v4424_v38 = vrot.slane %v12807_v13, 7  ;;  %v12810_v44 = vld [vmem:[#allocation103_spill] sm:$0xff]  ;;  %v12812_v3 = vld [vmem:[#allocation118_spill] sm:$0xff] }
 0x30d   :  { %v2442_v60 = vsel %vm2308_vm7, %v2441_v9, %v2440_v49  ;;  %v4413_v41 = vsel %vm2293_vm2, %v4412_v26, %v4411_v33  ;;  %v4426_v17 = vrot.slane %v12808_v51, 6  ;;  %v4428_v27 = vrot.slane %v12809_v57, 5  ;;  %v12815_v13 = vld [vmem:[#allocation50_spill] sm:$0xff] }
 0x30e   :  { %v2471_v39 = vpack.c.b16 %v2442_v60, %v2428_v19  ;;  %v4415_v24 = vsel %vm2296_vm3, %v4414_v1, %v4413_v41  ;;  %v4430_v56 = vrot.slane %v12810_v44, 4  ;;  %v4425_v25 = vsel %vm2290_vm1, %v4424_v38, %v12811_v29  ;;  %v12813_v19 = vld [vmem:[#allocation43_spill] sm:$0xff]  ;;  %v12816_v44 = vld [vmem:[#allocation26_spill] sm:$0xff] }
 0x30f   :  { %v4417_v12 = vsel %vm2299_vm4, %v4416_v16, %v4415_v24  ;;  %v4432_v9 = vrot.slane %v12812_v3, 3  ;;  %v4434_v26 = vrot.slane %v9873_v5, 2  ;;  %v4427_v60 = vsel %vm2293_vm2, %v4426_v17, %v4425_v25  ;;  %v12814_v24 = vld [vmem:[#allocation33_spill] sm:$0xff] }
 0x310   :  { %6694 = vmatprep.mubr.msk.bf16.mxu1 %vm221_vm0, %v2471_v39  ;;  %v4419_v49 = vsel %vm2302_vm5, %v4418_v2, %v4417_v12  ;;  %v4436_v41 = vrot.slane %v9953_v32, 1  ;;  %v4507_v1 = vrot.slane %v12813_v19, 1  ;;  %v4429_v16 = vsel %vm2296_vm3, %v4428_v27, %v4427_v60  ;;  %v12817_v25 = vld [vmem:[#allocation69_spill] sm:$0xff]  ;;  %v12819_v27 = vld [vmem:[#allocation59_spill] sm:$0xff] }
 0x311   :  { %v4421_v33 = vsel %vm2305_vm6, %v4420_v37, %v4419_v49  ;;  %v4509_v38 = vrot.slane %v12814_v24, 7  ;;  %v4511_v3 = vrot.slane %v12815_v13, 6  ;;  %v4431_v39 = vsel %vm2299_vm4, %v4430_v56, %v4429_v16  ;;  %v12818_v37 = vld [vmem:[#allocation91_spill] sm:$0xff]  ;;  %v12820_v56 = vld [vmem:[#allocation52_spill] sm:$0xff] }
 0x312   :  { %v4423_v5 = vsel %vm2308_vm7, %v4422_v30, %v4421_v33  ;;  %v4508_v2 = vsel %vm2290_vm1, %v12816_v44, %v4507_v1  ;;  %v4513_v17 = vrot.slane %v12817_v25, 5  ;;  %v4433_v12 = vsel %vm2302_vm5, %v4432_v9, %v4431_v39  ;;  %v12821_v25 = vld [vmem:[#allocation119_spill] sm:$0xff]  ;;  %v12822_v39 = vld [vmem:[#allocation58_spill] sm:$0xff] }
 0x313   :  { %v4510_v19 = vsel %vm2293_vm2, %v4509_v38, %v4508_v2  ;;  %v4515_v49 = vrot.slane %v12818_v37, 4  ;;  %v4517_v60 = vrot.slane %v12819_v27, 3  ;;  %v4435_v24 = vsel %vm2305_vm6, %v4434_v26, %v4433_v12  ;;  %v12823_v27 = vld [vmem:[#allocation29_spill] sm:$0xff] }
 0x314   :  { %v4512_v13 = vsel %vm2296_vm3, %v4511_v3, %v4510_v19  ;;  %v4519_v30 = vrot.slane %v9791_v55, 2  ;;  %v4521_v33 = vrot.slane %v12820_v56, 1  ;;  %v4437_v1 = vsel %vm2308_vm7, %v4436_v41, %v4435_v24  ;;  %v12824_v12 = vld [vmem:[#allocation21_spill] sm:$0xff]  ;;  %v12825_v24 = vld [vmem:[#allocation95_spill] sm:$0xff] }
 0x315   :  { %v4514_v16 = vsel %vm2299_vm4, %v4513_v17, %v4512_v13  ;;  %v4523_v9 = vrot.slane %v12821_v25, 7  ;;  %v4525_v38 = vrot.slane %v12822_v39, 6  ;;  %v4439_v2 = vpack.c.b16 %v4437_v1, %v4423_v5  ;;  %v10020_v19 = vld [vmem:[#allocation9 + $0x90] sm:$0xff]  }
 0x316   :  { %v4516_v37 = vsel %vm2302_vm5, %v4515_v49, %v4514_v16  ;;  %v4522_v26 = vsel %vm2290_vm1, %v12823_v27, %v4521_v33  ;;  %v4527_v3 = vrot.slane %v12824_v12, 5  ;;  %v4529_v13 = vrot.slane %v12825_v24, 4  ;;  %v7430_v16 = vld [vmem:[#allocation9 + $0x88] sm:$0xff]  }
 0x317   :  { %v4518_v56 = vsel %vm2305_vm6, %v4517_v60, %v4516_v37  ;;  %v4524_v41 = vsel %vm2293_vm2, %v4523_v9, %v4522_v26  ;;  %v4531_v17 = vrot.slane %v9713_v59, 3  ;;  %6785 = vmatmul.mubr.msk.bf16.vlgmr.msra.gmra.mrb[0].mxu0 %vm221_vm0, %v4439_v2  ;;  %v4533_v33 = vrot.slane %v9815_v15, 2 }
 0x318   :  { %v4520_v5 = vsel %vm2308_vm7, %v4519_v30, %v4518_v56  ;;  %v4526_v49 = vsel %vm2296_vm3, %v4525_v38, %v4524_v41  ;;  %v2443_v1 = vrot.slane %v9486_v46, 7  ;;  %6789 = vmatpush3.bf16.msra.mxu0 %v7430_v16  ;;  %v2445_v60 = vrot.slane %v9362_v14, 6 }
 0x319   :  { %v4528_v37 = vsel %vm2299_vm4, %v4527_v3, %v4526_v49  ;;  %v2447_v9 = vrot.slane %v9496_v45, 5  ;;  %v2449_v26 = vrot.slane %v9621_v23, 4  ;;  %v2451_v56 = vrot.slane %v9724_v18, 3  ;;  %6794 = vmatprep.subr.bf16.mxu0 %v10020_v19 }
 0x31a   :  { %v4530_v2 = vsel %vm2302_vm5, %v4529_v13, %v4528_v37  ;;  %v2444_v30 = vsel %vm2290_vm1, %v2443_v1, %v9202_v10  ;;  %v2453_v38 = vrot.slane %v9822_v31, 2  ;;  %v2455_v49 = vrot.slane %v9890_v42, 1 }
 0x31b   :  { %v4532_v41 = vsel %vm2305_vm6, %v4531_v17, %v4530_v2  ;;  %v2446_v3 = vsel %vm2293_vm2, %v2445_v60, %v2444_v30  ;;  %v2457_v16 = vrot.slane %v9538_v58, 7  ;;  %v2459_v1 = vrot.slane %v9398_v21, 6 }
 0x31c   :  { %v4534_v14 = vsel %vm2308_vm7, %v4533_v33, %v4532_v41  ;;  %v2448_v13 = vsel %vm2296_vm3, %v2447_v9, %v2446_v3  ;;  %v2461_v37 = vrot.slane %v9554_v53, 5  ;;  %v2463_v60 = vrot.slane %v9648_v35, 4 }
 0x31d   :  { %v4563_v18 = vpack.c.b16 %v4534_v14, %v4520_v5  ;;  %v2450_v31 = vsel %vm2299_vm4, %v2449_v26, %v2448_v13  ;;  %v2458_v17 = vsel %vm2290_vm1, %v2457_v16, %v9223_v4  ;;  %v2465_v33 = vrot.slane %v9751_v47, 3 }
 0x31e   :  { %v2452_v2 = vsel %vm2302_vm5, %v2451_v56, %v2450_v31  ;;  %v2460_v30 = vsel %vm2293_vm2, %v2459_v1, %v2458_v17  ;;  %v2467_v9 = vrot.slane %v9862_v8, 2  ;;  %v2469_v5 = vrot.slane %v9921_v34, 1 }
 0x31f   :  { %6790 = vmatprep.mubr.msk.bf16.mxu0 %vm221_vm0, %v4563_v18  ;;  %v2454_v41 = vsel %vm2305_vm6, %v2453_v38, %v2452_v2  ;;  %v2462_v14 = vsel %vm2296_vm3, %v2461_v37, %v2460_v30  ;;  %v2536_v26 = vrot.slane %v9097_v20, 2  ;;  %v2537_v56 = vrot.slane %v9265_v52, 1 }
 0x320   :  { %v2456_v3 = vsel %vm2308_vm7, %v2455_v49, %v2454_v41  ;;  %v2464_v31 = vsel %vm2299_vm4, %v2463_v60, %v2462_v14  ;;  %v2540_v16 = vrot.slane %v9267_v54, 7  ;;  %v2542_v18 = vrot.slane %v9416_v62, 6 }
 0x321   :  { %v2466_v13 = vsel %vm2302_vm5, %v2465_v33, %v2464_v31  ;;  %v2544_v38 = vrot.slane %v9577_v61, 5  ;;  %v2546_v1 = vrot.slane %v9678_v63, 4  ;;  %v2538_v17 = vsel %vm2290_vm1, %v2537_v56, %v2536_v26  ;;  %v10082_v56 = vld [vmem:[#allocation9 + $0x18] sm:$0xff]  }
 0x322   :  { %v2468_v37 = vsel %vm2305_vm6, %v2467_v9, %v2466_v13  ;;  %v2548_v49 = vrot.slane %v9783_v48, 3  ;;  %v2550_v60 = vrot.slane %v9120_v0, 2  ;;  %v2539_v30 = vsel %vm2293_vm2, %v9150_v28, %v2538_v17 }
 0x323   :  { %v2470_v2 = vsel %vm2308_vm7, %v2469_v5, %v2468_v37  ;;  %v2551_v33 = vrot.slane %v9317_v22, 1  ;;  %v2554_v41 = vrot.slane %v9330_v7, 7  ;;  %v2541_v31 = vsel %vm2296_vm3, %v2540_v16, %v2539_v30  ;;  %v12826_v30 = vld [vmem:[#allocation65_spill] sm:$0xff] }
 0x324   :  { %v2472_v14 = vpack.c.b16 %v2470_v2, %v2456_v3  ;;  %v2556_v9 = vrot.slane %v9450_v36, 6  ;;  %v2558_v26 = vrot.slane %v9594_v43, 5  ;;  %v2543_v13 = vsel %vm2299_vm4, %v2542_v18, %v2541_v31 }
 0x325   :  { %v2552_v5 = vsel %vm2290_vm1, %v2551_v33, %v2550_v60  ;;  %v2560_v37 = vrot.slane %v9705_v6, 4  ;;  %v2562_v17 = vrot.slane %v9803_v50, 3  ;;  %v2545_v3 = vsel %vm2302_vm5, %v2544_v38, %v2543_v13  ;;  %v12827_v60 = vld [vmem:[#allocation140_spill] sm:$0xff]  ;;  %v12828_v33 = vld [vmem:[#allocation79_spill] sm:$0xff] }
 0x326   :  { %6695 = vmatmul.mubr.msk.bf16.vlgmr.msra.gmra.mrb[0].mxu1 %vm221_vm0, %v2472_v14  ;;  %v2553_v16 = vsel %vm2293_vm2, %v9171_v11, %v2552_v5  ;;  %v4535_v2 = vrot.slane %v12806_v40, 1  ;;  %v4537_v7 = vrot.slane %v12826_v30, 7  ;;  %v2547_v43 = vsel %vm2305_vm6, %v2546_v1, %v2545_v3  ;;  %v12829_v50 = vld [vmem:[#allocation99_spill] sm:$0xff]  ;;  %v12831_v40 = vld [vmem:[#allocation114_spill] sm:$0xff]  ;;  %v12832_v3 = vld [vmem:[#allocation128_spill] sm:$0xff] }
 0x327   :  { %v2555_v18 = vsel %vm2296_vm3, %v2554_v41, %v2553_v16  ;;  %6699 = vmatpush3.bf16.msra.mxu1 %v12827_v60  ;;  %v4539_v31 = vrot.slane %v12828_v33, 6  ;;  %v4541_v6 = vrot.slane %v12829_v50, 5  ;;  %v2549_v14 = vsel %vm2308_vm7, %v2548_v49, %v2547_v43  ;;  %v12830_v13 = vld [vmem:[#allocation39_spill] sm:$0xff]  ;;  %v12833_v60 = vld [vmem:[#allocation136_spill] sm:$0xff] }
 0x328   :  { %v2557_v38 = vsel %vm2299_vm4, %v2556_v9, %v2555_v18  ;;  %v4536_v5 = vsel %vm2290_vm1, %v12830_v13, %v4535_v2  ;;  %v4543_v36 = vrot.slane %v12831_v40, 4  ;;  %6704 = vmatprep.subr.bf16.mxu1 %v10082_v56  ;;  %v4545_v16 = vrot.slane %v12832_v3, 3 }
 0x329   :  { %v2559_v1 = vsel %vm2302_vm5, %v2558_v26, %v2557_v38  ;;  %v4538_v41 = vsel %vm2293_vm2, %v4537_v7, %v4536_v5  ;;  %v4547_v30 = vrot.slane %v12833_v60, 2  ;;  %v4549_v49 = vrot.slane %v12811_v29, 1  ;;  %v12834_v38 = vld [vmem:[#allocation103_spill] sm:$0xff]  ;;  %v12835_v60 = vld [vmem:[#allocation42_spill] sm:$0xff]  ;;  %v12837_v29 = vld [vmem:[#allocation132_spill] sm:$0xff] }
 0x32a   :  { %v2561_v50 = vsel %vm2305_vm6, %v2560_v37, %v2559_v1  ;;  %v4540_v43 = vsel %vm2296_vm3, %v4539_v31, %v4538_v41  ;;  %v4551_v9 = vrot.slane %v12808_v51, 7  ;;  %v4553_v26 = vrot.slane %v12809_v57, 6  ;;  %v12836_v1 = vld [vmem:[#allocation118_spill] sm:$0xff] }
 0x32b   :  { %v2563_v2 = vsel %vm2308_vm7, %v2562_v17, %v2561_v50  ;;  %v4542_v18 = vsel %vm2299_vm4, %v4541_v6, %v4540_v43  ;;  %v4555_v7 = vrot.slane %v12834_v38, 5  ;;  %v4550_v37 = vsel %vm2290_vm1, %v12835_v60, %v4549_v49 }
 0x32c   :  { %v2592_v5 = vpack.c.b16 %v2563_v2, %v2549_v14  ;;  %v4544_v3 = vsel %vm2302_vm5, %v4543_v36, %v4542_v18  ;;  %v4557_v31 = vrot.slane %v12836_v1, 4  ;;  %v4552_v51 = vsel %vm2293_vm2, %v4551_v9, %v4550_v37  ;;  %v12838_v36 = vld [vmem:[#allocation43_spill] sm:$0xff]  ;;  %v12839_v18 = vld [vmem:[#allocation50_spill] sm:$0xff] }
 0x32d   :  { %v4546_v41 = vsel %vm2305_vm6, %v4545_v16, %v4544_v3  ;;  %v4559_v50 = vrot.slane %v12837_v29, 3  ;;  %v4561_v6 = vrot.slane %v9953_v32, 2  ;;  %v4554_v14 = vsel %vm2296_vm3, %v4553_v26, %v4552_v51  ;;  %v12840_v16 = vld [vmem:[#allocation69_spill] sm:$0xff]  ;;  %v12841_v37 = vld [vmem:[#allocation91_spill] sm:$0xff] }
 0x32e   :  { %6700 = vmatprep.mubr.msk.bf16.mxu1 %vm221_vm0, %v2592_v5  ;;  %v4548_v17 = vsel %vm2308_vm7, %v4547_v30, %v4546_v41  ;;  %v4632_v43 = vrot.slane %v12838_v36, 2  ;;  %v4633_v49 = vrot.slane %v12816_v44, 1  ;;  %v4556_v2 = vsel %vm2299_vm4, %v4555_v7, %v4554_v14  ;;  %v12842_v1 = vld [vmem:[#allocation59_spill] sm:$0xff]  ;;  %v12843_v41 = vld [vmem:[#allocation33_spill] sm:$0xff]  ;;  %v12844_v7 = vld [vmem:[#allocation52_spill] sm:$0xff] }
 0x32f   :  { %v4636_v3 = vrot.slane %v12839_v18, 7  ;;  %v4638_v9 = vrot.slane %v12840_v16, 6  ;;  %v4640_v29 = vrot.slane %v12841_v37, 5  ;;  %v4558_v32 = vsel %vm2302_vm5, %v4557_v31, %v4556_v2 }
 0x330   :  { %v4634_v5 = vsel %vm2290_vm1, %v4633_v49, %v4632_v43  ;;  %v4642_v30 = vrot.slane %v12842_v1, 4  ;;  %v4644_v51 = vrot.slane %v9791_v55, 3  ;;  %v4560_v26 = vsel %vm2305_vm6, %v4559_v50, %v4558_v32 }
 0x331   :  { %v4635_v44 = vsel %vm2293_vm2, %v12843_v41, %v4634_v5  ;;  %v4646_v14 = vrot.slane %v12844_v7, 2  ;;  %v4647_v18 = vrot.slane %v12823_v27, 1  ;;  %v4562_v16 = vsel %vm2308_vm7, %v4561_v6, %v4560_v26  ;;  %v10150_v5 = vld [vmem:[#allocation9 + $0x98] sm:$0xff]  }
 0x332   :  { %v4637_v37 = vsel %vm2296_vm3, %v4636_v3, %v4635_v44  ;;  %v4650_v31 = vrot.slane %v12822_v39, 7  ;;  %v4652_v43 = vrot.slane %v12824_v12, 6  ;;  %v4564_v49 = vpack.c.b16 %v4562_v16, %v4548_v17 }
 0x333   :  { %v4639_v2 = vsel %vm2299_vm4, %v4638_v9, %v4637_v37  ;;  %v4648_v32 = vsel %vm2290_vm1, %v4647_v18, %v4646_v14  ;;  %v4654_v50 = vrot.slane %v12825_v24, 5  ;;  %v4656_v44 = vrot.slane %v9713_v59, 4 }
 0x334   :  { %v4641_v7 = vsel %vm2302_vm5, %v4640_v29, %v4639_v2  ;;  %v4649_v6 = vsel %vm2293_vm2, %v12821_v25, %v4648_v32  ;;  %v4658_v3 = vrot.slane %v9815_v15, 3  ;;  %6791 = vmatmul.mubr.msk.bf16.vlgmr.msra.gmra.mrb[0].mxu0 %vm221_vm0, %v4564_v49  ;;  %v2564_v18 = vrot.slane %v9202_v10, 2  ;;  %v12846_v2 = vld [vmem:[#allocation126_spill] sm:$0xff] }
 0x335   :  { %v4643_v17 = vsel %vm2305_vm6, %v4642_v30, %v4641_v7  ;;  %v4651_v16 = vsel %vm2296_vm3, %v4650_v31, %v4649_v6  ;;  %v2565_v9 = vrot.slane %v9486_v46, 1  ;;  %6795 = vmatpush3.bf16.msra.mxu0 %v10020_v19  ;;  %v2568_v26 = vrot.slane %v9496_v45, 7  ;;  %v12845_v7 = vld [vmem:[#allocation71_spill] sm:$0xff]  ;;  %v12847_v6 = vld [vmem:[#allocation61_spill] sm:$0xff] }
 0x336   :  { %v4645_v29 = vsel %vm2308_vm7, %v4644_v51, %v4643_v17  ;;  %v4653_v37 = vsel %vm2299_vm4, %v4652_v43, %v4651_v16  ;;  %v2570_v14 = vrot.slane %v9621_v23, 6  ;;  %v2572_v31 = vrot.slane %v12845_v7, 5  ;;  %6800 = vmatprep.subr.bf16.mxu0 %v10150_v5 }
 0x337   :  { %v4655_v49 = vsel %vm2302_vm5, %v4654_v50, %v4653_v37  ;;  %v2566_v30 = vsel %vm2290_vm1, %v2565_v9, %v2564_v18  ;;  %v2574_v32 = vrot.slane %v12846_v2, 4  ;;  %v2576_v43 = vrot.slane %v9890_v42, 3 }
 0x338   :  { %v4657_v19 = vsel %vm2305_vm6, %v4656_v44, %v4655_v49  ;;  %v2567_v51 = vsel %vm2293_vm2, %v12847_v6, %v2566_v30  ;;  %v2578_v17 = vrot.slane %v9223_v4, 2  ;;  %v2579_v18 = vrot.slane %v9538_v58, 1 }
 0x339   :  { %v4659_v16 = vsel %vm2308_vm7, %v4658_v3, %v4657_v19  ;;  %v2569_v50 = vsel %vm2296_vm3, %v2568_v26, %v2567_v51  ;;  %v2582_v9 = vrot.slane %v9554_v53, 7  ;;  %v2584_v44 = vrot.slane %v9648_v35, 6 }
 0x33a   :  { %v4688_v37 = vpack.c.b16 %v4659_v16, %v4645_v29  ;;  %v2571_v45 = vsel %vm2299_vm4, %v2570_v14, %v2569_v50  ;;  %v2586_v49 = vrot.slane %v9751_v47, 5  ;;  %v2580_v42 = vsel %vm2290_vm1, %v2579_v18, %v2578_v17 }
 0x33b   :  { %v2573_v30 = vsel %vm2302_vm5, %v2572_v31, %v2571_v45  ;;  %v2588_v4 = vrot.slane %v9862_v8, 4  ;;  %v2590_v3 = vrot.slane %v9921_v34, 3  ;;  %v2581_v29 = vsel %vm2293_vm2, %v9398_v21, %v2580_v42 }
 0x33c   :  { %6796 = vmatprep.mubr.msk.bf16.mxu0 %vm221_vm0, %v4688_v37  ;;  %v2575_v26 = vsel %vm2305_vm6, %v2574_v32, %v2573_v30  ;;  %v2661_v14 = vrot.slane %v9097_v20, 3  ;;  %v2662_v19 = vrot.slane %v9265_v52, 2  ;;  %v2583_v45 = vsel %vm2296_vm3, %v2582_v9, %v2581_v29 }
 0x33d   :  { %v2577_v51 = vsel %vm2308_vm7, %v2576_v43, %v2575_v26  ;;  %v2664_v31 = vrot.slane %v9150_v28, 1  ;;  %v2667_v17 = vrot.slane %v9416_v62, 7  ;;  %v2585_v16 = vsel %vm2299_vm4, %v2584_v44, %v2583_v45 }
 0x33e   :  { %v2663_v50 = vsel %vm2290_vm1, %v2662_v19, %v2661_v14  ;;  %v2669_v32 = vrot.slane %v9577_v61, 6  ;;  %v2671_v42 = vrot.slane %v9678_v63, 5  ;;  %v2587_v18 = vsel %vm2302_vm5, %v2586_v49, %v2585_v16  ;;  %v12848_v49 = vld [vmem:[#allocation70_spill] sm:$0xff] }
 0x33f   :  { %v2665_v37 = vsel %vm2293_vm2, %v2664_v31, %v2663_v50  ;;  %v2673_v43 = vrot.slane %v9783_v48, 4  ;;  %v2675_v9 = vrot.slane %v9120_v0, 3  ;;  %v2589_v30 = vsel %vm2305_vm6, %v2588_v4, %v2587_v18  ;;  %v12849_v31 = vld [vmem:[#allocation93_spill] sm:$0xff]  ;;  %v12850_v18 = vld [vmem:[#allocation110_spill] sm:$0xff] }
 0x340   :  { %v2666_v26 = vsel %vm2296_vm3, %v9267_v54, %v2665_v37  ;;  %v2676_v44 = vrot.slane %v9317_v22, 2  ;;  %v2678_v29 = vrot.slane %v9171_v11, 1  ;;  %v2591_v14 = vsel %vm2308_vm7, %v2590_v3, %v2589_v30  ;;  %v10218_v37 = vld [vmem:[#allocation9 + $0x20] sm:$0xff]  }
 0x341   :  { %v2668_v19 = vsel %vm2299_vm4, %v2667_v17, %v2666_v26  ;;  %v2681_v45 = vrot.slane %v12848_v49, 7  ;;  %v2683_v16 = vrot.slane %v12849_v31, 6  ;;  %v2593_v50 = vpack.c.b16 %v2591_v14, %v2577_v51  ;;  %12851 = vst [vmem:[#allocation143_spill] sm:$0xff] %v10218_v37  ;;  %v12852_v3 = vld [vmem:[#allocation122_spill] sm:$0xff]  ;;  %v12853_v17 = vld [vmem:[#allocation73_spill] sm:$0xff]  ;;  %v12854_v14 = vld [vmem:[#allocation56_spill] sm:$0xff] }
 0x342   :  { %v2670_v62 = vsel %vm2302_vm5, %v2669_v32, %v2668_v19  ;;  %v2677_v4 = vsel %vm2290_vm1, %v2676_v44, %v2675_v9  ;;  %v2685_v0 = vrot.slane %v12850_v18, 5  ;;  %v2687_v30 = vrot.slane %v12852_v3, 4 }
 0x343   :  { %v2672_v22 = vsel %vm2305_vm6, %v2671_v42, %v2670_v62  ;;  %v2679_v11 = vsel %vm2293_vm2, %v2678_v29, %v2677_v4  ;;  %v4660_v26 = vrot.slane %v12853_v17, 2  ;;  %6701 = vmatmul.mubr.msk.bf16.vlgmr.msra.gmra.mrb[0].mxu1 %vm221_vm0, %v2593_v50  ;;  %v4661_v9 = vrot.slane %v12830_v13, 1  ;;  %v12855_v62 = vld [vmem:[#allocation99_spill] sm:$0xff]  ;;  %v12856_v4 = vld [vmem:[#allocation128_spill] sm:$0xff]  ;;  %v12858_v17 = vld [vmem:[#allocation81_spill] sm:$0xff] }
 0x344   :  { %v2674_v51 = vsel %vm2308_vm7, %v2673_v43, %v2672_v22  ;;  %v2680_v32 = vsel %vm2296_vm3, %v12854_v14, %v2679_v11  ;;  %v4664_v44 = vrot.slane %v12828_v33, 7  ;;  %6705 = vmatpush3.bf16.msra.mxu1 %v10082_v56  ;;  %v4666_v42 = vrot.slane %v12855_v62, 6  ;;  %v12857_v43 = vld [vmem:[#allocation136_spill] sm:$0xff] }
 0x345   :  { %v2682_v19 = vsel %vm2299_vm4, %v2681_v45, %v2680_v32  ;;  %v4668_v29 = vrot.slane %v12831_v40, 5  ;;  %v4670_v49 = vrot.slane %v12856_v4, 4  ;;  %v4662_v22 = vsel %vm2290_vm1, %v4661_v9, %v4660_v26  ;;  %6710 = vmatprep.subr.bf16.mxu1 %v10218_v37  ;;  %v12859_v32 = vld [vmem:[#allocation65_spill] sm:$0xff]  ;;  %v12860_v9 = vld [vmem:[#allocation118_spill] sm:$0xff] }
 0x346   :  { %v2684_v50 = vsel %vm2302_vm5, %v2683_v16, %v2682_v19  ;;  %v4672_v11 = vrot.slane %v12857_v43, 3  ;;  %v4674_v13 = vrot.slane %v12858_v17, 2  ;;  %v4663_v56 = vsel %vm2293_vm2, %v12859_v32, %v4662_v22  ;;  %v12863_v37 = vld [vmem:[#allocation141_spill] sm:$0xff] }
 0x347   :  { %v2686_v45 = vsel %vm2305_vm6, %v2685_v0, %v2684_v50  ;;  %v4675_v33 = vrot.slane %v12835_v60, 1  ;;  %v4678_v40 = vrot.slane %v12809_v57, 7  ;;  %v4665_v16 = vsel %vm2296_vm3, %v4664_v44, %v4663_v56  ;;  %v12861_v50 = vld [vmem:[#allocation132_spill] sm:$0xff]  ;;  %v12862_v60 = vld [vmem:[#allocation109_spill] sm:$0xff] }
 0x348   :  { %v2688_v4 = vsel %vm2308_vm7, %v2687_v30, %v2686_v45  ;;  %v4680_v26 = vrot.slane %v12834_v38, 6  ;;  %v4682_v19 = vrot.slane %v12860_v9, 5  ;;  %v4667_v43 = vsel %vm2299_vm4, %v4666_v42, %v4665_v16  ;;  %v12864_v42 = vld [vmem:[#allocation26_spill] sm:$0xff]  ;;  %v12866_v16 = vld [vmem:[#allocation91_spill] sm:$0xff] }
 0x349   :  { %v2717_v17 = vpack.c.b16 %v2688_v4, %v2674_v51  ;;  %v4676_v0 = vsel %vm2290_vm1, %v4675_v33, %v4674_v13  ;;  %v4684_v62 = vrot.slane %v12861_v50, 4  ;;  %v4669_v22 = vsel %vm2302_vm5, %v4668_v29, %v4667_v43  ;;  %v12865_v43 = vld [vmem:[#allocation69_spill] sm:$0xff] }
 0x34a   :  { %v4677_v57 = vsel %vm2293_vm2, %v12862_v60, %v4676_v0  ;;  %v4686_v30 = vrot.slane %v12863_v37, 3  ;;  %v4757_v44 = vrot.slane %v12838_v36, 3  ;;  %v4671_v45 = vsel %vm2305_vm6, %v4670_v49, %v4669_v22 }
 0x34b   :  { %6706 = vmatprep.mubr.msk.bf16.mxu1 %vm221_vm0, %v2717_v17  ;;  %v4679_v51 = vsel %vm2296_vm3, %v4678_v40, %v4677_v57  ;;  %v4758_v4 = vrot.slane %v12864_v42, 2  ;;  %v4760_v33 = vrot.slane %v12843_v41, 1  ;;  %v4673_v13 = vsel %vm2308_vm7, %v4672_v11, %v4671_v45  ;;  %v12867_v41 = vld [vmem:[#allocation52_spill] sm:$0xff] }
 0x34c   :  { %v4681_v29 = vsel %vm2299_vm4, %v4680_v26, %v4679_v51  ;;  %v4763_v56 = vrot.slane %v12865_v43, 7  ;;  %v4765_v0 = vrot.slane %v12866_v16, 6  ;;  %v4767_v49 = vrot.slane %v12842_v1, 5  ;;  %v12868_v51 = vld [vmem:[#allocation50_spill] sm:$0xff] }
 0x34d   :  { %v4683_v36 = vsel %vm2302_vm5, %v4682_v19, %v4681_v29  ;;  %v4759_v17 = vsel %vm2290_vm1, %v4758_v4, %v4757_v44  ;;  %v4769_v40 = vrot.slane %v9791_v55, 4  ;;  %v4771_v11 = vrot.slane %v12867_v41, 3 }
 0x34e   :  { %v4685_v57 = vsel %vm2305_vm6, %v4684_v62, %v4683_v36  ;;  %v4761_v22 = vsel %vm2293_vm2, %v4760_v33, %v4759_v17  ;;  %v4772_v26 = vrot.slane %v12823_v27, 2  ;;  %v4774_v19 = vrot.slane %v12821_v25, 1  ;;  %v10282_v33 = vld [vmem:[#allocation9 + $0xa0] sm:$0xff]  }
 0x34f   :  { %v4687_v45 = vsel %vm2308_vm7, %v4686_v30, %v4685_v57  ;;  %v4762_v43 = vsel %vm2296_vm3, %v12868_v51, %v4761_v22  ;;  %v4777_v44 = vrot.slane %v12824_v12, 7  ;;  %v4779_v62 = vrot.slane %v12825_v24, 6 }
 0x350   :  { %v4689_v4 = vpack.c.b16 %v4687_v45, %v4673_v13  ;;  %v4764_v29 = vsel %vm2299_vm4, %v4763_v56, %v4762_v43  ;;  %v4773_v36 = vsel %vm2290_vm1, %v4772_v26, %v4771_v11  ;;  %v4781_v57 = vrot.slane %v9713_v59, 5 }
 0x351   :  { %v4766_v17 = vsel %vm2302_vm5, %v4765_v0, %v4764_v29  ;;  %v4775_v30 = vsel %vm2293_vm2, %v4774_v19, %v4773_v36  ;;  %v4783_v22 = vrot.slane %v9815_v15, 4  ;;  %v2689_v56 = vrot.slane %v9202_v10, 3 }
 0x352   :  { %6797 = vmatmul.mubr.msk.bf16.vlgmr.msra.gmra.mrb[0].mxu0 %vm221_vm0, %v4689_v4  ;;  %v4768_v13 = vsel %vm2305_vm6, %v4767_v49, %v4766_v17  ;;  %v4776_v43 = vsel %vm2296_vm3, %v12822_v39, %v4775_v30  ;;  %v2690_v11 = vrot.slane %v9486_v46, 2  ;;  %v2692_v45 = vrot.slane %v12847_v6, 1  ;;  %v12869_v17 = vld [vmem:[#allocation134_spill] sm:$0xff]  ;;  %v12870_v30 = vld [vmem:[#allocation123_spill] sm:$0xff] }
 0x353   :  { %6801 = vmatpush3.bf16.msra.mxu0 %v10150_v5  ;;  %v4770_v0 = vsel %vm2308_vm7, %v4769_v40, %v4768_v13  ;;  %v4778_v26 = vsel %vm2299_vm4, %v4777_v44, %v4776_v43  ;;  %v2695_v19 = vrot.slane %v9621_v23, 7  ;;  %v2697_v29 = vrot.slane %v12845_v7, 6  ;;  %v12871_v23 = vld [vmem:[#allocation77_spill] sm:$0xff] }
 0x354   :  { %v4780_v4 = vsel %vm2302_vm5, %v4779_v62, %v4778_v26  ;;  %v2691_v49 = vsel %vm2290_vm1, %v2690_v11, %v2689_v56  ;;  %v2699_v36 = vrot.slane %v12846_v2, 5  ;;  %6806 = vmatprep.subr.bf16.mxu0 %v10282_v33  ;;  %v2701_v44 = vrot.slane %v12869_v17, 4 }
 0x355   :  { %v4782_v5 = vsel %vm2305_vm6, %v4781_v57, %v4780_v4  ;;  %v2693_v40 = vsel %vm2293_vm2, %v2692_v45, %v2691_v49  ;;  %v2703_v13 = vrot.slane %v12870_v30, 3  ;;  %v2704_v56 = vrot.slane %v9538_v58, 2 }
 0x356   :  { %v4784_v43 = vsel %vm2308_vm7, %v4783_v22, %v4782_v5  ;;  %v2694_v62 = vsel %vm2296_vm3, %v12871_v23, %v2693_v40  ;;  %v2706_v11 = vrot.slane %v9398_v21, 1  ;;  %v2709_v57 = vrot.slane %v9648_v35, 7 }
 0x357   :  { %v4813_v26 = vpack.c.b16 %v4784_v43, %v4770_v0  ;;  %v2696_v2 = vsel %vm2299_vm4, %v2695_v19, %v2694_v62  ;;  %v2711_v45 = vrot.slane %v9751_v47, 6  ;;  %v2705_v49 = vsel %vm2290_vm1, %v2704_v56, %v2703_v13 }
 0x358   :  { %v2698_v4 = vsel %vm2302_vm5, %v2697_v29, %v2696_v2  ;;  %v2713_v22 = vrot.slane %v9862_v8, 5  ;;  %v2715_v5 = vrot.slane %v9921_v34, 4  ;;  %v2707_v0 = vsel %vm2293_vm2, %v2706_v11, %v2705_v49 }
 0x359   :  { %6802 = vmatprep.mubr.msk.bf16.mxu0 %vm221_vm0, %v4813_v26  ;;  %v2700_v40 = vsel %vm2305_vm6, %v2699_v36, %v2698_v4  ;;  %v2786_v19 = vrot.slane %v9097_v20, 4  ;;  %v2787_v43 = vrot.slane %v9265_v52, 3  ;;  %v2708_v2 = vsel %vm2296_vm3, %v9554_v53, %v2707_v0 }
 0x35a   :  { %v2702_v62 = vsel %vm2308_vm7, %v2701_v44, %v2700_v40  ;;  %v2789_v29 = vrot.slane %v9150_v28, 2  ;;  %v2791_v13 = vrot.slane %v9267_v54, 1  ;;  %v2710_v56 = vsel %vm2299_vm4, %v2709_v57, %v2708_v2  ;;  %v12872_v40 = vld [vmem:[#allocation25_spill] sm:$0xff]  ;;  %v12873_v28 = vld [vmem:[#allocation54_spill] sm:$0xff]  ;;  %v12874_v2 = vld [vmem:[#allocation35_spill] sm:$0xff] }
 0x35b   :  { %v2788_v26 = vsel %vm2290_vm1, %v2787_v43, %v2786_v19  ;;  %v2794_v36 = vrot.slane %v9577_v61, 7  ;;  %v2796_v11 = vrot.slane %v9678_v63, 6  ;;  %v2712_v4 = vsel %vm2302_vm5, %v2711_v45, %v2710_v56  ;;  %v12875_v61 = vld [vmem:[#allocation67_spill] sm:$0xff] }
 0x35c   :  { %v2790_v49 = vsel %vm2293_vm2, %v2789_v29, %v2788_v26  ;;  %v2798_v44 = vrot.slane %v9783_v48, 5  ;;  %v2800_v0 = vrot.slane %v12872_v40, 4  ;;  %v2714_v35 = vsel %vm2305_vm6, %v2713_v22, %v2712_v4  ;;  %v10350_v4 = vld [vmem:[#allocation9 + $0x28] sm:$0xff]  }
 0x35d   :  { %v2792_v54 = vsel %vm2296_vm3, %v2791_v13, %v2790_v49  ;;  %v2801_v57 = vrot.slane %v12873_v28, 3  ;;  %v2803_v19 = vrot.slane %v12874_v2, 2  ;;  %v2716_v43 = vsel %vm2308_vm7, %v2715_v5, %v2714_v35 }
 0x35e   :  { %v2793_v63 = vsel %vm2299_vm4, %v12875_v61, %v2792_v54  ;;  %v2805_v45 = vrot.slane %v12854_v14, 1  ;;  %v2808_v29 = vrot.slane %v12849_v31, 7  ;;  %v2718_v56 = vpack.c.b16 %v2716_v43, %v2702_v62  ;;  %v12876_v54 = vld [vmem:[#allocation73_spill] sm:$0xff]  ;;  %v12878_v43 = vld [vmem:[#allocation70_spill] sm:$0xff] }
 0x35f   :  { %v2795_v26 = vsel %vm2302_vm5, %v2794_v36, %v2793_v63  ;;  %v2802_v22 = vsel %vm2290_vm1, %v2801_v57, %v2800_v0  ;;  %v2810_v13 = vrot.slane %v12850_v18, 6  ;;  %v2812_v5 = vrot.slane %v12852_v3, 5  ;;  %v12877_v36 = vld [vmem:[#allocation39_spill] sm:$0xff] }
 0x360   :  { %v2797_v49 = vsel %vm2305_vm6, %v2796_v11, %v2795_v26  ;;  %v2804_v35 = vsel %vm2293_vm2, %v2803_v19, %v2802_v22  ;;  %v4785_v2 = vrot.slane %v12876_v54, 3  ;;  %6707 = vmatmul.mubr.msk.bf16.vlgmr.msra.gmra.mrb[0].mxu1 %vm221_vm0, %v2718_v56  ;;  %v4786_v0 = vrot.slane %v12877_v36, 2  ;;  %v12879_v11 = vld [vmem:[#allocation143_spill] sm:$0xff]  ;;  %v12881_v22 = vld [vmem:[#allocation114_spill] sm:$0xff]  ;;  %v12882_v54 = vld [vmem:[#allocation128_spill] sm:$0xff] }
 0x361   :  { %v2799_v62 = vsel %vm2308_vm7, %v2798_v44, %v2797_v49  ;;  %v2806_v63 = vsel %vm2296_vm3, %v2805_v45, %v2804_v35  ;;  %v4788_v57 = vrot.slane %v12859_v32, 1  ;;  %6711 = vmatpush3.bf16.msra.mxu1 %v12879_v11  ;;  %v12880_v19 = vld [vmem:[#allocation99_spill] sm:$0xff]  ;;  %v4793_v3 = vrot.slane %v12881_v22, 6  ;;  %v12883_v45 = vld [vmem:[#allocation136_spill] sm:$0xff]  ;;  %v12884_v35 = vld [vmem:[#allocation81_spill] sm:$0xff] }
 0x362   :  { %v2807_v31 = vsel %vm2299_vm4, %v12878_v43, %v2806_v63  ;;  %v4791_v26 = vrot.slane %v12880_v19, 7  ;;  %v4795_v18 = vrot.slane %v12882_v54, 5  ;;  %v4787_v44 = vsel %vm2290_vm1, %v4786_v0, %v4785_v2  ;;  %6716 = vmatprep.subr.bf16.mxu1 %v10350_v4  ;;  %v12885_v32 = vld [vmem:[#allocation42_spill] sm:$0xff]  ;;  %v12886_v43 = vld [vmem:[#allocation79_spill] sm:$0xff] }
 0x363   :  { %v2809_v56 = vsel %vm2302_vm5, %v2808_v29, %v2807_v31  ;;  %v4797_v49 = vrot.slane %v12883_v45, 4  ;;  %v4799_v36 = vrot.slane %v12884_v35, 3  ;;  %v4789_v11 = vsel %vm2293_vm2, %v4788_v57, %v4787_v44 }
 0x364   :  { %v2811_v63 = vsel %vm2305_vm6, %v2810_v13, %v2809_v56  ;;  %v4800_v19 = vrot.slane %v12885_v32, 2  ;;  %v4802_v22 = vrot.slane %v12862_v60, 1  ;;  %v4790_v31 = vsel %vm2296_vm3, %v12886_v43, %v4789_v11 }
 0x365   :  { %v2813_v54 = vsel %vm2308_vm7, %v2812_v5, %v2811_v63  ;;  %v4805_v2 = vrot.slane %v12834_v38, 7  ;;  %v4807_v29 = vrot.slane %v12860_v9, 6  ;;  %v4792_v35 = vsel %vm2299_vm4, %v4791_v26, %v4790_v31  ;;  %v12887_v63 = vld [vmem:[#allocation43_spill] sm:$0xff] }
 0x366   :  { %v2842_v0 = vpack.c.b16 %v2813_v54, %v2799_v62  ;;  %v4801_v13 = vsel %vm2290_vm1, %v4800_v19, %v4799_v36  ;;  %v4809_v57 = vrot.slane %v12861_v50, 5  ;;  %v4794_v56 = vsel %vm2302_vm5, %v4793_v3, %v4792_v35  ;;  %v12888_v38 = vld [vmem:[#allocation87_spill] sm:$0xff]  ;;  %v12889_v36 = vld [vmem:[#allocation33_spill] sm:$0xff] }
 0x367   :  { %v4803_v44 = vsel %vm2293_vm2, %v4802_v22, %v4801_v13  ;;  %v4811_v5 = vrot.slane %v12863_v37, 4  ;;  %v4882_v60 = vrot.slane %v12887_v63, 4  ;;  %v4796_v11 = vsel %vm2305_vm6, %v4795_v18, %v4794_v56 }
 0x368   :  { %6712 = vmatprep.mubr.msk.bf16.mxu1 %vm221_vm0, %v2842_v0  ;;  %v4804_v54 = vsel %vm2296_vm3, %v12888_v38, %v4803_v44  ;;  %v4883_v62 = vrot.slane %v12864_v42, 3  ;;  %v4885_v19 = vrot.slane %v12889_v36, 2  ;;  %v4798_v26 = vsel %vm2308_vm7, %v4797_v49, %v4796_v11 }
 0x369   :  { %v4806_v3 = vsel %vm2299_vm4, %v4805_v2, %v4804_v54  ;;  %v4887_v22 = vrot.slane %v12868_v51, 1  ;;  %v4890_v35 = vrot.slane %v12866_v16, 7  ;;  %v4892_v18 = vrot.slane %v12842_v1, 6 }
 0x36a   :  { %v4808_v31 = vsel %vm2302_vm5, %v4807_v29, %v4806_v3  ;;  %v4884_v0 = vsel %vm2290_vm1, %v4883_v62, %v4882_v60  ;;  %v4894_v13 = vrot.slane %v9791_v55, 5  ;;  %v4896_v49 = vrot.slane %v12867_v41, 4  ;;  %v12890_v3 = vld [vmem:[#allocation69_spill] sm:$0xff] }
 0x36b   :  { %v4810_v56 = vsel %vm2305_vm6, %v4809_v57, %v4808_v31  ;;  %v4886_v44 = vsel %vm2293_vm2, %v4885_v19, %v4884_v0  ;;  %v4897_v2 = vrot.slane %v12823_v27, 3  ;;  %v4899_v29 = vrot.slane %v12821_v25, 2  ;;  %v10414_v31 = vld [vmem:[#allocation9 + $0xa8] sm:$0xff]  }
 0x36c   :  { %v4812_v11 = vsel %vm2308_vm7, %v4811_v5, %v4810_v56  ;;  %v4888_v54 = vsel %vm2296_vm3, %v4887_v22, %v4886_v44  ;;  %v4901_v60 = vrot.slane %v12822_v39, 1  ;;  %v4904_v19 = vrot.slane %v12825_v24, 7 }
 0x36d   :  { %v4814_v62 = vpack.c.b16 %v4812_v11, %v4798_v26  ;;  %v4889_v16 = vsel %vm2299_vm4, %v12890_v3, %v4888_v54  ;;  %v4898_v57 = vsel %vm2290_vm1, %v4897_v2, %v4896_v49  ;;  %v4906_v22 = vrot.slane %v9713_v59, 6 }
 0x36e   :  { %v4891_v0 = vsel %vm2302_vm5, %v4890_v35, %v4889_v16  ;;  %v4900_v5 = vsel %vm2293_vm2, %v4899_v29, %v4898_v57  ;;  %v4908_v56 = vrot.slane %v9815_v15, 5  ;;  %v2814_v49 = vrot.slane %v9202_v10, 4 }
 0x36f   :  { %6803 = vmatmul.mubr.msk.bf16.vlgmr.msra.gmra.mrb[0].mxu0 %vm221_vm0, %v4814_v62  ;;  %v4893_v26 = vsel %vm2305_vm6, %v4892_v18, %v4891_v0  ;;  %v4902_v44 = vsel %vm2296_vm3, %v4901_v60, %v4900_v5  ;;  %v2815_v2 = vrot.slane %v9486_v46, 3  ;;  %v2817_v11 = vrot.slane %v12847_v6, 2  ;;  %v12891_v62 = vld [vmem:[#allocation126_spill] sm:$0xff] }
 0x370   :  { %6807 = vmatpush3.bf16.msra.mxu0 %v10282_v33  ;;  %v4895_v16 = vsel %vm2308_vm7, %v4894_v13, %v4893_v26  ;;  %v4903_v35 = vsel %vm2299_vm4, %v12824_v12, %v4902_v44  ;;  %v2819_v54 = vrot.slane %v12871_v23, 1  ;;  %v2822_v60 = vrot.slane %v12845_v7, 7 }
 0x371   :  { %v4905_v29 = vsel %vm2302_vm5, %v4904_v19, %v4903_v35  ;;  %v2816_v18 = vsel %vm2290_vm1, %v2815_v2, %v2814_v49  ;;  %v2824_v57 = vrot.slane %v12891_v62, 6  ;;  %6812 = vmatprep.subr.bf16.mxu0 %v10414_v31  ;;  %v2826_v0 = vrot.slane %v12869_v17, 5  ;;  %v12892_v35 = vld [vmem:[#allocation97_spill] sm:$0xff] }
 0x372   :  { %v4907_v33 = vsel %vm2305_vm6, %v4906_v22, %v4905_v29  ;;  %v2818_v13 = vsel %vm2293_vm2, %v2817_v11, %v2816_v18  ;;  %v2828_v5 = vrot.slane %v12870_v30, 4  ;;  %v2829_v44 = vrot.slane %v9538_v58, 3 }
 0x373   :  { %v4909_v26 = vsel %vm2308_vm7, %v4908_v56, %v4907_v33  ;;  %v2820_v19 = vsel %vm2296_vm3, %v2819_v54, %v2818_v13  ;;  %v2831_v49 = vrot.slane %v9398_v21, 2  ;;  %v2833_v22 = vrot.slane %v9554_v53, 1 }
 0x374   :  { %v4938_v2 = vpack.c.b16 %v4909_v26, %v4895_v16  ;;  %v2821_v7 = vsel %vm2299_vm4, %v12892_v35, %v2820_v19  ;;  %v2836_v11 = vrot.slane %v9751_v47, 7  ;;  %v2830_v18 = vsel %vm2290_vm1, %v2829_v44, %v2828_v5  ;;  %v12894_v44 = vld [vmem:[#allocation47_spill] sm:$0xff] }
 0x375   :  { %v2823_v29 = vsel %vm2302_vm5, %v2822_v60, %v2821_v7  ;;  %v2838_v56 = vrot.slane %v9862_v8, 6  ;;  %v2840_v54 = vrot.slane %v9921_v34, 5  ;;  %v2832_v16 = vsel %vm2293_vm2, %v2831_v49, %v2830_v18  ;;  %v12893_v60 = vld [vmem:[#allocation31_spill] sm:$0xff]  ;;  %v12895_v8 = vld [vmem:[#allocation101_spill] sm:$0xff] }
 0x376   :  { %6808 = vmatprep.mubr.msk.bf16.mxu0 %vm221_vm0, %v4938_v2  ;;  %v2825_v33 = vsel %vm2305_vm6, %v2824_v57, %v2823_v29  ;;  %v2911_v13 = vrot.slane %v9097_v20, 5  ;;  %v2912_v26 = vrot.slane %v9265_v52, 4  ;;  %v2834_v7 = vsel %vm2296_vm3, %v2833_v22, %v2832_v16  ;;  %v12896_v49 = vld [vmem:[#allocation107_spill] sm:$0xff] }
 0x377   :  { %v2827_v19 = vsel %vm2308_vm7, %v2826_v0, %v2825_v33  ;;  %v2914_v5 = vrot.slane %v12893_v60, 3  ;;  %v2916_v47 = vrot.slane %v12894_v44, 2  ;;  %v2835_v34 = vsel %vm2299_vm4, %v12895_v8, %v2834_v7  ;;  %v12897_v44 = vld [vmem:[#allocation35_spill] sm:$0xff] }
 0x378   :  { %v2913_v2 = vsel %vm2290_vm1, %v2912_v26, %v2911_v13  ;;  %v2918_v57 = vrot.slane %v12875_v61, 1  ;;  %v2921_v29 = vrot.slane %v12896_v49, 7  ;;  %v2837_v18 = vsel %vm2302_vm5, %v2836_v11, %v2835_v34  ;;  %v12898_v11 = vld [vmem:[#allocation70_spill] sm:$0xff] }
 0x379   :  { %v2915_v52 = vsel %vm2293_vm2, %v2914_v5, %v2913_v2  ;;  %v2923_v0 = vrot.slane %v9783_v48, 6  ;;  %v2925_v22 = vrot.slane %v12872_v40, 5  ;;  %v2839_v33 = vsel %vm2305_vm6, %v2838_v56, %v2837_v18  ;;  %v12899_v48 = vld [vmem:[#allocation89_spill] sm:$0xff]  ;;  %v12900_v18 = vld [vmem:[#allocation110_spill] sm:$0xff] }
 0x37a   :  { %v2917_v16 = vsel %vm2296_vm3, %v2916_v47, %v2915_v52  ;;  %v2926_v7 = vrot.slane %v12873_v28, 4  ;;  %v2928_v13 = vrot.slane %v12897_v44, 3  ;;  %v2841_v26 = vsel %vm2308_vm7, %v2840_v54, %v2839_v33  ;;  %v10482_v47 = vld [vmem:[#allocation9 + $0x30] sm:$0xff]   ;;  %v12902_v33 = vld [vmem:[#allocation122_spill] sm:$0xff] }
 0x37b   :  { %v2919_v49 = vsel %vm2299_vm4, %v2918_v57, %v2917_v16  ;;  %v2930_v34 = vrot.slane %v12854_v14, 2  ;;  %v2932_v5 = vrot.slane %v12898_v11, 1  ;;  %v2843_v2 = vpack.c.b16 %v2841_v26, %v2827_v19  ;;  %12901 = vst [vmem:[#allocation144_spill] sm:$0xff] %v10482_v47  ;;  %v12903_v16 = vld [vmem:[#allocation73_spill] sm:$0xff]  ;;  %v12904_v26 = vld [vmem:[#allocation39_spill] sm:$0xff] }
 0x37c   :  { %v2920_v40 = vsel %vm2302_vm5, %v12899_v48, %v2919_v49  ;;  %v2927_v56 = vsel %vm2290_vm1, %v2926_v7, %v2925_v22  ;;  %v2935_v52 = vrot.slane %v12900_v18, 7  ;;  %v2937_v57 = vrot.slane %v12902_v33, 6  ;;  %v12905_v7 = vld [vmem:[#allocation65_spill] sm:$0xff] }
 0x37d   :  { %v2922_v44 = vsel %vm2305_vm6, %v2921_v29, %v2920_v40  ;;  %v2929_v54 = vsel %vm2293_vm2, %v2928_v13, %v2927_v56  ;;  %v4910_v14 = vrot.slane %v12903_v16, 4  ;;  %6713 = vmatmul.mubr.msk.bf16.vlgmr.msra.gmra.mrb[0].mxu1 %vm221_vm0, %v2843_v2  ;;  %v4911_v22 = vrot.slane %v12904_v26, 3  ;;  %v12906_v29 = vld [vmem:[#allocation114_spill] sm:$0xff]  ;;  %v12907_v56 = vld [vmem:[#allocation128_spill] sm:$0xff]  ;;  %v12908_v33 = vld [vmem:[#allocation93_spill] sm:$0xff] }
 0x37e   :  { %v2924_v19 = vsel %vm2308_vm7, %v2923_v0, %v2922_v44  ;;  %v2931_v49 = vsel %vm2296_vm3, %v2930_v34, %v2929_v54  ;;  %v4913_v18 = vrot.slane %v12905_v7, 2  ;;  %6717 = vmatpush3.bf16.msra.mxu1 %v10350_v4  ;;  %v4915_v40 = vrot.slane %v12886_v43, 1  ;;  %v12909_v34 = vld [vmem:[#allocation81_spill] sm:$0xff] }
 0x37f   :  { %v2933_v11 = vsel %vm2299_vm4, %v2932_v5, %v2931_v49  ;;  %v4918_v13 = vrot.slane %v12906_v29, 7  ;;  %v4920_v16 = vrot.slane %v12907_v56, 6  ;;  %v4912_v44 = vsel %vm2290_vm1, %v4911_v22, %v4910_v14  ;;  %6722 = vmatprep.subr.bf16.mxu1 %v10482_v47  ;;  %v12910_v29 = vld [vmem:[#allocation109_spill] sm:$0xff] }
 0x380   :  { %v2934_v2 = vsel %vm2302_vm5, %v12908_v33, %v2933_v11  ;;  %v4922_v0 = vrot.slane %v12883_v45, 5  ;;  %v4924_v54 = vrot.slane %v12909_v34, 4  ;;  %v4914_v4 = vsel %vm2293_vm2, %v4913_v18, %v4912_v44  ;;  %v12911_v34 = vld [vmem:[#allocation99_spill] sm:$0xff] }
 0x381   :  { %v2936_v5 = vsel %vm2305_vm6, %v2935_v52, %v2934_v2  ;;  %v4925_v49 = vrot.slane %v12885_v32, 3  ;;  %v4927_v43 = vrot.slane %v12910_v29, 2  ;;  %v4916_v11 = vsel %vm2296_vm3, %v4915_v40, %v4914_v4 }
 0x382   :  { %v2938_v56 = vsel %vm2308_vm7, %v2937_v57, %v2936_v5  ;;  %v4929_v14 = vrot.slane %v12888_v38, 1  ;;  %v4932_v22 = vrot.slane %v12860_v9, 7  ;;  %v4917_v47 = vsel %vm2299_vm4, %v12911_v34, %v4916_v11 }
 0x383   :  { %v2967_v45 = vpack.c.b16 %v2938_v56, %v2924_v19  ;;  %v4926_v52 = vsel %vm2290_vm1, %v4925_v49, %v4924_v54  ;;  %v4934_v18 = vrot.slane %v12861_v50, 6  ;;  %v4919_v2 = vsel %vm2302_vm5, %v4918_v13, %v4917_v47  ;;  %v12912_v49 = vld [vmem:[#allocation103_spill] sm:$0xff] }
 0x384   :  { %v4928_v44 = vsel %vm2293_vm2, %v4927_v43, %v4926_v52  ;;  %v4936_v57 = vrot.slane %v12863_v37, 5  ;;  %v5007_v40 = vrot.slane %v12887_v63, 5  ;;  %v4921_v5 = vsel %vm2305_vm6, %v4920_v16, %v4919_v2 }
 0x385   :  { %6718 = vmatprep.mubr.msk.bf16.mxu1 %vm221_vm0, %v2967_v45  ;;  %v4930_v19 = vsel %vm2296_vm3, %v4929_v14, %v4928_v44  ;;  %v5008_v56 = vrot.slane %v12864_v42, 4  ;;  %v5010_v54 = vrot.slane %v12889_v36, 3  ;;  %v4923_v4 = vsel %vm2308_vm7, %v4922_v0, %v4921_v5 }
 0x386   :  { %v4931_v47 = vsel %vm2299_vm4, %v12912_v49, %v4930_v19  ;;  %v5012_v43 = vrot.slane %v12868_v51, 2  ;;  %v5014_v13 = vrot.slane %v12890_v3, 1  ;;  %v5017_v16 = vrot.slane %v12842_v1, 7 }
 0x387   :  { %v4933_v11 = vsel %vm2302_vm5, %v4932_v22, %v4931_v47  ;;  %v5009_v45 = vsel %vm2290_vm1, %v5008_v56, %v5007_v40  ;;  %v5019_v14 = vrot.slane %v9791_v55, 6  ;;  %v5021_v0 = vrot.slane %v12867_v41, 5 }
 0x388   :  { %v4935_v52 = vsel %vm2305_vm6, %v4934_v18, %v4933_v11  ;;  %v5011_v2 = vsel %vm2293_vm2, %v5010_v54, %v5009_v45  ;;  %v5022_v44 = vrot.slane %v12823_v27, 4  ;;  %v5024_v22 = vrot.slane %v12821_v25, 3  ;;  %v10545_v54 = vld [vmem:[#allocation9 + $0xb0] sm:$0xff]   ;;  %v12913_v11 = vld [vmem:[#allocation91_spill] sm:$0xff] }
 0x389   :  { %v4937_v5 = vsel %vm2308_vm7, %v4936_v57, %v4935_v52  ;;  %v5013_v19 = vsel %vm2296_vm3, %v5012_v43, %v5011_v2  ;;  %v5026_v40 = vrot.slane %v12822_v39, 2  ;;  %v5028_v18 = vrot.slane %v12824_v12, 1 }
 0x38a   :  { %v4939_v56 = vpack.c.b16 %v4937_v5, %v4923_v4  ;;  %v5015_v47 = vsel %vm2299_vm4, %v5014_v13, %v5013_v19  ;;  %v5023_v1 = vsel %vm2290_vm1, %v5022_v44, %v5021_v0  ;;  %v5031_v43 = vrot.slane %v9713_v59, 7 }
 0x38b   :  { %v5016_v45 = vsel %vm2302_vm5, %v12913_v11, %v5015_v47  ;;  %v5025_v57 = vsel %vm2293_vm2, %v5024_v22, %v5023_v1  ;;  %v5033_v52 = vrot.slane %v9815_v15, 6  ;;  %v2939_v2 = vrot.slane %v9202_v10, 5 }
 0x38c   :  { %6809 = vmatmul.mubr.msk.bf16.vlgmr.msra.gmra.mrb[0].mxu0 %vm221_vm0, %v4939_v56  ;;  %v5018_v4 = vsel %vm2305_vm6, %v5017_v16, %v5016_v45  ;;  %v5027_v13 = vsel %vm2296_vm3, %v5026_v40, %v5025_v57  ;;  %v2940_v0 = vrot.slane %v9486_v46, 4  ;;  %v2942_v5 = vrot.slane %v12847_v6, 3 }
 0x38d   :  { %6813 = vmatpush3.bf16.msra.mxu0 %v10414_v31  ;;  %v5020_v44 = vsel %vm2308_vm7, %v5019_v14, %v5018_v4  ;;  %v5029_v1 = vsel %vm2299_vm4, %v5028_v18, %v5027_v13  ;;  %v2944_v19 = vrot.slane %v12871_v23, 2  ;;  %v2946_v40 = vrot.slane %v12892_v35, 1 }
 0x38e   :  { %v5030_v22 = vsel %vm2302_vm5, %v12825_v24, %v5029_v1  ;;  %v2941_v16 = vsel %vm2290_vm1, %v2940_v0, %v2939_v2  ;;  %v2949_v56 = vrot.slane %v12891_v62, 7  ;;  %6818 = vmatprep.subr.bf16.mxu0 %v10545_v54  ;;  %v2951_v47 = vrot.slane %v12869_v17, 6  ;;  %v12915_v62 = vld [vmem:[#allocation130_spill] sm:$0xff] }
 0x38f   :  { %v5032_v31 = vsel %vm2305_vm6, %v5031_v43, %v5030_v22  ;;  %v2943_v14 = vsel %vm2293_vm2, %v2942_v5, %v2941_v16  ;;  %v2953_v18 = vrot.slane %v12870_v30, 5  ;;  %v2954_v4 = vrot.slane %v9538_v58, 4  ;;  %v12914_v5 = vld [vmem:[#allocation71_spill] sm:$0xff] }
 0x390   :  { %v5034_v45 = vsel %vm2308_vm7, %v5033_v52, %v5032_v31  ;;  %v2945_v57 = vsel %vm2296_vm3, %v2944_v19, %v2943_v14  ;;  %v2956_v13 = vrot.slane %v9398_v21, 3  ;;  %v2958_v1 = vrot.slane %v9554_v53, 2  ;;  %v12916_v31 = vld [vmem:[#allocation138_spill] sm:$0xff] }
 0x391   :  { %v5063_v2 = vpack.c.b16 %v5034_v45, %v5020_v44  ;;  %v2947_v0 = vsel %vm2299_vm4, %v2946_v40, %v2945_v57  ;;  %v2960_v43 = vrot.slane %v12895_v8, 1  ;;  %v2955_v16 = vsel %vm2290_vm1, %v2954_v4, %v2953_v18  ;;  %v12917_v45 = vld [vmem:[#allocation46_spill] sm:$0xff]  ;;  %v12918_v4 = vld [vmem:[#allocation47_spill] sm:$0xff] }
 0x392   :  { %v2948_v22 = vsel %vm2302_vm5, %v12914_v5, %v2947_v0  ;;  %v2963_v52 = vrot.slane %v12915_v62, 7  ;;  %v2965_v19 = vrot.slane %v12916_v31, 6  ;;  %v2957_v44 = vsel %vm2293_vm2, %v2956_v13, %v2955_v16 }
 0x393   :  { %6814 = vmatprep.mubr.msk.bf16.mxu0 %vm221_vm0, %v5063_v2  ;;  %v2950_v14 = vsel %vm2305_vm6, %v2949_v56, %v2948_v22  ;;  %v3036_v40 = vrot.slane %v9097_v20, 6  ;;  %v3037_v57 = vrot.slane %v12917_v45, 5  ;;  %v2959_v0 = vsel %vm2296_vm3, %v2958_v1, %v2957_v44  ;;  %v12919_v22 = vld [vmem:[#allocation116_spill] sm:$0xff]  ;;  %v12921_v1 = vld [vmem:[#allocation25_spill] sm:$0xff]  ;;  %v12924_v20 = vld [vmem:[#allocation70_spill] sm:$0xff] }
 0x394   :  { %v2952_v8 = vsel %vm2308_vm7, %v2951_v47, %v2950_v14  ;;  %v3039_v18 = vrot.slane %v12893_v60, 4  ;;  %v3041_v62 = vrot.slane %v12918_v4, 3  ;;  %v2961_v31 = vsel %vm2299_vm4, %v2960_v43, %v2959_v0  ;;  %v12920_v47 = vld [vmem:[#allocation75_spill] sm:$0xff] }
 0x395   :  { %v3038_v2 = vsel %vm2290_vm1, %v3037_v57, %v3036_v40  ;;  %v3043_v56 = vrot.slane %v12875_v61, 2  ;;  %v3045_v13 = vrot.slane %v12899_v48, 1  ;;  %v2962_v16 = vsel %vm2302_vm5, %v12919_v22, %v2961_v31  ;;  %v12922_v40 = vld [vmem:[#allocation35_spill] sm:$0xff]  ;;  %v12923_v61 = vld [vmem:[#allocation56_spill] sm:$0xff] }
 0x396   :  { %v3040_v45 = vsel %vm2293_vm2, %v3039_v18, %v3038_v2  ;;  %v3048_v14 = vrot.slane %v12920_v47, 7  ;;  %v3050_v44 = vrot.slane %v12921_v1, 6  ;;  %v2964_v60 = vsel %vm2305_vm6, %v2963_v52, %v2962_v16 }
 0x397   :  { %v3042_v4 = vsel %vm2296_vm3, %v3041_v62, %v3040_v45  ;;  %v3051_v43 = vrot.slane %v12873_v28, 5  ;;  %v3053_v57 = vrot.slane %v12922_v40, 4  ;;  %v2966_v0 = vsel %vm2308_vm7, %v2965_v19, %v2964_v60  ;;  %v10613_v62 = vld [vmem:[#allocation9 + $0x38] sm:$0xff]   ;;  %v12925_v45 = vld [vmem:[#allocation107_spill] sm:$0xff] }
 0x398   :  { %v3044_v48 = vsel %vm2299_vm4, %v3043_v56, %v3042_v4  ;;  %v3055_v31 = vrot.slane %v12923_v61, 3  ;;  %v3057_v18 = vrot.slane %v12924_v20, 2  ;;  %v2968_v2 = vpack.c.b16 %v2966_v0, %v2952_v8  ;;  %v12926_v19 = vld [vmem:[#allocation122_spill] sm:$0xff]  ;;  %v12927_v56 = vld [vmem:[#allocation73_spill] sm:$0xff]  ;;  %v12928_v0 = vld [vmem:[#allocation144_spill] sm:$0xff] }
 0x399   :  { %v3046_v47 = vsel %vm2302_vm5, %v3045_v13, %v3044_v48  ;;  %v3052_v1 = vsel %vm2290_vm1, %v3051_v43, %v3050_v44  ;;  %v3059_v52 = vrot.slane %v12908_v33, 1  ;;  %v3062_v4 = vrot.slane %v12926_v19, 7  ;;  %v12930_v19 = vld [vmem:[#allocation128_spill] sm:$0xff] }
 0x39a   :  { %v3047_v16 = vsel %vm2305_vm6, %v12925_v45, %v3046_v47  ;;  %v3054_v60 = vsel %vm2293_vm2, %v3053_v57, %v3052_v1  ;;  %v5035_v61 = vrot.slane %v12927_v56, 5  ;;  %6719 = vmatmul.mubr.msk.bf16.vlgmr.msra.gmra.mrb[0].mxu1 %vm221_vm0, %v2968_v2  ;;  %v5036_v13 = vrot.slane %v12904_v26, 4  ;;  %v12929_v47 = vld [vmem:[#allocation79_spill] sm:$0xff] }
 0x39b   :  { %v3049_v8 = vsel %vm2308_vm7, %v3048_v14, %v3047_v16  ;;  %v3056_v48 = vsel %vm2296_vm3, %v3055_v31, %v3054_v60  ;;  %v5038_v44 = vrot.slane %v12905_v7, 3  ;;  %6723 = vmatpush3.bf16.msra.mxu1 %v12928_v0  ;;  %v5040_v1 = vrot.slane %v12929_v47, 2  ;;  %v12931_v16 = vld [vmem:[#allocation136_spill] sm:$0xff]  ;;  %v12932_v60 = vld [vmem:[#allocation81_spill] sm:$0xff]  ;;  %v12933_v7 = vld [vmem:[#allocation110_spill] sm:$0xff] }
 0x39c   :  { %v3058_v43 = vsel %vm2299_vm4, %v3057_v18, %v3056_v48  ;;  %v5042_v57 = vrot.slane %v12911_v34, 1  ;;  %v5045_v56 = vrot.slane %v12930_v19, 7  ;;  %v5037_v14 = vsel %vm2290_vm1, %v5036_v13, %v5035_v61  ;;  %6728 = vmatprep.subr.bf16.mxu1 %v10613_v62 }
 0x39d   :  { %v3060_v2 = vsel %vm2302_vm5, %v3059_v52, %v3058_v43  ;;  %v5047_v31 = vrot.slane %v12931_v16, 6  ;;  %v5049_v26 = vrot.slane %v12932_v60, 5  ;;  %v5039_v48 = vsel %vm2293_vm2, %v5038_v44, %v5037_v14  ;;  %v12934_v44 = vld [vmem:[#allocation114_spill] sm:$0xff] }
 0x39e   :  { %v3061_v18 = vsel %vm2305_vm6, %v12933_v7, %v3060_v2  ;;  %v5050_v0 = vrot.slane %v12885_v32, 4  ;;  %v5052_v34 = vrot.slane %v12910_v29, 3  ;;  %v5041_v52 = vsel %vm2296_vm3, %v5040_v1, %v5039_v48 }
 0x39f   :  { %v3063_v19 = vsel %vm2308_vm7, %v3062_v4, %v3061_v18  ;;  %v5054_v61 = vrot.slane %v12888_v38, 2  ;;  %v5056_v13 = vrot.slane %v12912_v49, 1  ;;  %v5043_v60 = vsel %vm2299_vm4, %v5042_v57, %v5041_v52 }
 0x3a0   :  { %v3092_v43 = vpack.c.b16 %v3063_v19, %v3049_v8  ;;  %v5051_v16 = vsel %vm2290_vm1, %v5050_v0, %v5049_v26  ;;  %v5059_v2 = vrot.slane %v12861_v50, 7  ;;  %v5044_v14 = vsel %vm2302_vm5, %v12934_v44, %v5043_v60 }
 0x3a1   :  { %v5053_v29 = vsel %vm2293_vm2, %v5052_v34, %v5051_v16  ;;  %v5061_v4 = vrot.slane %v12863_v37, 6  ;;  %v5132_v1 = vrot.slane %v12887_v63, 6  ;;  %v5046_v18 = vsel %vm2305_vm6, %v5045_v56, %v5044_v14 }
 0x3a2   :  { %6724 = vmatprep.mubr.msk.bf16.mxu1 %vm221_vm0, %v3092_v43  ;;  %v5055_v19 = vsel %vm2296_vm3, %v5054_v61, %v5053_v29  ;;  %v5133_v8 = vrot.slane %v12864_v42, 5  ;;  %v5135_v26 = vrot.slane %v12889_v36, 4  ;;  %v5048_v57 = vsel %vm2308_vm7, %v5047_v31, %v5046_v18 }
 0x3a3   :  { %v5057_v60 = vsel %vm2299_vm4, %v5056_v13, %v5055_v19  ;;  %v5137_v34 = vrot.slane %v12868_v51, 3  ;;  %v5139_v16 = vrot.slane %v12890_v3, 2  ;;  %v5141_v56 = vrot.slane %v12913_v11, 1 }
 0x3a4   :  { %v5058_v48 = vsel %vm2302_vm5, %v12860_v9, %v5057_v60  ;;  %v5134_v0 = vsel %vm2290_vm1, %v5133_v8, %v5132_v1  ;;  %v5144_v29 = vrot.slane %v9791_v55, 7  ;;  %v5146_v31 = vrot.slane %v12867_v41, 6 }
 0x3a5   :  { %v5060_v52 = vsel %vm2305_vm6, %v5059_v2, %v5058_v48  ;;  %v5136_v61 = vsel %vm2293_vm2, %v5135_v26, %v5134_v0  ;;  %v5147_v13 = vrot.slane %v12823_v27, 5  ;;  %v5149_v18 = vrot.slane %v12821_v25, 4  ;;  %v10677_v26 = vld [vmem:[#allocation9 + $0xb8] sm:$0xff]  }
 0x3a6   :  { %v5062_v43 = vsel %vm2308_vm7, %v5061_v4, %v5060_v52  ;;  %v5138_v14 = vsel %vm2296_vm3, %v5137_v34, %v5136_v61  ;;  %v5151_v1 = vrot.slane %v12822_v39, 3  ;;  %v5153_v2 = vrot.slane %v12824_v12, 2  ;;  %v12935_v52 = vld [vmem:[#allocation59_spill] sm:$0xff] }
 0x3a7   :  { %v5064_v19 = vpack.c.b16 %v5062_v43, %v5048_v57  ;;  %v5140_v8 = vsel %vm2299_vm4, %v5139_v16, %v5138_v14  ;;  %v5148_v60 = vsel %vm2290_vm1, %v5147_v13, %v5146_v31  ;;  %v5155_v4 = vrot.slane %v12825_v24, 1 }
 0x3a8   :  { %v5142_v48 = vsel %vm2302_vm5, %v5141_v56, %v5140_v8  ;;  %v5150_v0 = vsel %vm2293_vm2, %v5149_v18, %v5148_v60  ;;  %v5158_v34 = vrot.slane %v9815_v15, 7  ;;  %v3064_v61 = vrot.slane %v9202_v10, 6 }
 0x3a9   :  { %6815 = vmatmul.mubr.msk.bf16.vlgmr.msra.gmra.mrb[0].mxu0 %vm221_vm0, %v5064_v19  ;;  %v5143_v57 = vsel %vm2305_vm6, %v12935_v52, %v5142_v48  ;;  %v5152_v16 = vsel %vm2296_vm3, %v5151_v1, %v5150_v0  ;;  %v3065_v31 = vrot.slane %v9486_v46, 5  ;;  %v3067_v43 = vrot.slane %v12847_v6, 4 }
 0x3aa   :  { %6819 = vmatpush3.bf16.msra.mxu0 %v10545_v54  ;;  %v5145_v56 = vsel %vm2308_vm7, %v5144_v29, %v5143_v57  ;;  %v5154_v13 = vsel %vm2299_vm4, %v5153_v2, %v5152_v16  ;;  %v3069_v14 = vrot.slane %v12871_v23, 3  ;;  %v3071_v1 = vrot.slane %v12892_v35, 2 }
 0x3ab   :  { %v5156_v18 = vsel %vm2302_vm5, %v5155_v4, %v5154_v13  ;;  %v3066_v19 = vsel %vm2290_vm1, %v3065_v31, %v3064_v61  ;;  %v3073_v8 = vrot.slane %v12914_v5, 1  ;;  %6824 = vmatprep.subr.bf16.mxu0 %v10677_v26  ;;  %v3076_v60 = vrot.slane %v12869_v17, 7  ;;  %v12936_v13 = vld [vmem:[#allocation101_spill] sm:$0xff] }
 0x3ac   :  { %v5157_v54 = vsel %vm2305_vm6, %v9713_v59, %v5156_v18  ;;  %v3068_v29 = vsel %vm2293_vm2, %v3067_v43, %v3066_v19  ;;  %v3078_v2 = vrot.slane %v12870_v30, 6  ;;  %v3079_v4 = vrot.slane %v9538_v58, 5  ;;  %v12944_v58 = vld [vmem:[#allocation89_spill] sm:$0xff] }
 0x3ad   :  { %v5159_v48 = vsel %vm2308_vm7, %v5158_v34, %v5157_v54  ;;  %v3070_v0 = vsel %vm2296_vm3, %v3069_v14, %v3068_v29  ;;  %v3081_v57 = vrot.slane %v9398_v21, 4  ;;  %v3083_v31 = vrot.slane %v9554_v53, 3  ;;  %v12937_v34 = vld [vmem:[#allocation138_spill] sm:$0xff]  ;;  %v12943_v21 = vld [vmem:[#allocation67_spill] sm:$0xff] }
 0x3ae   :  { %v5188_v16 = vpack.c.b16 %v5159_v48, %v5145_v56  ;;  %v3072_v61 = vsel %vm2299_vm4, %v3071_v1, %v3070_v0  ;;  %v3085_v18 = vrot.slane %v12936_v13, 2  ;;  %v3080_v19 = vsel %vm2290_vm1, %v3079_v4, %v3078_v2  ;;  %v12938_v14 = vld [vmem:[#allocation126_spill] sm:$0xff]  ;;  %v12939_v1 = vld [vmem:[#allocation23_spill] sm:$0xff] }
 0x3af   :  { %v3074_v43 = vsel %vm2302_vm5, %v3073_v8, %v3072_v61  ;;  %v3087_v17 = vrot.slane %v12919_v22, 1  ;;  %v3090_v54 = vrot.slane %v12937_v34, 7  ;;  %v3082_v56 = vsel %vm2293_vm2, %v3081_v57, %v3080_v19  ;;  %v12940_v0 = vld [vmem:[#allocation46_spill] sm:$0xff]  ;;  %v12941_v2 = vld [vmem:[#allocation31_spill] sm:$0xff] }
 0x3b0   :  { %6820 = vmatprep.mubr.msk.bf16.mxu0 %vm221_vm0, %v5188_v16  ;;  %v3075_v29 = vsel %vm2305_vm6, %v12938_v14, %v3074_v43  ;;  %v3161_v48 = vrot.slane %v12939_v1, 7  ;;  %v3162_v53 = vrot.slane %v12940_v0, 6  ;;  %v3084_v8 = vsel %vm2296_vm3, %v3083_v31, %v3082_v56  ;;  %v12942_v61 = vld [vmem:[#allocation47_spill] sm:$0xff]  ;;  %v12946_v56 = vld [vmem:[#allocation130_spill] sm:$0xff] }
 0x3b1   :  { %v3077_v13 = vsel %vm2308_vm7, %v3076_v60, %v3075_v29  ;;  %v3164_v4 = vrot.slane %v12941_v2, 5  ;;  %v3166_v22 = vrot.slane %v12942_v61, 4  ;;  %v3086_v34 = vsel %vm2299_vm4, %v3085_v18, %v3084_v8  ;;  %v12945_v29 = vld [vmem:[#allocation25_spill] sm:$0xff] }
 0x3b2   :  { %v3163_v16 = vsel %vm2290_vm1, %v3162_v53, %v3161_v48  ;;  %v3168_v43 = vrot.slane %v12943_v21, 3  ;;  %v3170_v57 = vrot.slane %v12944_v58, 2  ;;  %v3088_v19 = vsel %vm2302_vm5, %v3087_v17, %v3086_v34  ;;  %v12947_v17 = vld [vmem:[#allocation56_spill] sm:$0xff] }
 0x3b3   :  { %v3165_v1 = vsel %vm2293_vm2, %v3164_v4, %v3163_v16  ;;  %v3172_v60 = vrot.slane %v12925_v45, 1  ;;  %v3175_v31 = vrot.slane %v12945_v29, 7  ;;  %v3089_v0 = vsel %vm2305_vm6, %v12946_v56, %v3088_v19  ;;  %v12948_v16 = vld [vmem:[#allocation73_spill] sm:$0xff]  ;;  %v12950_v19 = vld [vmem:[#allocation39_spill] sm:$0xff] }
 0x3b4   :  { %v3167_v2 = vsel %vm2296_vm3, %v3166_v22, %v3165_v1  ;;  %v3176_v18 = vrot.slane %v12873_v28, 6  ;;  %v3178_v53 = vrot.slane %v12922_v40, 5  ;;  %v3091_v21 = vsel %vm2308_vm7, %v3090_v54, %v3089_v0  ;;  %v10745_v22 = vld [vmem:[#allocation9 + $0x40] sm:$0xff]  }
 0x3b5   :  { %v3169_v58 = vsel %vm2299_vm4, %v3168_v43, %v3167_v2  ;;  %v3180_v34 = vrot.slane %v12947_v17, 4  ;;  %v3182_v48 = vrot.slane %v12924_v20, 3  ;;  %v3093_v45 = vpack.c.b16 %v3091_v21, %v3077_v13  ;;  %v12949_v20 = vld [vmem:[#allocation75_spill] sm:$0xff]  ;;  %v12953_v21 = vld [vmem:[#allocation136_spill] sm:$0xff]  ;;  %v12954_v17 = vld [vmem:[#allocation81_spill] sm:$0xff] }
 0x3b6   :  { %v3171_v8 = vsel %vm2302_vm5, %v3170_v57, %v3169_v58  ;;  %v3177_v4 = vsel %vm2290_vm1, %v3176_v18, %v3175_v31  ;;  %v3184_v61 = vrot.slane %v12908_v33, 2  ;;  %v3186_v54 = vrot.slane %v12933_v7, 1  ;;  %v12951_v33 = vld [vmem:[#allocation65_spill] sm:$0xff]  ;;  %v12952_v7 = vld [vmem:[#allocation99_spill] sm:$0xff] }
 0x3b7   :  { %v3173_v28 = vsel %vm2305_vm6, %v3172_v60, %v3171_v8  ;;  %v3179_v40 = vsel %vm2293_vm2, %v3178_v53, %v3177_v4  ;;  %v5160_v43 = vrot.slane %v12948_v16, 6  ;;  %6725 = vmatmul.mubr.msk.bf16.vlgmr.msra.gmra.mrb[0].mxu1 %vm221_vm0, %v3093_v45  ;;  %v5161_v1 = vrot.slane %v12950_v19, 5  ;;  %v12955_v8 = vld [vmem:[#allocation109_spill] sm:$0xff] }
 0x3b8   :  { %v3174_v13 = vsel %vm2308_vm7, %v12949_v20, %v3173_v28  ;;  %v3181_v57 = vsel %vm2296_vm3, %v3180_v34, %v3179_v40  ;;  %v5163_v29 = vrot.slane %v12951_v33, 4  ;;  %6729 = vmatpush3.bf16.msra.mxu1 %v10613_v62  ;;  %v5165_v60 = vrot.slane %v12929_v47, 3  ;;  %v12956_v28 = vld [vmem:[#allocation122_spill] sm:$0xff] }
 0x3b9   :  { %v3183_v31 = vsel %vm2299_vm4, %v3182_v48, %v3181_v57  ;;  %v5167_v0 = vrot.slane %v12952_v7, 2  ;;  %v5169_v2 = vrot.slane %v12934_v44, 1  ;;  %v5162_v53 = vsel %vm2290_vm1, %v5161_v1, %v5160_v43  ;;  %6734 = vmatprep.subr.bf16.mxu1 %v10745_v22 }
 0x3ba   :  { %v3185_v18 = vsel %vm2302_vm5, %v3184_v61, %v3183_v31  ;;  %v5172_v58 = vrot.slane %v12953_v21, 7  ;;  %v5174_v34 = vrot.slane %v12954_v17, 6  ;;  %v5164_v62 = vsel %vm2293_vm2, %v5163_v29, %v5162_v53 }
 0x3bb   :  { %v3187_v48 = vsel %vm2305_vm6, %v3186_v54, %v3185_v18  ;;  %v5175_v45 = vrot.slane %v12885_v32, 5  ;;  %v5177_v4 = vrot.slane %v12955_v8, 4  ;;  %v5166_v61 = vsel %vm2296_vm3, %v5165_v60, %v5164_v62  ;;  %v12957_v60 = vld [vmem:[#allocation128_spill] sm:$0xff] }
 0x3bc   :  { %v3188_v40 = vsel %vm2308_vm7, %v12956_v28, %v3187_v48  ;;  %v5179_v43 = vrot.slane %v12888_v38, 3  ;;  %v5181_v20 = vrot.slane %v12912_v49, 2  ;;  %v5168_v1 = vsel %vm2299_vm4, %v5167_v0, %v5166_v61 }
 0x3bd   :  { %v3217_v57 = vpack.c.b16 %v3188_v40, %v3174_v13  ;;  %v5176_v54 = vsel %vm2290_vm1, %v5175_v45, %v5174_v34  ;;  %v5183_v29 = vrot.slane %v12860_v9, 1  ;;  %v5170_v31 = vsel %vm2302_vm5, %v5169_v2, %v5168_v1 }
 0x3be   :  { %v5178_v18 = vsel %vm2293_vm2, %v5177_v4, %v5176_v54  ;;  %v5186_v53 = vrot.slane %v12863_v37, 7  ;;  %v5257_v48 = vrot.slane %v12887_v63, 7  ;;  %v5171_v62 = vsel %vm2305_vm6, %v12957_v60, %v5170_v31  ;;  %v10809_v31 = vld [vmem:[#allocation9 + $0xc0] sm:$0xff]  }
 0x3bf   :  { %6730 = vmatprep.mubr.msk.bf16.mxu1 %vm221_vm0, %v3217_v57  ;;  %v5180_v13 = vsel %vm2296_vm3, %v5179_v43, %v5178_v18  ;;  %v5258_v0 = vrot.slane %v12864_v42, 6  ;;  %v5260_v34 = vrot.slane %v12889_v36, 5  ;;  %v5173_v45 = vsel %vm2308_vm7, %v5172_v58, %v5171_v62 }
 0x3c0   :  { %v5182_v2 = vsel %vm2299_vm4, %v5181_v20, %v5180_v13  ;;  %v5262_v4 = vrot.slane %v12868_v51, 4  ;;  %v5264_v28 = vrot.slane %v12890_v3, 3  ;;  %v5266_v61 = vrot.slane %v12913_v11, 2 }
 0x3c1   :  { %v5184_v63 = vsel %vm2302_vm5, %v5183_v29, %v5182_v2  ;;  %v5259_v40 = vsel %vm2290_vm1, %v5258_v0, %v5257_v48  ;;  %v5268_v43 = vrot.slane %v12935_v52, 1  ;;  %v5271_v58 = vrot.slane %v12867_v41, 7 }
 0x3c2   :  { %v5185_v42 = vsel %vm2305_vm6, %v12861_v50, %v5184_v63  ;;  %v5261_v36 = vsel %vm2293_vm2, %v5260_v34, %v5259_v40  ;;  %v5272_v20 = vrot.slane %v12823_v27, 6  ;;  %v5274_v57 = vrot.slane %v12821_v25, 5 }
 0x3c3   :  { %v5187_v51 = vsel %vm2308_vm7, %v5186_v53, %v5185_v42  ;;  %v5263_v3 = vsel %vm2296_vm3, %v5262_v4, %v5261_v36  ;;  %v5276_v1 = vrot.slane %v12822_v39, 4  ;;  %v5278_v29 = vrot.slane %v12824_v12, 3  ;;  %v12958_v4 = vld [vmem:[#allocation83_spill] sm:$0xff]  ;;  %v12961_v42 = vld [vmem:[#allocation101_spill] sm:$0xff] }
 0x3c4   :  { %v5189_v11 = vpack.c.b16 %v5187_v51, %v5173_v45  ;;  %v5265_v52 = vsel %vm2299_vm4, %v5264_v28, %v5263_v3  ;;  %v5273_v54 = vsel %vm2290_vm1, %v5272_v20, %v5271_v58  ;;  %v5280_v18 = vrot.slane %v12825_v24, 2  ;;  %v12962_v58 = vld [vmem:[#allocation116_spill] sm:$0xff] }
 0x3c5   :  { %v5267_v41 = vsel %vm2302_vm5, %v5266_v61, %v5265_v52  ;;  %v5275_v27 = vsel %vm2293_vm2, %v5274_v57, %v5273_v54  ;;  %v5282_v53 = vrot.slane %v9713_v59, 1  ;;  %v3189_v48 = vrot.slane %v9202_v10, 7  ;;  %v12960_v61 = vld [vmem:[#allocation85_spill] sm:$0xff]  ;;  %v12963_v57 = vld [vmem:[#allocation48_spill] sm:$0xff]  ;;  %v12965_v54 = vld [vmem:[#allocation134_spill] sm:$0xff] }
 0x3c6   :  { %6821 = vmatmul.mubr.msk.bf16.vlgmr.msra.gmra.mrb[0].mxu0 %vm221_vm0, %v5189_v11  ;;  %v5269_v25 = vsel %vm2305_vm6, %v5268_v43, %v5267_v41  ;;  %v5277_v39 = vsel %vm2296_vm3, %v5276_v1, %v5275_v27  ;;  %v3190_v12 = vrot.slane %v9486_v46, 6  ;;  %v3192_v24 = vrot.slane %v12847_v6, 5  ;;  %v12964_v11 = vld [vmem:[#allocation32_spill] sm:$0xff]  ;;  %v12966_v27 = vld [vmem:[#allocation49_spill] sm:$0xff] }
 0x3c7   :  { %6825 = vmatpush3.bf16.msra.mxu0 %v10677_v26  ;;  %v5270_v62 = vsel %vm2308_vm7, %v9791_v55, %v5269_v25  ;;  %v5279_v13 = vsel %vm2299_vm4, %v5278_v29, %v5277_v39  ;;  %v3194_v59 = vrot.slane %v12871_v23, 4  ;;  %v3196_v45 = vrot.slane %v12892_v35, 3  ;;  %v12959_v35 = vld [vmem:[#allocation18_spill] sm:$0xff] }
 0x3c8   :  { %v5281_v0 = vsel %vm2302_vm5, %v5280_v18, %v5279_v13  ;;  %v3191_v34 = vsel %vm2290_vm1, %v3190_v12, %v3189_v48  ;;  %v3198_v10 = vrot.slane %v12914_v5, 2  ;;  %6830 = vmatprep.subr.bf16.mxu0 %v10809_v31  ;;  %v3200_v26 = vrot.slane %v12938_v14, 1  ;;  %v12968_v39 = vld [vmem:[#allocation62_spill] sm:$0xff]  ;;  %v12970_v13 = vld [vmem:[#allocation108_spill] sm:$0xff] }
 0x3c9   :  { %v5283_v46 = vsel %vm2305_vm6, %v5282_v53, %v5281_v0  ;;  %v3193_v55 = vsel %vm2293_vm2, %v3192_v24, %v3191_v34  ;;  %v3203_v6 = vrot.slane %v12870_v30, 7  ;;  %v3204_v28 = vrot.slane %v12958_v4, 6  ;;  %v12967_v53 = vld [vmem:[#allocation68_spill] sm:$0xff]  ;;  %v12969_v12 = vld [vmem:[#allocation90_spill] sm:$0xff] }
 0x3ca   :  { %v5284_v23 = vsel %vm2308_vm7, %v9815_v15, %v5283_v46  ;;  %v3195_v2 = vsel %vm2296_vm3, %v3194_v59, %v3193_v55  ;;  %v3206_v63 = vrot.slane %v12959_v35, 5  ;;  %v3208_v43 = vrot.slane %v12960_v61, 4  ;;  %v12971_v34 = vld [vmem:[#allocation120_spill] sm:$0xff] }
 0x3cb   :  { %v5313_v5 = vpack.c.b16 %v5284_v23, %v5270_v62  ;;  %v3197_v40 = vsel %vm2299_vm4, %v3196_v45, %v3195_v2  ;;  %v3210_v36 = vrot.slane %v12961_v42, 3  ;;  %v3205_v30 = vsel %vm2290_vm1, %v3204_v28, %v3203_v6  ;;  %v12973_v6 = vld [vmem:[#allocation36_spill] sm:$0xff]  ;;  %v12974_v2 = vld [vmem:[#allocation57_spill] sm:$0xff]  ;;  %v12975_v28 = vld [vmem:[#allocation138_spill] sm:$0xff] }
 0x3cc   :  { %v3199_v14 = vsel %vm2302_vm5, %v3198_v10, %v3197_v40  ;;  %v3212_v20 = vrot.slane %v12962_v58, 2  ;;  %v3214_v15 = vrot.slane %v12946_v56, 1  ;;  %v3207_v3 = vsel %vm2293_vm2, %v3206_v63, %v3205_v30  ;;  %v12972_v10 = vld [vmem:[#allocation55_spill] sm:$0xff]  ;;  %v12977_v61 = vld [vmem:[#allocation20_spill] sm:$0xff]  ;;  %v12978_v30 = vld [vmem:[#allocation94_spill] sm:$0xff] }
 0x3cd   :  { %6826 = vmatprep.mubr.msk.bf16.mxu0 %vm221_vm0, %v5313_v5  ;;  %v3201_v51 = vsel %vm2305_vm6, %v3200_v26, %v3199_v14  ;;  %v3318_v1 = vrot.slane %v12963_v57, 7  ;;  %v3320_v52 = vrot.slane %v12964_v11, 6  ;;  %v3209_v41 = vsel %vm2296_vm3, %v3208_v43, %v3207_v3  ;;  %v12976_v5 = vld [vmem:[#allocation28_spill] sm:$0xff]  ;;  %v12979_v3 = vld [vmem:[#allocation111_spill] sm:$0xff] }
 0x3ce   :  { %v3202_v29 = vsel %vm2308_vm7, %v12965_v54, %v3201_v51  ;;  %v3322_v18 = vrot.slane %v12966_v27, 5  ;;  %v3324_v25 = vrot.slane %v12967_v53, 4  ;;  %v3211_v56 = vsel %vm2299_vm4, %v3210_v36, %v3209_v41 }
 0x3cf   :  { %v3319_v48 = vsel %vm2290_vm1, %v3318_v1, %v12968_v39  ;;  %v3326_v62 = vrot.slane %v12969_v12, 3  ;;  %v3328_v24 = vrot.slane %v12970_v13, 2  ;;  %v3213_v59 = vsel %vm2302_vm5, %v3212_v20, %v3211_v56  ;;  %v10879_v20 = vld [vmem:[#allocation9 + $0x48] sm:$0xff]  }
 0x3d0   :  { %v3321_v0 = vsel %vm2293_vm2, %v3320_v52, %v3319_v48  ;;  %v3330_v45 = vrot.slane %v12971_v34, 1  ;;  %v3332_v46 = vrot.slane %v12972_v10, 7  ;;  %v3215_v55 = vsel %vm2305_vm6, %v3214_v15, %v3213_v59  ;;  %v12980_v52 = vld [vmem:[#allocation124_spill] sm:$0xff] }
 0x3d1   :  { %v3323_v26 = vsel %vm2296_vm3, %v3322_v18, %v3321_v0  ;;  %v3334_v23 = vrot.slane %v12973_v6, 6  ;;  %v3336_v4 = vrot.slane %v12974_v2, 5  ;;  %v3216_v35 = vsel %vm2308_vm7, %v12975_v28, %v3215_v55 }
 0x3d2   :  { %v3325_v63 = vsel %vm2299_vm4, %v3324_v25, %v3323_v26  ;;  %v3333_v40 = vsel %vm2290_vm1, %v3332_v46, %v12976_v5  ;;  %v3338_v43 = vrot.slane %v12977_v61, 4  ;;  %v3218_v42 = vpack.c.b16 %v3216_v35, %v3202_v29  ;;  %v12981_v35 = vld [vmem:[#allocation27_spill] sm:$0xff] }
 0x3d3   :  { %v3327_v36 = vsel %vm2302_vm5, %v3326_v62, %v3325_v63  ;;  %v3335_v14 = vsel %vm2293_vm2, %v3334_v23, %v3333_v40  ;;  %v3340_v58 = vrot.slane %v12978_v30, 3  ;;  %v3342_v1 = vrot.slane %v12979_v3, 2  ;;  %v12982_v40 = vld [vmem:[#allocation34_spill] sm:$0xff] }
 0x3d4   :  { %v3329_v15 = vsel %vm2305_vm6, %v3328_v24, %v3327_v36  ;;  %v3337_v51 = vsel %vm2296_vm3, %v3336_v4, %v3335_v14  ;;  %v3344_v54 = vrot.slane %v12980_v52, 1  ;;  %6731 = vmatmul.mubr.msk.bf16.vlgmr.msra.gmra.mrb[0].mxu1 %vm221_vm0, %v3218_v42  ;;  %v5285_v18 = vrot.slane %v12948_v16, 7  ;;  %v12983_v42 = vld [vmem:[#allocation51_spill] sm:$0xff]  ;;  %v12984_v14 = vld [vmem:[#allocation45_spill] sm:$0xff] }
 0x3d5   :  { %v3331_v29 = vsel %vm2308_vm7, %v3330_v45, %v3329_v15  ;;  %v3339_v41 = vsel %vm2299_vm4, %v3338_v43, %v3337_v51  ;;  %v5286_v25 = vrot.slane %v12950_v19, 6  ;;  %6735 = vmatpush3.bf16.msra.mxu1 %v10745_v22  ;;  %v5288_v48 = vrot.slane %v12951_v33, 5  ;;  %v12985_v15 = vld [vmem:[#allocation19_spill] sm:$0xff] }
 0x3d6   :  { %v3341_v56 = vsel %vm2302_vm5, %v3340_v58, %v3339_v41  ;;  %v5290_v62 = vrot.slane %v12929_v47, 4  ;;  %v5292_v24 = vrot.slane %v12952_v7, 3  ;;  %v5294_v45 = vrot.slane %v12934_v44, 2  ;;  %6740 = vmatprep.subr.bf16.mxu1 %v10879_v20  ;;  %v12987_v41 = vld [vmem:[#allocation63_spill] sm:$0xff] }
 0x3d7   :  { %v3343_v59 = vsel %vm2305_vm6, %v3342_v1, %v3341_v56  ;;  %v5287_v0 = vsel %vm2290_vm1, %v5286_v25, %v5285_v18  ;;  %v5296_v16 = vrot.slane %v12957_v60, 1  ;;  %v5299_v33 = vrot.slane %v12954_v17, 7 }
 0x3d8   :  { %v3345_v19 = vsel %vm2308_vm7, %v3344_v54, %v3343_v59  ;;  %v5289_v22 = vsel %vm2293_vm2, %v5288_v48, %v5287_v0  ;;  %v5300_v47 = vrot.slane %v12885_v32, 6  ;;  %v5302_v55 = vrot.slane %v12955_v8, 5  ;;  %v12986_v54 = vld [vmem:[#allocation92_spill] sm:$0xff] }
 0x3d9   :  { %v3374_v46 = vpack.c.b16 %v3345_v19, %v3331_v29  ;;  %v5291_v7 = vsel %vm2296_vm3, %v5290_v62, %v5289_v22  ;;  %v5304_v26 = vrot.slane %v12888_v38, 4  ;;  %v5306_v23 = vrot.slane %v12912_v49, 3  ;;  %v12989_v62 = vld [vmem:[#allocation30_spill] sm:$0xff]  ;;  %v12991_v19 = vld [vmem:[#allocation60_spill] sm:$0xff] }
 0x3da   :  { %v5293_v44 = vsel %vm2299_vm4, %v5292_v24, %v5291_v7  ;;  %v5301_v60 = vsel %vm2290_vm1, %v5300_v47, %v5299_v33  ;;  %v5308_v4 = vrot.slane %v12860_v9, 2  ;;  %v5310_v28 = vrot.slane %v12861_v50, 1 }
 0x3db   :  { %6736 = vmatprep.mubr.msk.bf16.mxu1 %vm221_vm0, %v3374_v46  ;;  %v5295_v17 = vsel %vm2302_vm5, %v5294_v45, %v5293_v44  ;;  %v5303_v32 = vsel %vm2293_vm2, %v5302_v55, %v5301_v60  ;;  %v5414_v8 = vrot.slane %v12981_v35, 7  ;;  %v5416_v43 = vrot.slane %v12982_v40, 6  ;;  %v12990_v45 = vld [vmem:[#allocation37_spill] sm:$0xff]  ;;  %v12993_v55 = vld [vmem:[#allocation72_spill] sm:$0xff] }
 0x3dc   :  { %v5297_v38 = vsel %vm2305_vm6, %v5296_v16, %v5295_v17  ;;  %v5305_v63 = vsel %vm2296_vm3, %v5304_v26, %v5303_v32  ;;  %v5418_v49 = vrot.slane %v12983_v42, 5  ;;  %v5420_v50 = vrot.slane %v12985_v15, 4  ;;  %v12992_v46 = vld [vmem:[#allocation53_spill] sm:$0xff]  ;;  %v10943_v44 = vld [vmem:[#allocation9 + $0xc8] sm:$0xff]  }
 0x3dd   :  { %v5298_v9 = vsel %vm2308_vm7, %v12953_v21, %v5297_v38  ;;  %v5307_v36 = vsel %vm2299_vm4, %v5306_v23, %v5305_v63  ;;  %v5415_v58 = vsel %vm2290_vm1, %v5414_v8, %v12984_v14  ;;  %v5422_v29 = vrot.slane %v12986_v54, 3  ;;  %v12988_v21 = vld [vmem:[#allocation121_spill] sm:$0xff]  ;;  %v12994_v23 = vld [vmem:[#allocation96_spill] sm:$0xff] }
 0x3de   :  { %v5309_v51 = vsel %vm2302_vm5, %v5308_v4, %v5307_v36  ;;  %v5417_v1 = vsel %vm2293_vm2, %v5416_v43, %v5415_v58  ;;  %v5424_v18 = vrot.slane %v12987_v41, 2  ;;  %v5426_v48 = vrot.slane %v12988_v21, 1  ;;  %v12995_v17 = vld [vmem:[#allocation112_spill] sm:$0xff]  ;;  %v12996_v38 = vld [vmem:[#allocation125_spill] sm:$0xff] }
 0x3df   :  { %v5311_v25 = vsel %vm2305_vm6, %v5310_v28, %v5309_v51  ;;  %v5419_v56 = vsel %vm2296_vm3, %v5418_v49, %v5417_v1  ;;  %v5428_v24 = vrot.slane %v12989_v62, 7  ;;  %v5430_v16 = vrot.slane %v12990_v45, 6  ;;  %v12997_v43 = vld [vmem:[#allocation76_spill] sm:$0xff]  ;;  %v13000_v1 = vld [vmem:[#allocation98_spill] sm:$0xff] }
 0x3e0   :  { %v5312_v59 = vsel %vm2308_vm7, %v12863_v37, %v5311_v25  ;;  %v5421_v0 = vsel %vm2299_vm4, %v5420_v50, %v5419_v56  ;;  %v5432_v22 = vrot.slane %v12991_v19, 5  ;;  %v5434_v26 = vrot.slane %v12993_v55, 4  ;;  %v12998_v36 = vld [vmem:[#allocation64_spill] sm:$0xff]  ;;  %v12999_v50 = vld [vmem:[#allocation78_spill] sm:$0xff] }
 0x3e1   :  { %v5314_v33 = vpack.c.b16 %v5312_v59, %v5298_v9  ;;  %v5423_v47 = vsel %vm2302_vm5, %v5422_v29, %v5421_v0  ;;  %v5429_v7 = vsel %vm2290_vm1, %v5428_v24, %v12992_v46  ;;  %v5436_v4 = vrot.slane %v12994_v23, 3  ;;  %v13001_v25 = vld [vmem:[#allocation38_spill] sm:$0xff]  ;;  %v13003_v59 = vld [vmem:[#allocation127_spill] sm:$0xff] }
 0x3e2   :  { %v5425_v60 = vsel %vm2305_vm6, %v5424_v18, %v5423_v47  ;;  %v5431_v37 = vsel %vm2293_vm2, %v5430_v16, %v5429_v7  ;;  %v5438_v32 = vrot.slane %v12995_v17, 2  ;;  %v5440_v63 = vrot.slane %v12996_v38, 1  ;;  %v13005_v47 = vld [vmem:[#allocation84_spill] sm:$0xff] }
 0x3e3   :  { %6827 = vmatmul.mubr.msk.bf16.vlgmr.msra.gmra.mrb[0].mxu0 %vm221_vm0, %v5314_v33  ;;  %v5427_v28 = vsel %vm2308_vm7, %v5426_v48, %v5425_v60  ;;  %v5433_v8 = vsel %vm2296_vm3, %v5432_v22, %v5431_v37  ;;  %v3346_v49 = vrot.slane %v12997_v43, 7  ;;  %v3348_v58 = vrot.slane %v12998_v36, 6  ;;  %v13002_v48 = vld [vmem:[#allocation113_spill] sm:$0xff]  ;;  %v13004_v22 = vld [vmem:[#allocation135_spill] sm:$0xff]  ;;  %v13006_v37 = vld [vmem:[#allocation106_spill] sm:$0xff] }
 0x3e4   :  { %6831 = vmatpush3.bf16.msra.mxu0 %v10809_v31  ;;  %v5435_v9 = vsel %vm2299_vm4, %v5434_v26, %v5433_v8  ;;  %v3350_v51 = vrot.slane %v12999_v50, 5  ;;  %v3352_v29 = vrot.slane %v13000_v1, 4  ;;  %v3354_v24 = vrot.slane %v13002_v48, 3  ;;  %v13007_v8 = vld [vmem:[#allocation86_spill] sm:$0xff]  ;;  %v13008_v48 = vld [vmem:[#allocation41_spill] sm:$0xff] }
 0x3e5   :  { %v5437_v18 = vsel %vm2302_vm5, %v5436_v4, %v5435_v9  ;;  %v3347_v56 = vsel %vm2290_vm1, %v3346_v49, %v13001_v25  ;;  %v3356_v0 = vrot.slane %v13003_v59, 2  ;;  %6836 = vmatprep.subr.bf16.mxu0 %v10943_v44  ;;  %v3358_v33 = vrot.slane %v13004_v22, 1  ;;  %v13010_v22 = vld [vmem:[#allocation117_spill] sm:$0xff] }
 0x3e6   :  { %v5439_v31 = vsel %vm2305_vm6, %v5438_v32, %v5437_v18  ;;  %v3349_v16 = vsel %vm2293_vm2, %v3348_v58, %v3347_v56  ;;  %v3360_v7 = vrot.slane %v13005_v47, 7  ;;  %v3362_v4 = vrot.slane %v13006_v37, 6  ;;  %v13009_v18 = vld [vmem:[#allocation102_spill] sm:$0xff] }
 0x3e7   :  { %v5441_v26 = vsel %vm2308_vm7, %v5440_v63, %v5439_v31  ;;  %v3351_v60 = vsel %vm2296_vm3, %v3350_v51, %v3349_v16  ;;  %v3364_v49 = vrot.slane %v13007_v8, 5  ;;  %v3366_v58 = vrot.slane %v13009_v18, 4  ;;  %v13011_v31 = vld [vmem:[#allocation131_spill] sm:$0xff] }
 0x3e8   :  { %v5470_v9 = vpack.c.b16 %v5441_v26, %v5427_v28  ;;  %v3353_v59 = vsel %vm2299_vm4, %v3352_v29, %v3351_v60  ;;  %v3361_v32 = vsel %vm2290_vm1, %v3360_v7, %v13008_v48  ;;  %v3368_v63 = vrot.slane %v13010_v22, 3  ;;  %v13012_v29 = vld [vmem:[#allocation139_spill] sm:$0xff] }
 0x3e9   :  { %v3355_v56 = vsel %vm2302_vm5, %v3354_v24, %v3353_v59  ;;  %v3363_v47 = vsel %vm2293_vm2, %v3362_v4, %v3361_v32  ;;  %v3370_v51 = vrot.slane %v13011_v31, 2  ;;  %v3372_v26 = vrot.slane %v13012_v29, 1 }
 0x3ea   :  { %6832 = vmatprep.mubr.msk.bf16.mxu0 %vm221_vm0, %v5470_v9  ;;  %v3357_v16 = vsel %vm2305_vm6, %v3356_v0, %v3355_v56  ;;  %v3365_v28 = vsel %vm2296_vm3, %v3364_v49, %v3363_v47  ;;  %v3443_v7 = vrot.slane %v12968_v39, 1  ;;  %v3445_v59 = vrot.slane %v12964_v11, 7 }
 0x3eb   :  { %v3359_v60 = vsel %vm2308_vm7, %v3358_v33, %v3357_v16  ;;  %v3367_v24 = vsel %vm2299_vm4, %v3366_v58, %v3365_v28  ;;  %v3447_v4 = vrot.slane %v12966_v27, 6  ;;  %v3449_v0 = vrot.slane %v12967_v53, 5 }
 0x3ec   :  { %v3369_v32 = vsel %vm2302_vm5, %v3368_v63, %v3367_v24  ;;  %v3444_v9 = vsel %vm2290_vm1, %v12963_v57, %v3443_v7  ;;  %v3451_v47 = vrot.slane %v12969_v12, 4  ;;  %v3453_v33 = vrot.slane %v12970_v13, 3 }
 0x3ed   :  { %v3371_v49 = vsel %vm2305_vm6, %v3370_v51, %v3369_v32  ;;  %v3446_v56 = vsel %vm2293_vm2, %v3445_v59, %v3444_v9  ;;  %v3455_v58 = vrot.slane %v12971_v34, 2  ;;  %v3457_v63 = vrot.slane %v12976_v5, 1  ;;  %v11006_v59 = vld [vmem:[#allocation9 + $0x50] sm:$0xff]  }
 0x3ee   :  { %v3373_v16 = vsel %vm2308_vm7, %v3372_v26, %v3371_v49  ;;  %v3448_v28 = vsel %vm2296_vm3, %v3447_v4, %v3446_v56  ;;  %v3459_v7 = vrot.slane %v12973_v6, 7  ;;  %v3461_v12 = vrot.slane %v12974_v2, 6  ;;  %13013 = vst [vmem:[#allocation105_spill] sm:$0xff] %v11006_v59  ;;  %v13014_v56 = vld [vmem:[#allocation40_spill] sm:$0xff] }
 0x3ef   :  { %v3375_v24 = vpack.c.b16 %v3373_v16, %v3359_v60  ;;  %v3450_v11 = vsel %vm2299_vm4, %v3449_v0, %v3448_v28  ;;  %v3463_v51 = vrot.slane %v12977_v61, 5  ;;  %v3458_v26 = vsel %vm2290_vm1, %v12972_v10, %v3457_v63  ;;  %v13016_v6 = vld [vmem:[#allocation80_spill] sm:$0xff] }
 0x3f0   :  { %v3452_v32 = vsel %vm2302_vm5, %v3451_v47, %v3450_v11  ;;  %v3465_v4 = vrot.slane %v12978_v30, 4  ;;  %v3467_v9 = vrot.slane %v12979_v3, 3  ;;  %v3460_v0 = vsel %vm2293_vm2, %v3459_v7, %v3458_v26  ;;  %v13015_v47 = vld [vmem:[#allocation17_spill] sm:$0xff]  ;;  %v13017_v30 = vld [vmem:[#allocation74_spill] sm:$0xff]  ;;  %v13018_v7 = vld [vmem:[#allocation100_spill] sm:$0xff] }
 0x3f1   :  { %6737 = vmatmul.mubr.msk.bf16.vlgmr.msra.gmra.mrb[0].mxu1 %vm221_vm0, %v3375_v24  ;;  %v3454_v60 = vsel %vm2305_vm6, %v3453_v33, %v3452_v32  ;;  %v3469_v49 = vrot.slane %v12980_v52, 2  ;;  %v5442_v16 = vrot.slane %v13014_v56, 7  ;;  %v3462_v11 = vsel %vm2296_vm3, %v3461_v12, %v3460_v0  ;;  %v13019_v26 = vld [vmem:[#allocation115_spill] sm:$0xff]  ;;  %v13021_v0 = vld [vmem:[#allocation137_spill] sm:$0xff] }
 0x3f2   :  { %v3456_v28 = vsel %vm2308_vm7, %v3455_v58, %v3454_v60  ;;  %6741 = vmatpush3.bf16.msra.mxu1 %v10879_v20  ;;  %v5444_v63 = vrot.slane %v13015_v47, 6  ;;  %v5446_v3 = vrot.slane %v13016_v6, 5  ;;  %v3464_v24 = vsel %vm2299_vm4, %v3463_v51, %v3462_v11  ;;  %v13020_v20 = vld [vmem:[#allocation129_spill] sm:$0xff]  ;;  %v13022_v11 = vld [vmem:[#allocation44_spill] sm:$0xff]  ;;  %v13023_v47 = vld [vmem:[#allocation66_spill] sm:$0xff] }
 0x3f3   :  { %v5443_v33 = vsel %vm2290_vm1, %v5442_v16, %v13017_v30  ;;  %v5448_v32 = vrot.slane %v13018_v7, 4  ;;  %v5450_v52 = vrot.slane %v13019_v26, 3  ;;  %6746 = vmatprep.subr.bf16.mxu1 %v11006_v59  ;;  %v3466_v58 = vsel %vm2302_vm5, %v3465_v4, %v3464_v24  ;;  %v13024_v30 = vld [vmem:[#allocation88_spill] sm:$0xff] }
 0x3f4   :  { %v5445_v12 = vsel %vm2293_vm2, %v5444_v63, %v5443_v33  ;;  %v5452_v60 = vrot.slane %v13020_v20, 2  ;;  %v5454_v56 = vrot.slane %v13021_v0, 1  ;;  %v3468_v6 = vsel %vm2305_vm6, %v3467_v9, %v3466_v58  ;;  %v13025_v24 = vld [vmem:[#allocation104_spill] sm:$0xff]  ;;  %v13026_v0 = vld [vmem:[#allocation82_spill] sm:$0xff] }
 0x3f5   :  { %v5447_v51 = vsel %vm2296_vm3, %v5446_v3, %v5445_v12  ;;  %v5456_v16 = vrot.slane %v13022_v11, 7  ;;  %v5458_v7 = vrot.slane %v13023_v47, 6  ;;  %v3470_v26 = vsel %vm2308_vm7, %v3469_v49, %v3468_v6  ;;  %v13027_v58 = vld [vmem:[#allocation22_spill] sm:$0xff]  ;;  %v13028_v47 = vld [vmem:[#allocation133_spill] sm:$0xff] }
 0x3f6   :  { %v5449_v59 = vsel %vm2299_vm4, %v5448_v32, %v5447_v51  ;;  %v5460_v4 = vrot.slane %v13024_v30, 5  ;;  %v5462_v63 = vrot.slane %v13025_v24, 4  ;;  %v3499_v33 = vpack.c.b16 %v3470_v26, %v3456_v28  ;;  %v13029_v49 = vld [vmem:[#allocation142_spill] sm:$0xff] }
 0x3f7   :  { %v5451_v20 = vsel %vm2302_vm5, %v5450_v52, %v5449_v59  ;;  %v5457_v9 = vsel %vm2290_vm1, %v5456_v16, %v13026_v0  ;;  %v5464_v3 = vrot.slane %v13027_v58, 3  ;;  %v5466_v6 = vrot.slane %v13028_v47, 2 }
 0x3f8   :  { %v5453_v12 = vsel %vm2305_vm6, %v5452_v60, %v5451_v20  ;;  %v5459_v11 = vsel %vm2293_vm2, %v5458_v7, %v5457_v9  ;;  %v5468_v32 = vrot.slane %v13029_v49, 1  ;;  %6742 = vmatprep.mubr.msk.bf16.mxu1 %vm221_vm0, %v3499_v33  ;;  %v5539_v52 = vrot.slane %v12984_v14, 1 }
 0x3f9   :  { %v5455_v51 = vsel %vm2308_vm7, %v5454_v56, %v5453_v12  ;;  %v5461_v28 = vsel %vm2296_vm3, %v5460_v4, %v5459_v11  ;;  %v5541_v59 = vrot.slane %v12982_v40, 7  ;;  %v5543_v20 = vrot.slane %v12983_v42, 6 }
 0x3fa   :  { %v5463_v26 = vsel %vm2299_vm4, %v5462_v63, %v5461_v28  ;;  %v5545_v7 = vrot.slane %v12985_v15, 5  ;;  %v5547_v60 = vrot.slane %v12986_v54, 4  ;;  %v5540_v33 = vsel %vm2290_vm1, %v12981_v35, %v5539_v52 }
 0x3fb   :  { %v5465_v16 = vsel %vm2302_vm5, %v5464_v3, %v5463_v26  ;;  %v5549_v56 = vrot.slane %v12987_v41, 3  ;;  %v5551_v11 = vrot.slane %v12988_v21, 2  ;;  %v5542_v9 = vsel %vm2293_vm2, %v5541_v59, %v5540_v33 }
 0x3fc   :  { %v5467_v4 = vsel %vm2305_vm6, %v5466_v6, %v5465_v16  ;;  %v5553_v63 = vrot.slane %v12992_v46, 1  ;;  %v5555_v12 = vrot.slane %v12990_v45, 7  ;;  %v5544_v40 = vsel %vm2296_vm3, %v5543_v20, %v5542_v9  ;;  %v11075_v16 = vld [vmem:[#allocation9 + $0xd0] sm:$0xff]  }
 0x3fd   :  { %v5469_v28 = vsel %vm2308_vm7, %v5468_v32, %v5467_v4  ;;  %v5557_v3 = vrot.slane %v12991_v19, 6  ;;  %v5559_v52 = vrot.slane %v12993_v55, 5  ;;  %v5546_v41 = vsel %vm2299_vm4, %v5545_v7, %v5544_v40 }
 0x3fe   :  { %v5471_v26 = vpack.c.b16 %v5469_v28, %v5455_v51  ;;  %v5554_v6 = vsel %vm2290_vm1, %v12989_v62, %v5553_v63  ;;  %v5561_v59 = vrot.slane %v12994_v23, 4  ;;  %v5548_v33 = vsel %vm2302_vm5, %v5547_v60, %v5546_v41 }
 0x3ff   :  { %v5556_v32 = vsel %vm2293_vm2, %v5555_v12, %v5554_v6  ;;  %v5563_v20 = vrot.slane %v12995_v17, 3  ;;  %v5565_v4 = vrot.slane %v12996_v38, 2  ;;  %v5550_v51 = vsel %vm2305_vm6, %v5549_v56, %v5548_v33  ;;  %v13031_v6 = vld [vmem:[#allocation127_spill] sm:$0xff] }
 0x400   :  { %6833 = vmatmul.mubr.msk.bf16.vlgmr.msra.gmra.mrb[0].mxu0 %vm221_vm0, %v5471_v26  ;;  %v5558_v40 = vsel %vm2296_vm3, %v5557_v3, %v5556_v32  ;;  %v3471_v7 = vrot.slane %v13001_v25, 1  ;;  %v3473_v9 = vrot.slane %v12998_v36, 7  ;;  %v5552_v41 = vsel %vm2308_vm7, %v5551_v11, %v5550_v51  ;;  %v13030_v3 = vld [vmem:[#allocation113_spill] sm:$0xff] }
 0x401   :  { %6837 = vmatpush3.bf16.msra.mxu0 %v10943_v44  ;;  %v5560_v60 = vsel %vm2299_vm4, %v5559_v52, %v5558_v40  ;;  %v3475_v63 = vrot.slane %v12999_v50, 6  ;;  %v3477_v12 = vrot.slane %v13000_v1, 5  ;;  %v3479_v26 = vrot.slane %v13030_v3, 4  ;;  %v13032_v52 = vld [vmem:[#allocation135_spill] sm:$0xff]  ;;  %v13033_v3 = vld [vmem:[#allocation84_spill] sm:$0xff] }
 0x402   :  { %v5562_v28 = vsel %vm2302_vm5, %v5561_v59, %v5560_v60  ;;  %v3472_v56 = vsel %vm2290_vm1, %v12997_v43, %v3471_v7  ;;  %v3481_v33 = vrot.slane %v13031_v6, 3  ;;  %6842 = vmatprep.subr.bf16.mxu0 %v11075_v16  ;;  %v3483_v32 = vrot.slane %v13032_v52, 2 }
 0x403   :  { %v5564_v44 = vsel %vm2305_vm6, %v5563_v20, %v5562_v28  ;;  %v3474_v11 = vsel %vm2293_vm2, %v3473_v9, %v3472_v56  ;;  %v3485_v51 = vrot.slane %v13008_v48, 1  ;;  %v3487_v7 = vrot.slane %v13006_v37, 7 }
 0x404   :  { %v5566_v40 = vsel %vm2308_vm7, %v5565_v4, %v5564_v44  ;;  %v3476_v59 = vsel %vm2296_vm3, %v3475_v63, %v3474_v11  ;;  %v3489_v60 = vrot.slane %v13007_v8, 6  ;;  %v3491_v9 = vrot.slane %v13009_v18, 5 }
 0x405   :  { %v5595_v36 = vpack.c.b16 %v5566_v40, %v5552_v41  ;;  %v3478_v6 = vsel %vm2299_vm4, %v3477_v12, %v3476_v59  ;;  %v3486_v20 = vsel %vm2290_vm1, %v13033_v3, %v3485_v51  ;;  %v3493_v4 = vrot.slane %v13010_v22, 4 }
 0x406   :  { %v3480_v28 = vsel %vm2302_vm5, %v3479_v26, %v3478_v6  ;;  %v3488_v56 = vsel %vm2293_vm2, %v3487_v7, %v3486_v20  ;;  %v3495_v63 = vrot.slane %v13011_v31, 3  ;;  %v3497_v12 = vrot.slane %v13012_v29, 2  ;;  %v13034_v7 = vld [vmem:[#allocation90_spill] sm:$0xff] }
 0x407   :  { %6838 = vmatprep.mubr.msk.bf16.mxu0 %vm221_vm0, %v5595_v36  ;;  %v3482_v44 = vsel %vm2305_vm6, %v3481_v33, %v3480_v28  ;;  %v3490_v41 = vsel %vm2296_vm3, %v3489_v60, %v3488_v56  ;;  %v3568_v11 = vrot.slane %v12968_v39, 2  ;;  %v3569_v6 = vrot.slane %v12963_v57, 1 }
 0x408   :  { %v3484_v51 = vsel %vm2308_vm7, %v3483_v32, %v3482_v44  ;;  %v3492_v26 = vsel %vm2299_vm4, %v3491_v9, %v3490_v41  ;;  %v3572_v40 = vrot.slane %v12966_v27, 7  ;;  %v3574_v36 = vrot.slane %v12967_v53, 6  ;;  %v13035_v44 = vld [vmem:[#allocation32_spill] sm:$0xff] }
 0x409   :  { %v3494_v59 = vsel %vm2302_vm5, %v3493_v4, %v3492_v26  ;;  %v3576_v33 = vrot.slane %v13034_v7, 5  ;;  %v3578_v60 = vrot.slane %v12970_v13, 4  ;;  %v3570_v28 = vsel %vm2290_vm1, %v3569_v6, %v3568_v11  ;;  %v11138_v6 = vld [vmem:[#allocation9 + $0x58] sm:$0xff]  }
 0x40a   :  { %v3496_v20 = vsel %vm2305_vm6, %v3495_v63, %v3494_v59  ;;  %v3580_v32 = vrot.slane %v12971_v34, 3  ;;  %v3582_v9 = vrot.slane %v12976_v5, 2  ;;  %v3571_v41 = vsel %vm2293_vm2, %v13035_v44, %v3570_v28  ;;  %v13036_v59 = vld [vmem:[#allocation94_spill] sm:$0xff]  ;;  %v13038_v28 = vld [vmem:[#allocation124_spill] sm:$0xff] }
 0x40b   :  { %v3498_v56 = vsel %vm2308_vm7, %v3497_v12, %v3496_v20  ;;  %v3583_v4 = vrot.slane %v12972_v10, 1  ;;  %v3586_v26 = vrot.slane %v12974_v2, 7  ;;  %v3573_v13 = vsel %vm2296_vm3, %v3572_v40, %v3571_v41  ;;  %v13037_v20 = vld [vmem:[#allocation111_spill] sm:$0xff]  ;;  %v13040_v41 = vld [vmem:[#allocation74_spill] sm:$0xff] }
 0x40c   :  { %v3500_v27 = vpack.c.b16 %v3498_v56, %v3484_v51  ;;  %v3588_v63 = vrot.slane %v12977_v61, 6  ;;  %v3590_v11 = vrot.slane %v13036_v59, 5  ;;  %v3575_v5 = vsel %vm2299_vm4, %v3574_v36, %v3573_v13  ;;  %v13039_v56 = vld [vmem:[#allocation36_spill] sm:$0xff]  ;;  %v13041_v59 = vld [vmem:[#allocation17_spill] sm:$0xff] }
 0x40d   :  { %v3584_v12 = vsel %vm2290_vm1, %v3583_v4, %v3582_v9  ;;  %v3592_v34 = vrot.slane %v13037_v20, 4  ;;  %v3594_v7 = vrot.slane %v13038_v28, 3  ;;  %v3577_v51 = vsel %vm2302_vm5, %v3576_v33, %v3575_v5  ;;  %v13042_v36 = vld [vmem:[#allocation105_spill] sm:$0xff]  ;;  %v13043_v9 = vld [vmem:[#allocation80_spill] sm:$0xff] }
 0x40e   :  { %6743 = vmatmul.mubr.msk.bf16.vlgmr.msra.gmra.mrb[0].mxu1 %vm221_vm0, %v3500_v27  ;;  %v3585_v40 = vsel %vm2293_vm2, %v13039_v56, %v3584_v12  ;;  %v5567_v2 = vrot.slane %v13040_v41, 1  ;;  %v5569_v61 = vrot.slane %v13041_v59, 7  ;;  %v3579_v10 = vsel %vm2305_vm6, %v3578_v60, %v3577_v51  ;;  %v13044_v28 = vld [vmem:[#allocation100_spill] sm:$0xff]  ;;  %v13046_v41 = vld [vmem:[#allocation115_spill] sm:$0xff]  ;;  %v13047_v51 = vld [vmem:[#allocation129_spill] sm:$0xff] }
 0x40f   :  { %v3587_v13 = vsel %vm2296_vm3, %v3586_v26, %v3585_v40  ;;  %6747 = vmatpush3.bf16.msra.mxu1 %v13042_v36  ;;  %v5571_v4 = vrot.slane %v13043_v9, 6  ;;  %v5573_v20 = vrot.slane %v13044_v28, 5  ;;  %v3581_v27 = vsel %vm2308_vm7, %v3580_v32, %v3579_v10  ;;  %v13045_v33 = vld [vmem:[#allocation40_spill] sm:$0xff]  ;;  %v13048_v36 = vld [vmem:[#allocation137_spill] sm:$0xff] }
 0x410   :  { %v3589_v5 = vsel %vm2299_vm4, %v3588_v63, %v3587_v13  ;;  %v5568_v12 = vsel %vm2290_vm1, %v13045_v33, %v5567_v2  ;;  %v5575_v56 = vrot.slane %v13046_v41, 4  ;;  %6752 = vmatprep.subr.bf16.mxu1 %v11138_v6  ;;  %v5577_v40 = vrot.slane %v13047_v51, 3  ;;  %v13049_v63 = vld [vmem:[#allocation66_spill] sm:$0xff] }
 0x411   :  { %v3591_v60 = vsel %vm2302_vm5, %v3590_v11, %v3589_v5  ;;  %v5570_v26 = vsel %vm2293_vm2, %v5569_v61, %v5568_v12  ;;  %v5579_v59 = vrot.slane %v13048_v36, 2  ;;  %v5581_v32 = vrot.slane %v13026_v0, 1  ;;  %v13050_v36 = vld [vmem:[#allocation44_spill] sm:$0xff] }
 0x412   :  { %v3593_v28 = vsel %vm2305_vm6, %v3592_v34, %v3591_v60  ;;  %v5572_v10 = vsel %vm2296_vm3, %v5571_v4, %v5570_v26  ;;  %v5583_v2 = vrot.slane %v13049_v63, 7  ;;  %v5585_v11 = vrot.slane %v13024_v30, 6 }
 0x413   :  { %v3595_v13 = vsel %vm2308_vm7, %v3594_v7, %v3593_v28  ;;  %v5574_v41 = vsel %vm2299_vm4, %v5573_v20, %v5572_v10  ;;  %v5587_v61 = vrot.slane %v13025_v24, 5  ;;  %v5582_v34 = vsel %vm2290_vm1, %v13050_v36, %v5581_v32 }
 0x414   :  { %v3624_v5 = vpack.c.b16 %v3595_v13, %v3581_v27  ;;  %v5576_v12 = vsel %vm2302_vm5, %v5575_v56, %v5574_v41  ;;  %v5589_v4 = vrot.slane %v13027_v58, 4  ;;  %v5584_v26 = vsel %vm2293_vm2, %v5583_v2, %v5582_v34 }
 0x415   :  { %v5578_v60 = vsel %vm2305_vm6, %v5577_v40, %v5576_v12  ;;  %v5591_v7 = vrot.slane %v13028_v47, 3  ;;  %v5593_v20 = vrot.slane %v13029_v49, 2  ;;  %v5586_v27 = vsel %vm2296_vm3, %v5585_v11, %v5584_v26  ;;  %v13051_v12 = vld [vmem:[#allocation63_spill] sm:$0xff] }
 0x416   :  { %6748 = vmatprep.mubr.msk.bf16.mxu1 %vm221_vm0, %v3624_v5  ;;  %v5580_v28 = vsel %vm2308_vm7, %v5579_v59, %v5578_v60  ;;  %v5664_v56 = vrot.slane %v12984_v14, 2  ;;  %v5665_v41 = vrot.slane %v12981_v35, 1  ;;  %v5588_v10 = vsel %vm2299_vm4, %v5587_v61, %v5586_v27  ;;  %v13052_v60 = vld [vmem:[#allocation34_spill] sm:$0xff] }
 0x417   :  { %v5668_v40 = vrot.slane %v12983_v42, 7  ;;  %v5670_v32 = vrot.slane %v12985_v15, 6  ;;  %v5672_v2 = vrot.slane %v12986_v54, 5  ;;  %v5590_v13 = vsel %vm2302_vm5, %v5589_v4, %v5588_v10 }
 0x418   :  { %v5666_v5 = vsel %vm2290_vm1, %v5665_v41, %v5664_v56  ;;  %v5674_v59 = vrot.slane %v13051_v12, 4  ;;  %v5676_v11 = vrot.slane %v12988_v21, 3  ;;  %v5592_v34 = vsel %vm2305_vm6, %v5591_v7, %v5590_v13 }
 0x419   :  { %v5667_v26 = vsel %vm2293_vm2, %v13052_v60, %v5666_v5  ;;  %v5678_v61 = vrot.slane %v12992_v46, 2  ;;  %v5679_v27 = vrot.slane %v12989_v62, 1  ;;  %v5594_v42 = vsel %vm2308_vm7, %v5593_v20, %v5592_v34  ;;  %v11206_v5 = vld [vmem:[#allocation9 + $0xd8] sm:$0xff]  }
 0x41a   :  { %v5669_v54 = vsel %vm2296_vm3, %v5668_v40, %v5667_v26  ;;  %v5682_v4 = vrot.slane %v12991_v19, 7  ;;  %v5684_v56 = vrot.slane %v12993_v55, 6  ;;  %v5596_v41 = vpack.c.b16 %v5594_v42, %v5580_v28 }
 0x41b   :  { %v5671_v10 = vsel %vm2299_vm4, %v5670_v32, %v5669_v54  ;;  %v5680_v7 = vsel %vm2290_vm1, %v5679_v27, %v5678_v61  ;;  %v5686_v13 = vrot.slane %v12994_v23, 5  ;;  %v5688_v40 = vrot.slane %v12995_v17, 4 }
 0x41c   :  { %v5673_v46 = vsel %vm2302_vm5, %v5672_v2, %v5671_v10  ;;  %v5681_v20 = vsel %vm2293_vm2, %v12990_v45, %v5680_v7  ;;  %v5690_v34 = vrot.slane %v12996_v38, 3  ;;  %6839 = vmatmul.mubr.msk.bf16.vlgmr.msra.gmra.mrb[0].mxu0 %vm221_vm0, %v5596_v41  ;;  %v3596_v28 = vrot.slane %v13001_v25, 2  ;;  %v13054_v10 = vld [vmem:[#allocation127_spill] sm:$0xff] }
 0x41d   :  { %v5675_v42 = vsel %vm2305_vm6, %v5674_v59, %v5673_v46  ;;  %v5683_v54 = vsel %vm2296_vm3, %v5682_v4, %v5681_v20  ;;  %v3597_v32 = vrot.slane %v12997_v43, 1  ;;  %6843 = vmatpush3.bf16.msra.mxu0 %v11075_v16  ;;  %v3600_v61 = vrot.slane %v12999_v50, 7  ;;  %v13053_v59 = vld [vmem:[#allocation113_spill] sm:$0xff]  ;;  %v13055_v20 = vld [vmem:[#allocation64_spill] sm:$0xff] }
 0x41e   :  { %v5677_v2 = vsel %vm2308_vm7, %v5676_v11, %v5675_v42  ;;  %v5685_v26 = vsel %vm2299_vm4, %v5684_v56, %v5683_v54  ;;  %v3602_v27 = vrot.slane %v13000_v1, 6  ;;  %v3604_v4 = vrot.slane %v13053_v59, 5  ;;  %6848 = vmatprep.subr.bf16.mxu0 %v11206_v5 }
 0x41f   :  { %v5687_v41 = vsel %vm2302_vm5, %v5686_v13, %v5685_v26  ;;  %v3598_v46 = vsel %vm2290_vm1, %v3597_v32, %v3596_v28  ;;  %v3606_v7 = vrot.slane %v13054_v10, 4  ;;  %v3608_v56 = vrot.slane %v13032_v52, 3 }
 0x420   :  { %v5689_v16 = vsel %vm2305_vm6, %v5688_v40, %v5687_v41  ;;  %v3599_v11 = vsel %vm2293_vm2, %v13055_v20, %v3598_v46  ;;  %v3610_v42 = vrot.slane %v13008_v48, 2  ;;  %v3611_v28 = vrot.slane %v13033_v3, 1 }
 0x421   :  { %v5691_v54 = vsel %vm2308_vm7, %v5690_v34, %v5689_v16  ;;  %v3601_v13 = vsel %vm2296_vm3, %v3600_v61, %v3599_v11  ;;  %v3614_v32 = vrot.slane %v13007_v8, 7  ;;  %v3616_v40 = vrot.slane %v13009_v18, 6 }
 0x422   :  { %v5720_v26 = vpack.c.b16 %v5691_v54, %v5677_v2  ;;  %v3603_v50 = vsel %vm2299_vm4, %v3602_v27, %v3601_v13  ;;  %v3618_v41 = vrot.slane %v13010_v22, 5  ;;  %v3612_v52 = vsel %vm2290_vm1, %v3611_v28, %v3610_v42 }
 0x423   :  { %v3605_v46 = vsel %vm2302_vm5, %v3604_v4, %v3603_v50  ;;  %v3620_v48 = vrot.slane %v13011_v31, 4  ;;  %v3622_v34 = vrot.slane %v13012_v29, 3  ;;  %v3613_v2 = vsel %vm2293_vm2, %v13006_v37, %v3612_v52 }
 0x424   :  { %6844 = vmatprep.mubr.msk.bf16.mxu0 %vm221_vm0, %v5720_v26  ;;  %v3607_v61 = vsel %vm2305_vm6, %v3606_v7, %v3605_v46  ;;  %v3693_v27 = vrot.slane %v12968_v39, 3  ;;  %v3694_v16 = vrot.slane %v12963_v57, 2  ;;  %v3615_v50 = vsel %vm2296_vm3, %v3614_v32, %v3613_v2  ;;  %v13056_v7 = vld [vmem:[#allocation90_spill] sm:$0xff]  ;;  %v13057_v26 = vld [vmem:[#allocation108_spill] sm:$0xff] }
 0x425   :  { %v3609_v11 = vsel %vm2308_vm7, %v3608_v56, %v3607_v61  ;;  %v3696_v4 = vrot.slane %v13035_v44, 1  ;;  %v3699_v42 = vrot.slane %v12967_v53, 7  ;;  %v3617_v54 = vsel %vm2299_vm4, %v3616_v40, %v3615_v50  ;;  %v13058_v57 = vld [vmem:[#allocation120_spill] sm:$0xff]  ;;  %v13060_v44 = vld [vmem:[#allocation49_spill] sm:$0xff]  ;;  %v13061_v40 = vld [vmem:[#allocation55_spill] sm:$0xff] }
 0x426   :  { %v3695_v13 = vsel %vm2290_vm1, %v3694_v16, %v3693_v27  ;;  %v3701_v28 = vrot.slane %v13056_v7, 6  ;;  %v3703_v52 = vrot.slane %v13057_v26, 5  ;;  %v3619_v46 = vsel %vm2302_vm5, %v3618_v41, %v3617_v54  ;;  %v13059_v61 = vld [vmem:[#allocation28_spill] sm:$0xff] }
 0x427   :  { %v3697_v8 = vsel %vm2293_vm2, %v3696_v4, %v3695_v13  ;;  %v3705_v56 = vrot.slane %v13058_v57, 4  ;;  %v3707_v32 = vrot.slane %v13059_v61, 3  ;;  %v3621_v2 = vsel %vm2305_vm6, %v3620_v48, %v3619_v46  ;;  %v13062_v27 = vld [vmem:[#allocation36_spill] sm:$0xff]  ;;  %v13064_v4 = vld [vmem:[#allocation94_spill] sm:$0xff]  ;;  %v13065_v46 = vld [vmem:[#allocation111_spill] sm:$0xff] }
 0x428   :  { %v3698_v53 = vsel %vm2296_vm3, %v13060_v44, %v3697_v8  ;;  %v3708_v50 = vrot.slane %v13061_v40, 2  ;;  %v3710_v16 = vrot.slane %v13062_v27, 1  ;;  %v3623_v7 = vsel %vm2308_vm7, %v3622_v34, %v3621_v2  ;;  %v13063_v41 = vld [vmem:[#allocation20_spill] sm:$0xff]  ;;  %v11274_v8 = vld [vmem:[#allocation9 + $0x60] sm:$0xff]  }
 0x429   :  { %v3700_v26 = vsel %vm2299_vm4, %v3699_v42, %v3698_v53  ;;  %v3713_v54 = vrot.slane %v13063_v41, 7  ;;  %v3715_v13 = vrot.slane %v13064_v4, 6  ;;  %v3625_v57 = vpack.c.b16 %v3623_v7, %v3609_v11  ;;  %v13066_v34 = vld [vmem:[#allocation124_spill] sm:$0xff]  ;;  %v13067_v53 = vld [vmem:[#allocation74_spill] sm:$0xff]  ;;  %v13068_v7 = vld [vmem:[#allocation57_spill] sm:$0xff] }
 0x42a   :  { %v3702_v61 = vsel %vm2302_vm5, %v3701_v28, %v3700_v26  ;;  %v3709_v48 = vsel %vm2290_vm1, %v3708_v50, %v3707_v32  ;;  %v3717_v39 = vrot.slane %v13065_v46, 5  ;;  %v3719_v2 = vrot.slane %v13066_v34, 4 }
 0x42b   :  { %v3704_v40 = vsel %vm2305_vm6, %v3703_v52, %v3702_v61  ;;  %v3711_v27 = vsel %vm2293_vm2, %v3710_v16, %v3709_v48  ;;  %v5692_v42 = vrot.slane %v13067_v53, 2  ;;  %6749 = vmatmul.mubr.msk.bf16.vlgmr.msra.gmra.mrb[0].mxu1 %vm221_vm0, %v3625_v57  ;;  %v5693_v26 = vrot.slane %v13045_v33, 1  ;;  %v13069_v52 = vld [vmem:[#allocation100_spill] sm:$0xff]  ;;  %v13070_v16 = vld [vmem:[#allocation115_spill] sm:$0xff] }
 0x42c   :  { %v3706_v11 = vsel %vm2308_vm7, %v3705_v56, %v3704_v40  ;;  %v3712_v28 = vsel %vm2296_vm3, %v13068_v7, %v3711_v27  ;;  %v5696_v32 = vrot.slane %v13043_v9, 7  ;;  %6753 = vmatpush3.bf16.msra.mxu1 %v11138_v6  ;;  %v5698_v61 = vrot.slane %v13069_v52, 6  ;;  %v13071_v40 = vld [vmem:[#allocation137_spill] sm:$0xff] }
 0x42d   :  { %v3714_v50 = vsel %vm2299_vm4, %v3713_v54, %v3712_v28  ;;  %v5700_v48 = vrot.slane %v13070_v16, 5  ;;  %v5702_v41 = vrot.slane %v13047_v51, 4  ;;  %v5694_v56 = vsel %vm2290_vm1, %v5693_v26, %v5692_v42  ;;  %6758 = vmatprep.subr.bf16.mxu1 %v11274_v8  ;;  %v13072_v28 = vld [vmem:[#allocation17_spill] sm:$0xff] }
 0x42e   :  { %v3716_v57 = vsel %vm2302_vm5, %v3715_v13, %v3714_v50  ;;  %v5704_v27 = vrot.slane %v13071_v40, 3  ;;  %v5706_v33 = vrot.slane %v13026_v0, 2  ;;  %v5695_v6 = vsel %vm2293_vm2, %v13072_v28, %v5694_v56 }
 0x42f   :  { %v3718_v54 = vsel %vm2305_vm6, %v3717_v39, %v3716_v57  ;;  %v5707_v9 = vrot.slane %v13050_v36, 1  ;;  %v5710_v16 = vrot.slane %v13024_v30, 7  ;;  %v5697_v13 = vsel %vm2296_vm3, %v5696_v32, %v5695_v6 }
 0x430   :  { %v3720_v51 = vsel %vm2308_vm7, %v3719_v2, %v3718_v54  ;;  %v5712_v42 = vrot.slane %v13025_v24, 6  ;;  %v5714_v26 = vrot.slane %v13027_v58, 5  ;;  %v5699_v0 = vsel %vm2299_vm4, %v5698_v61, %v5697_v13 }
 0x431   :  { %v3749_v50 = vpack.c.b16 %v3720_v51, %v3706_v11  ;;  %v5708_v39 = vsel %vm2290_vm1, %v5707_v9, %v5706_v33  ;;  %v5716_v57 = vrot.slane %v13028_v47, 4  ;;  %v5701_v56 = vsel %vm2302_vm5, %v5700_v48, %v5699_v0  ;;  %v13073_v48 = vld [vmem:[#allocation92_spill] sm:$0xff] }
 0x432   :  { %v5709_v30 = vsel %vm2293_vm2, %v13049_v63, %v5708_v39  ;;  %v5718_v2 = vrot.slane %v13029_v49, 3  ;;  %v5789_v32 = vrot.slane %v12984_v14, 3  ;;  %v5703_v54 = vsel %vm2305_vm6, %v5702_v41, %v5701_v56  ;;  %v13074_v56 = vld [vmem:[#allocation53_spill] sm:$0xff] }
 0x433   :  { %6754 = vmatprep.mubr.msk.bf16.mxu1 %vm221_vm0, %v3749_v50  ;;  %v5711_v51 = vsel %vm2296_vm3, %v5710_v16, %v5709_v30  ;;  %v5790_v11 = vrot.slane %v12981_v35, 2  ;;  %v5792_v9 = vrot.slane %v13052_v60, 1  ;;  %v5705_v33 = vsel %vm2308_vm7, %v5704_v27, %v5703_v54 }
 0x434   :  { %v5713_v0 = vsel %vm2299_vm4, %v5712_v42, %v5711_v51  ;;  %v5795_v61 = vrot.slane %v12985_v15, 7  ;;  %v5797_v6 = vrot.slane %v13073_v48, 6  ;;  %v5799_v41 = vrot.slane %v13051_v12, 5  ;;  %v13075_v51 = vld [vmem:[#allocation51_spill] sm:$0xff] }
 0x435   :  { %v5715_v13 = vsel %vm2302_vm5, %v5714_v26, %v5713_v0  ;;  %v5791_v50 = vsel %vm2290_vm1, %v5790_v11, %v5789_v32  ;;  %v5801_v30 = vrot.slane %v12988_v21, 4  ;;  %v5803_v27 = vrot.slane %v13074_v56, 3 }
 0x436   :  { %v5717_v16 = vsel %vm2305_vm6, %v5716_v57, %v5715_v13  ;;  %v5793_v39 = vsel %vm2293_vm2, %v5792_v9, %v5791_v50  ;;  %v5804_v42 = vrot.slane %v12989_v62, 2  ;;  %v5806_v26 = vrot.slane %v12990_v45, 1  ;;  %v11338_v13 = vld [vmem:[#allocation9 + $0xe0] sm:$0xff]  }
 0x437   :  { %v5719_v54 = vsel %vm2308_vm7, %v5718_v2, %v5717_v16  ;;  %v5794_v15 = vsel %vm2296_vm3, %v13075_v51, %v5793_v39  ;;  %v5809_v32 = vrot.slane %v12993_v55, 7  ;;  %v5811_v9 = vrot.slane %v12994_v23, 6 }
 0x438   :  { %v5721_v11 = vpack.c.b16 %v5719_v54, %v5705_v33  ;;  %v5796_v0 = vsel %vm2299_vm4, %v5795_v61, %v5794_v15  ;;  %v5805_v57 = vsel %vm2290_vm1, %v5804_v42, %v5803_v27  ;;  %v5813_v16 = vrot.slane %v12995_v17, 5 }
 0x439   :  { %v5798_v50 = vsel %vm2302_vm5, %v5797_v6, %v5796_v0  ;;  %v5807_v2 = vsel %vm2293_vm2, %v5806_v26, %v5805_v57  ;;  %v5815_v39 = vrot.slane %v12996_v38, 4  ;;  %v3721_v61 = vrot.slane %v13001_v25, 3 }
 0x43a   :  { %6845 = vmatmul.mubr.msk.bf16.vlgmr.msra.gmra.mrb[0].mxu0 %vm221_vm0, %v5721_v11  ;;  %v5800_v33 = vsel %vm2305_vm6, %v5799_v41, %v5798_v50  ;;  %v5808_v15 = vsel %vm2296_vm3, %v12991_v19, %v5807_v2  ;;  %v3722_v27 = vrot.slane %v12997_v43, 2  ;;  %v3724_v54 = vrot.slane %v13055_v20, 1  ;;  %v13076_v50 = vld [vmem:[#allocation135_spill] sm:$0xff]  ;;  %v13077_v2 = vld [vmem:[#allocation41_spill] sm:$0xff] }
 0x43b   :  { %6849 = vmatpush3.bf16.msra.mxu0 %v11206_v5  ;;  %v5802_v6 = vsel %vm2308_vm7, %v5801_v30, %v5800_v33  ;;  %v5810_v42 = vsel %vm2299_vm4, %v5809_v32, %v5808_v15  ;;  %v3727_v26 = vrot.slane %v13000_v1, 7  ;;  %v3729_v0 = vrot.slane %v13053_v59, 6  ;;  %v13078_v1 = vld [vmem:[#allocation78_spill] sm:$0xff] }
 0x43c   :  { %v5812_v11 = vsel %vm2302_vm5, %v5811_v9, %v5810_v42  ;;  %v3723_v41 = vsel %vm2290_vm1, %v3722_v27, %v3721_v61  ;;  %v3731_v57 = vrot.slane %v13054_v10, 5  ;;  %6854 = vmatprep.subr.bf16.mxu0 %v11338_v13  ;;  %v3733_v32 = vrot.slane %v13076_v50, 4 }
 0x43d   :  { %v5814_v5 = vsel %vm2305_vm6, %v5813_v16, %v5812_v11  ;;  %v3725_v30 = vsel %vm2293_vm2, %v3724_v54, %v3723_v41  ;;  %v3735_v33 = vrot.slane %v13077_v2, 3  ;;  %v3736_v61 = vrot.slane %v13033_v3, 2 }
 0x43e   :  { %v5816_v15 = vsel %vm2308_vm7, %v5815_v39, %v5814_v5  ;;  %v3726_v9 = vsel %vm2296_vm3, %v13078_v1, %v3725_v30  ;;  %v3738_v27 = vrot.slane %v13006_v37, 1  ;;  %v3741_v16 = vrot.slane %v13009_v18, 7  ;;  %v13081_v37 = vld [vmem:[#allocation86_spill] sm:$0xff] }
 0x43f   :  { %v5845_v42 = vpack.c.b16 %v5816_v15, %v5802_v6  ;;  %v3728_v10 = vsel %vm2299_vm4, %v3727_v26, %v3726_v9  ;;  %v3743_v54 = vrot.slane %v13010_v22, 6  ;;  %v3737_v41 = vsel %vm2290_vm1, %v3736_v61, %v3735_v33  ;;  %v13079_v15 = vld [vmem:[#allocation62_spill] sm:$0xff]  ;;  %v13080_v9 = vld [vmem:[#allocation48_spill] sm:$0xff] }
 0x440   :  { %v3730_v11 = vsel %vm2302_vm5, %v3729_v0, %v3728_v10  ;;  %v3745_v39 = vrot.slane %v13011_v31, 5  ;;  %v3747_v5 = vrot.slane %v13012_v29, 4  ;;  %v3739_v6 = vsel %vm2293_vm2, %v3738_v27, %v3737_v41  ;;  %v13082_v0 = vld [vmem:[#allocation32_spill] sm:$0xff] }
 0x441   :  { %6850 = vmatprep.mubr.msk.bf16.mxu0 %vm221_vm0, %v5845_v42  ;;  %v3732_v30 = vsel %vm2305_vm6, %v3731_v57, %v3730_v11  ;;  %v3818_v26 = vrot.slane %v13079_v15, 4  ;;  %v3819_v18 = vrot.slane %v13080_v9, 3  ;;  %v3740_v10 = vsel %vm2296_vm3, %v13081_v37, %v3739_v6  ;;  %v13083_v57 = vld [vmem:[#allocation90_spill] sm:$0xff]  ;;  %v13084_v27 = vld [vmem:[#allocation108_spill] sm:$0xff]  ;;  %v13087_v37 = vld [vmem:[#allocation55_spill] sm:$0xff] }
 0x442   :  { %v3734_v22 = vsel %vm2308_vm7, %v3733_v32, %v3732_v30  ;;  %v3821_v33 = vrot.slane %v13082_v0, 2  ;;  %v3823_v61 = vrot.slane %v13060_v44, 1  ;;  %v3742_v29 = vsel %vm2299_vm4, %v3741_v16, %v3740_v10  ;;  %v13085_v32 = vld [vmem:[#allocation120_spill] sm:$0xff] }
 0x443   :  { %v3820_v42 = vsel %vm2290_vm1, %v3819_v18, %v3818_v26  ;;  %v3826_v11 = vrot.slane %v13083_v57, 7  ;;  %v3828_v41 = vrot.slane %v13084_v27, 6  ;;  %v3744_v15 = vsel %vm2302_vm5, %v3743_v54, %v3742_v29  ;;  %v13086_v31 = vld [vmem:[#allocation28_spill] sm:$0xff] }
 0x444   :  { %v3822_v9 = vsel %vm2293_vm2, %v3821_v33, %v3820_v42  ;;  %v3830_v30 = vrot.slane %v13085_v32, 5  ;;  %v3832_v6 = vrot.slane %v13086_v31, 4  ;;  %v3746_v0 = vsel %vm2305_vm6, %v3745_v39, %v3744_v15  ;;  %v13088_v10 = vld [vmem:[#allocation36_spill] sm:$0xff] }
 0x445   :  { %v3824_v44 = vsel %vm2296_vm3, %v3823_v61, %v3822_v9  ;;  %v3833_v16 = vrot.slane %v13087_v37, 3  ;;  %v3835_v18 = vrot.slane %v13088_v10, 2  ;;  %v3748_v26 = vsel %vm2308_vm7, %v3747_v5, %v3746_v0  ;;  %v13089_v57 = vld [vmem:[#allocation68_spill] sm:$0xff] }
 0x446   :  { %v3825_v27 = vsel %vm2299_vm4, %v13089_v57, %v3824_v44  ;;  %v3837_v29 = vrot.slane %v13068_v7, 1  ;;  %v3840_v54 = vrot.slane %v13064_v4, 7  ;;  %v3750_v33 = vpack.c.b16 %v3748_v26, %v3734_v22  ;;  %v11406_v9 = vld [vmem:[#allocation9 + $0x68] sm:$0xff]  }
 0x447   :  { %v3827_v42 = vsel %vm2302_vm5, %v3826_v11, %v3825_v27  ;;  %v3834_v39 = vsel %vm2290_vm1, %v3833_v16, %v3832_v6  ;;  %v3842_v15 = vrot.slane %v13065_v46, 6  ;;  %v3844_v0 = vrot.slane %v13066_v34, 5  ;;  %v13090_v27 = vld [vmem:[#allocation40_spill] sm:$0xff] }
 0x448   :  { %v3829_v61 = vsel %vm2305_vm6, %v3828_v41, %v3827_v42  ;;  %v3836_v5 = vsel %vm2293_vm2, %v3835_v18, %v3834_v39  ;;  %v5817_v44 = vrot.slane %v13067_v53, 3  ;;  %6755 = vmatmul.mubr.msk.bf16.vlgmr.msra.gmra.mrb[0].mxu1 %vm221_vm0, %v3750_v33  ;;  %v5818_v6 = vrot.slane %v13090_v27, 2  ;;  %v13091_v26 = vld [vmem:[#allocation20_spill] sm:$0xff]  ;;  %v13092_v18 = vld [vmem:[#allocation115_spill] sm:$0xff]  ;;  %v13093_v39 = vld [vmem:[#allocation129_spill] sm:$0xff] }
 0x449   :  { %v3831_v22 = vsel %vm2308_vm7, %v3830_v30, %v3829_v61  ;;  %v3838_v11 = vsel %vm2296_vm3, %v3837_v29, %v3836_v5  ;;  %v5820_v16 = vrot.slane %v13072_v28, 1  ;;  %6759 = vmatpush3.bf16.msra.mxu1 %v11274_v8  ;;  %v5823_v41 = vrot.slane %v13069_v52, 7  ;;  %v13094_v61 = vld [vmem:[#allocation82_spill] sm:$0xff]  ;;  %v13095_v28 = vld [vmem:[#allocation80_spill] sm:$0xff] }
 0x44a   :  { %v3839_v4 = vsel %vm2299_vm4, %v13091_v26, %v3838_v11  ;;  %v5825_v42 = vrot.slane %v13092_v18, 6  ;;  %v5827_v53 = vrot.slane %v13093_v39, 5  ;;  %v5819_v30 = vsel %vm2290_vm1, %v5818_v6, %v5817_v44  ;;  %6764 = vmatprep.subr.bf16.mxu1 %v11406_v9 }
 0x44b   :  { %v3841_v33 = vsel %vm2302_vm5, %v3840_v54, %v3839_v4  ;;  %v5829_v29 = vrot.slane %v13071_v40, 4  ;;  %v5831_v5 = vrot.slane %v13094_v61, 3  ;;  %v5821_v8 = vsel %vm2293_vm2, %v5820_v16, %v5819_v30 }
 0x44c   :  { %v3843_v11 = vsel %vm2305_vm6, %v3842_v15, %v3841_v33  ;;  %v5832_v52 = vrot.slane %v13050_v36, 2  ;;  %v5834_v18 = vrot.slane %v13049_v63, 1  ;;  %v5822_v4 = vsel %vm2296_vm3, %v13095_v28, %v5821_v8 }
 0x44d   :  { %v3845_v39 = vsel %vm2308_vm7, %v3844_v0, %v3843_v11  ;;  %v5837_v54 = vrot.slane %v13025_v24, 7  ;;  %v5839_v44 = vrot.slane %v13027_v58, 6  ;;  %v5824_v61 = vsel %vm2299_vm4, %v5823_v41, %v5822_v4  ;;  %v13096_v24 = vld [vmem:[#allocation88_spill] sm:$0xff] }
 0x44e   :  { %v3874_v6 = vpack.c.b16 %v3845_v39, %v3831_v22  ;;  %v5833_v15 = vsel %vm2290_vm1, %v5832_v52, %v5831_v5  ;;  %v5841_v16 = vrot.slane %v13028_v47, 5  ;;  %v5826_v33 = vsel %vm2302_vm5, %v5825_v42, %v5824_v61 }
 0x44f   :  { %v5835_v30 = vsel %vm2293_vm2, %v5834_v18, %v5833_v15  ;;  %v5843_v0 = vrot.slane %v13029_v49, 4  ;;  %v5914_v11 = vrot.slane %v12984_v14, 4  ;;  %v5828_v8 = vsel %vm2305_vm6, %v5827_v53, %v5826_v33 }
 0x450   :  { %6760 = vmatprep.mubr.msk.bf16.mxu1 %vm221_vm0, %v3874_v6  ;;  %v5836_v22 = vsel %vm2296_vm3, %v13096_v24, %v5835_v30  ;;  %v5915_v41 = vrot.slane %v12981_v35, 3  ;;  %v5917_v52 = vrot.slane %v13052_v60, 2  ;;  %v5830_v39 = vsel %vm2308_vm7, %v5829_v29, %v5828_v8 }
 0x451   :  { %v5838_v42 = vsel %vm2299_vm4, %v5837_v54, %v5836_v22  ;;  %v5919_v18 = vrot.slane %v13075_v51, 1  ;;  %v5922_v61 = vrot.slane %v13073_v48, 7  ;;  %v5924_v53 = vrot.slane %v13051_v12, 6 }
 0x452   :  { %v5840_v5 = vsel %vm2302_vm5, %v5839_v44, %v5838_v42  ;;  %v5916_v4 = vsel %vm2290_vm1, %v5915_v41, %v5914_v11  ;;  %v5926_v6 = vrot.slane %v12988_v21, 5  ;;  %v5928_v29 = vrot.slane %v13074_v56, 4  ;;  %v13097_v41 = vld [vmem:[#allocation19_spill] sm:$0xff] }
 0x453   :  { %v5842_v15 = vsel %vm2305_vm6, %v5841_v16, %v5840_v5  ;;  %v5918_v33 = vsel %vm2293_vm2, %v5917_v52, %v5916_v4  ;;  %v5929_v54 = vrot.slane %v12989_v62, 3  ;;  %v5931_v44 = vrot.slane %v12990_v45, 2  ;;  %v11470_v5 = vld [vmem:[#allocation9 + $0xe8] sm:$0xff]  }
 0x454   :  { %v5844_v30 = vsel %vm2308_vm7, %v5843_v0, %v5842_v15  ;;  %v5920_v8 = vsel %vm2296_vm3, %v5919_v18, %v5918_v33  ;;  %v5933_v11 = vrot.slane %v12991_v19, 1  ;;  %v5936_v52 = vrot.slane %v12994_v23, 7  ;;  %v13101_v23 = vld [vmem:[#allocation86_spill] sm:$0xff] }
 0x455   :  { %v5846_v22 = vpack.c.b16 %v5844_v30, %v5830_v39  ;;  %v5921_v42 = vsel %vm2299_vm4, %v13097_v41, %v5920_v8  ;;  %v5930_v16 = vsel %vm2290_vm1, %v5929_v54, %v5928_v29  ;;  %v5938_v18 = vrot.slane %v12995_v17, 6 }
 0x456   :  { %v5923_v4 = vsel %vm2302_vm5, %v5922_v61, %v5921_v42  ;;  %v5932_v0 = vsel %vm2293_vm2, %v5931_v44, %v5930_v16  ;;  %v5940_v15 = vrot.slane %v12996_v38, 5  ;;  %v3846_v29 = vrot.slane %v13001_v25, 4  ;;  %v13098_v42 = vld [vmem:[#allocation127_spill] sm:$0xff] }
 0x457   :  { %6851 = vmatmul.mubr.msk.bf16.vlgmr.msra.gmra.mrb[0].mxu0 %vm221_vm0, %v5846_v22  ;;  %v5925_v39 = vsel %vm2305_vm6, %v5924_v53, %v5923_v4  ;;  %v5934_v33 = vsel %vm2296_vm3, %v5933_v11, %v5932_v0  ;;  %v3847_v54 = vrot.slane %v12997_v43, 3  ;;  %v3849_v8 = vrot.slane %v13055_v20, 2 }
 0x458   :  { %6855 = vmatpush3.bf16.msra.mxu0 %v11338_v13  ;;  %v5927_v61 = vsel %vm2308_vm7, %v5926_v6, %v5925_v39  ;;  %v5935_v30 = vsel %vm2299_vm4, %v12993_v55, %v5934_v33  ;;  %v3851_v44 = vrot.slane %v13078_v1, 1  ;;  %v3854_v11 = vrot.slane %v13053_v59, 7  ;;  %v13100_v59 = vld [vmem:[#allocation98_spill] sm:$0xff] }
 0x459   :  { %v5937_v22 = vsel %vm2302_vm5, %v5936_v52, %v5935_v30  ;;  %v3848_v53 = vsel %vm2290_vm1, %v3847_v54, %v3846_v29  ;;  %v3856_v16 = vrot.slane %v13098_v42, 6  ;;  %6860 = vmatprep.subr.bf16.mxu0 %v11470_v5  ;;  %v3858_v4 = vrot.slane %v13076_v50, 5  ;;  %v13099_v29 = vld [vmem:[#allocation106_spill] sm:$0xff]  ;;  %v13103_v50 = vld [vmem:[#allocation131_spill] sm:$0xff] }
 0x45a   :  { %v5939_v13 = vsel %vm2305_vm6, %v5938_v18, %v5937_v22  ;;  %v3850_v6 = vsel %vm2293_vm2, %v3849_v8, %v3848_v53  ;;  %v3860_v0 = vrot.slane %v13077_v2, 4  ;;  %v3861_v33 = vrot.slane %v13033_v3, 3  ;;  %v13102_v22 = vld [vmem:[#allocation117_spill] sm:$0xff]  ;;  %v13109_v3 = vld [vmem:[#allocation102_spill] sm:$0xff] }
 0x45b   :  { %v5941_v39 = vsel %vm2308_vm7, %v5940_v15, %v5939_v13  ;;  %v3852_v52 = vsel %vm2296_vm3, %v3851_v44, %v3850_v6  ;;  %v3863_v54 = vrot.slane %v13099_v29, 2  ;;  %v3865_v18 = vrot.slane %v13101_v23, 1  ;;  %v13104_v13 = vld [vmem:[#allocation139_spill] sm:$0xff]  ;;  %v13106_v29 = vld [vmem:[#allocation48_spill] sm:$0xff] }
 0x45c   :  { %v5970_v30 = vpack.c.b16 %v5941_v39, %v5927_v61  ;;  %v3853_v42 = vsel %vm2299_vm4, %v13100_v59, %v3852_v52  ;;  %v3868_v8 = vrot.slane %v13102_v22, 7  ;;  %v3862_v2 = vsel %vm2290_vm1, %v3861_v33, %v3860_v0  ;;  %v13105_v39 = vld [vmem:[#allocation62_spill] sm:$0xff]  ;;  %v13108_v33 = vld [vmem:[#allocation49_spill] sm:$0xff] }
 0x45d   :  { %v3855_v53 = vsel %vm2302_vm5, %v3854_v11, %v3853_v42  ;;  %v3870_v15 = vrot.slane %v13103_v50, 6  ;;  %v3872_v44 = vrot.slane %v13104_v13, 5  ;;  %v3864_v61 = vsel %vm2293_vm2, %v3863_v54, %v3862_v2  ;;  %v13107_v42 = vld [vmem:[#allocation32_spill] sm:$0xff] }
 0x45e   :  { %6856 = vmatprep.mubr.msk.bf16.mxu0 %vm221_vm0, %v5970_v30  ;;  %v3857_v6 = vsel %vm2305_vm6, %v3856_v16, %v3855_v53  ;;  %v3943_v52 = vrot.slane %v13105_v39, 5  ;;  %v3944_v23 = vrot.slane %v13106_v29, 4  ;;  %v3866_v11 = vsel %vm2296_vm3, %v3865_v18, %v3864_v61  ;;  %v13110_v2 = vld [vmem:[#allocation108_spill] sm:$0xff] }
 0x45f   :  { %v3859_v22 = vsel %vm2308_vm7, %v3858_v4, %v3857_v6  ;;  %v3946_v0 = vrot.slane %v13107_v42, 3  ;;  %v3948_v50 = vrot.slane %v13108_v33, 2  ;;  %v3867_v13 = vsel %vm2299_vm4, %v13109_v3, %v3866_v11 }
 0x460   :  { %v3945_v30 = vsel %vm2290_vm1, %v3944_v23, %v3943_v52  ;;  %v3950_v16 = vrot.slane %v13089_v57, 1  ;;  %v3953_v54 = vrot.slane %v13110_v2, 7  ;;  %v3869_v53 = vsel %vm2302_vm5, %v3868_v8, %v3867_v13 }
 0x461   :  { %v3947_v29 = vsel %vm2293_vm2, %v3946_v0, %v3945_v30  ;;  %v3955_v4 = vrot.slane %v13085_v32, 6  ;;  %v3957_v18 = vrot.slane %v13086_v31, 5  ;;  %v3871_v6 = vsel %vm2305_vm6, %v3870_v15, %v3869_v53  ;;  %v13111_v30 = vld [vmem:[#allocation90_spill] sm:$0xff] }
 0x462   :  { %v3949_v61 = vsel %vm2296_vm3, %v3948_v50, %v3947_v29  ;;  %v3958_v11 = vrot.slane %v13087_v37, 4  ;;  %v3960_v23 = vrot.slane %v13088_v10, 3  ;;  %v3873_v52 = vsel %vm2308_vm7, %v3872_v44, %v3871_v6  ;;  %v11538_v29 = vld [vmem:[#allocation9 + $0x70] sm:$0xff]   ;;  %v13112_v6 = vld [vmem:[#allocation74_spill] sm:$0xff] }
 0x463   :  { %v3951_v2 = vsel %vm2299_vm4, %v3950_v16, %v3949_v61  ;;  %v3962_v8 = vrot.slane %v13068_v7, 2  ;;  %v3964_v13 = vrot.slane %v13091_v26, 1  ;;  %v3875_v0 = vpack.c.b16 %v3873_v52, %v3859_v22 }
 0x464   :  { %v3952_v31 = vsel %vm2302_vm5, %v13111_v30, %v3951_v2  ;;  %v3959_v15 = vsel %vm2290_vm1, %v3958_v11, %v3957_v18  ;;  %v3967_v50 = vrot.slane %v13065_v46, 7  ;;  %v3969_v16 = vrot.slane %v13066_v34, 6  ;;  %v13113_v11 = vld [vmem:[#allocation17_spill] sm:$0xff]  ;;  %v13116_v34 = vld [vmem:[#allocation94_spill] sm:$0xff] }
 0x465   :  { %v3954_v53 = vsel %vm2305_vm6, %v3953_v54, %v3952_v31  ;;  %v3961_v44 = vsel %vm2293_vm2, %v3960_v23, %v3959_v15  ;;  %v5942_v61 = vrot.slane %v13112_v6, 4  ;;  %6761 = vmatmul.mubr.msk.bf16.vlgmr.msra.gmra.mrb[0].mxu1 %vm221_vm0, %v3875_v0  ;;  %v5943_v18 = vrot.slane %v13090_v27, 3  ;;  %v13114_v54 = vld [vmem:[#allocation115_spill] sm:$0xff]  ;;  %v13115_v15 = vld [vmem:[#allocation129_spill] sm:$0xff] }
 0x466   :  { %v3956_v22 = vsel %vm2308_vm7, %v3955_v4, %v3954_v53  ;;  %v3963_v2 = vsel %vm2296_vm3, %v3962_v8, %v3961_v44  ;;  %v5945_v52 = vrot.slane %v13113_v11, 2  ;;  %6765 = vmatpush3.bf16.msra.mxu1 %v11406_v9  ;;  %v5947_v31 = vrot.slane %v13095_v28, 1  ;;  %v13117_v53 = vld [vmem:[#allocation82_spill] sm:$0xff] }
 0x467   :  { %v3965_v46 = vsel %vm2299_vm4, %v3964_v13, %v3963_v2  ;;  %v5950_v23 = vrot.slane %v13114_v54, 7  ;;  %v5952_v6 = vrot.slane %v13115_v15, 6  ;;  %v5944_v4 = vsel %vm2290_vm1, %v5943_v18, %v5942_v61  ;;  %6770 = vmatprep.subr.bf16.mxu1 %v11538_v29 }
 0x468   :  { %v3966_v0 = vsel %vm2302_vm5, %v13116_v34, %v3965_v46  ;;  %v5954_v8 = vrot.slane %v13071_v40, 5  ;;  %v5956_v44 = vrot.slane %v13117_v53, 4  ;;  %v5946_v9 = vsel %vm2293_vm2, %v5945_v52, %v5944_v4  ;;  %v13118_v53 = vld [vmem:[#allocation100_spill] sm:$0xff] }
 0x469   :  { %v3968_v13 = vsel %vm2305_vm6, %v3967_v50, %v3966_v0  ;;  %v5957_v2 = vrot.slane %v13050_v36, 3  ;;  %v5959_v54 = vrot.slane %v13049_v63, 2  ;;  %v5948_v46 = vsel %vm2296_vm3, %v5947_v31, %v5946_v9 }
 0x46a   :  { %v3970_v15 = vsel %vm2308_vm7, %v3969_v16, %v3968_v13  ;;  %v5961_v61 = vrot.slane %v13096_v24, 1  ;;  %v5964_v18 = vrot.slane %v13027_v58, 7  ;;  %v5949_v28 = vsel %vm2299_vm4, %v13118_v53, %v5948_v46 }
 0x46b   :  { %v3999_v40 = vpack.c.b16 %v3970_v15, %v3956_v22  ;;  %v5958_v50 = vsel %vm2290_vm1, %v5957_v2, %v5956_v44  ;;  %v5966_v52 = vrot.slane %v13028_v47, 6  ;;  %v5951_v0 = vsel %vm2302_vm5, %v5950_v23, %v5949_v28  ;;  %v13119_v2 = vld [vmem:[#allocation104_spill] sm:$0xff] }
 0x46c   :  { %v5960_v4 = vsel %vm2293_vm2, %v5959_v54, %v5958_v50  ;;  %v5968_v16 = vrot.slane %v13029_v49, 5  ;;  %v6039_v31 = vrot.slane %v12984_v14, 5  ;;  %v5953_v13 = vsel %vm2305_vm6, %v5952_v6, %v5951_v0 }
 0x46d   :  { %6766 = vmatprep.mubr.msk.bf16.mxu1 %vm221_vm0, %v3999_v40  ;;  %v5962_v22 = vsel %vm2296_vm3, %v5961_v61, %v5960_v4  ;;  %v6040_v15 = vrot.slane %v12981_v35, 4  ;;  %v6042_v44 = vrot.slane %v13052_v60, 3  ;;  %v5955_v9 = vsel %vm2308_vm7, %v5954_v8, %v5953_v13 }
 0x46e   :  { %v5963_v28 = vsel %vm2299_vm4, %v13119_v2, %v5962_v22  ;;  %v6044_v54 = vrot.slane %v13075_v51, 2  ;;  %v6046_v23 = vrot.slane %v13097_v41, 1  ;;  %v6049_v6 = vrot.slane %v13051_v12, 7 }
 0x46f   :  { %v5965_v46 = vsel %vm2302_vm5, %v5964_v18, %v5963_v28  ;;  %v6041_v40 = vsel %vm2290_vm1, %v6040_v15, %v6039_v31  ;;  %v6051_v61 = vrot.slane %v12988_v21, 6  ;;  %v6053_v8 = vrot.slane %v13074_v56, 5 }
 0x470   :  { %v5967_v50 = vsel %vm2305_vm6, %v5966_v52, %v5965_v46  ;;  %v6043_v0 = vsel %vm2293_vm2, %v6042_v44, %v6041_v40  ;;  %v6054_v4 = vrot.slane %v12989_v62, 4  ;;  %v6056_v18 = vrot.slane %v12990_v45, 3  ;;  %v11601_v44 = vld [vmem:[#allocation9 + $0xf0] sm:$0xff]  }
 0x471   :  { %v5969_v13 = vsel %vm2308_vm7, %v5968_v16, %v5967_v50  ;;  %v6045_v22 = vsel %vm2296_vm3, %v6044_v54, %v6043_v0  ;;  %v6058_v31 = vrot.slane %v12991_v19, 2  ;;  %v6060_v52 = vrot.slane %v12993_v55, 1  ;;  %13120 = vst [vmem:[#allocation145_spill] sm:$0xff] %v11601_v44 }
 0x472   :  { %v5971_v15 = vpack.c.b16 %v5969_v13, %v5955_v9  ;;  %v6047_v28 = vsel %vm2299_vm4, %v6046_v23, %v6045_v22  ;;  %v6055_v12 = vsel %vm2290_vm1, %v6054_v4, %v6053_v8  ;;  %v6063_v54 = vrot.slane %v12995_v17, 7  ;;  %v13121_v22 = vld [vmem:[#allocation96_spill] sm:$0xff] }
 0x473   :  { %v6048_v46 = vsel %vm2302_vm5, %v13073_v48, %v6047_v28  ;;  %v6057_v16 = vsel %vm2293_vm2, %v6056_v18, %v6055_v12  ;;  %v6065_v40 = vrot.slane %v12996_v38, 6  ;;  %v3971_v50 = vrot.slane %v13001_v25, 5  ;;  %v13125_v17 = vld [vmem:[#allocation84_spill] sm:$0xff] }
 0x474   :  { %6857 = vmatmul.mubr.msk.bf16.vlgmr.msra.gmra.mrb[0].mxu0 %vm221_vm0, %v5971_v15  ;;  %v6050_v9 = vsel %vm2305_vm6, %v6049_v6, %v6048_v46  ;;  %v6059_v23 = vsel %vm2296_vm3, %v6058_v31, %v6057_v16  ;;  %v3972_v0 = vrot.slane %v12997_v43, 4  ;;  %v3974_v4 = vrot.slane %v13055_v20, 3  ;;  %v13122_v15 = vld [vmem:[#allocation127_spill] sm:$0xff]  ;;  %v13124_v16 = vld [vmem:[#allocation41_spill] sm:$0xff]  ;;  %v13127_v20 = vld [vmem:[#allocation86_spill] sm:$0xff] }
 0x475   :  { %6861 = vmatpush3.bf16.msra.mxu0 %v11470_v5  ;;  %v6052_v8 = vsel %vm2308_vm7, %v6051_v61, %v6050_v9  ;;  %v6061_v12 = vsel %vm2299_vm4, %v6060_v52, %v6059_v23  ;;  %v3976_v13 = vrot.slane %v13078_v1, 2  ;;  %v3978_v31 = vrot.slane %v13100_v59, 1  ;;  %v13123_v52 = vld [vmem:[#allocation135_spill] sm:$0xff] }
 0x476   :  { %v6062_v18 = vsel %vm2302_vm5, %v13121_v22, %v6061_v12  ;;  %v3973_v6 = vsel %vm2290_vm1, %v3972_v0, %v3971_v50  ;;  %v3981_v28 = vrot.slane %v13122_v15, 7  ;;  %6866 = vmatprep.subr.bf16.mxu0 %v11601_v44  ;;  %v3983_v46 = vrot.slane %v13123_v52, 6  ;;  %v13126_v0 = vld [vmem:[#allocation106_spill] sm:$0xff] }
 0x477   :  { %v6064_v5 = vsel %vm2305_vm6, %v6063_v54, %v6062_v18  ;;  %v3975_v61 = vsel %vm2293_vm2, %v3974_v4, %v3973_v6  ;;  %v3985_v9 = vrot.slane %v13124_v16, 5  ;;  %v3986_v50 = vrot.slane %v13125_v17, 4  ;;  %v13128_v4 = vld [vmem:[#allocation113_spill] sm:$0xff]  ;;  %v13129_v16 = vld [vmem:[#allocation131_spill] sm:$0xff] }
 0x478   :  { %v6066_v23 = vsel %vm2308_vm7, %v6065_v40, %v6064_v5  ;;  %v3977_v12 = vsel %vm2296_vm3, %v3976_v13, %v3975_v61  ;;  %v3988_v59 = vrot.slane %v13126_v0, 3  ;;  %v3990_v44 = vrot.slane %v13127_v20, 2  ;;  %v13130_v5 = vld [vmem:[#allocation139_spill] sm:$0xff] }
 0x479   :  { %v6095_v1 = vpack.c.b16 %v6066_v23, %v6052_v8  ;;  %v3979_v15 = vsel %vm2299_vm4, %v3978_v31, %v3977_v12  ;;  %v3992_v54 = vrot.slane %v13109_v3, 1  ;;  %v3987_v6 = vsel %vm2290_vm1, %v3986_v50, %v3985_v9  ;;  %v13131_v23 = vld [vmem:[#allocation48_spill] sm:$0xff] }
 0x47a   :  { %v3980_v18 = vsel %vm2302_vm5, %v13128_v4, %v3979_v15  ;;  %v3995_v40 = vrot.slane %v13129_v16, 7  ;;  %v3997_v13 = vrot.slane %v13130_v5, 6  ;;  %v3989_v8 = vsel %vm2293_vm2, %v3988_v59, %v3987_v6 }
 0x47b   :  { %6862 = vmatprep.mubr.msk.bf16.mxu0 %vm221_vm0, %v6095_v1  ;;  %v3982_v61 = vsel %vm2305_vm6, %v3981_v28, %v3980_v18  ;;  %v4068_v31 = vrot.slane %v13105_v39, 6  ;;  %v4069_v12 = vrot.slane %v13131_v23, 5  ;;  %v3991_v15 = vsel %vm2296_vm3, %v3990_v44, %v3989_v8  ;;  %v13132_v18 = vld [vmem:[#allocation117_spill] sm:$0xff]  ;;  %v13133_v44 = vld [vmem:[#allocation28_spill] sm:$0xff] }
 0x47c   :  { %v3984_v3 = vsel %vm2308_vm7, %v3983_v46, %v3982_v61  ;;  %v4071_v9 = vrot.slane %v13107_v42, 4  ;;  %v4073_v50 = vrot.slane %v13108_v33, 3  ;;  %v3993_v16 = vsel %vm2299_vm4, %v3992_v54, %v3991_v15 }
 0x47d   :  { %v4070_v1 = vsel %vm2290_vm1, %v4069_v12, %v4068_v31  ;;  %v4075_v28 = vrot.slane %v13089_v57, 2  ;;  %v4077_v59 = vrot.slane %v13111_v30, 1  ;;  %v3994_v6 = vsel %vm2302_vm5, %v13132_v18, %v3993_v16 }
 0x47e   :  { %v4072_v23 = vsel %vm2293_vm2, %v4071_v9, %v4070_v1  ;;  %v4080_v46 = vrot.slane %v13085_v32, 7  ;;  %v4082_v61 = vrot.slane %v13133_v44, 6  ;;  %v3996_v8 = vsel %vm2305_vm6, %v3995_v40, %v3994_v6 }
 0x47f   :  { %v4074_v33 = vsel %vm2296_vm3, %v4073_v50, %v4072_v23  ;;  %v4083_v54 = vrot.slane %v13087_v37, 5  ;;  %v4085_v31 = vrot.slane %v13088_v10, 4  ;;  %v3998_v12 = vsel %vm2308_vm7, %v3997_v13, %v3996_v8  ;;  %v11669_v23 = vld [vmem:[#allocation9 + $0x78] sm:$0xff]   ;;  %v13134_v50 = vld [vmem:[#allocation108_spill] sm:$0xff] }
 0x480   :  { %v4076_v15 = vsel %vm2299_vm4, %v4075_v28, %v4074_v33  ;;  %v4087_v16 = vrot.slane %v13068_v7, 3  ;;  %v4089_v9 = vrot.slane %v13091_v26, 2  ;;  %v4000_v1 = vpack.c.b16 %v3998_v12, %v3984_v3  ;;  %v13135_v8 = vld [vmem:[#allocation124_spill] sm:$0xff]  ;;  %v13136_v28 = vld [vmem:[#allocation74_spill] sm:$0xff] }
 0x481   :  { %v4078_v32 = vsel %vm2302_vm5, %v4077_v59, %v4076_v15  ;;  %v4084_v44 = vsel %vm2290_vm1, %v4083_v54, %v4082_v61  ;;  %v4091_v40 = vrot.slane %v13116_v34, 1  ;;  %v4094_v33 = vrot.slane %v13135_v8, 7  ;;  %v13138_v15 = vld [vmem:[#allocation129_spill] sm:$0xff] }
 0x482   :  { %v4079_v6 = vsel %vm2305_vm6, %v13134_v50, %v4078_v32  ;;  %v4086_v13 = vsel %vm2293_vm2, %v4085_v31, %v4084_v44  ;;  %v6067_v7 = vrot.slane %v13136_v28, 5  ;;  %6767 = vmatmul.mubr.msk.bf16.vlgmr.msra.gmra.mrb[0].mxu1 %vm221_vm0, %v4000_v1  ;;  %v6068_v61 = vrot.slane %v13090_v27, 4  ;;  %v13137_v32 = vld [vmem:[#allocation80_spill] sm:$0xff] }
 0x483   :  { %v4081_v3 = vsel %vm2308_vm7, %v4080_v46, %v4079_v6  ;;  %v4088_v59 = vsel %vm2296_vm3, %v4087_v16, %v4086_v13  ;;  %v6070_v54 = vrot.slane %v13113_v11, 3  ;;  %6771 = vmatpush3.bf16.msra.mxu1 %v11538_v29  ;;  %v6072_v44 = vrot.slane %v13137_v32, 2  ;;  %v13139_v6 = vld [vmem:[#allocation137_spill] sm:$0xff]  ;;  %v13140_v13 = vld [vmem:[#allocation82_spill] sm:$0xff]  ;;  %v13141_v11 = vld [vmem:[#allocation111_spill] sm:$0xff] }
 0x484   :  { %v4090_v12 = vsel %vm2299_vm4, %v4089_v9, %v4088_v59  ;;  %v6074_v31 = vrot.slane %v13118_v53, 1  ;;  %v6077_v8 = vrot.slane %v13138_v15, 7  ;;  %v6069_v46 = vsel %vm2290_vm1, %v6068_v61, %v6067_v7  ;;  %6776 = vmatprep.subr.bf16.mxu1 %v11669_v23 }
 0x485   :  { %v4092_v1 = vsel %vm2302_vm5, %v4091_v40, %v4090_v12  ;;  %v6079_v16 = vrot.slane %v13139_v6, 6  ;;  %v6081_v27 = vrot.slane %v13140_v13, 5  ;;  %v6071_v29 = vsel %vm2293_vm2, %v6070_v54, %v6069_v46  ;;  %v13142_v54 = vld [vmem:[#allocation115_spill] sm:$0xff] }
 0x486   :  { %v4093_v9 = vsel %vm2305_vm6, %v13141_v11, %v4092_v1  ;;  %v6082_v59 = vrot.slane %v13050_v36, 4  ;;  %v6084_v53 = vrot.slane %v13049_v63, 3  ;;  %v6073_v40 = vsel %vm2296_vm3, %v6072_v44, %v6071_v29 }
 0x487   :  { %v4095_v15 = vsel %vm2308_vm7, %v4094_v33, %v4093_v9  ;;  %v6086_v7 = vrot.slane %v13096_v24, 2  ;;  %v6088_v61 = vrot.slane %v13119_v2, 1  ;;  %v6075_v13 = vsel %vm2299_vm4, %v6074_v31, %v6073_v40 }
 0x488   :  { %v4124_v12 = vpack.c.b16 %v4095_v15, %v4081_v3  ;;  %v6083_v6 = vsel %vm2290_vm1, %v6082_v59, %v6081_v27  ;;  %v6091_v1 = vrot.slane %v13028_v47, 7  ;;  %v6076_v46 = vsel %vm2302_vm5, %v13142_v54, %v6075_v13 }
 0x489   :  { %v6085_v63 = vsel %vm2293_vm2, %v6084_v53, %v6083_v6  ;;  %v6093_v33 = vrot.slane %v13029_v49, 6  ;;  %v6164_v44 = vrot.slane %v12984_v14, 6  ;;  %v6078_v9 = vsel %vm2305_vm6, %v6077_v8, %v6076_v46 }
 0x48a   :  { %6772 = vmatprep.mubr.msk.bf16.mxu1 %vm221_vm0, %v4124_v12  ;;  %v6087_v3 = vsel %vm2296_vm3, %v6086_v7, %v6085_v63  ;;  %v6165_v31 = vrot.slane %v12981_v35, 5  ;;  %v6167_v27 = vrot.slane %v13052_v60, 4  ;;  %v6080_v15 = vsel %vm2308_vm7, %v6079_v16, %v6078_v9 }
 0x48b   :  { %v6089_v13 = vsel %vm2299_vm4, %v6088_v61, %v6087_v3  ;;  %v6169_v53 = vrot.slane %v13075_v51, 3  ;;  %v6171_v6 = vrot.slane %v13097_v41, 2  ;;  %v6173_v8 = vrot.slane %v13073_v48, 1 }
 0x48c   :  { %v6090_v29 = vsel %vm2302_vm5, %v13027_v58, %v6089_v13  ;;  %v6166_v59 = vsel %vm2290_vm1, %v6165_v31, %v6164_v44  ;;  %v6176_v63 = vrot.slane %v12988_v21, 7  ;;  %v6178_v16 = vrot.slane %v13074_v56, 6  ;;  %v13148_v21 = vld [vmem:[#allocation112_spill] sm:$0xff] }
 0x48d   :  { %v6092_v40 = vsel %vm2305_vm6, %v6091_v1, %v6090_v29  ;;  %v6168_v7 = vsel %vm2293_vm2, %v6167_v27, %v6166_v59  ;;  %v6179_v61 = vrot.slane %v12989_v62, 5  ;;  %v6181_v9 = vrot.slane %v12990_v45, 4  ;;  %v11733_v27 = vld [vmem:[#allocation9 + $0xf8] sm:$0xff]  }
 0x48e   :  { %v6094_v12 = vsel %vm2308_vm7, %v6093_v33, %v6092_v40  ;;  %v6170_v46 = vsel %vm2296_vm3, %v6169_v53, %v6168_v7  ;;  %v6183_v44 = vrot.slane %v12991_v19, 3  ;;  %v6185_v1 = vrot.slane %v12993_v55, 2  ;;  %v13143_v40 = vld [vmem:[#allocation63_spill] sm:$0xff] }
 0x48f   :  { %v6096_v3 = vpack.c.b16 %v6094_v12, %v6080_v15  ;;  %v6172_v31 = vsel %vm2299_vm4, %v6171_v6, %v6170_v46  ;;  %v6180_v13 = vsel %vm2290_vm1, %v6179_v61, %v6178_v16  ;;  %v6187_v33 = vrot.slane %v13121_v22, 1  ;;  %v13144_v61 = vld [vmem:[#allocation145_spill] sm:$0xff]  ;;  %v13145_v46 = vld [vmem:[#allocation64_spill] sm:$0xff] }
 0x490   :  { %v6174_v29 = vsel %vm2302_vm5, %v6173_v8, %v6172_v31  ;;  %v6182_v59 = vsel %vm2293_vm2, %v6181_v9, %v6180_v13  ;;  %v6190_v53 = vrot.slane %v12996_v38, 7  ;;  %v4096_v7 = vrot.slane %v13001_v25, 6  ;;  %v13146_v31 = vld [vmem:[#allocation78_spill] sm:$0xff] }
 0x491   :  { %6863 = vmatmul.mubr.msk.bf16.vlgmr.msra.gmra.mrb[0].mxu0 %vm221_vm0, %v6096_v3  ;;  %v6175_v15 = vsel %vm2305_vm6, %v13143_v40, %v6174_v29  ;;  %v6184_v6 = vsel %vm2296_vm3, %v6183_v44, %v6182_v59  ;;  %v4097_v16 = vrot.slane %v12997_v43, 5  ;;  %v4099_v9 = vrot.slane %v13145_v46, 4  ;;  %v13147_v38 = vld [vmem:[#allocation98_spill] sm:$0xff] }
 0x492   :  { %6867 = vmatpush3.bf16.msra.mxu0 %v13144_v61  ;;  %v6177_v8 = vsel %vm2308_vm7, %v6176_v63, %v6175_v15  ;;  %v6186_v12 = vsel %vm2299_vm4, %v6185_v1, %v6184_v6  ;;  %v4101_v13 = vrot.slane %v13146_v31, 3  ;;  %v4103_v44 = vrot.slane %v13147_v38, 2  ;;  %v13149_v15 = vld [vmem:[#allocation41_spill] sm:$0xff] }
 0x493   :  { %v6188_v3 = vsel %vm2302_vm5, %v6187_v33, %v6186_v12  ;;  %v4098_v29 = vsel %vm2290_vm1, %v4097_v16, %v4096_v7  ;;  %v4105_v59 = vrot.slane %v13128_v4, 1  ;;  %6872 = vmatprep.subr.bf16.mxu0 %v11733_v27  ;;  %v4108_v1 = vrot.slane %v13123_v52, 7 }
 0x494   :  { %v6189_v61 = vsel %vm2305_vm6, %v13148_v21, %v6188_v3  ;;  %v4100_v63 = vsel %vm2293_vm2, %v4099_v9, %v4098_v29  ;;  %v4110_v6 = vrot.slane %v13149_v15, 6  ;;  %v4111_v7 = vrot.slane %v13125_v17, 5  ;;  %v13150_v3 = vld [vmem:[#allocation102_spill] sm:$0xff] }
 0x495   :  { %v6191_v31 = vsel %vm2308_vm7, %v6190_v53, %v6189_v61  ;;  %v4102_v33 = vsel %vm2296_vm3, %v4101_v13, %v4100_v63  ;;  %v4113_v16 = vrot.slane %v13126_v0, 4  ;;  %v4115_v38 = vrot.slane %v13127_v20, 3  ;;  %v13151_v13 = vld [vmem:[#allocation127_spill] sm:$0xff] }
 0x496   :  { %v6220_v12 = vpack.c.b16 %v6191_v31, %v6177_v8  ;;  %v4104_v4 = vsel %vm2299_vm4, %v4103_v44, %v4102_v33  ;;  %v4117_v46 = vrot.slane %v13150_v3, 2  ;;  %v4112_v29 = vsel %vm2290_vm1, %v4111_v7, %v4110_v6  ;;  %v13152_v44 = vld [vmem:[#allocation48_spill] sm:$0xff]  ;;  %v13153_v6 = vld [vmem:[#allocation49_spill] sm:$0xff] }
 0x497   :  { %v4106_v9 = vsel %vm2302_vm5, %v4105_v59, %v4104_v4  ;;  %v4119_v52 = vrot.slane %v13132_v18, 1  ;;  %v4122_v53 = vrot.slane %v13130_v5, 7  ;;  %v4114_v8 = vsel %vm2293_vm2, %v4113_v16, %v4112_v29 }
 0x498   :  { %6868 = vmatprep.mubr.msk.bf16.mxu0 %vm221_vm0, %v6220_v12  ;;  %v4107_v61 = vsel %vm2305_vm6, %v13151_v13, %v4106_v9  ;;  %v4193_v31 = vrot.slane %v13105_v39, 7  ;;  %v4194_v63 = vrot.slane %v13152_v44, 6  ;;  %v4116_v4 = vsel %vm2296_vm3, %v4115_v38, %v4114_v8  ;;  %v13155_v8 = vld [vmem:[#allocation131_spill] sm:$0xff] }
 0x499   :  { %v4109_v33 = vsel %vm2308_vm7, %v4108_v1, %v4107_v61  ;;  %v4196_v59 = vrot.slane %v13107_v42, 5  ;;  %v4198_v7 = vrot.slane %v13153_v6, 4  ;;  %v4118_v5 = vsel %vm2299_vm4, %v4117_v46, %v4116_v4  ;;  %v13154_v61 = vld [vmem:[#allocation28_spill] sm:$0xff] }
 0x49a   :  { %v4195_v12 = vsel %vm2290_vm1, %v4194_v63, %v4193_v31  ;;  %v4200_v9 = vrot.slane %v13089_v57, 3  ;;  %v4202_v16 = vrot.slane %v13111_v30, 2  ;;  %v4120_v39 = vsel %vm2302_vm5, %v4119_v52, %v4118_v5  ;;  %v13156_v52 = vld [vmem:[#allocation57_spill] sm:$0xff] }
 0x49b   :  { %v4197_v29 = vsel %vm2293_vm2, %v4196_v59, %v4195_v12  ;;  %v4204_v1 = vrot.slane %v13134_v50, 1  ;;  %v4207_v38 = vrot.slane %v13154_v61, 7  ;;  %v4121_v42 = vsel %vm2305_vm6, %v13155_v8, %v4120_v39  ;;  %v13157_v12 = vld [vmem:[#allocation120_spill] sm:$0xff]  ;;  %v13159_v39 = vld [vmem:[#allocation17_spill] sm:$0xff] }
 0x49c   :  { %v4199_v44 = vsel %vm2296_vm3, %v4198_v7, %v4197_v29  ;;  %v4208_v46 = vrot.slane %v13087_v37, 6  ;;  %v4210_v31 = vrot.slane %v13088_v10, 5  ;;  %v4123_v57 = vsel %vm2308_vm7, %v4122_v53, %v4121_v42 }
 0x49d   :  { %v4201_v30 = vsel %vm2299_vm4, %v4200_v9, %v4199_v44  ;;  %v4212_v5 = vrot.slane %v13156_v52, 4  ;;  %v4214_v63 = vrot.slane %v13091_v26, 3  ;;  %v4125_v50 = vpack.c.b16 %v4123_v57, %v4109_v33  ;;  %v13158_v9 = vld [vmem:[#allocation40_spill] sm:$0xff]  ;;  %v13162_v57 = vld [vmem:[#allocation82_spill] sm:$0xff] }
 0x49e   :  { %v4203_v4 = vsel %vm2302_vm5, %v4202_v16, %v4201_v30  ;;  %v4209_v59 = vsel %vm2290_vm1, %v4208_v46, %v4207_v38  ;;  %v4216_v6 = vrot.slane %v13116_v34, 2  ;;  %v4218_v10 = vrot.slane %v13141_v11, 1  ;;  %v13160_v11 = vld [vmem:[#allocation100_spill] sm:$0xff]  ;;  %v13161_v46 = vld [vmem:[#allocation137_spill] sm:$0xff] }
 0x49f   :  { %v4205_v7 = vsel %vm2305_vm6, %v4204_v1, %v4203_v4  ;;  %v4211_v37 = vsel %vm2293_vm2, %v4210_v31, %v4209_v59  ;;  %v6192_v53 = vrot.slane %v13136_v28, 6  ;;  %6773 = vmatmul.mubr.msk.bf16.vlgmr.msra.gmra.mrb[0].mxu1 %vm221_vm0, %v4125_v50  ;;  %v6193_v16 = vrot.slane %v13158_v9, 5  ;;  %v13164_v4 = vld [vmem:[#allocation124_spill] sm:$0xff] }
 0x4a0   :  { %v4206_v26 = vsel %vm2308_vm7, %v13157_v12, %v4205_v7  ;;  %v4213_v33 = vsel %vm2296_vm3, %v4212_v5, %v4211_v37  ;;  %v6195_v29 = vrot.slane %v13159_v39, 4  ;;  %6777 = vmatpush3.bf16.msra.mxu1 %v11669_v23  ;;  %v6197_v1 = vrot.slane %v13137_v32, 3 }
 0x4a1   :  { %v4215_v34 = vsel %vm2299_vm4, %v4214_v63, %v4213_v33  ;;  %v6199_v61 = vrot.slane %v13160_v11, 2  ;;  %v6201_v38 = vrot.slane %v13142_v54, 1  ;;  %v6194_v44 = vsel %vm2290_vm1, %v6193_v16, %v6192_v53  ;;  %v13163_v63 = vld [vmem:[#allocation66_spill] sm:$0xff] }
 0x4a2   :  { %v4217_v42 = vsel %vm2302_vm5, %v4216_v6, %v4215_v34  ;;  %v6204_v31 = vrot.slane %v13161_v46, 7  ;;  %v6206_v30 = vrot.slane %v13162_v57, 6  ;;  %v6196_v5 = vsel %vm2293_vm2, %v6195_v29, %v6194_v44 }
 0x4a3   :  { %v4219_v52 = vsel %vm2305_vm6, %v4218_v10, %v4217_v42  ;;  %v6207_v23 = vrot.slane %v13050_v36, 5  ;;  %v6209_v50 = vrot.slane %v13163_v63, 4  ;;  %v6198_v7 = vsel %vm2296_vm3, %v6197_v1, %v6196_v5  ;;  %v13165_v1 = vld [vmem:[#allocation129_spill] sm:$0xff] }
 0x4a4   :  { %v4220_v59 = vsel %vm2308_vm7, %v13164_v4, %v4219_v52  ;;  %v6211_v6 = vrot.slane %v13096_v24, 3  ;;  %v6213_v37 = vrot.slane %v13119_v2, 2  ;;  %v6200_v12 = vsel %vm2299_vm4, %v6199_v61, %v6198_v7 }
 0x4a5   :  { %v4249_v53 = vpack.c.b16 %v4220_v59, %v4206_v26  ;;  %v6208_v10 = vsel %vm2290_vm1, %v6207_v23, %v6206_v30  ;;  %v6215_v33 = vrot.slane %v13027_v58, 1  ;;  %v6202_v16 = vsel %vm2302_vm5, %v6201_v38, %v6200_v12 }
 0x4a6   :  { %v6210_v29 = vsel %vm2293_vm2, %v6209_v50, %v6208_v10  ;;  %v6289_v34 = vrot.slane %v12984_v14, 7  ;;  %v6203_v42 = vsel %vm2305_vm6, %v13165_v1, %v6202_v16  ;;  %v6218_v26 = vrot.slane %v13029_v49, 7 }
 0x4a7   :  { %6778 = vmatprep.mubr.msk.bf16.mxu1 %vm221_vm0, %v4249_v53  ;;  %v6212_v44 = vsel %vm2296_vm3, %v6211_v6, %v6210_v29  ;;  %v6290_v61 = vrot.slane %v12981_v35, 6  ;;  %v6205_v30 = vsel %vm2308_vm7, %v6204_v31, %v6203_v42  ;;  %v6292_v38 = vrot.slane %v13052_v60, 5  ;;  %v13167_v42 = vld [vmem:[#allocation78_spill] sm:$0xff] }
 0x4a8   :  { %v6214_v52 = vsel %vm2299_vm4, %v6213_v37, %v6212_v44  ;;  %v6294_v5 = vrot.slane %v13075_v51, 4  ;;  %v6296_v50 = vrot.slane %v13097_v41, 3  ;;  %v6298_v4 = vrot.slane %v13073_v48, 2  ;;  %v13168_v44 = vld [vmem:[#allocation121_spill] sm:$0xff] }
 0x4a9   :  { %v6216_v14 = vsel %vm2302_vm5, %v6215_v33, %v6214_v52  ;;  %v6291_v23 = vsel %vm2290_vm1, %v6290_v61, %v6289_v34  ;;  %v6300_v35 = vrot.slane %v13143_v40, 1  ;;  %v6303_v31 = vrot.slane %v13074_v56, 7  ;;  %v13166_v34 = vld [vmem:[#allocation64_spill] sm:$0xff] }
 0x4aa   :  { %v6217_v59 = vsel %vm2305_vm6, %v13028_v47, %v6216_v14  ;;  %v6304_v7 = vrot.slane %v12989_v62, 6  ;;  %v6293_v51 = vsel %vm2293_vm2, %v6292_v38, %v6291_v23  ;;  %v6306_v6 = vrot.slane %v12990_v45, 5  ;;  %v13170_v38 = vld [vmem:[#allocation113_spill] sm:$0xff] }
 0x4ab   :  { %v6219_v60 = vsel %vm2308_vm7, %v6218_v26, %v6217_v59  ;;  %v6308_v37 = vrot.slane %v12991_v19, 4  ;;  %v6295_v48 = vsel %vm2296_vm3, %v6294_v5, %v6293_v51  ;;  %v6310_v12 = vrot.slane %v12993_v55, 3  ;;  %v13171_v23 = vld [vmem:[#allocation125_spill] sm:$0xff] }
 0x4ac   :  { %v6221_v41 = vpack.c.b16 %v6219_v60, %v6205_v30  ;;  %v6305_v53 = vsel %vm2290_vm1, %v6304_v7, %v6303_v31  ;;  %v6297_v40 = vsel %vm2299_vm4, %v6296_v50, %v6295_v48  ;;  %v6312_v62 = vrot.slane %v13121_v22, 2  ;;  %v13172_v48 = vld [vmem:[#allocation135_spill] sm:$0xff] }
 0x4ad   :  { %v6307_v56 = vsel %vm2293_vm2, %v6306_v6, %v6305_v53  ;;  %v6314_v10 = vrot.slane %v13148_v21, 1  ;;  %v6299_v45 = vsel %vm2302_vm5, %v6298_v4, %v6297_v40  ;;  %v4221_v33 = vrot.slane %v13001_v25, 7  ;;  %v13169_v25 = vld [vmem:[#allocation98_spill] sm:$0xff] }
 0x4ae   :  { %6869 = vmatmul.mubr.msk.bf16.vlgmr.msra.gmra.mrb[0].mxu0 %vm221_vm0, %v6221_v41  ;;  %v6309_v19 = vsel %vm2296_vm3, %v6308_v37, %v6307_v56  ;;  %v4222_v16 = vrot.slane %v12997_v43, 6  ;;  %v6301_v55 = vsel %vm2305_vm6, %v6300_v35, %v6299_v45  ;;  %v4224_v22 = vrot.slane %v13166_v34, 5 }
 0x4af   :  { %6873 = vmatpush3.bf16.msra.mxu0 %v11733_v27  ;;  %v6311_v29 = vsel %vm2299_vm4, %v6310_v12, %v6309_v19  ;;  %v4226_v21 = vrot.slane %v13167_v42, 4  ;;  %v6302_v26 = vsel %vm2308_vm7, %v13168_v44, %v6301_v55  ;;  %v4228_v52 = vrot.slane %v13169_v25, 3 }
 0x4b0   :  { %v6313_v61 = vsel %vm2302_vm5, %v6312_v62, %v6311_v29  ;;  %v4223_v30 = vsel %vm2290_vm1, %v4222_v16, %v4221_v33  ;;  %v4230_v5 = vrot.slane %v13170_v38, 2  ;;  %v4232_v14 = vrot.slane %v13151_v13, 1  ;;  %v13173_v33 = vld [vmem:[#allocation139_spill] sm:$0xff] }
 0x4b1   :  { %v6315_v43 = vsel %vm2305_vm6, %v6314_v10, %v6313_v61  ;;  %v4225_v27 = vsel %vm2293_vm2, %v4224_v22, %v4223_v30  ;;  %v4235_v59 = vrot.slane %v13149_v15, 7  ;;  %v4236_v35 = vrot.slane %v13125_v17, 6 }
 0x4b2   :  { %v6316_v50 = vsel %vm2308_vm7, %v13171_v23, %v6315_v43  ;;  %v4227_v4 = vsel %vm2296_vm3, %v4226_v21, %v4225_v27  ;;  %v4238_v7 = vrot.slane %v13126_v0, 5  ;;  %v4240_v60 = vrot.slane %v13127_v20, 4 }
 0x4b3   :  { %v6345_v31 = vpack.c.b16 %v6316_v50, %v6302_v26  ;;  %v4242_v51 = vrot.slane %v13150_v3, 3  ;;  %v4229_v6 = vsel %vm2299_vm4, %v4228_v52, %v4227_v4  ;;  %v4237_v13 = vsel %vm2290_vm1, %v4236_v35, %v4235_v59 }
 0x4b4   :  { %v4244_v37 = vrot.slane %v13132_v18, 2  ;;  %v4231_v41 = vsel %vm2302_vm5, %v4230_v5, %v4229_v6  ;;  %v4239_v15 = vsel %vm2293_vm2, %v4238_v7, %v4237_v13  ;;  %v4246_v17 = vrot.slane %v13155_v8, 1 }
 0x4b5   :  { %6874 = vmatprep.mubr.msk.bf16.mxu0 %vm221_vm0, %v6345_v31  ;;  %v6317_v0 = vrot.slane %v13136_v28, 7  ;;  %v4233_v20 = vsel %vm2305_vm6, %v4232_v14, %v4231_v41  ;;  %v4241_v3 = vsel %vm2296_vm3, %v4240_v60, %v4239_v15  ;;  %v6318_v18 = vrot.slane %v13158_v9, 6 }
 0x4b6   :  { %v4234_v53 = vsel %vm2308_vm7, %v13172_v48, %v4233_v20  ;;  %v4243_v12 = vsel %vm2299_vm4, %v4242_v51, %v4241_v3  ;;  %v6320_v56 = vrot.slane %v13159_v39, 5  ;;  %v6322_v62 = vrot.slane %v13137_v32, 4 }
 0x4b7   :  { %v4245_v40 = vsel %vm2302_vm5, %v4244_v37, %v4243_v12  ;;  %v6331_v8 = vrot.slane %v13162_v57, 7  ;;  %v6319_v10 = vsel %vm2290_vm1, %v6318_v18, %v6317_v0  ;;  %v6324_v45 = vrot.slane %v13160_v11, 3  ;;  %v6581_v37 = vld [vmem:[#allocation11] ss:$0 sm:$0xff] }
 0x4b8   :  { %v4247_v28 = vsel %vm2305_vm6, %v4246_v17, %v4245_v40  ;;  %v6332_v19 = vrot.slane %v13050_v36, 6  ;;  %v6334_v9 = vrot.slane %v13163_v63, 5  ;;  %v6336_v55 = vrot.slane %v13096_v24, 4 }
 0x4b9   :  { %v4248_v16 = vsel %vm2308_vm7, %v13173_v33, %v4247_v28  ;;  %v6338_v39 = vrot.slane %v13119_v2, 3  ;;  %v6326_v57 = vrot.slane %v13142_v54, 2  ;;  %v6340_v34 = vrot.slane %v13027_v58, 2 }
 0x4ba   :  { %v4250_v32 = vpack.c.b16 %v4248_v16, %v4234_v53  ;;  %v6333_v29 = vsel %vm2290_vm1, %v6332_v19, %v6331_v8  ;;  %v6321_v11 = vsel %vm2293_vm2, %v6320_v56, %v6319_v10  ;;  %v6328_v36 = vrot.slane %v13165_v1, 1 }
 0x4bb   :  { %v6335_v22 = vsel %vm2293_vm2, %v6334_v9, %v6333_v29  ;;  %v6342_v42 = vrot.slane %v13028_v47, 1  ;;  %v6323_v24 = vsel %vm2296_vm3, %v6322_v62, %v6321_v11  ;;  %v7580_v30 = vmov 0.0  }
 0x4bc   :  { %6779 = vmatmul.mubr.msk.bf16.vlgmr.msra.gmra.mrb[0].mxu1 %vm221_vm0, %v4250_v32  ;;  %v6337_v2 = vsel %vm2296_vm3, %v6336_v55, %v6335_v22  ;;  %v6325_v54 = vsel %vm2299_vm4, %v6324_v45, %v6323_v24  ;;  %91 = vst.msk [vmem:[#allocation2 + $0x10] sm:$0xff] %vm88_vm8, %v7580_v30  ;;  %89 = vst.msk [vmem:[#allocation2] sm:$0xff] %vm88_vm8, %v7580_v30 }
 0x4bd   :  { %v6339_v63 = vsel %vm2299_vm4, %v6338_v39, %v6337_v2  ;;  %v6327_v58 = vsel %vm2302_vm5, %v6326_v57, %v6325_v54  ;;  %90 = vst.msk [vmem:[#allocation2 + $0x8] sm:$0xff] %vm88_vm8, %v7580_v30  ;;  %92 = vst.msk [vmem:[#allocation2 + $0x18] sm:$0xff] %vm88_vm8, %v7580_v30 }
 0x4be   :  { %v6341_v21 = vsel %vm2302_vm5, %v6340_v34, %v6339_v63  ;;  %v6329_v1 = vsel %vm2305_vm6, %v6328_v36, %v6327_v58 }
 0x4bf   :  { %v6343_v44 = vsel %vm2305_vm6, %v6342_v42, %v6341_v21  ;;  %v6330_v47 = vsel %vm2308_vm7, %v13161_v46, %v6329_v1 }
 0x4c0   :  { %v6344_v26 = vsel %vm2308_vm7, %v13029_v49, %v6343_v44 }
 0x4c1   :  { %v6346_v61 = vpack.c.b16 %v6344_v26, %v6330_v47 }
 0x4c3   :  { %6875 = vmatmul.mubr.msk.bf16.vlgmr.msra.gmra.mrb[0].mxu0 %vm221_vm0, %v6346_v61  ;;  %v6414_v38 = vld [vmem:[#allocation2 + $0x10] sm:$0xff]  ;;  %v6412_v14 = vld [vmem:[#allocation2] sm:$0xff] }
 0x4c4   :  { %v6415_v4 = vld [vmem:[#allocation2 + $0x18] sm:$0xff]  ;;  %v6413_v7 = vld [vmem:[#allocation2 + $0x8] sm:$0xff] }
 0x58f   :  { %v6780_v25 = vpop.f32.mrb[0].mxu1 }
 0x590   :  { %v4297_v52 = vpop.f32.mrb[1].mxu1 }
 0x591   :  { %v6781_v43 = vpop.f32.mrb[2].mxu1 }
 0x592   :  { %v4300_v46 = vpop.f32.mrb[3].mxu1 }
 0x596   :  { %v6876_v27 = vpop.f32.mrb[0].mxu0 }
 0x597   :  { %v6878_v49 = vadd.f32 %v6876_v27, %v6780_v25  ;;  %v6393_v5 = vpop.f32.mrb[1].mxu0 }
 0x598   :  { %v6879_v23 = vadd.f32 %v6393_v5, %v4297_v52  ;;  %v6877_v50 = vpop.f32.mrb[2].mxu0 }
 0x599   :  { %v6418_v59 = vadd.f32 %v6878_v49, %v6414_v38  ;;  %v6880_v35 = vadd.f32 %v6877_v50, %v6781_v43  ;;  %v6396_v31 = vpop.f32.mrb[3].mxu0 }
 0x59a   :  { %v6416_v60 = vadd.f32 %v6879_v23, %v6412_v14  ;;  %v6881_v51 = vadd.f32 %v6396_v31, %v4300_v46 }
 0x59b   :  { %6423 = vst.msk [vmem:[#allocation2 + $0x10] sm:$0xff] %vm88_vm8, %v6418_v59  ;;  %v6419_v6 = vadd.f32 %v6880_v35, %v6415_v4 }
 0x59c   :  { %6421 = vst.msk [vmem:[#allocation2] sm:$0xff] %vm88_vm8, %v6416_v60  ;;  %v6417_v13 = vadd.f32 %v6881_v51, %v6413_v7 }
 0x59d   :  { %6424 = vst.msk [vmem:[#allocation2 + $0x18] sm:$0xff] %vm88_vm8, %v6419_v6 }
 0x59e   :  { %6422 = vst.msk [vmem:[#allocation2 + $0x8] sm:$0xff] %vm88_vm8, %v6417_v13 }
 0x5a2   :  { %v6430_v41 = vld [vmem:[#allocation2 + $0x10] sm:$0xff] }
 0x5a3   :  { %v6428_v15 = vld [vmem:[#allocation2] sm:$0xff]  ;;  %v6441_v17 = vadd.f32 %v6581_v37, %v6430_v41 }
 0x5a4   :  { %v6431_v0 = vld [vmem:[#allocation2 + $0x18] sm:$0xff]  ;;  %v6439_v20 = vadd.f32 %v6581_v37, %v6428_v15 }
 0x5a5   :  { %v6429_v3 = vld [vmem:[#allocation2 + $0x8] sm:$0xff]  ;;  %v6442_v48 = vadd.f32 %v6581_v37, %v6431_v0  ;;  %v6588_v53 = vpack.c.bf16 %v6441_v17, %v6441_v17 }
 0x5a6   :  { %v6440_v12 = vadd.f32 %v6581_v37, %v6429_v3  ;;  %v6586_v18 = vpack.c.bf16 %v6439_v20, %v6439_v20 }
 0x5a7   :  { %v6589_v40 = vpack.c.bf16 %v6442_v48, %v6442_v48  ;;  %6462 = vst.msk [vmem:[#allocation12 + $0x8] sm:$0xf] %vm6459_vm9, %v6588_v53 }
 0x5a8   :  { %v6587_v56 = vpack.c.bf16 %v6440_v12, %v6440_v12  ;;  %6460 = vst.msk [vmem:[#allocation12] sm:$0xf] %vm6459_vm9, %v6586_v18 }
 0x5a9   :  { %6463 = vst.msk [vmem:[#allocation12 + $0xc] sm:$0xf] %vm6459_vm9, %v6589_v40 }
 0x5aa   :  { %6461 = vst.msk [vmem:[#allocation12 + $0x4] sm:$0xf] %vm6459_vm9, %v6587_v56 }
 0x5ab   :  { %7552 = shalt.err (!%p7549_p2)
}
 0x5ac   :  { %s7553_s10 = scalar_lea.hbm %s11968_s5, 256 }
 0x5ad   :  { %p7554_p3 = scmp.ne.s32.totalorder %s11968_s5, %s7553_s10  ;;  %p7557_p4 = scmp.lt.u32.totalorder %s7553_s10, %s11968_s5 }
 0x5af   :  { %p7559_p5 = pnand %p7557_p4, %p7554_p3 }
 0x5b1   :  { %7562 = shalt.err (!%p7559_p5)
}
 0x5b2   :  { %6475 = dma.vmem_to_hbm [thread:$0]  %s6470_s6, 256, %s11968_s5, [#allocation5], %s7573_s1, %s7573_s1, %s7574_s16  }
 0x5b3   :  { %7569 = dma.done.wait [#allocation5], 256  }
 0x5b4   :  { %7570 = vsyncadd [#allocation5], 4294967040 }
 0x5b5   :  { %6479 = vsyncpa [#allocation4], 1 }
 0x5b6   :  { %6480 = vsyncpa [#allocation7], 1 }
 0x5b7   :  { %6481 = vsyncpa [#allocation10], 1 }
 0x5b8   :  { %6482 = vsyncpa [#allocation5], 1 }

</bundles_post_ra>
